<compile_context>
chip_gen: v7x
topology: tpu7x:2x2x1
jax: 0.10.0
libtpu: 0.0.40
codegen_flags: <defaults>
</compile_context>

<pallas_src>
import functools

import jax
import jax.numpy as jnp
from jax.experimental import pallas as pl
from jax.experimental.pallas import tpu as pltpu

LEAKY_SLOPE = 0.1
BN_EPS = 1e-5


# ----------------------------------------------------------------------------
# Pallas kernels
# ----------------------------------------------------------------------------
def _mm_affine_act_kernel(x_ref, w_ref, s_ref, b_ref, o_ref, *, leaky):
    acc = jnp.dot(x_ref[...], w_ref[...], preferred_element_type=jnp.float32)
    acc = acc * s_ref[...] + b_ref[...]
    if leaky:
        acc = jnp.maximum(acc, LEAKY_SLOPE * acc)
    o_ref[...] = acc.astype(o_ref.dtype)


def _mm_res_affine_act_kernel(x_ref, w_ref, r_ref, s_ref, b_ref, o_ref, *, leaky):
    acc = jnp.dot(x_ref[...], w_ref[...], preferred_element_type=jnp.float32)
    acc = acc + r_ref[...]
    acc = acc * s_ref[...] + b_ref[...]
    if leaky:
        acc = jnp.maximum(acc, LEAKY_SLOPE * acc)
    o_ref[...] = acc.astype(o_ref.dtype)


def _dil3x3_kernel(x_ref, w_ref, s_ref, b_ref, o_ref, *, dil, Wp, Mout, Cin, leaky):
    # x_ref: (1, slab, Cin) one spatially padded image, row-major flattened.
    # Output is computed over (Hout, Wp) positions (the extra padded columns
    # produce garbage that the wrapper slices off) so every tap is a single
    # contiguous flat-offset slice - x is read from HBM exactly once.
    Cout = o_ref.shape[-1]
    acc = jnp.zeros((Mout, Cout), jnp.float32)
    for ki in range(3):
        for kj in range(3):
            off = ki * dil * Wp + kj * dil
            patch = x_ref[0, off:off + Mout, :].astype(jnp.bfloat16)
            w_tap = w_ref[(ki * 3 + kj) * Cin:(ki * 3 + kj + 1) * Cin, :]
            acc = acc + jnp.dot(patch, w_tap, preferred_element_type=jnp.float32)
    acc = acc * s_ref[...] + b_ref[...]
    if leaky:
        acc = jnp.maximum(acc, LEAKY_SLOPE * acc)
    o_ref[0, :, :] = acc.astype(o_ref.dtype)


# ----------------------------------------------------------------------------
# Fused matmul wrapper (1x1 convs / im2col'd strided convs)
# ----------------------------------------------------------------------------
def _choose_tile_m(M, cap=1024):
    """Pick (padded_M, tile_m) with no padding in the common cases."""
    if M <= cap:
        return M, M                      # one full-extent tile, no padding
    for t in (cap, 512, 256, 128):
        if M % t == 0:
            return M, t                  # evenly tiled, no padding
    tile = 256
    return ((M + tile - 1) // tile) * tile, tile


def matmul_affine_act(x2d, w2d, scale, shift, *, leaky, out_dtype=jnp.bfloat16,
                      residual=None, max_tile_m=1024):
    """(M,K) @ (K,Cout) [+ residual] -> *scale + shift -> optional LeakyReLU."""
    M, K = x2d.shape
    Cout = w2d.shape[1]
    xb = x2d.astype(jnp.bfloat16)
    wb = w2d.astype(jnp.bfloat16)
    sc = scale.astype(jnp.float32).reshape(1, Cout)
    sh = shift.astype(jnp.float32).reshape(1, Cout)
    res = None if residual is None else residual.astype(jnp.float32)

    Mp, tile_m = _choose_tile_m(M, max_tile_m)
    if Mp != M:
        xb = jnp.pad(xb, ((0, Mp - M), (0, 0)))
        if res is not None:
            res = jnp.pad(res, ((0, Mp - M), (0, 0)))
    grid = (Mp // tile_m,)

    x_spec = pl.BlockSpec((tile_m, K), lambda i: (i, 0))
    w_spec = pl.BlockSpec((K, Cout), lambda i: (0, 0))
    v_spec = pl.BlockSpec((1, Cout), lambda i: (0, 0))
    o_spec = pl.BlockSpec((tile_m, Cout), lambda i: (i, 0))
    cp = pltpu.CompilerParams(dimension_semantics=("parallel",))

    if res is None:
        out = pl.pallas_call(
            functools.partial(_mm_affine_act_kernel, leaky=leaky),
            out_shape=jax.ShapeDtypeStruct((Mp, Cout), out_dtype),
            grid=grid,
            in_specs=[x_spec, w_spec, v_spec, v_spec],
            out_specs=o_spec,
            compiler_params=cp,
        )(xb, wb, sc, sh)
    else:
        r_spec = pl.BlockSpec((tile_m, Cout), lambda i: (i, 0))
        out = pl.pallas_call(
            functools.partial(_mm_res_affine_act_kernel, leaky=leaky),
            out_shape=jax.ShapeDtypeStruct((Mp, Cout), out_dtype),
            grid=grid,
            in_specs=[x_spec, w_spec, r_spec, v_spec, v_spec],
            out_specs=o_spec,
            compiler_params=cp,
        )(xb, wb, res, sc, sh)
    return out if Mp == M else out[:M]


# ----------------------------------------------------------------------------
# Fused dilated 3x3 conv (stride 1) - no im2col materialization in HBM
# ----------------------------------------------------------------------------
def dilated_conv3x3(x, w_hwio, scale, shift, *, pad, dilation, leaky,
                    out_dtype=jnp.bfloat16):
    N, H, W, Cin = x.shape
    Cout = w_hwio.shape[-1]
    d = dilation
    Hp, Wp = H + 2 * pad, W + 2 * pad
    Hout, Wout = Hp - 2 * d, Wp - 2 * d
    # Extra bottom rows so the last tap's contiguous slab stays in bounds.
    eh = (2 * d + Wp - 1) // Wp
    # f32 in VMEM keeps in-kernel slices at arbitrary row offsets simple;
    # the tap matmuls still run in bf16 on the MXU.
    xp = jnp.pad(x, ((0, 0), (pad, pad + eh), (pad, pad), (0, 0))).astype(jnp.float32)
    slab = (Hp + eh) * Wp
    x_flat = xp.reshape(N, slab, Cin)
    Mout = Hout * Wp
    w2d = w_hwio.reshape(9 * Cin, Cout).astype(jnp.bfloat16)

    out = pl.pallas_call(
        functools.partial(_dil3x3_kernel, dil=d, Wp=Wp, Mout=Mout, Cin=Cin,
                          leaky=leaky),
        out_shape=jax.ShapeDtypeStruct((N, Mout, Cout), out_dtype),
        grid=(N,),
        in_specs=[
            pl.BlockSpec((1, slab, Cin), lambda n: (n, 0, 0)),
            pl.BlockSpec((9 * Cin, Cout), lambda n: (0, 0)),
            pl.BlockSpec((1, Cout), lambda n: (0, 0)),
            pl.BlockSpec((1, Cout), lambda n: (0, 0)),
        ],
        out_specs=pl.BlockSpec((1, Mout, Cout), lambda n: (n, 0, 0)),
        compiler_params=pltpu.CompilerParams(dimension_semantics=("parallel",)),
    )(x_flat, w2d,
      scale.astype(jnp.float32).reshape(1, Cout),
      shift.astype(jnp.float32).reshape(1, Cout))
    return out.reshape(N, Hout, Wp, Cout)[:, :, :Wout, :]


# ----------------------------------------------------------------------------
# Conv glue
# ----------------------------------------------------------------------------
def _im2col(x, k, stride, pad, dilation):
    N, H, W, C = x.shape
    xp = jnp.pad(x, ((0, 0), (pad, pad), (pad, pad), (0, 0)))
    Hout = (H + 2 * pad - dilation * (k - 1) - 1) // stride + 1
    Wout = (W + 2 * pad - dilation * (k - 1) - 1) // stride + 1
    cols = []
    for ki in range(k):
        for kj in range(k):
            patch = xp[:, ki * dilation: ki * dilation + stride * (Hout - 1) + 1: stride,
                          kj * dilation: kj * dilation + stride * (Wout - 1) + 1: stride, :]
            cols.append(patch)
    return jnp.concatenate(cols, axis=-1), Hout, Wout


def conv2d(x, p, *, stride=1, pad=0, dilation=1, out_dtype=jnp.bfloat16):
    w = p['w']
    k = w.shape[0]
    cin, cout = w.shape[2], w.shape[3]
    N = x.shape[0]
    if k == 1:
        _, H, W, C = x.shape
        y = matmul_affine_act(x.reshape(N * H * W, C), w.reshape(C, cout),
                              p['scale'], p['shift'], leaky=p['leaky'],
                              out_dtype=out_dtype)
        return y.reshape(N, H, W, cout)
    if stride == 1:
        return dilated_conv3x3(x, w, p['scale'], p['shift'], pad=pad,
                               dilation=dilation, leaky=p['leaky'],
                               out_dtype=out_dtype)
    # strided 3x3 (DCN stand-ins): im2col + fused matmul
    cols, Hout, Wout = _im2col(x, k, stride, pad, dilation)
    y = matmul_affine_act(cols.reshape(N * Hout * Wout, k * k * cin),
                          w.reshape(k * k * cin, cout),
                          p['scale'], p['shift'], leaky=p['leaky'],
                          out_dtype=out_dtype)
    return y.reshape(N, Hout, Wout, cout)


def apply_conv(p, x, *, stride=1, pad=0, dilation=1, out_dtype=jnp.bfloat16):
    return conv2d(x, p, stride=stride, pad=pad, dilation=dilation,
                  out_dtype=out_dtype)


def channel_shuffle(x, groups):
    N, H, W, C = x.shape
    x = x.reshape(N, H, W, groups, C // groups)
    x = jnp.swapaxes(x, 3, 4)
    return x.reshape(N, H, W, C)


def upsample_nearest_x2(x):
    return jnp.repeat(jnp.repeat(x, 2, axis=1), 2, axis=2)


# ----------------------------------------------------------------------------
# Parameters (deterministic, mimics normal_(0,0.01) / BN init)
# ----------------------------------------------------------------------------
class _KeyGen:
    def __init__(self, seed):
        self._key = jax.random.PRNGKey(seed)

    def next(self):
        self._key, sub = jax.random.split(self._key)
        return sub


def make_conv(kg, cin, cout, k, norm=None, act=None):
    w = (jax.random.normal(kg.next(), (k, k, cin, cout), jnp.float32) * 0.01)
    w = w.astype(jnp.bfloat16)
    if norm == 'bn':
        # eval-mode BN with init stats (gamma=1, beta=0, mean=0, var=1) folded.
        scale = jnp.full((cout,), 1.0 / jnp.sqrt(1.0 + BN_EPS), jnp.float32)
        shift = jnp.zeros((cout,), jnp.float32)
    else:
        scale = jnp.ones((cout,), jnp.float32)
        shift = jnp.zeros((cout,), jnp.float32)  # zero-init bias
    return dict(w=w, scale=scale, shift=shift, leaky=(act == 'leaky'))


def _shuffle_perm(C, groups):
    # channel_shuffle(x)[..., i] == x[..., perm[i]]
    return jnp.arange(C).reshape(groups, C // groups).T.reshape(-1)


# ---- stand-ins for blocks whose source was not provided ---------------------
def make_dcn(kg, cin, cout):
    # TODO(synk): deformable offsets unavailable; plain 3x3 s2 conv + BN + leaky.
    return make_conv(kg, cin, cout, 3, norm='bn', act='leaky')


def apply_dcn(p, x):
    return apply_conv(p, x, stride=2, pad=1)


def make_shuffle_new(kg, cin, cout, groups):
    # TODO(synk): Shuffle_new internals unavailable; channel-shuffle + 1x1 conv
    # stand-in. The shuffle is folded into the conv weight (exact permutation).
    conv = make_conv(kg, cin, cout, 1, norm='bn', act='leaky')
    inv = jnp.argsort(_shuffle_perm(cin, groups))
    conv = dict(conv, w=conv['w'][:, :, inv, :])
    return dict(conv=conv)


def apply_shuffle_new(p, x, out_dtype=jnp.bfloat16):
    return apply_conv(p['conv'], x, out_dtype=out_dtype)


def make_shuffle_new_s(kg, c_half, c_full, groups):
    # TODO(synk): Shuffle_new_s internals unavailable; split / process-half /
    # concat / shuffle stand-in with matching channel counts.
    return dict(groups=groups, c_half=c_half,
                conv=make_conv(kg, c_half, c_half, 1, norm='bn', act='leaky'))


def apply_shuffle_new_s(p, x):
    c = p['c_half']
    left, right = x[..., :c], x[..., c:]
    right = apply_conv(p['conv'], right)
    return channel_shuffle(jnp.concatenate([left, right], axis=-1), p['groups'])


def make_rfa(kg, c, groups, dila_l, dila_r):
    # TODO(synk): Shuffle_Cond_RFA internals unavailable; split into halves
    # processed by dilated 3x3 convs, concat, channel shuffle.
    return dict(groups=groups, c_half=c // 2, dl=dila_l, dr=dila_r,
                conv_l=make_conv(kg, c // 2, c // 2, 3, norm='bn', act='leaky'),
                conv_r=make_conv(kg, c // 2, c // 2, 3, norm='bn', act='leaky'))


def apply_rfa(p, x):
    c = p['c_half']
    left, right = x[..., :c], x[..., c:]
    left = apply_conv(p['conv_l'], left, pad=p['dl'], dilation=p['dl'])
    right = apply_conv(p['conv_r'], right, pad=p['dr'], dilation=p['dr'])
    return channel_shuffle(jnp.concatenate([left, right], axis=-1), p['groups'])


def apply_dropblock(x):
    # TODO(synk): LinearScheduler(DropBlock2D) is identity at inference.
    return x


# ----------------------------------------------------------------------------
# Fused: conv1x1 -> upsample2x -> Route(cat) -> conv1x1(BN,leaky)
# (1x1 conv commutes with nearest-upsample; up-branch runs at low resolution.)
# ----------------------------------------------------------------------------
def fused_upsample_route_conv(p_up, p_route, x_lo, x_hi, out_dtype=jnp.bfloat16):
    w_up = p_up['w'][0, 0].astype(jnp.float32)       # (Cl, Cm); p_up has no BN
    b_up = p_up['shift'].astype(jnp.float32)         # (Cm,) conv bias
    w_r = p_route['w'][0, 0].astype(jnp.float32)     # (Cm + Ch, Cout)
    Cm = w_up.shape[1]
    w_r_up, w_r_hi = w_r[:Cm], w_r[Cm:]
    w_comb = w_up @ w_r_up                            # (Cl, Cout)
    b_comb = b_up @ w_r_up                            # (Cout,)
    Cout = w_comb.shape[1]

    N, Hl, Wl, Cl = x_lo.shape
    t = matmul_affine_act(x_lo.reshape(N * Hl * Wl, Cl), w_comb,
                          jnp.ones((Cout,), jnp.float32), b_comb,
                          leaky=False, out_dtype=jnp.float32)
    t = upsample_nearest_x2(t.reshape(N, Hl, Wl, Cout))

    Nh, Hh, Wh, Ch = x_hi.shape
    y = matmul_affine_act(x_hi.reshape(Nh * Hh * Wh, Ch), w_r_hi,
                          p_route['scale'], p_route['shift'],
                          leaky=p_route['leaky'], out_dtype=out_dtype,
                          residual=t.reshape(Nh * Hh * Wh, Cout))
    return y.reshape(Nh, Hh, Wh, Cout)


# ----------------------------------------------------------------------------
# CSA_DRF_FPN
# ----------------------------------------------------------------------------
def init_csa_drf_fpn(seed, filters_in, model_size, fo):
    fi_0, fi_1, fi_2 = filters_in
    fm_0 = int(1024 * model_size)
    fm_1 = fm_0 // 2
    fm_2 = fm_0 // 4
    kg = _KeyGen(seed)
    P = {}
    P['dcn2_1'] = make_dcn(kg, fi_2, fi_2)
    P['dcn1_0'] = make_dcn(kg, fi_1 + fi_2, fi_1)
    P['cs0_conv'] = make_conv(kg, fi_0 + fi_1, fm_0, 1, norm='bn', act='leaky')
    P['cs0_rfa'] = make_rfa(kg, fm_0, 8, 4, 6)
    P['cs0_sns'] = make_shuffle_new_s(kg, fm_0 // 2, fm_0, 8)
    P['conv0_0'] = make_shuffle_new(kg, fm_0, fm_0, 4)
    P['conv0_1'] = make_conv(kg, fm_0, fo, 1)
    P['conv0up1'] = make_conv(kg, fm_0, fm_1, 1)
    P['pw1'] = make_conv(kg, fi_2 + fi_1, fm_1, 1, norm='bn', act='leaky')
    P['shuffle10'] = make_shuffle_new(kg, fm_1, fm_1, 4)
    P['cs1_conv'] = make_conv(kg, fm_1 * 2, fm_1, 1, norm='bn', act='leaky')
    P['cs1_rfa'] = make_rfa(kg, fm_1, 4, 2, 3)
    P['cs1_sns'] = make_shuffle_new_s(kg, fm_1 // 2, fm_1, 4)
    P['conv1_0'] = make_shuffle_new(kg, fm_1, fm_1, 4)
    P['conv1_1'] = make_conv(kg, fm_1, fo, 1)
    P['conv1up2'] = make_conv(kg, fm_1, fm_2, 1)
    P['pw2'] = make_conv(kg, fi_2, fm_2, 1, norm='bn', act='leaky')
    P['shuffle20'] = make_shuffle_new(kg, fm_2, fm_2, 4)
    P['cs2_conv'] = make_conv(kg, fm_2 * 2, fm_2, 1, norm='bn', act='leaky')
    P['cs2_sn1'] = make_shuffle_new(kg, fm_2, fm_2, 4)
    P['cs2_sn2'] = make_shuffle_new(kg, fm_2, fm_2, 4)
    P['conv2_0'] = make_shuffle_new(kg, fm_2, fm_2, 4)
    P['conv2_1'] = make_conv(kg, fm_2, fo, 1)
    return P


def csa_drf_fpn_forward(P, x0, x1, x2):
    # bf16 activations end-to-end (heads emit f32)
    x0 = x0.astype(jnp.bfloat16)
    x1 = x1.astype(jnp.bfloat16)
    x2 = x2.astype(jnp.bfloat16)

    # top-down strided path
    dcn2_1 = apply_dcn(P['dcn2_1'], x2)
    routdcn2_1 = jnp.concatenate([dcn2_1, x1], axis=-1)      # Route(x1, dcn2_1)
    dcn1_0 = apply_dcn(P['dcn1_0'], routdcn2_1)
    routdcn1_0 = jnp.concatenate([dcn1_0, x0], axis=-1)       # Route(x0, dcn1_0)

    # scale 0
    conv_set_0 = apply_conv(P['cs0_conv'], routdcn1_0)
    conv_set_0 = apply_rfa(P['cs0_rfa'], conv_set_0)
    conv_set_0 = apply_shuffle_new_s(P['cs0_sns'], conv_set_0)

    # scale 1 (conv0up1 + upsample + Route + cs1 head-conv fused)
    pw1 = apply_conv(P['pw1'], routdcn2_1)
    shuffle10 = apply_shuffle_new(P['shuffle10'], pw1)
    conv_set_1 = fused_upsample_route_conv(P['conv0up1'], P['cs1_conv'],
                                           conv_set_0, shuffle10)
    conv_set_1 = apply_rfa(P['cs1_rfa'], conv_set_1)
    conv_set_1 = apply_dropblock(conv_set_1)
    conv_set_1 = apply_shuffle_new_s(P['cs1_sns'], conv_set_1)

    # scale 2 (conv1up2 + upsample + Route + cs2 head-conv fused)
    pw2 = apply_conv(P['pw2'], x2)
    shuffle20 = apply_shuffle_new(P['shuffle20'], pw2)
    conv_set_2 = fused_upsample_route_conv(P['conv1up2'], P['cs2_conv'],
                                           conv_set_1, shuffle20)
    conv_set_2 = apply_shuffle_new(P['cs2_sn1'], conv_set_2)
    conv_set_2 = apply_dropblock(conv_set_2)
    conv_set_2 = apply_shuffle_new(P['cs2_sn2'], conv_set_2)

    # heads (f32 outputs)
    out0 = apply_shuffle_new(P['conv0_0'], conv_set_0)
    out0 = apply_conv(P['conv0_1'], out0, out_dtype=jnp.float32)
    out1 = apply_shuffle_new(P['conv1_0'], conv_set_1)
    out1 = apply_conv(P['conv1_1'], out1, out_dtype=jnp.float32)
    out2 = apply_shuffle_new(P['conv2_0'], conv_set_2)
    out2 = apply_conv(P['conv2_1'], out2, out_dtype=jnp.float32)
    return out2, out1, out0


# ----------------------------------------------------------------------------
if __name__ == "__main__":
    # cfg stand-ins: DATA['NUM']=2, MODEL['ANCHORS_PER_SCLAE']=3
    NUM_CLASSES = 2
    ANCHORS_PER_SCALE = 3
    FO = (NUM_CLASSES + 5 + 5) * ANCHORS_PER_SCALE            # = 36

    fi = (64, 32, 16)            # (fi_0, fi_1, fi_2)
    model_size = 1.0 / 16.0      # fm_0=64, fm_1=32, fm_2=16
    N = 2

    params = init_csa_drf_fpn(seed=42, filters_in=fi, model_size=model_size, fo=FO)

    key = jax.random.PRNGKey(0)
    k0, k1, k2 = jax.random.split(key, 3)
    # layout: NHWC inputs (PyTorch equivalents would be NCHW of the same sizes)
    x0 = jax.random.normal(k0, (N, 4, 4, fi[0]), jnp.float32)    # lowest resolution
    x1 = jax.random.normal(k1, (N, 8, 8, fi[1]), jnp.float32)
    x2 = jax.random.normal(k2, (N, 16, 16, fi[2]), jnp.float32)  # highest resolution

    fwd = jax.jit(lambda a, b, c: csa_drf_fpn_forward(params, a, b, c))
    out2, out1, out0 = fwd(x0, x1, x2)
    jax.block_until_ready((out2, out1, out0))

    assert out2.shape == (N, 16, 16, FO), out2.shape
    assert out1.shape == (N, 8, 8, FO), out1.shape
    assert out0.shape == (N, 4, 4, FO), out0.shape
    assert bool(jnp.all(jnp.isfinite(out0))) and bool(jnp.all(jnp.isfinite(out1))) \
        and bool(jnp.all(jnp.isfinite(out2)))
    print("KERNEL_OK")
</pallas_src>

<mosaic_0001>
module attributes {stable_mosaic.version = 11 : i64} {
  func.func @_mm_affine_act_kernel(%arg0: i32, %arg1: memref<128x144xbf16, #tpu.memory_space<vmem>>, %arg2: memref<144x16xbf16, #tpu.memory_space<vmem>>, %arg3: memref<1x16xf32, #tpu.memory_space<vmem>>, %arg4: memref<1x16xf32, #tpu.memory_space<vmem>>, %arg5: memref<128x16xbf16, #tpu.memory_space<vmem>>) attributes {dimension_semantics = [#tpu.dimension_semantics<parallel>], iteration_bounds = array<i64: 1>, scalar_prefetch = 0 : i64, scratch_operands = 0 : i64, tpu.core_type = #tpu.core_type<tc>, window_params = [{transform_indices = @transform_0, window_bounds = array<i64: 128, 144>}, {pipeline_mode = #tpu.pipeline_mode<synchronous>, transform_indices = @transform_1, window_bounds = array<i64: 144, 16>}, {pipeline_mode = #tpu.pipeline_mode<synchronous>, transform_indices = @transform_2, window_bounds = array<i64: 1, 16>}, {pipeline_mode = #tpu.pipeline_mode<synchronous>, transform_indices = @transform_3, window_bounds = array<i64: 1, 16>}, {transform_indices = @transform_4, window_bounds = array<i64: 128, 16>}]} {
    %c0 = arith.constant 0 : index
    %c0_0 = arith.constant 0 : index
    %0 = vector.load %arg1[%c0, %c0_0] : memref<128x144xbf16, #tpu.memory_space<vmem>>, vector<128x144xbf16>
    %c0_1 = arith.constant 0 : index
    %c0_2 = arith.constant 0 : index
    %1 = vector.load %arg2[%c0_1, %c0_2] : memref<144x16xbf16, #tpu.memory_space<vmem>>, vector<144x16xbf16>
    %cst = arith.constant dense<0.000000e+00> : vector<128x16xf32>
    %2 = tpu.matmul %0, %1, %cst {dimension_numbers = #tpu.dot_dimension_numbers<[1], [0], [0], [1], [0, 0, 1, 1], [], []>} : vector<128x144xbf16>, vector<144x16xbf16>, vector<128x16xf32> -> vector<128x16xf32>
    %c0_3 = arith.constant 0 : index
    %c0_4 = arith.constant 0 : index
    %3 = vector.load %arg3[%c0_3, %c0_4] : memref<1x16xf32, #tpu.memory_space<vmem>>, vector<1x16xf32>
    %4 = vector.broadcast %3 : vector<1x16xf32> to vector<128x16xf32>
    %5 = arith.mulf %2, %4 : vector<128x16xf32>
    %c0_5 = arith.constant 0 : index
    %c0_6 = arith.constant 0 : index
    %6 = vector.load %arg4[%c0_5, %c0_6] : memref<1x16xf32, #tpu.memory_space<vmem>>, vector<1x16xf32>
    %7 = vector.broadcast %6 : vector<1x16xf32> to vector<128x16xf32>
    %8 = arith.addf %5, %7 : vector<128x16xf32>
    %cst_7 = arith.constant 1.000000e-01 : f32
    %9 = vector.broadcast %cst_7 : f32 to vector<128x16xf32>
    %10 = arith.mulf %9, %8 : vector<128x16xf32>
    %11 = arith.maximumf %8, %10 : vector<128x16xf32>
    %12 = arith.truncf %11 : vector<128x16xf32> to vector<128x16xbf16>
    %c0_8 = arith.constant 0 : index
    %c0_9 = arith.constant 0 : index
    %13 = vector.load %arg5[%c0_8, %c0_9] : memref<128x16xbf16, #tpu.memory_space<vmem>>, vector<128x16xbf16>
    tpu.vector_store %arg5[%c0_8, %c0_9], %12 {strides = array<i32>} : memref<128x16xbf16, #tpu.memory_space<vmem>>, vector<128x16xbf16>,
    return
  }
  func.func @transform_0(%arg0: i32) -> (i32, i32) {
    %c0_i32 = arith.constant 0 : i32
    %c0_i32_0 = arith.constant 0 : i32
    return %arg0, %c0_i32 : i32, i32
  }
  func.func @transform_1(%arg0: i32) -> (i32, i32) {
    %c0_i32 = arith.constant 0 : i32
    %c0_i32_0 = arith.constant 0 : i32
    %c0_i32_1 = arith.constant 0 : i32
    return %c0_i32, %c0_i32_0 : i32, i32
  }
  func.func @transform_2(%arg0: i32) -> (i32, i32) {
    %c0_i32 = arith.constant 0 : i32
    %c0_i32_0 = arith.constant 0 : i32
    %c0_i32_1 = arith.constant 0 : i32
    return %c0_i32, %c0_i32_0 : i32, i32
  }
  func.func @transform_3(%arg0: i32) -> (i32, i32) {
    %c0_i32 = arith.constant 0 : i32
    %c0_i32_0 = arith.constant 0 : i32
    %c0_i32_1 = arith.constant 0 : i32
    return %c0_i32, %c0_i32_0 : i32, i32
  }
  func.func @transform_4(%arg0: i32) -> (i32, i32) {
    %c0_i32 = arith.constant 0 : i32
    %c0_i32_0 = arith.constant 0 : i32
    return %arg0, %c0_i32 : i32, i32
  }
}

module attributes {stable_mosaic.version = 11 : i64} {
  func.func @_mm_affine_act_kernel(%arg0: i32, %arg1: memref<32x432xbf16, #tpu.memory_space<vmem>>, %arg2: memref<432x32xbf16, #tpu.memory_space<vmem>>, %arg3: memref<1x32xf32, #tpu.memory_space<vmem>>, %arg4: memref<1x32xf32, #tpu.memory_space<vmem>>, %arg5: memref<32x32xbf16, #tpu.memory_space<vmem>>) attributes {dimension_semantics = [#tpu.dimension_semantics<parallel>], iteration_bounds = array<i64: 1>, scalar_prefetch = 0 : i64, scratch_operands = 0 : i64, tpu.core_type = #tpu.core_type<tc>, window_params = [{transform_indices = @transform_0, window_bounds = array<i64: 32, 432>}, {pipeline_mode = #tpu.pipeline_mode<synchronous>, transform_indices = @transform_1, window_bounds = array<i64: 432, 32>}, {pipeline_mode = #tpu.pipeline_mode<synchronous>, transform_indices = @transform_2, window_bounds = array<i64: 1, 32>}, {pipeline_mode = #tpu.pipeline_mode<synchronous>, transform_indices = @transform_3, window_bounds = array<i64: 1, 32>}, {transform_indices = @transform_4, window_bounds = array<i64: 32, 32>}]} {
    %c0 = arith.constant 0 : index
    %c0_0 = arith.constant 0 : index
    %0 = vector.load %arg1[%c0, %c0_0] : memref<32x432xbf16, #tpu.memory_space<vmem>>, vector<32x432xbf16>
    %c0_1 = arith.constant 0 : index
    %c0_2 = arith.constant 0 : index
    %1 = vector.load %arg2[%c0_1, %c0_2] : memref<432x32xbf16, #tpu.memory_space<vmem>>, vector<432x32xbf16>
    %cst = arith.constant dense<0.000000e+00> : vector<32x32xf32>
    %2 = tpu.matmul %0, %1, %cst {dimension_numbers = #tpu.dot_dimension_numbers<[1], [0], [0], [1], [0, 0, 1, 1], [], []>} : vector<32x432xbf16>, vector<432x32xbf16>, vector<32x32xf32> -> vector<32x32xf32>
    %c0_3 = arith.constant 0 : index
    %c0_4 = arith.constant 0 : index
    %3 = vector.load %arg3[%c0_3, %c0_4] : memref<1x32xf32, #tpu.memory_space<vmem>>, vector<1x32xf32>
    %4 = vector.broadcast %3 : vector<1x32xf32> to vector<32x32xf32>
    %5 = arith.mulf %2, %4 : vector<32x32xf32>
    %c0_5 = arith.constant 0 : index
    %c0_6 = arith.constant 0 : index
    %6 = vector.load %arg4[%c0_5, %c0_6] : memref<1x32xf32, #tpu.memory_space<vmem>>, vector<1x32xf32>
    %7 = vector.broadcast %6 : vector<1x32xf32> to vector<32x32xf32>
    %8 = arith.addf %5, %7 : vector<32x32xf32>
    %cst_7 = arith.constant 1.000000e-01 : f32
    %9 = vector.broadcast %cst_7 : f32 to vector<32x32xf32>
    %10 = arith.mulf %9, %8 : vector<32x32xf32>
    %11 = arith.maximumf %8, %10 : vector<32x32xf32>
    %12 = arith.truncf %11 : vector<32x32xf32> to vector<32x32xbf16>
    %c0_8 = arith.constant 0 : index
    %c0_9 = arith.constant 0 : index
    %13 = vector.load %arg5[%c0_8, %c0_9] : memref<32x32xbf16, #tpu.memory_space<vmem>>, vector<32x32xbf16>
    tpu.vector_store %arg5[%c0_8, %c0_9], %12 {strides = array<i32>} : memref<32x32xbf16, #tpu.memory_space<vmem>>, vector<32x32xbf16>,
    return
  }
  func.func @transform_0(%arg0: i32) -> (i32, i32) {
    %c0_i32 = arith.constant 0 : i32
    %c0_i32_0 = arith.constant 0 : i32
    return %arg0, %c0_i32 : i32, i32
  }
  func.func @transform_1(%arg0: i32) -> (i32, i32) {
    %c0_i32 = arith.constant 0 : i32
    %c0_i32_0 = arith.constant 0 : i32
    %c0_i32_1 = arith.constant 0 : i32
    return %c0_i32, %c0_i32_0 : i32, i32
  }
  func.func @transform_2(%arg0: i32) -> (i32, i32) {
    %c0_i32 = arith.constant 0 : i32
    %c0_i32_0 = arith.constant 0 : i32
    %c0_i32_1 = arith.constant 0 : i32
    return %c0_i32, %c0_i32_0 : i32, i32
  }
  func.func @transform_3(%arg0: i32) -> (i32, i32) {
    %c0_i32 = arith.constant 0 : i32
    %c0_i32_0 = arith.constant 0 : i32
    %c0_i32_1 = arith.constant 0 : i32
    return %c0_i32, %c0_i32_0 : i32, i32
  }
  func.func @transform_4(%arg0: i32) -> (i32, i32) {
    %c0_i32 = arith.constant 0 : i32
    %c0_i32_0 = arith.constant 0 : i32
    return %arg0, %c0_i32 : i32, i32
  }
}

module attributes {stable_mosaic.version = 11 : i64} {
  func.func @_mm_affine_act_kernel(%arg0: i32, %arg1: memref<32x96xbf16, #tpu.memory_space<vmem>>, %arg2: memref<96x64xbf16, #tpu.memory_space<vmem>>, %arg3: memref<1x64xf32, #tpu.memory_space<vmem>>, %arg4: memref<1x64xf32, #tpu.memory_space<vmem>>, %arg5: memref<32x64xbf16, #tpu.memory_space<vmem>>) attributes {dimension_semantics = [#tpu.dimension_semantics<parallel>], iteration_bounds = array<i64: 1>, scalar_prefetch = 0 : i64, scratch_operands = 0 : i64, tpu.core_type = #tpu.core_type<tc>, window_params = [{transform_indices = @transform_0, window_bounds = array<i64: 32, 96>}, {pipeline_mode = #tpu.pipeline_mode<synchronous>, transform_indices = @transform_1, window_bounds = array<i64: 96, 64>}, {pipeline_mode = #tpu.pipeline_mode<synchronous>, transform_indices = @transform_2, window_bounds = array<i64: 1, 64>}, {pipeline_mode = #tpu.pipeline_mode<synchronous>, transform_indices = @transform_3, window_bounds = array<i64: 1, 64>}, {transform_indices = @transform_4, window_bounds = array<i64: 32, 64>}]} {
    %c0 = arith.constant 0 : index
    %c0_0 = arith.constant 0 : index
    %0 = vector.load %arg1[%c0, %c0_0] : memref<32x96xbf16, #tpu.memory_space<vmem>>, vector<32x96xbf16>
    %c0_1 = arith.constant 0 : index
    %c0_2 = arith.constant 0 : index
    %1 = vector.load %arg2[%c0_1, %c0_2] : memref<96x64xbf16, #tpu.memory_space<vmem>>, vector<96x64xbf16>
    %cst = arith.constant dense<0.000000e+00> : vector<32x64xf32>
    %2 = tpu.matmul %0, %1, %cst {dimension_numbers = #tpu.dot_dimension_numbers<[1], [0], [0], [1], [0, 0, 1, 1], [], []>} : vector<32x96xbf16>, vector<96x64xbf16>, vector<32x64xf32> -> vector<32x64xf32>
    %c0_3 = arith.constant 0 : index
    %c0_4 = arith.constant 0 : index
    %3 = vector.load %arg3[%c0_3, %c0_4] : memref<1x64xf32, #tpu.memory_space<vmem>>, vector<1x64xf32>
    %4 = vector.broadcast %3 : vector<1x64xf32> to vector<32x64xf32>
    %5 = arith.mulf %2, %4 : vector<32x64xf32>
    %c0_5 = arith.constant 0 : index
    %c0_6 = arith.constant 0 : index
    %6 = vector.load %arg4[%c0_5, %c0_6] : memref<1x64xf32, #tpu.memory_space<vmem>>, vector<1x64xf32>
    %7 = vector.broadcast %6 : vector<1x64xf32> to vector<32x64xf32>
    %8 = arith.addf %5, %7 : vector<32x64xf32>
    %cst_7 = arith.constant 1.000000e-01 : f32
    %9 = vector.broadcast %cst_7 : f32 to vector<32x64xf32>
    %10 = arith.mulf %9, %8 : vector<32x64xf32>
    %11 = arith.maximumf %8, %10 : vector<32x64xf32>
    %12 = arith.truncf %11 : vector<32x64xf32> to vector<32x64xbf16>
    %c0_8 = arith.constant 0 : index
    %c0_9 = arith.constant 0 : index
    %13 = vector.load %arg5[%c0_8, %c0_9] : memref<32x64xbf16, #tpu.memory_space<vmem>>, vector<32x64xbf16>
    tpu.vector_store %arg5[%c0_8, %c0_9], %12 {strides = array<i32>} : memref<32x64xbf16, #tpu.memory_space<vmem>>, vector<32x64xbf16>,
    return
  }
  func.func @transform_0(%arg0: i32) -> (i32, i32) {
    %c0_i32 = arith.constant 0 : i32
    %c0_i32_0 = arith.constant 0 : i32
    return %arg0, %c0_i32 : i32, i32
  }
  func.func @transform_1(%arg0: i32) -> (i32, i32) {
    %c0_i32 = arith.constant 0 : i32
    %c0_i32_0 = arith.constant 0 : i32
    %c0_i32_1 = arith.constant 0 : i32
    return %c0_i32, %c0_i32_0 : i32, i32
  }
  func.func @transform_2(%arg0: i32) -> (i32, i32) {
    %c0_i32 = arith.constant 0 : i32
    %c0_i32_0 = arith.constant 0 : i32
    %c0_i32_1 = arith.constant 0 : i32
    return %c0_i32, %c0_i32_0 : i32, i32
  }
  func.func @transform_3(%arg0: i32) -> (i32, i32) {
    %c0_i32 = arith.constant 0 : i32
    %c0_i32_0 = arith.constant 0 : i32
    %c0_i32_1 = arith.constant 0 : i32
    return %c0_i32, %c0_i32_0 : i32, i32
  }
  func.func @transform_4(%arg0: i32) -> (i32, i32) {
    %c0_i32 = arith.constant 0 : i32
    %c0_i32_0 = arith.constant 0 : i32
    return %arg0, %c0_i32 : i32, i32
  }
}

module attributes {stable_mosaic.version = 11 : i64} {
  func.func @_dil3x3_kernel(%arg0: i32, %arg1: memref<1x156x32xf32, #tpu.memory_space<vmem>>, %arg2: memref<288x32xbf16, #tpu.memory_space<vmem>>, %arg3: memref<1x32xf32, #tpu.memory_space<vmem>>, %arg4: memref<1x32xf32, #tpu.memory_space<vmem>>, %arg5: memref<1x48x32xbf16, #tpu.memory_space<vmem>>) attributes {dimension_semantics = [#tpu.dimension_semantics<parallel>], iteration_bounds = array<i64: 2>, scalar_prefetch = 0 : i64, scratch_operands = 0 : i64, tpu.core_type = #tpu.core_type<tc>, window_params = [{transform_indices = @transform_0, window_bounds = array<i64: 1, 156, 32>}, {pipeline_mode = #tpu.pipeline_mode<synchronous>, transform_indices = @transform_1, window_bounds = array<i64: 288, 32>}, {pipeline_mode = #tpu.pipeline_mode<synchronous>, transform_indices = @transform_2, window_bounds = array<i64: 1, 32>}, {pipeline_mode = #tpu.pipeline_mode<synchronous>, transform_indices = @transform_3, window_bounds = array<i64: 1, 32>}, {transform_indices = @transform_4, window_bounds = array<i64: 1, 48, 32>}]} {
    %cst = arith.constant 0.000000e+00 : f32
    %0 = vector.broadcast %cst : f32 to vector<48x32xf32>
    %c0 = arith.constant 0 : index
    %c0_0 = arith.constant 0 : index
    %c0_1 = arith.constant 0 : index
    %1 = vector.load %arg1[%c0, %c0_0, %c0_1] : memref<1x156x32xf32, #tpu.memory_space<vmem>>, vector<1x48x32xf32>
    %2 = vector.shape_cast %1 : vector<1x48x32xf32> to vector<48x32xf32>
    %3 = arith.truncf %2 : vector<48x32xf32> to vector<48x32xbf16>
    %c0_2 = arith.constant 0 : index
    %c0_3 = arith.constant 0 : index
    %4 = vector.load %arg2[%c0_2, %c0_3] : memref<288x32xbf16, #tpu.memory_space<vmem>>, vector<32x32xbf16>
    %cst_4 = arith.constant dense<0.000000e+00> : vector<48x32xf32>
    %5 = tpu.matmul %3, %4, %cst_4 {dimension_numbers = #tpu.dot_dimension_numbers<[1], [0], [0], [1], [0, 0, 1, 1], [], []>} : vector<48x32xbf16>, vector<32x32xbf16>, vector<48x32xf32> -> vector<48x32xf32>
    %6 = arith.addf %0, %5 : vector<48x32xf32>
    %c0_5 = arith.constant 0 : index
    %c4 = arith.constant 4 : index
    %c0_6 = arith.constant 0 : index
    %7 = vector.load %arg1[%c0_5, %c4, %c0_6] : memref<1x156x32xf32, #tpu.memory_space<vmem>>, vector<1x48x32xf32>
    %8 = vector.shape_cast %7 : vector<1x48x32xf32> to vector<48x32xf32>
    %9 = arith.truncf %8 : vector<48x32xf32> to vector<48x32xbf16>
    %c32 = arith.constant 32 : index
    %c0_7 = arith.constant 0 : index
    %10 = vector.load %arg2[%c32, %c0_7] : memref<288x32xbf16, #tpu.memory_space<vmem>>, vector<32x32xbf16>
    %cst_8 = arith.constant dense<0.000000e+00> : vector<48x32xf32>
    %11 = tpu.matmul %9, %10, %cst_8 {dimension_numbers = #tpu.dot_dimension_numbers<[1], [0], [0], [1], [0, 0, 1, 1], [], []>} : vector<48x32xbf16>, vector<32x32xbf16>, vector<48x32xf32> -> vector<48x32xf32>
    %12 = arith.addf %6, %11 : vector<48x32xf32>
    %c0_9 = arith.constant 0 : index
    %c8 = arith.constant 8 : index
    %c0_10 = arith.constant 0 : index
    %13 = vector.load %arg1[%c0_9, %c8, %c0_10] : memref<1x156x32xf32, #tpu.memory_space<vmem>>, vector<1x48x32xf32>
    %14 = vector.shape_cast %13 : vector<1x48x32xf32> to vector<48x32xf32>
    %15 = arith.truncf %14 : vector<48x32xf32> to vector<48x32xbf16>
    %c64 = arith.constant 64 : index
    %c0_11 = arith.constant 0 : index
    %16 = vector.load %arg2[%c64, %c0_11] : memref<288x32xbf16, #tpu.memory_space<vmem>>, vector<32x32xbf16>
    %cst_12 = arith.constant dense<0.000000e+00> : vector<48x32xf32>
    %17 = tpu.matmul %15, %16, %cst_12 {dimension_numbers = #tpu.dot_dimension_numbers<[1], [0], [0], [1], [0, 0, 1, 1], [], []>} : vector<48x32xbf16>, vector<32x32xbf16>, vector<48x32xf32> -> vector<48x32xf32>
    %18 = arith.addf %12, %17 : vector<48x32xf32>
    %c0_13 = arith.constant 0 : index
    %c48 = arith.constant 48 : index
    %c0_14 = arith.constant 0 : index
    %19 = vector.load %arg1[%c0_13, %c48, %c0_14] : memref<1x156x32xf32, #tpu.memory_space<vmem>>, vector<1x48x32xf32>
    %20 = vector.shape_cast %19 : vector<1x48x32xf32> to vector<48x32xf32>
    %21 = arith.truncf %20 : vector<48x32xf32> to vector<48x32xbf16>
    %c96 = arith.constant 96 : index
    %c0_15 = arith.constant 0 : index
    %22 = vector.load %arg2[%c96, %c0_15] : memref<288x32xbf16, #tpu.memory_space<vmem>>, vector<32x32xbf16>
    %cst_16 = arith.constant dense<0.000000e+00> : vector<48x32xf32>
    %23 = tpu.matmul %21, %22, %cst_16 {dimension_numbers = #tpu.dot_dimension_numbers<[1], [0], [0], [1], [0, 0, 1, 1], [], []>} : vector<48x32xbf16>, vector<32x32xbf16>, vector<48x32xf32> -> vector<48x32xf32>
    %24 = arith.addf %18, %23 : vector<48x32xf32>
    %c0_17 = arith.constant 0 : index
    %c52 = arith.constant 52 : index
    %c0_18 = arith.constant 0 : index
    %25 = vector.load %arg1[%c0_17, %c52, %c0_18] : memref<1x156x32xf32, #tpu.memory_space<vmem>>, vector<1x48x32xf32>
    %26 = vector.shape_cast %25 : vector<1x48x32xf32> to vector<48x32xf32>
    %27 = arith.truncf %26 : vector<48x32xf32> to vector<48x32xbf16>
    %c128 = arith.constant 128 : index
    %c0_19 = arith.constant 0 : index
    %28 = vector.load %arg2[%c128, %c0_19] : memref<288x32xbf16, #tpu.memory_space<vmem>>, vector<32x32xbf16>
    %cst_20 = arith.constant dense<0.000000e+00> : vector<48x32xf32>
    %29 = tpu.matmul %27, %28, %cst_20 {dimension_numbers = #tpu.dot_dimension_numbers<[1], [0], [0], [1], [0, 0, 1, 1], [], []>} : vector<48x32xbf16>, vector<32x32xbf16>, vector<48x32xf32> -> vector<48x32xf32>
    %30 = arith.addf %24, %29 : vector<48x32xf32>
    %c0_21 = arith.constant 0 : index
    %c56 = arith.constant 56 : index
    %c0_22 = arith.constant 0 : index
    %31 = vector.load %arg1[%c0_21, %c56, %c0_22] : memref<1x156x32xf32, #tpu.memory_space<vmem>>, vector<1x48x32xf32>
    %32 = vector.shape_cast %31 : vector<1x48x32xf32> to vector<48x32xf32>
    %33 = arith.truncf %32 : vector<48x32xf32> to vector<48x32xbf16>
    %c160 = arith.constant 160 : index
    %c0_23 = arith.constant 0 : index
    %34 = vector.load %arg2[%c160, %c0_23] : memref<288x32xbf16, #tpu.memory_space<vmem>>, vector<32x32xbf16>
    %cst_24 = arith.constant dense<0.000000e+00> : vector<48x32xf32>
    %35 = tpu.matmul %33, %34, %cst_24 {dimension_numbers = #tpu.dot_dimension_numbers<[1], [0], [0], [1], [0, 0, 1, 1], [], []>} : vector<48x32xbf16>, vector<32x32xbf16>, vector<48x32xf32> -> vector<48x32xf32>
    %36 = arith.addf %30, %35 : vector<48x32xf32>
    %c0_25 = arith.constant 0 : index
    %c96_26 = arith.constant 96 : index
    %c0_27 = arith.constant 0 : index
    %37 = vector.load %arg1[%c0_25, %c96_26, %c0_27] : memref<1x156x32xf32, #tpu.memory_space<vmem>>, vector<1x48x32xf32>
    %38 = vector.shape_cast %37 : vector<1x48x32xf32> to vector<48x32xf32>
    %39 = arith.truncf %38 : vector<48x32xf32> to vector<48x32xbf16>
    %c192 = arith.constant 192 : index
    %c0_28 = arith.constant 0 : index
    %40 = vector.load %arg2[%c192, %c0_28] : memref<288x32xbf16, #tpu.memory_space<vmem>>, vector<32x32xbf16>
    %cst_29 = arith.constant dense<0.000000e+00> : vector<48x32xf32>
    %41 = tpu.matmul %39, %40, %cst_29 {dimension_numbers = #tpu.dot_dimension_numbers<[1], [0], [0], [1], [0, 0, 1, 1], [], []>} : vector<48x32xbf16>, vector<32x32xbf16>, vector<48x32xf32> -> vector<48x32xf32>
    %42 = arith.addf %36, %41 : vector<48x32xf32>
    %c0_30 = arith.constant 0 : index
    %c100 = arith.constant 100 : index
    %c0_31 = arith.constant 0 : index
    %43 = vector.load %arg1[%c0_30, %c100, %c0_31] : memref<1x156x32xf32, #tpu.memory_space<vmem>>, vector<1x48x32xf32>
    %44 = vector.shape_cast %43 : vector<1x48x32xf32> to vector<48x32xf32>
    %45 = arith.truncf %44 : vector<48x32xf32> to vector<48x32xbf16>
    %c224 = arith.constant 224 : index
    %c0_32 = arith.constant 0 : index
    %46 = vector.load %arg2[%c224, %c0_32] : memref<288x32xbf16, #tpu.memory_space<vmem>>, vector<32x32xbf16>
    %cst_33 = arith.constant dense<0.000000e+00> : vector<48x32xf32>
    %47 = tpu.matmul %45, %46, %cst_33 {dimension_numbers = #tpu.dot_dimension_numbers<[1], [0], [0], [1], [0, 0, 1, 1], [], []>} : vector<48x32xbf16>, vector<32x32xbf16>, vector<48x32xf32> -> vector<48x32xf32>
    %48 = arith.addf %42, %47 : vector<48x32xf32>
    %c0_34 = arith.constant 0 : index
    %c104 = arith.constant 104 : index
    %c0_35 = arith.constant 0 : index
    %49 = vector.load %arg1[%c0_34, %c104, %c0_35] : memref<1x156x32xf32, #tpu.memory_space<vmem>>, vector<1x48x32xf32>
    %50 = vector.shape_cast %49 : vector<1x48x32xf32> to vector<48x32xf32>
    %51 = arith.truncf %50 : vector<48x32xf32> to vector<48x32xbf16>
    %c256 = arith.constant 256 : index
    %c0_36 = arith.constant 0 : index
    %52 = vector.load %arg2[%c256, %c0_36] : memref<288x32xbf16, #tpu.memory_space<vmem>>, vector<32x32xbf16>
    %cst_37 = arith.constant dense<0.000000e+00> : vector<48x32xf32>
    %53 = tpu.matmul %51, %52, %cst_37 {dimension_numbers = #tpu.dot_dimension_numbers<[1], [0], [0], [1], [0, 0, 1, 1], [], []>} : vector<48x32xbf16>, vector<32x32xbf16>, vector<48x32xf32> -> vector<48x32xf32>
    %54 = arith.addf %48, %53 : vector<48x32xf32>
    %c0_38 = arith.constant 0 : index
    %c0_39 = arith.constant 0 : index
    %55 = vector.load %arg3[%c0_38, %c0_39] : memref<1x32xf32, #tpu.memory_space<vmem>>, vector<1x32xf32>
    %56 = vector.broadcast %55 : vector<1x32xf32> to vector<48x32xf32>
    %57 = arith.mulf %54, %56 : vector<48x32xf32>
    %c0_40 = arith.constant 0 : index
    %c0_41 = arith.constant 0 : index
    %58 = vector.load %arg4[%c0_40, %c0_41] : memref<1x32xf32, #tpu.memory_space<vmem>>, vector<1x32xf32>
    %59 = vector.broadcast %58 : vector<1x32xf32> to vector<48x32xf32>
    %60 = arith.addf %57, %59 : vector<48x32xf32>
    %cst_42 = arith.constant 1.000000e-01 : f32
    %61 = vector.broadcast %cst_42 : f32 to vector<48x32xf32>
    %62 = arith.mulf %61, %60 : vector<48x32xf32>
    %63 = arith.maximumf %60, %62 : vector<48x32xf32>
    %64 = arith.truncf %63 : vector<48x32xf32> to vector<48x32xbf16>
    %c0_43 = arith.constant 0 : index
    %c0_44 = arith.constant 0 : index
    %c0_45 = arith.constant 0 : index
    %65 = vector.load %arg5[%c0_43, %c0_44, %c0_45] : memref<1x48x32xbf16, #tpu.memory_space<vmem>>, vector<1x48x32xbf16>
    %66 = vector.shape_cast %65 : vector<1x48x32xbf16> to vector<48x32xbf16>
    %67 = vector.shape_cast %64 : vector<48x32xbf16> to vector<1x48x32xbf16>
    tpu.vector_store %arg5[%c0_43, %c0_44, %c0_45], %67 {strides = array<i32>} : memref<1x48x32xbf16, #tpu.memory_space<vmem>>, vector<1x48x32xbf16>,
    return
  }
  func.func @transform_0(%arg0: i32) -> (i32, i32, i32) {
    %c0_i32 = arith.constant 0 : i32
    %c0_i32_0 = arith.constant 0 : i32
    %c0_i32_1 = arith.constant 0 : i32
    return %arg0, %c0_i32, %c0_i32_0 : i32, i32, i32
  }
  func.func @transform_1(%arg0: i32) -> (i32, i32) {
    %c0_i32 = arith.constant 0 : i32
    %c0_i32_0 = arith.constant 0 : i32
    %c0_i32_1 = arith.constant 0 : i32
    return %c0_i32, %c0_i32_0 : i32, i32
  }
  func.func @transform_2(%arg0: i32) -> (i32, i32) {
    %c0_i32 = arith.constant 0 : i32
    %c0_i32_0 = arith.constant 0 : i32
    %c0_i32_1 = arith.constant 0 : i32
    return %c0_i32, %c0_i32_0 : i32, i32
  }
  func.func @transform_3(%arg0: i32) -> (i32, i32) {
    %c0_i32 = arith.constant 0 : i32
    %c0_i32_0 = arith.constant 0 : i32
    %c0_i32_1 = arith.constant 0 : i32
    return %c0_i32, %c0_i32_0 : i32, i32
  }
  func.func @transform_4(%arg0: i32) -> (i32, i32, i32) {
    %c0_i32 = arith.constant 0 : i32
    %c0_i32_0 = arith.constant 0 : i32
    %c0_i32_1 = arith.constant 0 : i32
    return %arg0, %c0_i32, %c0_i32_0 : i32, i32, i32
  }
}

module attributes {stable_mosaic.version = 11 : i64} {
  func.func @_dil3x3_kernel(%arg0: i32, %arg1: memref<1x272x32xf32, #tpu.memory_space<vmem>>, %arg2: memref<288x32xbf16, #tpu.memory_space<vmem>>, %arg3: memref<1x32xf32, #tpu.memory_space<vmem>>, %arg4: memref<1x32xf32, #tpu.memory_space<vmem>>, %arg5: memref<1x64x32xbf16, #tpu.memory_space<vmem>>) attributes {dimension_semantics = [#tpu.dimension_semantics<parallel>], iteration_bounds = array<i64: 2>, scalar_prefetch = 0 : i64, scratch_operands = 0 : i64, tpu.core_type = #tpu.core_type<tc>, window_params = [{transform_indices = @transform_0, window_bounds = array<i64: 1, 272, 32>}, {pipeline_mode = #tpu.pipeline_mode<synchronous>, transform_indices = @transform_1, window_bounds = array<i64: 288, 32>}, {pipeline_mode = #tpu.pipeline_mode<synchronous>, transform_indices = @transform_2, window_bounds = array<i64: 1, 32>}, {pipeline_mode = #tpu.pipeline_mode<synchronous>, transform_indices = @transform_3, window_bounds = array<i64: 1, 32>}, {transform_indices = @transform_4, window_bounds = array<i64: 1, 64, 32>}]} {
    %cst = arith.constant 0.000000e+00 : f32
    %0 = vector.broadcast %cst : f32 to vector<64x32xf32>
    %c0 = arith.constant 0 : index
    %c0_0 = arith.constant 0 : index
    %c0_1 = arith.constant 0 : index
    %1 = vector.load %arg1[%c0, %c0_0, %c0_1] : memref<1x272x32xf32, #tpu.memory_space<vmem>>, vector<1x64x32xf32>
    %2 = vector.shape_cast %1 : vector<1x64x32xf32> to vector<64x32xf32>
    %3 = arith.truncf %2 : vector<64x32xf32> to vector<64x32xbf16>
    %c0_2 = arith.constant 0 : index
    %c0_3 = arith.constant 0 : index
    %4 = vector.load %arg2[%c0_2, %c0_3] : memref<288x32xbf16, #tpu.memory_space<vmem>>, vector<32x32xbf16>
    %cst_4 = arith.constant dense<0.000000e+00> : vector<64x32xf32>
    %5 = tpu.matmul %3, %4, %cst_4 {dimension_numbers = #tpu.dot_dimension_numbers<[1], [0], [0], [1], [0, 0, 1, 1], [], []>} : vector<64x32xbf16>, vector<32x32xbf16>, vector<64x32xf32> -> vector<64x32xf32>
    %6 = arith.addf %0, %5 : vector<64x32xf32>
    %c0_5 = arith.constant 0 : index
    %c6 = arith.constant 6 : index
    %c0_6 = arith.constant 0 : index
    %7 = vector.load %arg1[%c0_5, %c6, %c0_6] : memref<1x272x32xf32, #tpu.memory_space<vmem>>, vector<1x64x32xf32>
    %8 = vector.shape_cast %7 : vector<1x64x32xf32> to vector<64x32xf32>
    %9 = arith.truncf %8 : vector<64x32xf32> to vector<64x32xbf16>
    %c32 = arith.constant 32 : index
    %c0_7 = arith.constant 0 : index
    %10 = vector.load %arg2[%c32, %c0_7] : memref<288x32xbf16, #tpu.memory_space<vmem>>, vector<32x32xbf16>
    %cst_8 = arith.constant dense<0.000000e+00> : vector<64x32xf32>
    %11 = tpu.matmul %9, %10, %cst_8 {dimension_numbers = #tpu.dot_dimension_numbers<[1], [0], [0], [1], [0, 0, 1, 1], [], []>} : vector<64x32xbf16>, vector<32x32xbf16>, vector<64x32xf32> -> vector<64x32xf32>
    %12 = arith.addf %6, %11 : vector<64x32xf32>
    %c0_9 = arith.constant 0 : index
    %c12 = arith.constant 12 : index
    %c0_10 = arith.constant 0 : index
    %13 = vector.load %arg1[%c0_9, %c12, %c0_10] : memref<1x272x32xf32, #tpu.memory_space<vmem>>, vector<1x64x32xf32>
    %14 = vector.shape_cast %13 : vector<1x64x32xf32> to vector<64x32xf32>
    %15 = arith.truncf %14 : vector<64x32xf32> to vector<64x32xbf16>
    %c64 = arith.constant 64 : index
    %c0_11 = arith.constant 0 : index
    %16 = vector.load %arg2[%c64, %c0_11] : memref<288x32xbf16, #tpu.memory_space<vmem>>, vector<32x32xbf16>
    %cst_12 = arith.constant dense<0.000000e+00> : vector<64x32xf32>
    %17 = tpu.matmul %15, %16, %cst_12 {dimension_numbers = #tpu.dot_dimension_numbers<[1], [0], [0], [1], [0, 0, 1, 1], [], []>} : vector<64x32xbf16>, vector<32x32xbf16>, vector<64x32xf32> -> vector<64x32xf32>
    %18 = arith.addf %12, %17 : vector<64x32xf32>
    %c0_13 = arith.constant 0 : index
    %c96 = arith.constant 96 : index
    %c0_14 = arith.constant 0 : index
    %19 = vector.load %arg1[%c0_13, %c96, %c0_14] : memref<1x272x32xf32, #tpu.memory_space<vmem>>, vector<1x64x32xf32>
    %20 = vector.shape_cast %19 : vector<1x64x32xf32> to vector<64x32xf32>
    %21 = arith.truncf %20 : vector<64x32xf32> to vector<64x32xbf16>
    %c96_15 = arith.constant 96 : index
    %c0_16 = arith.constant 0 : index
    %22 = vector.load %arg2[%c96_15, %c0_16] : memref<288x32xbf16, #tpu.memory_space<vmem>>, vector<32x32xbf16>
    %cst_17 = arith.constant dense<0.000000e+00> : vector<64x32xf32>
    %23 = tpu.matmul %21, %22, %cst_17 {dimension_numbers = #tpu.dot_dimension_numbers<[1], [0], [0], [1], [0, 0, 1, 1], [], []>} : vector<64x32xbf16>, vector<32x32xbf16>, vector<64x32xf32> -> vector<64x32xf32>
    %24 = arith.addf %18, %23 : vector<64x32xf32>
    %c0_18 = arith.constant 0 : index
    %c102 = arith.constant 102 : index
    %c0_19 = arith.constant 0 : index
    %25 = vector.load %arg1[%c0_18, %c102, %c0_19] : memref<1x272x32xf32, #tpu.memory_space<vmem>>, vector<1x64x32xf32>
    %26 = vector.shape_cast %25 : vector<1x64x32xf32> to vector<64x32xf32>
    %27 = arith.truncf %26 : vector<64x32xf32> to vector<64x32xbf16>
    %c128 = arith.constant 128 : index
    %c0_20 = arith.constant 0 : index
    %28 = vector.load %arg2[%c128, %c0_20] : memref<288x32xbf16, #tpu.memory_space<vmem>>, vector<32x32xbf16>
    %cst_21 = arith.constant dense<0.000000e+00> : vector<64x32xf32>
    %29 = tpu.matmul %27, %28, %cst_21 {dimension_numbers = #tpu.dot_dimension_numbers<[1], [0], [0], [1], [0, 0, 1, 1], [], []>} : vector<64x32xbf16>, vector<32x32xbf16>, vector<64x32xf32> -> vector<64x32xf32>
    %30 = arith.addf %24, %29 : vector<64x32xf32>
    %c0_22 = arith.constant 0 : index
    %c108 = arith.constant 108 : index
    %c0_23 = arith.constant 0 : index
    %31 = vector.load %arg1[%c0_22, %c108, %c0_23] : memref<1x272x32xf32, #tpu.memory_space<vmem>>, vector<1x64x32xf32>
    %32 = vector.shape_cast %31 : vector<1x64x32xf32> to vector<64x32xf32>
    %33 = arith.truncf %32 : vector<64x32xf32> to vector<64x32xbf16>
    %c160 = arith.constant 160 : index
    %c0_24 = arith.constant 0 : index
    %34 = vector.load %arg2[%c160, %c0_24] : memref<288x32xbf16, #tpu.memory_space<vmem>>, vector<32x32xbf16>
    %cst_25 = arith.constant dense<0.000000e+00> : vector<64x32xf32>
    %35 = tpu.matmul %33, %34, %cst_25 {dimension_numbers = #tpu.dot_dimension_numbers<[1], [0], [0], [1], [0, 0, 1, 1], [], []>} : vector<64x32xbf16>, vector<32x32xbf16>, vector<64x32xf32> -> vector<64x32xf32>
    %36 = arith.addf %30, %35 : vector<64x32xf32>
    %c0_26 = arith.constant 0 : index
    %c192 = arith.constant 192 : index
    %c0_27 = arith.constant 0 : index
    %37 = vector.load %arg1[%c0_26, %c192, %c0_27] : memref<1x272x32xf32, #tpu.memory_space<vmem>>, vector<1x64x32xf32>
    %38 = vector.shape_cast %37 : vector<1x64x32xf32> to vector<64x32xf32>
    %39 = arith.truncf %38 : vector<64x32xf32> to vector<64x32xbf16>
    %c192_28 = arith.constant 192 : index
    %c0_29 = arith.constant 0 : index
    %40 = vector.load %arg2[%c192_28, %c0_29] : memref<288x32xbf16, #tpu.memory_space<vmem>>, vector<32x32xbf16>
    %cst_30 = arith.constant dense<0.000000e+00> : vector<64x32xf32>
    %41 = tpu.matmul %39, %40, %cst_30 {dimension_numbers = #tpu.dot_dimension_numbers<[1], [0], [0], [1], [0, 0, 1, 1], [], []>} : vector<64x32xbf16>, vector<32x32xbf16>, vector<64x32xf32> -> vector<64x32xf32>
    %42 = arith.addf %36, %41 : vector<64x32xf32>
    %c0_31 = arith.constant 0 : index
    %c198 = arith.constant 198 : index
    %c0_32 = arith.constant 0 : index
    %43 = vector.load %arg1[%c0_31, %c198, %c0_32] : memref<1x272x32xf32, #tpu.memory_space<vmem>>, vector<1x64x32xf32>
    %44 = vector.shape_cast %43 : vector<1x64x32xf32> to vector<64x32xf32>
    %45 = arith.truncf %44 : vector<64x32xf32> to vector<64x32xbf16>
    %c224 = arith.constant 224 : index
    %c0_33 = arith.constant 0 : index
    %46 = vector.load %arg2[%c224, %c0_33] : memref<288x32xbf16, #tpu.memory_space<vmem>>, vector<32x32xbf16>
    %cst_34 = arith.constant dense<0.000000e+00> : vector<64x32xf32>
    %47 = tpu.matmul %45, %46, %cst_34 {dimension_numbers = #tpu.dot_dimension_numbers<[1], [0], [0], [1], [0, 0, 1, 1], [], []>} : vector<64x32xbf16>, vector<32x32xbf16>, vector<64x32xf32> -> vector<64x32xf32>
    %48 = arith.addf %42, %47 : vector<64x32xf32>
    %c0_35 = arith.constant 0 : index
    %c204 = arith.constant 204 : index
    %c0_36 = arith.constant 0 : index
    %49 = vector.load %arg1[%c0_35, %c204, %c0_36] : memref<1x272x32xf32, #tpu.memory_space<vmem>>, vector<1x64x32xf32>
    %50 = vector.shape_cast %49 : vector<1x64x32xf32> to vector<64x32xf32>
    %51 = arith.truncf %50 : vector<64x32xf32> to vector<64x32xbf16>
    %c256 = arith.constant 256 : index
    %c0_37 = arith.constant 0 : index
    %52 = vector.load %arg2[%c256, %c0_37] : memref<288x32xbf16, #tpu.memory_space<vmem>>, vector<32x32xbf16>
    %cst_38 = arith.constant dense<0.000000e+00> : vector<64x32xf32>
    %53 = tpu.matmul %51, %52, %cst_38 {dimension_numbers = #tpu.dot_dimension_numbers<[1], [0], [0], [1], [0, 0, 1, 1], [], []>} : vector<64x32xbf16>, vector<32x32xbf16>, vector<64x32xf32> -> vector<64x32xf32>
    %54 = arith.addf %48, %53 : vector<64x32xf32>
    %c0_39 = arith.constant 0 : index
    %c0_40 = arith.constant 0 : index
    %55 = vector.load %arg3[%c0_39, %c0_40] : memref<1x32xf32, #tpu.memory_space<vmem>>, vector<1x32xf32>
    %56 = vector.broadcast %55 : vector<1x32xf32> to vector<64x32xf32>
    %57 = arith.mulf %54, %56 : vector<64x32xf32>
    %c0_41 = arith.constant 0 : index
    %c0_42 = arith.constant 0 : index
    %58 = vector.load %arg4[%c0_41, %c0_42] : memref<1x32xf32, #tpu.memory_space<vmem>>, vector<1x32xf32>
    %59 = vector.broadcast %58 : vector<1x32xf32> to vector<64x32xf32>
    %60 = arith.addf %57, %59 : vector<64x32xf32>
    %cst_43 = arith.constant 1.000000e-01 : f32
    %61 = vector.broadcast %cst_43 : f32 to vector<64x32xf32>
    %62 = arith.mulf %61, %60 : vector<64x32xf32>
    %63 = arith.maximumf %60, %62 : vector<64x32xf32>
    %64 = arith.truncf %63 : vector<64x32xf32> to vector<64x32xbf16>
    %c0_44 = arith.constant 0 : index
    %c0_45 = arith.constant 0 : index
    %c0_46 = arith.constant 0 : index
    %65 = vector.load %arg5[%c0_44, %c0_45, %c0_46] : memref<1x64x32xbf16, #tpu.memory_space<vmem>>, vector<1x64x32xbf16>
    %66 = vector.shape_cast %65 : vector<1x64x32xbf16> to vector<64x32xbf16>
    %67 = vector.shape_cast %64 : vector<64x32xbf16> to vector<1x64x32xbf16>
    tpu.vector_store %arg5[%c0_44, %c0_45, %c0_46], %67 {strides = array<i32>} : memref<1x64x32xbf16, #tpu.memory_space<vmem>>, vector<1x64x32xbf16>,
    return
  }
  func.func @transform_0(%arg0: i32) -> (i32, i32, i32) {
    %c0_i32 = arith.constant 0 : i32
    %c0_i32_0 = arith.constant 0 : i32
    %c0_i32_1 = arith.constant 0 : i32
    return %arg0, %c0_i32, %c0_i32_0 : i32, i32, i32
  }
  func.func @transform_1(%arg0: i32) -> (i32, i32) {
    %c0_i32 = arith.constant 0 : i32
    %c0_i32_0 = arith.constant 0 : i32
    %c0_i32_1 = arith.constant 0 : i32
    return %c0_i32, %c0_i32_0 : i32, i32
  }
  func.func @transform_2(%arg0: i32) -> (i32, i32) {
    %c0_i32 = arith.constant 0 : i32
    %c0_i32_0 = arith.constant 0 : i32
    %c0_i32_1 = arith.constant 0 : i32
    return %c0_i32, %c0_i32_0 : i32, i32
  }
  func.func @transform_3(%arg0: i32) -> (i32, i32) {
    %c0_i32 = arith.constant 0 : i32
    %c0_i32_0 = arith.constant 0 : i32
    %c0_i32_1 = arith.constant 0 : i32
    return %c0_i32, %c0_i32_0 : i32, i32
  }
  func.func @transform_4(%arg0: i32) -> (i32, i32, i32) {
    %c0_i32 = arith.constant 0 : i32
    %c0_i32_0 = arith.constant 0 : i32
    %c0_i32_1 = arith.constant 0 : i32
    return %arg0, %c0_i32, %c0_i32_0 : i32, i32, i32
  }
}

module attributes {stable_mosaic.version = 11 : i64} {
  func.func @_mm_affine_act_kernel(%arg0: i32, %arg1: memref<32x32xbf16, #tpu.memory_space<vmem>>, %arg2: memref<32x32xbf16, #tpu.memory_space<vmem>>, %arg3: memref<1x32xf32, #tpu.memory_space<vmem>>, %arg4: memref<1x32xf32, #tpu.memory_space<vmem>>, %arg5: memref<32x32xbf16, #tpu.memory_space<vmem>>) attributes {dimension_semantics = [#tpu.dimension_semantics<parallel>], iteration_bounds = array<i64: 1>, scalar_prefetch = 0 : i64, scratch_operands = 0 : i64, tpu.core_type = #tpu.core_type<tc>, window_params = [{transform_indices = @transform_0, window_bounds = array<i64: 32, 32>}, {pipeline_mode = #tpu.pipeline_mode<synchronous>, transform_indices = @transform_1, window_bounds = array<i64: 32, 32>}, {pipeline_mode = #tpu.pipeline_mode<synchronous>, transform_indices = @transform_2, window_bounds = array<i64: 1, 32>}, {pipeline_mode = #tpu.pipeline_mode<synchronous>, transform_indices = @transform_3, window_bounds = array<i64: 1, 32>}, {transform_indices = @transform_4, window_bounds = array<i64: 32, 32>}]} {
    %c0 = arith.constant 0 : index
    %c0_0 = arith.constant 0 : index
    %0 = vector.load %arg1[%c0, %c0_0] : memref<32x32xbf16, #tpu.memory_space<vmem>>, vector<32x32xbf16>
    %c0_1 = arith.constant 0 : index
    %c0_2 = arith.constant 0 : index
    %1 = vector.load %arg2[%c0_1, %c0_2] : memref<32x32xbf16, #tpu.memory_space<vmem>>, vector<32x32xbf16>
    %cst = arith.constant dense<0.000000e+00> : vector<32x32xf32>
    %2 = tpu.matmul %0, %1, %cst {dimension_numbers = #tpu.dot_dimension_numbers<[1], [0], [0], [1], [0, 0, 1, 1], [], []>} : vector<32x32xbf16>, vector<32x32xbf16>, vector<32x32xf32> -> vector<32x32xf32>
    %c0_3 = arith.constant 0 : index
    %c0_4 = arith.constant 0 : index
    %3 = vector.load %arg3[%c0_3, %c0_4] : memref<1x32xf32, #tpu.memory_space<vmem>>, vector<1x32xf32>
    %4 = vector.broadcast %3 : vector<1x32xf32> to vector<32x32xf32>
    %5 = arith.mulf %2, %4 : vector<32x32xf32>
    %c0_5 = arith.constant 0 : index
    %c0_6 = arith.constant 0 : index
    %6 = vector.load %arg4[%c0_5, %c0_6] : memref<1x32xf32, #tpu.memory_space<vmem>>, vector<1x32xf32>
    %7 = vector.broadcast %6 : vector<1x32xf32> to vector<32x32xf32>
    %8 = arith.addf %5, %7 : vector<32x32xf32>
    %cst_7 = arith.constant 1.000000e-01 : f32
    %9 = vector.broadcast %cst_7 : f32 to vector<32x32xf32>
    %10 = arith.mulf %9, %8 : vector<32x32xf32>
    %11 = arith.maximumf %8, %10 : vector<32x32xf32>
    %12 = arith.truncf %11 : vector<32x32xf32> to vector<32x32xbf16>
    %c0_8 = arith.constant 0 : index
    %c0_9 = arith.constant 0 : index
    %13 = vector.load %arg5[%c0_8, %c0_9] : memref<32x32xbf16, #tpu.memory_space<vmem>>, vector<32x32xbf16>
    tpu.vector_store %arg5[%c0_8, %c0_9], %12 {strides = array<i32>} : memref<32x32xbf16, #tpu.memory_space<vmem>>, vector<32x32xbf16>,
    return
  }
  func.func @transform_0(%arg0: i32) -> (i32, i32) {
    %c0_i32 = arith.constant 0 : i32
    %c0_i32_0 = arith.constant 0 : i32
    return %arg0, %c0_i32 : i32, i32
  }
  func.func @transform_1(%arg0: i32) -> (i32, i32) {
    %c0_i32 = arith.constant 0 : i32
    %c0_i32_0 = arith.constant 0 : i32
    %c0_i32_1 = arith.constant 0 : i32
    return %c0_i32, %c0_i32_0 : i32, i32
  }
  func.func @transform_2(%arg0: i32) -> (i32, i32) {
    %c0_i32 = arith.constant 0 : i32
    %c0_i32_0 = arith.constant 0 : i32
    %c0_i32_1 = arith.constant 0 : i32
    return %c0_i32, %c0_i32_0 : i32, i32
  }
  func.func @transform_3(%arg0: i32) -> (i32, i32) {
    %c0_i32 = arith.constant 0 : i32
    %c0_i32_0 = arith.constant 0 : i32
    %c0_i32_1 = arith.constant 0 : i32
    return %c0_i32, %c0_i32_0 : i32, i32
  }
  func.func @transform_4(%arg0: i32) -> (i32, i32) {
    %c0_i32 = arith.constant 0 : i32
    %c0_i32_0 = arith.constant 0 : i32
    return %arg0, %c0_i32 : i32, i32
  }
}

module attributes {stable_mosaic.version = 11 : i64} {
  func.func @_mm_affine_act_kernel(%arg0: i32, %arg1: memref<32x64xbf16, #tpu.memory_space<vmem>>, %arg2: memref<64x32xbf16, #tpu.memory_space<vmem>>, %arg3: memref<1x32xf32, #tpu.memory_space<vmem>>, %arg4: memref<1x32xf32, #tpu.memory_space<vmem>>, %arg5: memref<32x32xf32, #tpu.memory_space<vmem>>) attributes {dimension_semantics = [#tpu.dimension_semantics<parallel>], iteration_bounds = array<i64: 1>, scalar_prefetch = 0 : i64, scratch_operands = 0 : i64, tpu.core_type = #tpu.core_type<tc>, window_params = [{transform_indices = @transform_0, window_bounds = array<i64: 32, 64>}, {pipeline_mode = #tpu.pipeline_mode<synchronous>, transform_indices = @transform_1, window_bounds = array<i64: 64, 32>}, {pipeline_mode = #tpu.pipeline_mode<synchronous>, transform_indices = @transform_2, window_bounds = array<i64: 1, 32>}, {pipeline_mode = #tpu.pipeline_mode<synchronous>, transform_indices = @transform_3, window_bounds = array<i64: 1, 32>}, {transform_indices = @transform_4, window_bounds = array<i64: 32, 32>}]} {
    %c0 = arith.constant 0 : index
    %c0_0 = arith.constant 0 : index
    %0 = vector.load %arg1[%c0, %c0_0] : memref<32x64xbf16, #tpu.memory_space<vmem>>, vector<32x64xbf16>
    %c0_1 = arith.constant 0 : index
    %c0_2 = arith.constant 0 : index
    %1 = vector.load %arg2[%c0_1, %c0_2] : memref<64x32xbf16, #tpu.memory_space<vmem>>, vector<64x32xbf16>
    %cst = arith.constant dense<0.000000e+00> : vector<32x32xf32>
    %2 = tpu.matmul %0, %1, %cst {dimension_numbers = #tpu.dot_dimension_numbers<[1], [0], [0], [1], [0, 0, 1, 1], [], []>} : vector<32x64xbf16>, vector<64x32xbf16>, vector<32x32xf32> -> vector<32x32xf32>
    %c0_3 = arith.constant 0 : index
    %c0_4 = arith.constant 0 : index
    %3 = vector.load %arg3[%c0_3, %c0_4] : memref<1x32xf32, #tpu.memory_space<vmem>>, vector<1x32xf32>
    %4 = vector.broadcast %3 : vector<1x32xf32> to vector<32x32xf32>
    %5 = arith.mulf %2, %4 : vector<32x32xf32>
    %c0_5 = arith.constant 0 : index
    %c0_6 = arith.constant 0 : index
    %6 = vector.load %arg4[%c0_5, %c0_6] : memref<1x32xf32, #tpu.memory_space<vmem>>, vector<1x32xf32>
    %7 = vector.broadcast %6 : vector<1x32xf32> to vector<32x32xf32>
    %8 = arith.addf %5, %7 : vector<32x32xf32>
    %c0_7 = arith.constant 0 : index
    %c0_8 = arith.constant 0 : index
    %9 = vector.load %arg5[%c0_7, %c0_8] : memref<32x32xf32, #tpu.memory_space<vmem>>, vector<32x32xf32>
    tpu.vector_store %arg5[%c0_7, %c0_8], %8 {strides = array<i32>} : memref<32x32xf32, #tpu.memory_space<vmem>>, vector<32x32xf32>,
    return
  }
  func.func @transform_0(%arg0: i32) -> (i32, i32) {
    %c0_i32 = arith.constant 0 : i32
    %c0_i32_0 = arith.constant 0 : i32
    return %arg0, %c0_i32 : i32, i32
  }
  func.func @transform_1(%arg0: i32) -> (i32, i32) {
    %c0_i32 = arith.constant 0 : i32
    %c0_i32_0 = arith.constant 0 : i32
    %c0_i32_1 = arith.constant 0 : i32
    return %c0_i32, %c0_i32_0 : i32, i32
  }
  func.func @transform_2(%arg0: i32) -> (i32, i32) {
    %c0_i32 = arith.constant 0 : i32
    %c0_i32_0 = arith.constant 0 : i32
    %c0_i32_1 = arith.constant 0 : i32
    return %c0_i32, %c0_i32_0 : i32, i32
  }
  func.func @transform_3(%arg0: i32) -> (i32, i32) {
    %c0_i32 = arith.constant 0 : i32
    %c0_i32_0 = arith.constant 0 : i32
    %c0_i32_1 = arith.constant 0 : i32
    return %c0_i32, %c0_i32_0 : i32, i32
  }
  func.func @transform_4(%arg0: i32) -> (i32, i32) {
    %c0_i32 = arith.constant 0 : i32
    %c0_i32_0 = arith.constant 0 : i32
    return %arg0, %c0_i32 : i32, i32
  }
}

module attributes {stable_mosaic.version = 11 : i64} {
  func.func @_mm_affine_act_kernel(%arg0: i32, %arg1: memref<128x48xbf16, #tpu.memory_space<vmem>>, %arg2: memref<48x32xbf16, #tpu.memory_space<vmem>>, %arg3: memref<1x32xf32, #tpu.memory_space<vmem>>, %arg4: memref<1x32xf32, #tpu.memory_space<vmem>>, %arg5: memref<128x32xbf16, #tpu.memory_space<vmem>>) attributes {dimension_semantics = [#tpu.dimension_semantics<parallel>], iteration_bounds = array<i64: 1>, scalar_prefetch = 0 : i64, scratch_operands = 0 : i64, tpu.core_type = #tpu.core_type<tc>, window_params = [{transform_indices = @transform_0, window_bounds = array<i64: 128, 48>}, {pipeline_mode = #tpu.pipeline_mode<synchronous>, transform_indices = @transform_1, window_bounds = array<i64: 48, 32>}, {pipeline_mode = #tpu.pipeline_mode<synchronous>, transform_indices = @transform_2, window_bounds = array<i64: 1, 32>}, {pipeline_mode = #tpu.pipeline_mode<synchronous>, transform_indices = @transform_3, window_bounds = array<i64: 1, 32>}, {transform_indices = @transform_4, window_bounds = array<i64: 128, 32>}]} {
    %c0 = arith.constant 0 : index
    %c0_0 = arith.constant 0 : index
    %0 = vector.load %arg1[%c0, %c0_0] : memref<128x48xbf16, #tpu.memory_space<vmem>>, vector<128x48xbf16>
    %c0_1 = arith.constant 0 : index
    %c0_2 = arith.constant 0 : index
    %1 = vector.load %arg2[%c0_1, %c0_2] : memref<48x32xbf16, #tpu.memory_space<vmem>>, vector<48x32xbf16>
    %cst = arith.constant dense<0.000000e+00> : vector<128x32xf32>
    %2 = tpu.matmul %0, %1, %cst {dimension_numbers = #tpu.dot_dimension_numbers<[1], [0], [0], [1], [0, 0, 1, 1], [], []>} : vector<128x48xbf16>, vector<48x32xbf16>, vector<128x32xf32> -> vector<128x32xf32>
    %c0_3 = arith.constant 0 : index
    %c0_4 = arith.constant 0 : index
    %3 = vector.load %arg3[%c0_3, %c0_4] : memref<1x32xf32, #tpu.memory_space<vmem>>, vector<1x32xf32>
    %4 = vector.broadcast %3 : vector<1x32xf32> to vector<128x32xf32>
    %5 = arith.mulf %2, %4 : vector<128x32xf32>
    %c0_5 = arith.constant 0 : index
    %c0_6 = arith.constant 0 : index
    %6 = vector.load %arg4[%c0_5, %c0_6] : memref<1x32xf32, #tpu.memory_space<vmem>>, vector<1x32xf32>
    %7 = vector.broadcast %6 : vector<1x32xf32> to vector<128x32xf32>
    %8 = arith.addf %5, %7 : vector<128x32xf32>
    %cst_7 = arith.constant 1.000000e-01 : f32
    %9 = vector.broadcast %cst_7 : f32 to vector<128x32xf32>
    %10 = arith.mulf %9, %8 : vector<128x32xf32>
    %11 = arith.maximumf %8, %10 : vector<128x32xf32>
    %12 = arith.truncf %11 : vector<128x32xf32> to vector<128x32xbf16>
    %c0_8 = arith.constant 0 : index
    %c0_9 = arith.constant 0 : index
    %13 = vector.load %arg5[%c0_8, %c0_9] : memref<128x32xbf16, #tpu.memory_space<vmem>>, vector<128x32xbf16>
    tpu.vector_store %arg5[%c0_8, %c0_9], %12 {strides = array<i32>} : memref<128x32xbf16, #tpu.memory_space<vmem>>, vector<128x32xbf16>,
    return
  }
  func.func @transform_0(%arg0: i32) -> (i32, i32) {
    %c0_i32 = arith.constant 0 : i32
    %c0_i32_0 = arith.constant 0 : i32
    return %arg0, %c0_i32 : i32, i32
  }
  func.func @transform_1(%arg0: i32) -> (i32, i32) {
    %c0_i32 = arith.constant 0 : i32
    %c0_i32_0 = arith.constant 0 : i32
    %c0_i32_1 = arith.constant 0 : i32
    return %c0_i32, %c0_i32_0 : i32, i32
  }
  func.func @transform_2(%arg0: i32) -> (i32, i32) {
    %c0_i32 = arith.constant 0 : i32
    %c0_i32_0 = arith.constant 0 : i32
    %c0_i32_1 = arith.constant 0 : i32
    return %c0_i32, %c0_i32_0 : i32, i32
  }
  func.func @transform_3(%arg0: i32) -> (i32, i32) {
    %c0_i32 = arith.constant 0 : i32
    %c0_i32_0 = arith.constant 0 : i32
    %c0_i32_1 = arith.constant 0 : i32
    return %c0_i32, %c0_i32_0 : i32, i32
  }
  func.func @transform_4(%arg0: i32) -> (i32, i32) {
    %c0_i32 = arith.constant 0 : i32
    %c0_i32_0 = arith.constant 0 : i32
    return %arg0, %c0_i32 : i32, i32
  }
}

module attributes {stable_mosaic.version = 11 : i64} {
  func.func @_mm_res_affine_act_kernel(%arg0: i32, %arg1: memref<128x32xbf16, #tpu.memory_space<vmem>>, %arg2: memref<32x32xbf16, #tpu.memory_space<vmem>>, %arg3: memref<128x32xf32, #tpu.memory_space<vmem>>, %arg4: memref<1x32xf32, #tpu.memory_space<vmem>>, %arg5: memref<1x32xf32, #tpu.memory_space<vmem>>, %arg6: memref<128x32xbf16, #tpu.memory_space<vmem>>) attributes {dimension_semantics = [#tpu.dimension_semantics<parallel>], iteration_bounds = array<i64: 1>, scalar_prefetch = 0 : i64, scratch_operands = 0 : i64, tpu.core_type = #tpu.core_type<tc>, window_params = [{transform_indices = @transform_0, window_bounds = array<i64: 128, 32>}, {pipeline_mode = #tpu.pipeline_mode<synchronous>, transform_indices = @transform_1, window_bounds = array<i64: 32, 32>}, {transform_indices = @transform_2, window_bounds = array<i64: 128, 32>}, {pipeline_mode = #tpu.pipeline_mode<synchronous>, transform_indices = @transform_3, window_bounds = array<i64: 1, 32>}, {pipeline_mode = #tpu.pipeline_mode<synchronous>, transform_indices = @transform_4, window_bounds = array<i64: 1, 32>}, {transform_indices = @transform_5, window_bounds = array<i64: 128, 32>}]} {
    %c0 = arith.constant 0 : index
    %c0_0 = arith.constant 0 : index
    %0 = vector.load %arg1[%c0, %c0_0] : memref<128x32xbf16, #tpu.memory_space<vmem>>, vector<128x32xbf16>
    %c0_1 = arith.constant 0 : index
    %c0_2 = arith.constant 0 : index
    %1 = vector.load %arg2[%c0_1, %c0_2] : memref<32x32xbf16, #tpu.memory_space<vmem>>, vector<32x32xbf16>
    %cst = arith.constant dense<0.000000e+00> : vector<128x32xf32>
    %2 = tpu.matmul %0, %1, %cst {dimension_numbers = #tpu.dot_dimension_numbers<[1], [0], [0], [1], [0, 0, 1, 1], [], []>} : vector<128x32xbf16>, vector<32x32xbf16>, vector<128x32xf32> -> vector<128x32xf32>
    %c0_3 = arith.constant 0 : index
    %c0_4 = arith.constant 0 : index
    %3 = vector.load %arg3[%c0_3, %c0_4] : memref<128x32xf32, #tpu.memory_space<vmem>>, vector<128x32xf32>
    %4 = arith.addf %2, %3 : vector<128x32xf32>
    %c0_5 = arith.constant 0 : index
    %c0_6 = arith.constant 0 : index
    %5 = vector.load %arg4[%c0_5, %c0_6] : memref<1x32xf32, #tpu.memory_space<vmem>>, vector<1x32xf32>
    %6 = vector.broadcast %5 : vector<1x32xf32> to vector<128x32xf32>
    %7 = arith.mulf %4, %6 : vector<128x32xf32>
    %c0_7 = arith.constant 0 : index
    %c0_8 = arith.constant 0 : index
    %8 = vector.load %arg5[%c0_7, %c0_8] : memref<1x32xf32, #tpu.memory_space<vmem>>, vector<1x32xf32>
    %9 = vector.broadcast %8 : vector<1x32xf32> to vector<128x32xf32>
    %10 = arith.addf %7, %9 : vector<128x32xf32>
    %cst_9 = arith.constant 1.000000e-01 : f32
    %11 = vector.broadcast %cst_9 : f32 to vector<128x32xf32>
    %12 = arith.mulf %11, %10 : vector<128x32xf32>
    %13 = arith.maximumf %10, %12 : vector<128x32xf32>
    %14 = arith.truncf %13 : vector<128x32xf32> to vector<128x32xbf16>
    %c0_10 = arith.constant 0 : index
    %c0_11 = arith.constant 0 : index
    %15 = vector.load %arg6[%c0_10, %c0_11] : memref<128x32xbf16, #tpu.memory_space<vmem>>, vector<128x32xbf16>
    tpu.vector_store %arg6[%c0_10, %c0_11], %14 {strides = array<i32>} : memref<128x32xbf16, #tpu.memory_space<vmem>>, vector<128x32xbf16>,
    return
  }
  func.func @transform_0(%arg0: i32) -> (i32, i32) {
    %c0_i32 = arith.constant 0 : i32
    %c0_i32_0 = arith.constant 0 : i32
    return %arg0, %c0_i32 : i32, i32
  }
  func.func @transform_1(%arg0: i32) -> (i32, i32) {
    %c0_i32 = arith.constant 0 : i32
    %c0_i32_0 = arith.constant 0 : i32
    %c0_i32_1 = arith.constant 0 : i32
    return %c0_i32, %c0_i32_0 : i32, i32
  }
  func.func @transform_2(%arg0: i32) -> (i32, i32) {
    %c0_i32 = arith.constant 0 : i32
    %c0_i32_0 = arith.constant 0 : i32
    return %arg0, %c0_i32 : i32, i32
  }
  func.func @transform_3(%arg0: i32) -> (i32, i32) {
    %c0_i32 = arith.constant 0 : i32
    %c0_i32_0 = arith.constant 0 : i32
    %c0_i32_1 = arith.constant 0 : i32
    return %c0_i32, %c0_i32_0 : i32, i32
  }
  func.func @transform_4(%arg0: i32) -> (i32, i32) {
    %c0_i32 = arith.constant 0 : i32
    %c0_i32_0 = arith.constant 0 : i32
    %c0_i32_1 = arith.constant 0 : i32
    return %c0_i32, %c0_i32_0 : i32, i32
  }
  func.func @transform_5(%arg0: i32) -> (i32, i32) {
    %c0_i32 = arith.constant 0 : i32
    %c0_i32_0 = arith.constant 0 : i32
    return %arg0, %c0_i32 : i32, i32
  }
}

module attributes {stable_mosaic.version = 11 : i64} {
  func.func @_mm_affine_act_kernel(%arg0: i32, %arg1: memref<128x32xbf16, #tpu.memory_space<vmem>>, %arg2: memref<32x32xbf16, #tpu.memory_space<vmem>>, %arg3: memref<1x32xf32, #tpu.memory_space<vmem>>, %arg4: memref<1x32xf32, #tpu.memory_space<vmem>>, %arg5: memref<128x32xbf16, #tpu.memory_space<vmem>>) attributes {dimension_semantics = [#tpu.dimension_semantics<parallel>], iteration_bounds = array<i64: 1>, scalar_prefetch = 0 : i64, scratch_operands = 0 : i64, tpu.core_type = #tpu.core_type<tc>, window_params = [{transform_indices = @transform_0, window_bounds = array<i64: 128, 32>}, {pipeline_mode = #tpu.pipeline_mode<synchronous>, transform_indices = @transform_1, window_bounds = array<i64: 32, 32>}, {pipeline_mode = #tpu.pipeline_mode<synchronous>, transform_indices = @transform_2, window_bounds = array<i64: 1, 32>}, {pipeline_mode = #tpu.pipeline_mode<synchronous>, transform_indices = @transform_3, window_bounds = array<i64: 1, 32>}, {transform_indices = @transform_4, window_bounds = array<i64: 128, 32>}]} {
    %c0 = arith.constant 0 : index
    %c0_0 = arith.constant 0 : index
    %0 = vector.load %arg1[%c0, %c0_0] : memref<128x32xbf16, #tpu.memory_space<vmem>>, vector<128x32xbf16>
    %c0_1 = arith.constant 0 : index
    %c0_2 = arith.constant 0 : index
    %1 = vector.load %arg2[%c0_1, %c0_2] : memref<32x32xbf16, #tpu.memory_space<vmem>>, vector<32x32xbf16>
    %cst = arith.constant dense<0.000000e+00> : vector<128x32xf32>
    %2 = tpu.matmul %0, %1, %cst {dimension_numbers = #tpu.dot_dimension_numbers<[1], [0], [0], [1], [0, 0, 1, 1], [], []>} : vector<128x32xbf16>, vector<32x32xbf16>, vector<128x32xf32> -> vector<128x32xf32>
    %c0_3 = arith.constant 0 : index
    %c0_4 = arith.constant 0 : index
    %3 = vector.load %arg3[%c0_3, %c0_4] : memref<1x32xf32, #tpu.memory_space<vmem>>, vector<1x32xf32>
    %4 = vector.broadcast %3 : vector<1x32xf32> to vector<128x32xf32>
    %5 = arith.mulf %2, %4 : vector<128x32xf32>
    %c0_5 = arith.constant 0 : index
    %c0_6 = arith.constant 0 : index
    %6 = vector.load %arg4[%c0_5, %c0_6] : memref<1x32xf32, #tpu.memory_space<vmem>>, vector<1x32xf32>
    %7 = vector.broadcast %6 : vector<1x32xf32> to vector<128x32xf32>
    %8 = arith.addf %5, %7 : vector<128x32xf32>
    %cst_7 = arith.constant 1.000000e-01 : f32
    %9 = vector.broadcast %cst_7 : f32 to vector<128x32xf32>
    %10 = arith.mulf %9, %8 : vector<128x32xf32>
    %11 = arith.maximumf %8, %10 : vector<128x32xf32>
    %12 = arith.truncf %11 : vector<128x32xf32> to vector<128x32xbf16>
    %c0_8 = arith.constant 0 : index
    %c0_9 = arith.constant 0 : index
    %13 = vector.load %arg5[%c0_8, %c0_9] : memref<128x32xbf16, #tpu.memory_space<vmem>>, vector<128x32xbf16>
    tpu.vector_store %arg5[%c0_8, %c0_9], %12 {strides = array<i32>} : memref<128x32xbf16, #tpu.memory_space<vmem>>, vector<128x32xbf16>,
    return
  }
  func.func @transform_0(%arg0: i32) -> (i32, i32) {
    %c0_i32 = arith.constant 0 : i32
    %c0_i32_0 = arith.constant 0 : i32
    return %arg0, %c0_i32 : i32, i32
  }
  func.func @transform_1(%arg0: i32) -> (i32, i32) {
    %c0_i32 = arith.constant 0 : i32
    %c0_i32_0 = arith.constant 0 : i32
    %c0_i32_1 = arith.constant 0 : i32
    return %c0_i32, %c0_i32_0 : i32, i32
  }
  func.func @transform_2(%arg0: i32) -> (i32, i32) {
    %c0_i32 = arith.constant 0 : i32
    %c0_i32_0 = arith.constant 0 : i32
    %c0_i32_1 = arith.constant 0 : i32
    return %c0_i32, %c0_i32_0 : i32, i32
  }
  func.func @transform_3(%arg0: i32) -> (i32, i32) {
    %c0_i32 = arith.constant 0 : i32
    %c0_i32_0 = arith.constant 0 : i32
    %c0_i32_1 = arith.constant 0 : i32
    return %c0_i32, %c0_i32_0 : i32, i32
  }
  func.func @transform_4(%arg0: i32) -> (i32, i32) {
    %c0_i32 = arith.constant 0 : i32
    %c0_i32_0 = arith.constant 0 : i32
    return %arg0, %c0_i32 : i32, i32
  }
}

module attributes {stable_mosaic.version = 11 : i64} {
  func.func @_dil3x3_kernel(%arg0: i32, %arg1: memref<1x210x16xf32, #tpu.memory_space<vmem>>, %arg2: memref<144x16xbf16, #tpu.memory_space<vmem>>, %arg3: memref<1x16xf32, #tpu.memory_space<vmem>>, %arg4: memref<1x16xf32, #tpu.memory_space<vmem>>, %arg5: memref<1x112x16xbf16, #tpu.memory_space<vmem>>) attributes {dimension_semantics = [#tpu.dimension_semantics<parallel>], iteration_bounds = array<i64: 2>, scalar_prefetch = 0 : i64, scratch_operands = 0 : i64, tpu.core_type = #tpu.core_type<tc>, window_params = [{transform_indices = @transform_0, window_bounds = array<i64: 1, 210, 16>}, {pipeline_mode = #tpu.pipeline_mode<synchronous>, transform_indices = @transform_1, window_bounds = array<i64: 144, 16>}, {pipeline_mode = #tpu.pipeline_mode<synchronous>, transform_indices = @transform_2, window_bounds = array<i64: 1, 16>}, {pipeline_mode = #tpu.pipeline_mode<synchronous>, transform_indices = @transform_3, window_bounds = array<i64: 1, 16>}, {transform_indices = @transform_4, window_bounds = array<i64: 1, 112, 16>}]} {
    %cst = arith.constant 0.000000e+00 : f32
    %0 = vector.broadcast %cst : f32 to vector<112x16xf32>
    %c0 = arith.constant 0 : index
    %c0_0 = arith.constant 0 : index
    %c0_1 = arith.constant 0 : index
    %1 = vector.load %arg1[%c0, %c0_0, %c0_1] : memref<1x210x16xf32, #tpu.memory_space<vmem>>, vector<1x112x16xf32>
    %2 = vector.shape_cast %1 : vector<1x112x16xf32> to vector<112x16xf32>
    %3 = arith.truncf %2 : vector<112x16xf32> to vector<112x16xbf16>
    %c0_2 = arith.constant 0 : index
    %c0_3 = arith.constant 0 : index
    %4 = vector.load %arg2[%c0_2, %c0_3] : memref<144x16xbf16, #tpu.memory_space<vmem>>, vector<16x16xbf16>
    %cst_4 = arith.constant dense<0.000000e+00> : vector<112x16xf32>
    %5 = tpu.matmul %3, %4, %cst_4 {dimension_numbers = #tpu.dot_dimension_numbers<[1], [0], [0], [1], [0, 0, 1, 1], [], []>} : vector<112x16xbf16>, vector<16x16xbf16>, vector<112x16xf32> -> vector<112x16xf32>
    %6 = arith.addf %0, %5 : vector<112x16xf32>
    %c0_5 = arith.constant 0 : index
    %c3 = arith.constant 3 : index
    %c0_6 = arith.constant 0 : index
    %7 = vector.load %arg1[%c0_5, %c3, %c0_6] : memref<1x210x16xf32, #tpu.memory_space<vmem>>, vector<1x112x16xf32>
    %8 = vector.shape_cast %7 : vector<1x112x16xf32> to vector<112x16xf32>
    %9 = arith.truncf %8 : vector<112x16xf32> to vector<112x16xbf16>
    %c16 = arith.constant 16 : index
    %c0_7 = arith.constant 0 : index
    %10 = vector.load %arg2[%c16, %c0_7] : memref<144x16xbf16, #tpu.memory_space<vmem>>, vector<16x16xbf16>
    %cst_8 = arith.constant dense<0.000000e+00> : vector<112x16xf32>
    %11 = tpu.matmul %9, %10, %cst_8 {dimension_numbers = #tpu.dot_dimension_numbers<[1], [0], [0], [1], [0, 0, 1, 1], [], []>} : vector<112x16xbf16>, vector<16x16xbf16>, vector<112x16xf32> -> vector<112x16xf32>
    %12 = arith.addf %6, %11 : vector<112x16xf32>
    %c0_9 = arith.constant 0 : index
    %c6 = arith.constant 6 : index
    %c0_10 = arith.constant 0 : index
    %13 = vector.load %arg1[%c0_9, %c6, %c0_10] : memref<1x210x16xf32, #tpu.memory_space<vmem>>, vector<1x112x16xf32>
    %14 = vector.shape_cast %13 : vector<1x112x16xf32> to vector<112x16xf32>
    %15 = arith.truncf %14 : vector<112x16xf32> to vector<112x16xbf16>
    %c32 = arith.constant 32 : index
    %c0_11 = arith.constant 0 : index
    %16 = vector.load %arg2[%c32, %c0_11] : memref<144x16xbf16, #tpu.memory_space<vmem>>, vector<16x16xbf16>
    %cst_12 = arith.constant dense<0.000000e+00> : vector<112x16xf32>
    %17 = tpu.matmul %15, %16, %cst_12 {dimension_numbers = #tpu.dot_dimension_numbers<[1], [0], [0], [1], [0, 0, 1, 1], [], []>} : vector<112x16xbf16>, vector<16x16xbf16>, vector<112x16xf32> -> vector<112x16xf32>
    %18 = arith.addf %12, %17 : vector<112x16xf32>
    %c0_13 = arith.constant 0 : index
    %c42 = arith.constant 42 : index
    %c0_14 = arith.constant 0 : index
    %19 = vector.load %arg1[%c0_13, %c42, %c0_14] : memref<1x210x16xf32, #tpu.memory_space<vmem>>, vector<1x112x16xf32>
    %20 = vector.shape_cast %19 : vector<1x112x16xf32> to vector<112x16xf32>
    %21 = arith.truncf %20 : vector<112x16xf32> to vector<112x16xbf16>
    %c48 = arith.constant 48 : index
    %c0_15 = arith.constant 0 : index
    %22 = vector.load %arg2[%c48, %c0_15] : memref<144x16xbf16, #tpu.memory_space<vmem>>, vector<16x16xbf16>
    %cst_16 = arith.constant dense<0.000000e+00> : vector<112x16xf32>
    %23 = tpu.matmul %21, %22, %cst_16 {dimension_numbers = #tpu.dot_dimension_numbers<[1], [0], [0], [1], [0, 0, 1, 1], [], []>} : vector<112x16xbf16>, vector<16x16xbf16>, vector<112x16xf32> -> vector<112x16xf32>
    %24 = arith.addf %18, %23 : vector<112x16xf32>
    %c0_17 = arith.constant 0 : index
    %c45 = arith.constant 45 : index
    %c0_18 = arith.constant 0 : index
    %25 = vector.load %arg1[%c0_17, %c45, %c0_18] : memref<1x210x16xf32, #tpu.memory_space<vmem>>, vector<1x112x16xf32>
    %26 = vector.shape_cast %25 : vector<1x112x16xf32> to vector<112x16xf32>
    %27 = arith.truncf %26 : vector<112x16xf32> to vector<112x16xbf16>
    %c64 = arith.constant 64 : index
    %c0_19 = arith.constant 0 : index
    %28 = vector.load %arg2[%c64, %c0_19] : memref<144x16xbf16, #tpu.memory_space<vmem>>, vector<16x16xbf16>
    %cst_20 = arith.constant dense<0.000000e+00> : vector<112x16xf32>
    %29 = tpu.matmul %27, %28, %cst_20 {dimension_numbers = #tpu.dot_dimension_numbers<[1], [0], [0], [1], [0, 0, 1, 1], [], []>} : vector<112x16xbf16>, vector<16x16xbf16>, vector<112x16xf32> -> vector<112x16xf32>
    %30 = arith.addf %24, %29 : vector<112x16xf32>
    %c0_21 = arith.constant 0 : index
    %c48_22 = arith.constant 48 : index
    %c0_23 = arith.constant 0 : index
    %31 = vector.load %arg1[%c0_21, %c48_22, %c0_23] : memref<1x210x16xf32, #tpu.memory_space<vmem>>, vector<1x112x16xf32>
    %32 = vector.shape_cast %31 : vector<1x112x16xf32> to vector<112x16xf32>
    %33 = arith.truncf %32 : vector<112x16xf32> to vector<112x16xbf16>
    %c80 = arith.constant 80 : index
    %c0_24 = arith.constant 0 : index
    %34 = vector.load %arg2[%c80, %c0_24] : memref<144x16xbf16, #tpu.memory_space<vmem>>, vector<16x16xbf16>
    %cst_25 = arith.constant dense<0.000000e+00> : vector<112x16xf32>
    %35 = tpu.matmul %33, %34, %cst_25 {dimension_numbers = #tpu.dot_dimension_numbers<[1], [0], [0], [1], [0, 0, 1, 1], [], []>} : vector<112x16xbf16>, vector<16x16xbf16>, vector<112x16xf32> -> vector<112x16xf32>
    %36 = arith.addf %30, %35 : vector<112x16xf32>
    %c0_26 = arith.constant 0 : index
    %c84 = arith.constant 84 : index
    %c0_27 = arith.constant 0 : index
    %37 = vector.load %arg1[%c0_26, %c84, %c0_27] : memref<1x210x16xf32, #tpu.memory_space<vmem>>, vector<1x112x16xf32>
    %38 = vector.shape_cast %37 : vector<1x112x16xf32> to vector<112x16xf32>
    %39 = arith.truncf %38 : vector<112x16xf32> to vector<112x16xbf16>
    %c96 = arith.constant 96 : index
    %c0_28 = arith.constant 0 : index
    %40 = vector.load %arg2[%c96, %c0_28] : memref<144x16xbf16, #tpu.memory_space<vmem>>, vector<16x16xbf16>
    %cst_29 = arith.constant dense<0.000000e+00> : vector<112x16xf32>
    %41 = tpu.matmul %39, %40, %cst_29 {dimension_numbers = #tpu.dot_dimension_numbers<[1], [0], [0], [1], [0, 0, 1, 1], [], []>} : vector<112x16xbf16>, vector<16x16xbf16>, vector<112x16xf32> -> vector<112x16xf32>
    %42 = arith.addf %36, %41 : vector<112x16xf32>
    %c0_30 = arith.constant 0 : index
    %c87 = arith.constant 87 : index
    %c0_31 = arith.constant 0 : index
    %43 = vector.load %arg1[%c0_30, %c87, %c0_31] : memref<1x210x16xf32, #tpu.memory_space<vmem>>, vector<1x112x16xf32>
    %44 = vector.shape_cast %43 : vector<1x112x16xf32> to vector<112x16xf32>
    %45 = arith.truncf %44 : vector<112x16xf32> to vector<112x16xbf16>
    %c112 = arith.constant 112 : index
    %c0_32 = arith.constant 0 : index
    %46 = vector.load %arg2[%c112, %c0_32] : memref<144x16xbf16, #tpu.memory_space<vmem>>, vector<16x16xbf16>
    %cst_33 = arith.constant dense<0.000000e+00> : vector<112x16xf32>
    %47 = tpu.matmul %45, %46, %cst_33 {dimension_numbers = #tpu.dot_dimension_numbers<[1], [0], [0], [1], [0, 0, 1, 1], [], []>} : vector<112x16xbf16>, vector<16x16xbf16>, vector<112x16xf32> -> vector<112x16xf32>
    %48 = arith.addf %42, %47 : vector<112x16xf32>
    %c0_34 = arith.constant 0 : index
    %c90 = arith.constant 90 : index
    %c0_35 = arith.constant 0 : index
    %49 = vector.load %arg1[%c0_34, %c90, %c0_35] : memref<1x210x16xf32, #tpu.memory_space<vmem>>, vector<1x112x16xf32>
    %50 = vector.shape_cast %49 : vector<1x112x16xf32> to vector<112x16xf32>
    %51 = arith.truncf %50 : vector<112x16xf32> to vector<112x16xbf16>
    %c128 = arith.constant 128 : index
    %c0_36 = arith.constant 0 : index
    %52 = vector.load %arg2[%c128, %c0_36] : memref<144x16xbf16, #tpu.memory_space<vmem>>, vector<16x16xbf16>
    %cst_37 = arith.constant dense<0.000000e+00> : vector<112x16xf32>
    %53 = tpu.matmul %51, %52, %cst_37 {dimension_numbers = #tpu.dot_dimension_numbers<[1], [0], [0], [1], [0, 0, 1, 1], [], []>} : vector<112x16xbf16>, vector<16x16xbf16>, vector<112x16xf32> -> vector<112x16xf32>
    %54 = arith.addf %48, %53 : vector<112x16xf32>
    %c0_38 = arith.constant 0 : index
    %c0_39 = arith.constant 0 : index
    %55 = vector.load %arg3[%c0_38, %c0_39] : memref<1x16xf32, #tpu.memory_space<vmem>>, vector<1x16xf32>
    %56 = vector.broadcast %55 : vector<1x16xf32> to vector<112x16xf32>
    %57 = arith.mulf %54, %56 : vector<112x16xf32>
    %c0_40 = arith.constant 0 : index
    %c0_41 = arith.constant 0 : index
    %58 = vector.load %arg4[%c0_40, %c0_41] : memref<1x16xf32, #tpu.memory_space<vmem>>, vector<1x16xf32>
    %59 = vector.broadcast %58 : vector<1x16xf32> to vector<112x16xf32>
    %60 = arith.addf %57, %59 : vector<112x16xf32>
    %cst_42 = arith.constant 1.000000e-01 : f32
    %61 = vector.broadcast %cst_42 : f32 to vector<112x16xf32>
    %62 = arith.mulf %61, %60 : vector<112x16xf32>
    %63 = arith.maximumf %60, %62 : vector<112x16xf32>
    %64 = arith.truncf %63 : vector<112x16xf32> to vector<112x16xbf16>
    %c0_43 = arith.constant 0 : index
    %c0_44 = arith.constant 0 : index
    %c0_45 = arith.constant 0 : index
    %65 = vector.load %arg5[%c0_43, %c0_44, %c0_45] : memref<1x112x16xbf16, #tpu.memory_space<vmem>>, vector<1x112x16xbf16>
    %66 = vector.shape_cast %65 : vector<1x112x16xbf16> to vector<112x16xbf16>
    %67 = vector.shape_cast %64 : vector<112x16xbf16> to vector<1x112x16xbf16>
    tpu.vector_store %arg5[%c0_43, %c0_44, %c0_45], %67 {strides = array<i32>} : memref<1x112x16xbf16, #tpu.memory_space<vmem>>, vector<1x112x16xbf16>,
    return
  }
  func.func @transform_0(%arg0: i32) -> (i32, i32, i32) {
    %c0_i32 = arith.constant 0 : i32
    %c0_i32_0 = arith.constant 0 : i32
    %c0_i32_1 = arith.constant 0 : i32
    return %arg0, %c0_i32, %c0_i32_0 : i32, i32, i32
  }
  func.func @transform_1(%arg0: i32) -> (i32, i32) {
    %c0_i32 = arith.constant 0 : i32
    %c0_i32_0 = arith.constant 0 : i32
    %c0_i32_1 = arith.constant 0 : i32
    return %c0_i32, %c0_i32_0 : i32, i32
  }
  func.func @transform_2(%arg0: i32) -> (i32, i32) {
    %c0_i32 = arith.constant 0 : i32
    %c0_i32_0 = arith.constant 0 : i32
    %c0_i32_1 = arith.constant 0 : i32
    return %c0_i32, %c0_i32_0 : i32, i32
  }
  func.func @transform_3(%arg0: i32) -> (i32, i32) {
    %c0_i32 = arith.constant 0 : i32
    %c0_i32_0 = arith.constant 0 : i32
    %c0_i32_1 = arith.constant 0 : i32
    return %c0_i32, %c0_i32_0 : i32, i32
  }
  func.func @transform_4(%arg0: i32) -> (i32, i32, i32) {
    %c0_i32 = arith.constant 0 : i32
    %c0_i32_0 = arith.constant 0 : i32
    %c0_i32_1 = arith.constant 0 : i32
    return %arg0, %c0_i32, %c0_i32_0 : i32, i32, i32
  }
}

module attributes {stable_mosaic.version = 11 : i64} {
  func.func @_dil3x3_kernel(%arg0: i32, %arg1: memref<1x156x16xf32, #tpu.memory_space<vmem>>, %arg2: memref<144x16xbf16, #tpu.memory_space<vmem>>, %arg3: memref<1x16xf32, #tpu.memory_space<vmem>>, %arg4: memref<1x16xf32, #tpu.memory_space<vmem>>, %arg5: memref<1x96x16xbf16, #tpu.memory_space<vmem>>) attributes {dimension_semantics = [#tpu.dimension_semantics<parallel>], iteration_bounds = array<i64: 2>, scalar_prefetch = 0 : i64, scratch_operands = 0 : i64, tpu.core_type = #tpu.core_type<tc>, window_params = [{transform_indices = @transform_0, window_bounds = array<i64: 1, 156, 16>}, {pipeline_mode = #tpu.pipeline_mode<synchronous>, transform_indices = @transform_1, window_bounds = array<i64: 144, 16>}, {pipeline_mode = #tpu.pipeline_mode<synchronous>, transform_indices = @transform_2, window_bounds = array<i64: 1, 16>}, {pipeline_mode = #tpu.pipeline_mode<synchronous>, transform_indices = @transform_3, window_bounds = array<i64: 1, 16>}, {transform_indices = @transform_4, window_bounds = array<i64: 1, 96, 16>}]} {
    %cst = arith.constant 0.000000e+00 : f32
    %0 = vector.broadcast %cst : f32 to vector<96x16xf32>
    %c0 = arith.constant 0 : index
    %c0_0 = arith.constant 0 : index
    %c0_1 = arith.constant 0 : index
    %1 = vector.load %arg1[%c0, %c0_0, %c0_1] : memref<1x156x16xf32, #tpu.memory_space<vmem>>, vector<1x96x16xf32>
    %2 = vector.shape_cast %1 : vector<1x96x16xf32> to vector<96x16xf32>
    %3 = arith.truncf %2 : vector<96x16xf32> to vector<96x16xbf16>
    %c0_2 = arith.constant 0 : index
    %c0_3 = arith.constant 0 : index
    %4 = vector.load %arg2[%c0_2, %c0_3] : memref<144x16xbf16, #tpu.memory_space<vmem>>, vector<16x16xbf16>
    %cst_4 = arith.constant dense<0.000000e+00> : vector<96x16xf32>
    %5 = tpu.matmul %3, %4, %cst_4 {dimension_numbers = #tpu.dot_dimension_numbers<[1], [0], [0], [1], [0, 0, 1, 1], [], []>} : vector<96x16xbf16>, vector<16x16xbf16>, vector<96x16xf32> -> vector<96x16xf32>
    %6 = arith.addf %0, %5 : vector<96x16xf32>
    %c0_5 = arith.constant 0 : index
    %c2 = arith.constant 2 : index
    %c0_6 = arith.constant 0 : index
    %7 = vector.load %arg1[%c0_5, %c2, %c0_6] : memref<1x156x16xf32, #tpu.memory_space<vmem>>, vector<1x96x16xf32>
    %8 = vector.shape_cast %7 : vector<1x96x16xf32> to vector<96x16xf32>
    %9 = arith.truncf %8 : vector<96x16xf32> to vector<96x16xbf16>
    %c16 = arith.constant 16 : index
    %c0_7 = arith.constant 0 : index
    %10 = vector.load %arg2[%c16, %c0_7] : memref<144x16xbf16, #tpu.memory_space<vmem>>, vector<16x16xbf16>
    %cst_8 = arith.constant dense<0.000000e+00> : vector<96x16xf32>
    %11 = tpu.matmul %9, %10, %cst_8 {dimension_numbers = #tpu.dot_dimension_numbers<[1], [0], [0], [1], [0, 0, 1, 1], [], []>} : vector<96x16xbf16>, vector<16x16xbf16>, vector<96x16xf32> -> vector<96x16xf32>
    %12 = arith.addf %6, %11 : vector<96x16xf32>
    %c0_9 = arith.constant 0 : index
    %c4 = arith.constant 4 : index
    %c0_10 = arith.constant 0 : index
    %13 = vector.load %arg1[%c0_9, %c4, %c0_10] : memref<1x156x16xf32, #tpu.memory_space<vmem>>, vector<1x96x16xf32>
    %14 = vector.shape_cast %13 : vector<1x96x16xf32> to vector<96x16xf32>
    %15 = arith.truncf %14 : vector<96x16xf32> to vector<96x16xbf16>
    %c32 = arith.constant 32 : index
    %c0_11 = arith.constant 0 : index
    %16 = vector.load %arg2[%c32, %c0_11] : memref<144x16xbf16, #tpu.memory_space<vmem>>, vector<16x16xbf16>
    %cst_12 = arith.constant dense<0.000000e+00> : vector<96x16xf32>
    %17 = tpu.matmul %15, %16, %cst_12 {dimension_numbers = #tpu.dot_dimension_numbers<[1], [0], [0], [1], [0, 0, 1, 1], [], []>} : vector<96x16xbf16>, vector<16x16xbf16>, vector<96x16xf32> -> vector<96x16xf32>
    %18 = arith.addf %12, %17 : vector<96x16xf32>
    %c0_13 = arith.constant 0 : index
    %c24 = arith.constant 24 : index
    %c0_14 = arith.constant 0 : index
    %19 = vector.load %arg1[%c0_13, %c24, %c0_14] : memref<1x156x16xf32, #tpu.memory_space<vmem>>, vector<1x96x16xf32>
    %20 = vector.shape_cast %19 : vector<1x96x16xf32> to vector<96x16xf32>
    %21 = arith.truncf %20 : vector<96x16xf32> to vector<96x16xbf16>
    %c48 = arith.constant 48 : index
    %c0_15 = arith.constant 0 : index
    %22 = vector.load %arg2[%c48, %c0_15] : memref<144x16xbf16, #tpu.memory_space<vmem>>, vector<16x16xbf16>
    %cst_16 = arith.constant dense<0.000000e+00> : vector<96x16xf32>
    %23 = tpu.matmul %21, %22, %cst_16 {dimension_numbers = #tpu.dot_dimension_numbers<[1], [0], [0], [1], [0, 0, 1, 1], [], []>} : vector<96x16xbf16>, vector<16x16xbf16>, vector<96x16xf32> -> vector<96x16xf32>
    %24 = arith.addf %18, %23 : vector<96x16xf32>
    %c0_17 = arith.constant 0 : index
    %c26 = arith.constant 26 : index
    %c0_18 = arith.constant 0 : index
    %25 = vector.load %arg1[%c0_17, %c26, %c0_18] : memref<1x156x16xf32, #tpu.memory_space<vmem>>, vector<1x96x16xf32>
    %26 = vector.shape_cast %25 : vector<1x96x16xf32> to vector<96x16xf32>
    %27 = arith.truncf %26 : vector<96x16xf32> to vector<96x16xbf16>
    %c64 = arith.constant 64 : index
    %c0_19 = arith.constant 0 : index
    %28 = vector.load %arg2[%c64, %c0_19] : memref<144x16xbf16, #tpu.memory_space<vmem>>, vector<16x16xbf16>
    %cst_20 = arith.constant dense<0.000000e+00> : vector<96x16xf32>
    %29 = tpu.matmul %27, %28, %cst_20 {dimension_numbers = #tpu.dot_dimension_numbers<[1], [0], [0], [1], [0, 0, 1, 1], [], []>} : vector<96x16xbf16>, vector<16x16xbf16>, vector<96x16xf32> -> vector<96x16xf32>
    %30 = arith.addf %24, %29 : vector<96x16xf32>
    %c0_21 = arith.constant 0 : index
    %c28 = arith.constant 28 : index
    %c0_22 = arith.constant 0 : index
    %31 = vector.load %arg1[%c0_21, %c28, %c0_22] : memref<1x156x16xf32, #tpu.memory_space<vmem>>, vector<1x96x16xf32>
    %32 = vector.shape_cast %31 : vector<1x96x16xf32> to vector<96x16xf32>
    %33 = arith.truncf %32 : vector<96x16xf32> to vector<96x16xbf16>
    %c80 = arith.constant 80 : index
    %c0_23 = arith.constant 0 : index
    %34 = vector.load %arg2[%c80, %c0_23] : memref<144x16xbf16, #tpu.memory_space<vmem>>, vector<16x16xbf16>
    %cst_24 = arith.constant dense<0.000000e+00> : vector<96x16xf32>
    %35 = tpu.matmul %33, %34, %cst_24 {dimension_numbers = #tpu.dot_dimension_numbers<[1], [0], [0], [1], [0, 0, 1, 1], [], []>} : vector<96x16xbf16>, vector<16x16xbf16>, vector<96x16xf32> -> vector<96x16xf32>
    %36 = arith.addf %30, %35 : vector<96x16xf32>
    %c0_25 = arith.constant 0 : index
    %c48_26 = arith.constant 48 : index
    %c0_27 = arith.constant 0 : index
    %37 = vector.load %arg1[%c0_25, %c48_26, %c0_27] : memref<1x156x16xf32, #tpu.memory_space<vmem>>, vector<1x96x16xf32>
    %38 = vector.shape_cast %37 : vector<1x96x16xf32> to vector<96x16xf32>
    %39 = arith.truncf %38 : vector<96x16xf32> to vector<96x16xbf16>
    %c96 = arith.constant 96 : index
    %c0_28 = arith.constant 0 : index
    %40 = vector.load %arg2[%c96, %c0_28] : memref<144x16xbf16, #tpu.memory_space<vmem>>, vector<16x16xbf16>
    %cst_29 = arith.constant dense<0.000000e+00> : vector<96x16xf32>
    %41 = tpu.matmul %39, %40, %cst_29 {dimension_numbers = #tpu.dot_dimension_numbers<[1], [0], [0], [1], [0, 0, 1, 1], [], []>} : vector<96x16xbf16>, vector<16x16xbf16>, vector<96x16xf32> -> vector<96x16xf32>
    %42 = arith.addf %36, %41 : vector<96x16xf32>
    %c0_30 = arith.constant 0 : index
    %c50 = arith.constant 50 : index
    %c0_31 = arith.constant 0 : index
    %43 = vector.load %arg1[%c0_30, %c50, %c0_31] : memref<1x156x16xf32, #tpu.memory_space<vmem>>, vector<1x96x16xf32>
    %44 = vector.shape_cast %43 : vector<1x96x16xf32> to vector<96x16xf32>
    %45 = arith.truncf %44 : vector<96x16xf32> to vector<96x16xbf16>
    %c112 = arith.constant 112 : index
    %c0_32 = arith.constant 0 : index
    %46 = vector.load %arg2[%c112, %c0_32] : memref<144x16xbf16, #tpu.memory_space<vmem>>, vector<16x16xbf16>
    %cst_33 = arith.constant dense<0.000000e+00> : vector<96x16xf32>
    %47 = tpu.matmul %45, %46, %cst_33 {dimension_numbers = #tpu.dot_dimension_numbers<[1], [0], [0], [1], [0, 0, 1, 1], [], []>} : vector<96x16xbf16>, vector<16x16xbf16>, vector<96x16xf32> -> vector<96x16xf32>
    %48 = arith.addf %42, %47 : vector<96x16xf32>
    %c0_34 = arith.constant 0 : index
    %c52 = arith.constant 52 : index
    %c0_35 = arith.constant 0 : index
    %49 = vector.load %arg1[%c0_34, %c52, %c0_35] : memref<1x156x16xf32, #tpu.memory_space<vmem>>, vector<1x96x16xf32>
    %50 = vector.shape_cast %49 : vector<1x96x16xf32> to vector<96x16xf32>
    %51 = arith.truncf %50 : vector<96x16xf32> to vector<96x16xbf16>
    %c128 = arith.constant 128 : index
    %c0_36 = arith.constant 0 : index
    %52 = vector.load %arg2[%c128, %c0_36] : memref<144x16xbf16, #tpu.memory_space<vmem>>, vector<16x16xbf16>
    %cst_37 = arith.constant dense<0.000000e+00> : vector<96x16xf32>
    %53 = tpu.matmul %51, %52, %cst_37 {dimension_numbers = #tpu.dot_dimension_numbers<[1], [0], [0], [1], [0, 0, 1, 1], [], []>} : vector<96x16xbf16>, vector<16x16xbf16>, vector<96x16xf32> -> vector<96x16xf32>
    %54 = arith.addf %48, %53 : vector<96x16xf32>
    %c0_38 = arith.constant 0 : index
    %c0_39 = arith.constant 0 : index
    %55 = vector.load %arg3[%c0_38, %c0_39] : memref<1x16xf32, #tpu.memory_space<vmem>>, vector<1x16xf32>
    %56 = vector.broadcast %55 : vector<1x16xf32> to vector<96x16xf32>
    %57 = arith.mulf %54, %56 : vector<96x16xf32>
    %c0_40 = arith.constant 0 : index
    %c0_41 = arith.constant 0 : index
    %58 = vector.load %arg4[%c0_40, %c0_41] : memref<1x16xf32, #tpu.memory_space<vmem>>, vector<1x16xf32>
    %59 = vector.broadcast %58 : vector<1x16xf32> to vector<96x16xf32>
    %60 = arith.addf %57, %59 : vector<96x16xf32>
    %cst_42 = arith.constant 1.000000e-01 : f32
    %61 = vector.broadcast %cst_42 : f32 to vector<96x16xf32>
    %62 = arith.mulf %61, %60 : vector<96x16xf32>
    %63 = arith.maximumf %60, %62 : vector<96x16xf32>
    %64 = arith.truncf %63 : vector<96x16xf32> to vector<96x16xbf16>
    %c0_43 = arith.constant 0 : index
    %c0_44 = arith.constant 0 : index
    %c0_45 = arith.constant 0 : index
    %65 = vector.load %arg5[%c0_43, %c0_44, %c0_45] : memref<1x96x16xbf16, #tpu.memory_space<vmem>>, vector<1x96x16xbf16>
    %66 = vector.shape_cast %65 : vector<1x96x16xbf16> to vector<96x16xbf16>
    %67 = vector.shape_cast %64 : vector<96x16xbf16> to vector<1x96x16xbf16>
    tpu.vector_store %arg5[%c0_43, %c0_44, %c0_45], %67 {strides = array<i32>} : memref<1x96x16xbf16, #tpu.memory_space<vmem>>, vector<1x96x16xbf16>,
    return
  }
  func.func @transform_0(%arg0: i32) -> (i32, i32, i32) {
    %c0_i32 = arith.constant 0 : i32
    %c0_i32_0 = arith.constant 0 : i32
    %c0_i32_1 = arith.constant 0 : i32
    return %arg0, %c0_i32, %c0_i32_0 : i32, i32, i32
  }
  func.func @transform_1(%arg0: i32) -> (i32, i32) {
    %c0_i32 = arith.constant 0 : i32
    %c0_i32_0 = arith.constant 0 : i32
    %c0_i32_1 = arith.constant 0 : i32
    return %c0_i32, %c0_i32_0 : i32, i32
  }
  func.func @transform_2(%arg0: i32) -> (i32, i32) {
    %c0_i32 = arith.constant 0 : i32
    %c0_i32_0 = arith.constant 0 : i32
    %c0_i32_1 = arith.constant 0 : i32
    return %c0_i32, %c0_i32_0 : i32, i32
  }
  func.func @transform_3(%arg0: i32) -> (i32, i32) {
    %c0_i32 = arith.constant 0 : i32
    %c0_i32_0 = arith.constant 0 : i32
    %c0_i32_1 = arith.constant 0 : i32
    return %c0_i32, %c0_i32_0 : i32, i32
  }
  func.func @transform_4(%arg0: i32) -> (i32, i32, i32) {
    %c0_i32 = arith.constant 0 : i32
    %c0_i32_0 = arith.constant 0 : i32
    %c0_i32_1 = arith.constant 0 : i32
    return %arg0, %c0_i32, %c0_i32_0 : i32, i32, i32
  }
}

module attributes {stable_mosaic.version = 11 : i64} {
  func.func @_mm_affine_act_kernel(%arg0: i32, %arg1: memref<128x16xbf16, #tpu.memory_space<vmem>>, %arg2: memref<16x16xbf16, #tpu.memory_space<vmem>>, %arg3: memref<1x16xf32, #tpu.memory_space<vmem>>, %arg4: memref<1x16xf32, #tpu.memory_space<vmem>>, %arg5: memref<128x16xbf16, #tpu.memory_space<vmem>>) attributes {dimension_semantics = [#tpu.dimension_semantics<parallel>], iteration_bounds = array<i64: 1>, scalar_prefetch = 0 : i64, scratch_operands = 0 : i64, tpu.core_type = #tpu.core_type<tc>, window_params = [{transform_indices = @transform_0, window_bounds = array<i64: 128, 16>}, {pipeline_mode = #tpu.pipeline_mode<synchronous>, transform_indices = @transform_1, window_bounds = array<i64: 16, 16>}, {pipeline_mode = #tpu.pipeline_mode<synchronous>, transform_indices = @transform_2, window_bounds = array<i64: 1, 16>}, {pipeline_mode = #tpu.pipeline_mode<synchronous>, transform_indices = @transform_3, window_bounds = array<i64: 1, 16>}, {transform_indices = @transform_4, window_bounds = array<i64: 128, 16>}]} {
    %c0 = arith.constant 0 : index
    %c0_0 = arith.constant 0 : index
    %0 = vector.load %arg1[%c0, %c0_0] : memref<128x16xbf16, #tpu.memory_space<vmem>>, vector<128x16xbf16>
    %c0_1 = arith.constant 0 : index
    %c0_2 = arith.constant 0 : index
    %1 = vector.load %arg2[%c0_1, %c0_2] : memref<16x16xbf16, #tpu.memory_space<vmem>>, vector<16x16xbf16>
    %cst = arith.constant dense<0.000000e+00> : vector<128x16xf32>
    %2 = tpu.matmul %0, %1, %cst {dimension_numbers = #tpu.dot_dimension_numbers<[1], [0], [0], [1], [0, 0, 1, 1], [], []>} : vector<128x16xbf16>, vector<16x16xbf16>, vector<128x16xf32> -> vector<128x16xf32>
    %c0_3 = arith.constant 0 : index
    %c0_4 = arith.constant 0 : index
    %3 = vector.load %arg3[%c0_3, %c0_4] : memref<1x16xf32, #tpu.memory_space<vmem>>, vector<1x16xf32>
    %4 = vector.broadcast %3 : vector<1x16xf32> to vector<128x16xf32>
    %5 = arith.mulf %2, %4 : vector<128x16xf32>
    %c0_5 = arith.constant 0 : index
    %c0_6 = arith.constant 0 : index
    %6 = vector.load %arg4[%c0_5, %c0_6] : memref<1x16xf32, #tpu.memory_space<vmem>>, vector<1x16xf32>
    %7 = vector.broadcast %6 : vector<1x16xf32> to vector<128x16xf32>
    %8 = arith.addf %5, %7 : vector<128x16xf32>
    %cst_7 = arith.constant 1.000000e-01 : f32
    %9 = vector.broadcast %cst_7 : f32 to vector<128x16xf32>
    %10 = arith.mulf %9, %8 : vector<128x16xf32>
    %11 = arith.maximumf %8, %10 : vector<128x16xf32>
    %12 = arith.truncf %11 : vector<128x16xf32> to vector<128x16xbf16>
    %c0_8 = arith.constant 0 : index
    %c0_9 = arith.constant 0 : index
    %13 = vector.load %arg5[%c0_8, %c0_9] : memref<128x16xbf16, #tpu.memory_space<vmem>>, vector<128x16xbf16>
    tpu.vector_store %arg5[%c0_8, %c0_9], %12 {strides = array<i32>} : memref<128x16xbf16, #tpu.memory_space<vmem>>, vector<128x16xbf16>,
    return
  }
  func.func @transform_0(%arg0: i32) -> (i32, i32) {
    %c0_i32 = arith.constant 0 : i32
    %c0_i32_0 = arith.constant 0 : i32
    return %arg0, %c0_i32 : i32, i32
  }
  func.func @transform_1(%arg0: i32) -> (i32, i32) {
    %c0_i32 = arith.constant 0 : i32
    %c0_i32_0 = arith.constant 0 : i32
    %c0_i32_1 = arith.constant 0 : i32
    return %c0_i32, %c0_i32_0 : i32, i32
  }
  func.func @transform_2(%arg0: i32) -> (i32, i32) {
    %c0_i32 = arith.constant 0 : i32
    %c0_i32_0 = arith.constant 0 : i32
    %c0_i32_1 = arith.constant 0 : i32
    return %c0_i32, %c0_i32_0 : i32, i32
  }
  func.func @transform_3(%arg0: i32) -> (i32, i32) {
    %c0_i32 = arith.constant 0 : i32
    %c0_i32_0 = arith.constant 0 : i32
    %c0_i32_1 = arith.constant 0 : i32
    return %c0_i32, %c0_i32_0 : i32, i32
  }
  func.func @transform_4(%arg0: i32) -> (i32, i32) {
    %c0_i32 = arith.constant 0 : i32
    %c0_i32_0 = arith.constant 0 : i32
    return %arg0, %c0_i32 : i32, i32
  }
}

module attributes {stable_mosaic.version = 11 : i64} {
  func.func @_mm_affine_act_kernel(%arg0: i32, %arg1: memref<128x32xbf16, #tpu.memory_space<vmem>>, %arg2: memref<32x16xbf16, #tpu.memory_space<vmem>>, %arg3: memref<1x16xf32, #tpu.memory_space<vmem>>, %arg4: memref<1x16xf32, #tpu.memory_space<vmem>>, %arg5: memref<128x16xf32, #tpu.memory_space<vmem>>) attributes {dimension_semantics = [#tpu.dimension_semantics<parallel>], iteration_bounds = array<i64: 1>, scalar_prefetch = 0 : i64, scratch_operands = 0 : i64, tpu.core_type = #tpu.core_type<tc>, window_params = [{transform_indices = @transform_0, window_bounds = array<i64: 128, 32>}, {pipeline_mode = #tpu.pipeline_mode<synchronous>, transform_indices = @transform_1, window_bounds = array<i64: 32, 16>}, {pipeline_mode = #tpu.pipeline_mode<synchronous>, transform_indices = @transform_2, window_bounds = array<i64: 1, 16>}, {pipeline_mode = #tpu.pipeline_mode<synchronous>, transform_indices = @transform_3, window_bounds = array<i64: 1, 16>}, {transform_indices = @transform_4, window_bounds = array<i64: 128, 16>}]} {
    %c0 = arith.constant 0 : index
    %c0_0 = arith.constant 0 : index
    %0 = vector.load %arg1[%c0, %c0_0] : memref<128x32xbf16, #tpu.memory_space<vmem>>, vector<128x32xbf16>
    %c0_1 = arith.constant 0 : index
    %c0_2 = arith.constant 0 : index
    %1 = vector.load %arg2[%c0_1, %c0_2] : memref<32x16xbf16, #tpu.memory_space<vmem>>, vector<32x16xbf16>
    %cst = arith.constant dense<0.000000e+00> : vector<128x16xf32>
    %2 = tpu.matmul %0, %1, %cst {dimension_numbers = #tpu.dot_dimension_numbers<[1], [0], [0], [1], [0, 0, 1, 1], [], []>} : vector<128x32xbf16>, vector<32x16xbf16>, vector<128x16xf32> -> vector<128x16xf32>
    %c0_3 = arith.constant 0 : index
    %c0_4 = arith.constant 0 : index
    %3 = vector.load %arg3[%c0_3, %c0_4] : memref<1x16xf32, #tpu.memory_space<vmem>>, vector<1x16xf32>
    %4 = vector.broadcast %3 : vector<1x16xf32> to vector<128x16xf32>
    %5 = arith.mulf %2, %4 : vector<128x16xf32>
    %c0_5 = arith.constant 0 : index
    %c0_6 = arith.constant 0 : index
    %6 = vector.load %arg4[%c0_5, %c0_6] : memref<1x16xf32, #tpu.memory_space<vmem>>, vector<1x16xf32>
    %7 = vector.broadcast %6 : vector<1x16xf32> to vector<128x16xf32>
    %8 = arith.addf %5, %7 : vector<128x16xf32>
    %c0_7 = arith.constant 0 : index
    %c0_8 = arith.constant 0 : index
    %9 = vector.load %arg5[%c0_7, %c0_8] : memref<128x16xf32, #tpu.memory_space<vmem>>, vector<128x16xf32>
    tpu.vector_store %arg5[%c0_7, %c0_8], %8 {strides = array<i32>} : memref<128x16xf32, #tpu.memory_space<vmem>>, vector<128x16xf32>,
    return
  }
  func.func @transform_0(%arg0: i32) -> (i32, i32) {
    %c0_i32 = arith.constant 0 : i32
    %c0_i32_0 = arith.constant 0 : i32
    return %arg0, %c0_i32 : i32, i32
  }
  func.func @transform_1(%arg0: i32) -> (i32, i32) {
    %c0_i32 = arith.constant 0 : i32
    %c0_i32_0 = arith.constant 0 : i32
    %c0_i32_1 = arith.constant 0 : i32
    return %c0_i32, %c0_i32_0 : i32, i32
  }
  func.func @transform_2(%arg0: i32) -> (i32, i32) {
    %c0_i32 = arith.constant 0 : i32
    %c0_i32_0 = arith.constant 0 : i32
    %c0_i32_1 = arith.constant 0 : i32
    return %c0_i32, %c0_i32_0 : i32, i32
  }
  func.func @transform_3(%arg0: i32) -> (i32, i32) {
    %c0_i32 = arith.constant 0 : i32
    %c0_i32_0 = arith.constant 0 : i32
    %c0_i32_1 = arith.constant 0 : i32
    return %c0_i32, %c0_i32_0 : i32, i32
  }
  func.func @transform_4(%arg0: i32) -> (i32, i32) {
    %c0_i32 = arith.constant 0 : i32
    %c0_i32_0 = arith.constant 0 : i32
    return %arg0, %c0_i32 : i32, i32
  }
}

module attributes {stable_mosaic.version = 11 : i64} {
  func.func @_mm_affine_act_kernel(%arg0: i32, %arg1: memref<512x16xbf16, #tpu.memory_space<vmem>>, %arg2: memref<16x16xbf16, #tpu.memory_space<vmem>>, %arg3: memref<1x16xf32, #tpu.memory_space<vmem>>, %arg4: memref<1x16xf32, #tpu.memory_space<vmem>>, %arg5: memref<512x16xbf16, #tpu.memory_space<vmem>>) attributes {dimension_semantics = [#tpu.dimension_semantics<parallel>], iteration_bounds = array<i64: 1>, scalar_prefetch = 0 : i64, scratch_operands = 0 : i64, tpu.core_type = #tpu.core_type<tc>, window_params = [{transform_indices = @transform_0, window_bounds = array<i64: 512, 16>}, {pipeline_mode = #tpu.pipeline_mode<synchronous>, transform_indices = @transform_1, window_bounds = array<i64: 16, 16>}, {pipeline_mode = #tpu.pipeline_mode<synchronous>, transform_indices = @transform_2, window_bounds = array<i64: 1, 16>}, {pipeline_mode = #tpu.pipeline_mode<synchronous>, transform_indices = @transform_3, window_bounds = array<i64: 1, 16>}, {transform_indices = @transform_4, window_bounds = array<i64: 512, 16>}]} {
    %c0 = arith.constant 0 : index
    %c0_0 = arith.constant 0 : index
    %0 = vector.load %arg1[%c0, %c0_0] : memref<512x16xbf16, #tpu.memory_space<vmem>>, vector<512x16xbf16>
    %c0_1 = arith.constant 0 : index
    %c0_2 = arith.constant 0 : index
    %1 = vector.load %arg2[%c0_1, %c0_2] : memref<16x16xbf16, #tpu.memory_space<vmem>>, vector<16x16xbf16>
    %cst = arith.constant dense<0.000000e+00> : vector<512x16xf32>
    %2 = tpu.matmul %0, %1, %cst {dimension_numbers = #tpu.dot_dimension_numbers<[1], [0], [0], [1], [0, 0, 1, 1], [], []>} : vector<512x16xbf16>, vector<16x16xbf16>, vector<512x16xf32> -> vector<512x16xf32>
    %c0_3 = arith.constant 0 : index
    %c0_4 = arith.constant 0 : index
    %3 = vector.load %arg3[%c0_3, %c0_4] : memref<1x16xf32, #tpu.memory_space<vmem>>, vector<1x16xf32>
    %4 = vector.broadcast %3 : vector<1x16xf32> to vector<512x16xf32>
    %5 = arith.mulf %2, %4 : vector<512x16xf32>
    %c0_5 = arith.constant 0 : index
    %c0_6 = arith.constant 0 : index
    %6 = vector.load %arg4[%c0_5, %c0_6] : memref<1x16xf32, #tpu.memory_space<vmem>>, vector<1x16xf32>
    %7 = vector.broadcast %6 : vector<1x16xf32> to vector<512x16xf32>
    %8 = arith.addf %5, %7 : vector<512x16xf32>
    %cst_7 = arith.constant 1.000000e-01 : f32
    %9 = vector.broadcast %cst_7 : f32 to vector<512x16xf32>
    %10 = arith.mulf %9, %8 : vector<512x16xf32>
    %11 = arith.maximumf %8, %10 : vector<512x16xf32>
    %12 = arith.truncf %11 : vector<512x16xf32> to vector<512x16xbf16>
    %c0_8 = arith.constant 0 : index
    %c0_9 = arith.constant 0 : index
    %13 = vector.load %arg5[%c0_8, %c0_9] : memref<512x16xbf16, #tpu.memory_space<vmem>>, vector<512x16xbf16>
    tpu.vector_store %arg5[%c0_8, %c0_9], %12 {strides = array<i32>} : memref<512x16xbf16, #tpu.memory_space<vmem>>, vector<512x16xbf16>,
    return
  }
  func.func @transform_0(%arg0: i32) -> (i32, i32) {
    %c0_i32 = arith.constant 0 : i32
    %c0_i32_0 = arith.constant 0 : i32
    return %arg0, %c0_i32 : i32, i32
  }
  func.func @transform_1(%arg0: i32) -> (i32, i32) {
    %c0_i32 = arith.constant 0 : i32
    %c0_i32_0 = arith.constant 0 : i32
    %c0_i32_1 = arith.constant 0 : i32
    return %c0_i32, %c0_i32_0 : i32, i32
  }
  func.func @transform_2(%arg0: i32) -> (i32, i32) {
    %c0_i32 = arith.constant 0 : i32
    %c0_i32_0 = arith.constant 0 : i32
    %c0_i32_1 = arith.constant 0 : i32
    return %c0_i32, %c0_i32_0 : i32, i32
  }
  func.func @transform_3(%arg0: i32) -> (i32, i32) {
    %c0_i32 = arith.constant 0 : i32
    %c0_i32_0 = arith.constant 0 : i32
    %c0_i32_1 = arith.constant 0 : i32
    return %c0_i32, %c0_i32_0 : i32, i32
  }
  func.func @transform_4(%arg0: i32) -> (i32, i32) {
    %c0_i32 = arith.constant 0 : i32
    %c0_i32_0 = arith.constant 0 : i32
    return %arg0, %c0_i32 : i32, i32
  }
}

module attributes {stable_mosaic.version = 11 : i64} {
  func.func @_mm_res_affine_act_kernel(%arg0: i32, %arg1: memref<512x16xbf16, #tpu.memory_space<vmem>>, %arg2: memref<16x16xbf16, #tpu.memory_space<vmem>>, %arg3: memref<512x16xf32, #tpu.memory_space<vmem>>, %arg4: memref<1x16xf32, #tpu.memory_space<vmem>>, %arg5: memref<1x16xf32, #tpu.memory_space<vmem>>, %arg6: memref<512x16xbf16, #tpu.memory_space<vmem>>) attributes {dimension_semantics = [#tpu.dimension_semantics<parallel>], iteration_bounds = array<i64: 1>, scalar_prefetch = 0 : i64, scratch_operands = 0 : i64, tpu.core_type = #tpu.core_type<tc>, window_params = [{transform_indices = @transform_0, window_bounds = array<i64: 512, 16>}, {pipeline_mode = #tpu.pipeline_mode<synchronous>, transform_indices = @transform_1, window_bounds = array<i64: 16, 16>}, {transform_indices = @transform_2, window_bounds = array<i64: 512, 16>}, {pipeline_mode = #tpu.pipeline_mode<synchronous>, transform_indices = @transform_3, window_bounds = array<i64: 1, 16>}, {pipeline_mode = #tpu.pipeline_mode<synchronous>, transform_indices = @transform_4, window_bounds = array<i64: 1, 16>}, {transform_indices = @transform_5, window_bounds = array<i64: 512, 16>}]} {
    %c0 = arith.constant 0 : index
    %c0_0 = arith.constant 0 : index
    %0 = vector.load %arg1[%c0, %c0_0] : memref<512x16xbf16, #tpu.memory_space<vmem>>, vector<512x16xbf16>
    %c0_1 = arith.constant 0 : index
    %c0_2 = arith.constant 0 : index
    %1 = vector.load %arg2[%c0_1, %c0_2] : memref<16x16xbf16, #tpu.memory_space<vmem>>, vector<16x16xbf16>
    %cst = arith.constant dense<0.000000e+00> : vector<512x16xf32>
    %2 = tpu.matmul %0, %1, %cst {dimension_numbers = #tpu.dot_dimension_numbers<[1], [0], [0], [1], [0, 0, 1, 1], [], []>} : vector<512x16xbf16>, vector<16x16xbf16>, vector<512x16xf32> -> vector<512x16xf32>
    %c0_3 = arith.constant 0 : index
    %c0_4 = arith.constant 0 : index
    %3 = vector.load %arg3[%c0_3, %c0_4] : memref<512x16xf32, #tpu.memory_space<vmem>>, vector<512x16xf32>
    %4 = arith.addf %2, %3 : vector<512x16xf32>
    %c0_5 = arith.constant 0 : index
    %c0_6 = arith.constant 0 : index
    %5 = vector.load %arg4[%c0_5, %c0_6] : memref<1x16xf32, #tpu.memory_space<vmem>>, vector<1x16xf32>
    %6 = vector.broadcast %5 : vector<1x16xf32> to vector<512x16xf32>
    %7 = arith.mulf %4, %6 : vector<512x16xf32>
    %c0_7 = arith.constant 0 : index
    %c0_8 = arith.constant 0 : index
    %8 = vector.load %arg5[%c0_7, %c0_8] : memref<1x16xf32, #tpu.memory_space<vmem>>, vector<1x16xf32>
    %9 = vector.broadcast %8 : vector<1x16xf32> to vector<512x16xf32>
    %10 = arith.addf %7, %9 : vector<512x16xf32>
    %cst_9 = arith.constant 1.000000e-01 : f32
    %11 = vector.broadcast %cst_9 : f32 to vector<512x16xf32>
    %12 = arith.mulf %11, %10 : vector<512x16xf32>
    %13 = arith.maximumf %10, %12 : vector<512x16xf32>
    %14 = arith.truncf %13 : vector<512x16xf32> to vector<512x16xbf16>
    %c0_10 = arith.constant 0 : index
    %c0_11 = arith.constant 0 : index
    %15 = vector.load %arg6[%c0_10, %c0_11] : memref<512x16xbf16, #tpu.memory_space<vmem>>, vector<512x16xbf16>
    tpu.vector_store %arg6[%c0_10, %c0_11], %14 {strides = array<i32>} : memref<512x16xbf16, #tpu.memory_space<vmem>>, vector<512x16xbf16>,
    return
  }
  func.func @transform_0(%arg0: i32) -> (i32, i32) {
    %c0_i32 = arith.constant 0 : i32
    %c0_i32_0 = arith.constant 0 : i32
    return %arg0, %c0_i32 : i32, i32
  }
  func.func @transform_1(%arg0: i32) -> (i32, i32) {
    %c0_i32 = arith.constant 0 : i32
    %c0_i32_0 = arith.constant 0 : i32
    %c0_i32_1 = arith.constant 0 : i32
    return %c0_i32, %c0_i32_0 : i32, i32
  }
  func.func @transform_2(%arg0: i32) -> (i32, i32) {
    %c0_i32 = arith.constant 0 : i32
    %c0_i32_0 = arith.constant 0 : i32
    return %arg0, %c0_i32 : i32, i32
  }
  func.func @transform_3(%arg0: i32) -> (i32, i32) {
    %c0_i32 = arith.constant 0 : i32
    %c0_i32_0 = arith.constant 0 : i32
    %c0_i32_1 = arith.constant 0 : i32
    return %c0_i32, %c0_i32_0 : i32, i32
  }
  func.func @transform_4(%arg0: i32) -> (i32, i32) {
    %c0_i32 = arith.constant 0 : i32
    %c0_i32_0 = arith.constant 0 : i32
    %c0_i32_1 = arith.constant 0 : i32
    return %c0_i32, %c0_i32_0 : i32, i32
  }
  func.func @transform_5(%arg0: i32) -> (i32, i32) {
    %c0_i32 = arith.constant 0 : i32
    %c0_i32_0 = arith.constant 0 : i32
    return %arg0, %c0_i32 : i32, i32
  }
}

module attributes {stable_mosaic.version = 11 : i64} {
  func.func @_mm_affine_act_kernel(%arg0: i32, %arg1: memref<128x32xbf16, #tpu.memory_space<vmem>>, %arg2: memref<32x36xbf16, #tpu.memory_space<vmem>>, %arg3: memref<1x36xf32, #tpu.memory_space<vmem>>, %arg4: memref<1x36xf32, #tpu.memory_space<vmem>>, %arg5: memref<128x36xf32, #tpu.memory_space<vmem>>) attributes {dimension_semantics = [#tpu.dimension_semantics<parallel>], iteration_bounds = array<i64: 1>, scalar_prefetch = 0 : i64, scratch_operands = 0 : i64, tpu.core_type = #tpu.core_type<tc>, window_params = [{transform_indices = @transform_0, window_bounds = array<i64: 128, 32>}, {pipeline_mode = #tpu.pipeline_mode<synchronous>, transform_indices = @transform_1, window_bounds = array<i64: 32, 36>}, {pipeline_mode = #tpu.pipeline_mode<synchronous>, transform_indices = @transform_2, window_bounds = array<i64: 1, 36>}, {pipeline_mode = #tpu.pipeline_mode<synchronous>, transform_indices = @transform_3, window_bounds = array<i64: 1, 36>}, {transform_indices = @transform_4, window_bounds = array<i64: 128, 36>}]} {
    %c0 = arith.constant 0 : index
    %c0_0 = arith.constant 0 : index
    %0 = vector.load %arg1[%c0, %c0_0] : memref<128x32xbf16, #tpu.memory_space<vmem>>, vector<128x32xbf16>
    %c0_1 = arith.constant 0 : index
    %c0_2 = arith.constant 0 : index
    %1 = vector.load %arg2[%c0_1, %c0_2] : memref<32x36xbf16, #tpu.memory_space<vmem>>, vector<32x36xbf16>
    %cst = arith.constant dense<0.000000e+00> : vector<128x36xf32>
    %2 = tpu.matmul %0, %1, %cst {dimension_numbers = #tpu.dot_dimension_numbers<[1], [0], [0], [1], [0, 0, 1, 1], [], []>} : vector<128x32xbf16>, vector<32x36xbf16>, vector<128x36xf32> -> vector<128x36xf32>
    %c0_3 = arith.constant 0 : index
    %c0_4 = arith.constant 0 : index
    %3 = vector.load %arg3[%c0_3, %c0_4] : memref<1x36xf32, #tpu.memory_space<vmem>>, vector<1x36xf32>
    %4 = vector.broadcast %3 : vector<1x36xf32> to vector<128x36xf32>
    %5 = arith.mulf %2, %4 : vector<128x36xf32>
    %c0_5 = arith.constant 0 : index
    %c0_6 = arith.constant 0 : index
    %6 = vector.load %arg4[%c0_5, %c0_6] : memref<1x36xf32, #tpu.memory_space<vmem>>, vector<1x36xf32>
    %7 = vector.broadcast %6 : vector<1x36xf32> to vector<128x36xf32>
    %8 = arith.addf %5, %7 : vector<128x36xf32>
    %c0_7 = arith.constant 0 : index
    %c0_8 = arith.constant 0 : index
    %9 = vector.load %arg5[%c0_7, %c0_8] : memref<128x36xf32, #tpu.memory_space<vmem>>, vector<128x36xf32>
    tpu.vector_store %arg5[%c0_7, %c0_8], %8 {strides = array<i32>} : memref<128x36xf32, #tpu.memory_space<vmem>>, vector<128x36xf32>,
    return
  }
  func.func @transform_0(%arg0: i32) -> (i32, i32) {
    %c0_i32 = arith.constant 0 : i32
    %c0_i32_0 = arith.constant 0 : i32
    return %arg0, %c0_i32 : i32, i32
  }
  func.func @transform_1(%arg0: i32) -> (i32, i32) {
    %c0_i32 = arith.constant 0 : i32
    %c0_i32_0 = arith.constant 0 : i32
    %c0_i32_1 = arith.constant 0 : i32
    return %c0_i32, %c0_i32_0 : i32, i32
  }
  func.func @transform_2(%arg0: i32) -> (i32, i32) {
    %c0_i32 = arith.constant 0 : i32
    %c0_i32_0 = arith.constant 0 : i32
    %c0_i32_1 = arith.constant 0 : i32
    return %c0_i32, %c0_i32_0 : i32, i32
  }
  func.func @transform_3(%arg0: i32) -> (i32, i32) {
    %c0_i32 = arith.constant 0 : i32
    %c0_i32_0 = arith.constant 0 : i32
    %c0_i32_1 = arith.constant 0 : i32
    return %c0_i32, %c0_i32_0 : i32, i32
  }
  func.func @transform_4(%arg0: i32) -> (i32, i32) {
    %c0_i32 = arith.constant 0 : i32
    %c0_i32_0 = arith.constant 0 : i32
    return %arg0, %c0_i32 : i32, i32
  }
}

module attributes {stable_mosaic.version = 11 : i64} {
  func.func @_mm_affine_act_kernel(%arg0: i32, %arg1: memref<512x16xbf16, #tpu.memory_space<vmem>>, %arg2: memref<16x36xbf16, #tpu.memory_space<vmem>>, %arg3: memref<1x36xf32, #tpu.memory_space<vmem>>, %arg4: memref<1x36xf32, #tpu.memory_space<vmem>>, %arg5: memref<512x36xf32, #tpu.memory_space<vmem>>) attributes {dimension_semantics = [#tpu.dimension_semantics<parallel>], iteration_bounds = array<i64: 1>, scalar_prefetch = 0 : i64, scratch_operands = 0 : i64, tpu.core_type = #tpu.core_type<tc>, window_params = [{transform_indices = @transform_0, window_bounds = array<i64: 512, 16>}, {pipeline_mode = #tpu.pipeline_mode<synchronous>, transform_indices = @transform_1, window_bounds = array<i64: 16, 36>}, {pipeline_mode = #tpu.pipeline_mode<synchronous>, transform_indices = @transform_2, window_bounds = array<i64: 1, 36>}, {pipeline_mode = #tpu.pipeline_mode<synchronous>, transform_indices = @transform_3, window_bounds = array<i64: 1, 36>}, {transform_indices = @transform_4, window_bounds = array<i64: 512, 36>}]} {
    %c0 = arith.constant 0 : index
    %c0_0 = arith.constant 0 : index
    %0 = vector.load %arg1[%c0, %c0_0] : memref<512x16xbf16, #tpu.memory_space<vmem>>, vector<512x16xbf16>
    %c0_1 = arith.constant 0 : index
    %c0_2 = arith.constant 0 : index
    %1 = vector.load %arg2[%c0_1, %c0_2] : memref<16x36xbf16, #tpu.memory_space<vmem>>, vector<16x36xbf16>
    %cst = arith.constant dense<0.000000e+00> : vector<512x36xf32>
    %2 = tpu.matmul %0, %1, %cst {dimension_numbers = #tpu.dot_dimension_numbers<[1], [0], [0], [1], [0, 0, 1, 1], [], []>} : vector<512x16xbf16>, vector<16x36xbf16>, vector<512x36xf32> -> vector<512x36xf32>
    %c0_3 = arith.constant 0 : index
    %c0_4 = arith.constant 0 : index
    %3 = vector.load %arg3[%c0_3, %c0_4] : memref<1x36xf32, #tpu.memory_space<vmem>>, vector<1x36xf32>
    %4 = vector.broadcast %3 : vector<1x36xf32> to vector<512x36xf32>
    %5 = arith.mulf %2, %4 : vector<512x36xf32>
    %c0_5 = arith.constant 0 : index
    %c0_6 = arith.constant 0 : index
    %6 = vector.load %arg4[%c0_5, %c0_6] : memref<1x36xf32, #tpu.memory_space<vmem>>, vector<1x36xf32>
    %7 = vector.broadcast %6 : vector<1x36xf32> to vector<512x36xf32>
    %8 = arith.addf %5, %7 : vector<512x36xf32>
    %c0_7 = arith.constant 0 : index
    %c0_8 = arith.constant 0 : index
    %9 = vector.load %arg5[%c0_7, %c0_8] : memref<512x36xf32, #tpu.memory_space<vmem>>, vector<512x36xf32>
    tpu.vector_store %arg5[%c0_7, %c0_8], %8 {strides = array<i32>} : memref<512x36xf32, #tpu.memory_space<vmem>>, vector<512x36xf32>,
    return
  }
  func.func @transform_0(%arg0: i32) -> (i32, i32) {
    %c0_i32 = arith.constant 0 : i32
    %c0_i32_0 = arith.constant 0 : i32
    return %arg0, %c0_i32 : i32, i32
  }
  func.func @transform_1(%arg0: i32) -> (i32, i32) {
    %c0_i32 = arith.constant 0 : i32
    %c0_i32_0 = arith.constant 0 : i32
    %c0_i32_1 = arith.constant 0 : i32
    return %c0_i32, %c0_i32_0 : i32, i32
  }
  func.func @transform_2(%arg0: i32) -> (i32, i32) {
    %c0_i32 = arith.constant 0 : i32
    %c0_i32_0 = arith.constant 0 : i32
    %c0_i32_1 = arith.constant 0 : i32
    return %c0_i32, %c0_i32_0 : i32, i32
  }
  func.func @transform_3(%arg0: i32) -> (i32, i32) {
    %c0_i32 = arith.constant 0 : i32
    %c0_i32_0 = arith.constant 0 : i32
    %c0_i32_1 = arith.constant 0 : i32
    return %c0_i32, %c0_i32_0 : i32, i32
  }
  func.func @transform_4(%arg0: i32) -> (i32, i32) {
    %c0_i32 = arith.constant 0 : i32
    %c0_i32_0 = arith.constant 0 : i32
    return %arg0, %c0_i32 : i32, i32
  }
}

module attributes {stable_mosaic.version = 11 : i64} {
  func.func @_mm_affine_act_kernel(%arg0: i32, %arg1: memref<32x64xbf16, #tpu.memory_space<vmem>>, %arg2: memref<64x64xbf16, #tpu.memory_space<vmem>>, %arg3: memref<1x64xf32, #tpu.memory_space<vmem>>, %arg4: memref<1x64xf32, #tpu.memory_space<vmem>>, %arg5: memref<32x64xbf16, #tpu.memory_space<vmem>>) attributes {dimension_semantics = [#tpu.dimension_semantics<parallel>], iteration_bounds = array<i64: 1>, scalar_prefetch = 0 : i64, scratch_operands = 0 : i64, tpu.core_type = #tpu.core_type<tc>, window_params = [{transform_indices = @transform_0, window_bounds = array<i64: 32, 64>}, {pipeline_mode = #tpu.pipeline_mode<synchronous>, transform_indices = @transform_1, window_bounds = array<i64: 64, 64>}, {pipeline_mode = #tpu.pipeline_mode<synchronous>, transform_indices = @transform_2, window_bounds = array<i64: 1, 64>}, {pipeline_mode = #tpu.pipeline_mode<synchronous>, transform_indices = @transform_3, window_bounds = array<i64: 1, 64>}, {transform_indices = @transform_4, window_bounds = array<i64: 32, 64>}]} {
    %c0 = arith.constant 0 : index
    %c0_0 = arith.constant 0 : index
    %0 = vector.load %arg1[%c0, %c0_0] : memref<32x64xbf16, #tpu.memory_space<vmem>>, vector<32x64xbf16>
    %c0_1 = arith.constant 0 : index
    %c0_2 = arith.constant 0 : index
    %1 = vector.load %arg2[%c0_1, %c0_2] : memref<64x64xbf16, #tpu.memory_space<vmem>>, vector<64x64xbf16>
    %cst = arith.constant dense<0.000000e+00> : vector<32x64xf32>
    %2 = tpu.matmul %0, %1, %cst {dimension_numbers = #tpu.dot_dimension_numbers<[1], [0], [0], [1], [0, 0, 1, 1], [], []>} : vector<32x64xbf16>, vector<64x64xbf16>, vector<32x64xf32> -> vector<32x64xf32>
    %c0_3 = arith.constant 0 : index
    %c0_4 = arith.constant 0 : index
    %3 = vector.load %arg3[%c0_3, %c0_4] : memref<1x64xf32, #tpu.memory_space<vmem>>, vector<1x64xf32>
    %4 = vector.broadcast %3 : vector<1x64xf32> to vector<32x64xf32>
    %5 = arith.mulf %2, %4 : vector<32x64xf32>
    %c0_5 = arith.constant 0 : index
    %c0_6 = arith.constant 0 : index
    %6 = vector.load %arg4[%c0_5, %c0_6] : memref<1x64xf32, #tpu.memory_space<vmem>>, vector<1x64xf32>
    %7 = vector.broadcast %6 : vector<1x64xf32> to vector<32x64xf32>
    %8 = arith.addf %5, %7 : vector<32x64xf32>
    %cst_7 = arith.constant 1.000000e-01 : f32
    %9 = vector.broadcast %cst_7 : f32 to vector<32x64xf32>
    %10 = arith.mulf %9, %8 : vector<32x64xf32>
    %11 = arith.maximumf %8, %10 : vector<32x64xf32>
    %12 = arith.truncf %11 : vector<32x64xf32> to vector<32x64xbf16>
    %c0_8 = arith.constant 0 : index
    %c0_9 = arith.constant 0 : index
    %13 = vector.load %arg5[%c0_8, %c0_9] : memref<32x64xbf16, #tpu.memory_space<vmem>>, vector<32x64xbf16>
    tpu.vector_store %arg5[%c0_8, %c0_9], %12 {strides = array<i32>} : memref<32x64xbf16, #tpu.memory_space<vmem>>, vector<32x64xbf16>,
    return
  }
  func.func @transform_0(%arg0: i32) -> (i32, i32) {
    %c0_i32 = arith.constant 0 : i32
    %c0_i32_0 = arith.constant 0 : i32
    return %arg0, %c0_i32 : i32, i32
  }
  func.func @transform_1(%arg0: i32) -> (i32, i32) {
    %c0_i32 = arith.constant 0 : i32
    %c0_i32_0 = arith.constant 0 : i32
    %c0_i32_1 = arith.constant 0 : i32
    return %c0_i32, %c0_i32_0 : i32, i32
  }
  func.func @transform_2(%arg0: i32) -> (i32, i32) {
    %c0_i32 = arith.constant 0 : i32
    %c0_i32_0 = arith.constant 0 : i32
    %c0_i32_1 = arith.constant 0 : i32
    return %c0_i32, %c0_i32_0 : i32, i32
  }
  func.func @transform_3(%arg0: i32) -> (i32, i32) {
    %c0_i32 = arith.constant 0 : i32
    %c0_i32_0 = arith.constant 0 : i32
    %c0_i32_1 = arith.constant 0 : i32
    return %c0_i32, %c0_i32_0 : i32, i32
  }
  func.func @transform_4(%arg0: i32) -> (i32, i32) {
    %c0_i32 = arith.constant 0 : i32
    %c0_i32_0 = arith.constant 0 : i32
    return %arg0, %c0_i32 : i32, i32
  }
}

module attributes {stable_mosaic.version = 11 : i64} {
  func.func @_mm_affine_act_kernel(%arg0: i32, %arg1: memref<32x64xbf16, #tpu.memory_space<vmem>>, %arg2: memref<64x36xbf16, #tpu.memory_space<vmem>>, %arg3: memref<1x36xf32, #tpu.memory_space<vmem>>, %arg4: memref<1x36xf32, #tpu.memory_space<vmem>>, %arg5: memref<32x36xf32, #tpu.memory_space<vmem>>) attributes {dimension_semantics = [#tpu.dimension_semantics<parallel>], iteration_bounds = array<i64: 1>, scalar_prefetch = 0 : i64, scratch_operands = 0 : i64, tpu.core_type = #tpu.core_type<tc>, window_params = [{transform_indices = @transform_0, window_bounds = array<i64: 32, 64>}, {pipeline_mode = #tpu.pipeline_mode<synchronous>, transform_indices = @transform_1, window_bounds = array<i64: 64, 36>}, {pipeline_mode = #tpu.pipeline_mode<synchronous>, transform_indices = @transform_2, window_bounds = array<i64: 1, 36>}, {pipeline_mode = #tpu.pipeline_mode<synchronous>, transform_indices = @transform_3, window_bounds = array<i64: 1, 36>}, {transform_indices = @transform_4, window_bounds = array<i64: 32, 36>}]} {
    %c0 = arith.constant 0 : index
    %c0_0 = arith.constant 0 : index
    %0 = vector.load %arg1[%c0, %c0_0] : memref<32x64xbf16, #tpu.memory_space<vmem>>, vector<32x64xbf16>
    %c0_1 = arith.constant 0 : index
    %c0_2 = arith.constant 0 : index
    %1 = vector.load %arg2[%c0_1, %c0_2] : memref<64x36xbf16, #tpu.memory_space<vmem>>, vector<64x36xbf16>
    %cst = arith.constant dense<0.000000e+00> : vector<32x36xf32>
    %2 = tpu.matmul %0, %1, %cst {dimension_numbers = #tpu.dot_dimension_numbers<[1], [0], [0], [1], [0, 0, 1, 1], [], []>} : vector<32x64xbf16>, vector<64x36xbf16>, vector<32x36xf32> -> vector<32x36xf32>
    %c0_3 = arith.constant 0 : index
    %c0_4 = arith.constant 0 : index
    %3 = vector.load %arg3[%c0_3, %c0_4] : memref<1x36xf32, #tpu.memory_space<vmem>>, vector<1x36xf32>
    %4 = vector.broadcast %3 : vector<1x36xf32> to vector<32x36xf32>
    %5 = arith.mulf %2, %4 : vector<32x36xf32>
    %c0_5 = arith.constant 0 : index
    %c0_6 = arith.constant 0 : index
    %6 = vector.load %arg4[%c0_5, %c0_6] : memref<1x36xf32, #tpu.memory_space<vmem>>, vector<1x36xf32>
    %7 = vector.broadcast %6 : vector<1x36xf32> to vector<32x36xf32>
    %8 = arith.addf %5, %7 : vector<32x36xf32>
    %c0_7 = arith.constant 0 : index
    %c0_8 = arith.constant 0 : index
    %9 = vector.load %arg5[%c0_7, %c0_8] : memref<32x36xf32, #tpu.memory_space<vmem>>, vector<32x36xf32>
    tpu.vector_store %arg5[%c0_7, %c0_8], %8 {strides = array<i32>} : memref<32x36xf32, #tpu.memory_space<vmem>>, vector<32x36xf32>,
    return
  }
  func.func @transform_0(%arg0: i32) -> (i32, i32) {
    %c0_i32 = arith.constant 0 : i32
    %c0_i32_0 = arith.constant 0 : i32
    return %arg0, %c0_i32 : i32, i32
  }
  func.func @transform_1(%arg0: i32) -> (i32, i32) {
    %c0_i32 = arith.constant 0 : i32
    %c0_i32_0 = arith.constant 0 : i32
    %c0_i32_1 = arith.constant 0 : i32
    return %c0_i32, %c0_i32_0 : i32, i32
  }
  func.func @transform_2(%arg0: i32) -> (i32, i32) {
    %c0_i32 = arith.constant 0 : i32
    %c0_i32_0 = arith.constant 0 : i32
    %c0_i32_1 = arith.constant 0 : i32
    return %c0_i32, %c0_i32_0 : i32, i32
  }
  func.func @transform_3(%arg0: i32) -> (i32, i32) {
    %c0_i32 = arith.constant 0 : i32
    %c0_i32_0 = arith.constant 0 : i32
    %c0_i32_1 = arith.constant 0 : i32
    return %c0_i32, %c0_i32_0 : i32, i32
  }
  func.func @transform_4(%arg0: i32) -> (i32, i32) {
    %c0_i32 = arith.constant 0 : i32
    %c0_i32_0 = arith.constant 0 : i32
    return %arg0, %c0_i32 : i32, i32
  }
}

</mosaic_0001>

<bundles_post_ra>
// kernel: _lambda_.25
= control target key start
LH: loop header
LB: loop body
LE: loop exit
PB: predicated region body
PF: predicated region fallthrough
CT: control target
= control target key end

     0   :  { %v582_v0 = vmov 0   ;;  %vm178_vm0 = vcmask 130048   ;;  %vm442_vm1 = vcmask 125952   ;;  %s797_s1 = inlined_call_operand.vmem [shape: bf16[144,16], index: 1, kind: input, shape index: {}]   ;;  %s798_s0 = inlined_call_operand.vmem [shape: bf16[128,144], index: 0, kind: input, shape index: {}]   ;;  %s799_s2 = inlined_call_operand.vmem [shape: f32[1,16], index: 2, kind: input, shape index: {}]   ;;  %s800_s3 = inlined_call_operand.vmem [shape: f32[1,16], index: 3, kind: input, shape index: {}]   ;;  %s801_s4 = inlined_call_operand.vmem [shape: bf16[128,16], index: 4, kind: output, shape index: {}]  }
   0x1   :  { %203 = vmatprep.subr.bf16.mxu0 %v582_v0  ;;  %530 = vmatprep.subr.bf16.mxu1 %v582_v0  ;;  %v549_v1 = vld [vmem:[%s797_s1] sm:$0xff]   ;;  %v550_v2 = vld [vmem:[%s797_s1 + $0x8] sm:$0xff]   ;;  %v551_v3 = vld [vmem:[%s797_s1 + $0x10] sm:$0xff]  }
   0x2   :  { %204 = vmatpush1.bf16.msra.mxu0 %v549_v1  ;;  %539 = vmatpush1.bf16.msra.mxu1 %v549_v1  ;;  %v552_v4 = vld [vmem:[%s797_s1 + $0x18] sm:$0xff]   ;;  %v560_v5 = vld [vmem:[%s798_s0 + $0x4] ss:$8 sps:$4 sm:$0xff]   ;;  %v555_v9 = vld [vmem:[%s797_s1 + $0x30] sm:$0xff]  }
   0x3   :  { %205 = vmatprep.subr.bf16.mxu0 %v582_v0  ;;  %531 = vmatprep.subr.bf16.mxu1 %v582_v0  ;;  %v563_v6 = vld [vmem:[%s798_s0 + $0x44] ss:$8 sps:$4 sm:$0xff]   ;;  %v556_v10 = vld [vmem:[%s797_s1 + $0x38] sm:$0xff]   ;;  %v558_v12 = vld [vmem:[%s798_s0] ss:$8 sps:$4 sm:$0xff]  }
   0x4   :  { %488 = vmatprep.mubr.msk.bf16.mxu0 %vm178_vm0, %v560_v5  ;;  %492 = vmatprep.mubr.msk.bf16.mxu1 %vm178_vm0, %v563_v6  ;;  %v553_v7 = vld [vmem:[%s797_s1 + $0x20] sm:$0xff]   ;;  %v554_v8 = vld [vmem:[%s797_s1 + $0x28] sm:$0xff]   ;;  %v564_v14 = vld [vmem:[%s798_s0 + $0x14] ss:$8 sps:$4 sm:$0xff]  }
   0x5   :  { %v557_v11 = vld [vmem:[%s797_s1 + $0x40] sm:$0xff]   ;;  %v566_v15 = vld [vmem:[%s798_s0 + $0x54] ss:$8 sps:$4 sm:$0xff]   ;;  %v568_v16 = vld [vmem:[%s798_s0 + $0x10] ss:$8 sps:$4 sm:$0xff]  }
   0x6   :  { %206 = vmatpush1.bf16.msra.mxu0 %v550_v2  ;;  %540 = vmatpush1.bf16.msra.mxu1 %v550_v2  ;;  %v561_v13 = vld [vmem:[%s798_s0 + $0x40] ss:$8 sps:$4 sm:$0xff]   ;;  %v569_v17 = vld [vmem:[%s798_s0 + $0x50] ss:$8 sps:$4 sm:$0xff]   ;;  %v570_v18 = vld [vmem:[%s798_s0 + $0x24] ss:$8 sps:$4 sm:$0xff]  }
   0x7   :  { %207 = vmatprep.subr.bf16.mxu0 %v582_v0  ;;  %532 = vmatprep.subr.bf16.mxu1 %v582_v0  ;;  %v572_v19 = vld [vmem:[%s798_s0 + $0x64] ss:$8 sps:$4 sm:$0xff]   ;;  %v574_v20 = vld [vmem:[%s798_s0 + $0x20] ss:$8 sps:$4 sm:$0xff]   ;;  %v576_v22 = vld [vmem:[%s798_s0 + $0x34] ss:$8 sps:$4 sm:$0xff]  }
   0x8   :  { %v575_v21 = vld [vmem:[%s798_s0 + $0x60] ss:$8 sps:$4 sm:$0xff]   ;;  %v578_v23 = vld [vmem:[%s798_s0 + $0x74] ss:$8 sps:$4 sm:$0xff]   ;;  %v580_v24 = vld [vmem:[%s798_s0 + $0x30] ss:$8 sps:$4 sm:$0xff]  }
   0x9   :  { %v581_v25 = vld [vmem:[%s798_s0 + $0x70] ss:$8 sps:$4 sm:$0xff]   ;;  %v694_v26 = vld [vmem:[%s799_s2] ss:$0 sm:$0xff] }
   0xa   :  { %208 = vmatpush1.bf16.msra.mxu0 %v551_v3  ;;  %541 = vmatpush1.bf16.msra.mxu1 %v551_v3  ;;  %v699_v28 = vld [vmem:[%s800_s3] ss:$0 sm:$0xff] }
   0xb   :  { %209 = vmatprep.subr.bf16.mxu0 %v582_v0  ;;  %533 = vmatprep.subr.bf16.mxu1 %v582_v0 }
   0xe   :  { %210 = vmatpush1.bf16.msra.mxu0 %v552_v4  ;;  %542 = vmatpush1.bf16.msra.mxu1 %v552_v4 }
   0xf   :  { %211 = vmatprep.subr.bf16.mxu0 %v582_v0  ;;  %534 = vmatprep.subr.bf16.mxu1 %v582_v0 }
  0x12   :  { %212 = vmatpush1.bf16.msra.mxu0 %v553_v7  ;;  %543 = vmatpush1.bf16.msra.mxu1 %v553_v7 }
  0x13   :  { %213 = vmatprep.subr.bf16.mxu0 %v582_v0  ;;  %535 = vmatprep.subr.bf16.mxu1 %v582_v0 }
  0x16   :  { %214 = vmatpush1.bf16.msra.mxu0 %v554_v8  ;;  %544 = vmatpush1.bf16.msra.mxu1 %v554_v8 }
  0x17   :  { %215 = vmatprep.subr.bf16.mxu0 %v582_v0  ;;  %536 = vmatprep.subr.bf16.mxu1 %v582_v0 }
  0x1a   :  { %216 = vmatpush1.bf16.msra.mxu0 %v555_v9  ;;  %545 = vmatpush1.bf16.msra.mxu1 %v555_v9 }
  0x1b   :  { %217 = vmatprep.subr.bf16.mxu0 %v582_v0  ;;  %537 = vmatprep.subr.bf16.mxu1 %v582_v0 }
  0x1e   :  { %218 = vmatpush1.bf16.msra.mxu0 %v556_v10  ;;  %546 = vmatpush1.bf16.msra.mxu1 %v556_v10 }
  0x1f   :  { %219 = vmatprep.subr.bf16.mxu0 %v582_v0  ;;  %538 = vmatprep.subr.bf16.mxu1 %v582_v0 }
  0x22   :  { %220 = vmatpush1.bf16.msra.mxu0 %v557_v11  ;;  %547 = vmatpush1.bf16.msra.mxu1 %v557_v11 }
  0x25   :  { %236 = vmatmul.mubr.bf16.vlgmr.msra.gmra.mrb[0].mxu0 %v558_v12  ;;  %268 = vmatmul.mubr.bf16.vlgmr.msra.gmra.mrb[0].mxu1 %v561_v13 }
  0x26   :  { %489 = vmatprep.mubr.msk.bf16.mxu0 %vm178_vm0, %v564_v14  ;;  %493 = vmatprep.mubr.msk.bf16.mxu1 %vm178_vm0, %v566_v15 }
  0x2d   :  { %244 = vmatmul.mubr.bf16.gmra.mrb[4].mxu0 %v568_v16  ;;  %276 = vmatmul.mubr.bf16.gmra.mrb[4].mxu1 %v569_v17 }
  0x2e   :  { %490 = vmatprep.mubr.msk.bf16.mxu0 %vm178_vm0, %v570_v18  ;;  %494 = vmatprep.mubr.msk.bf16.mxu1 %vm178_vm0, %v572_v19 }
  0x35   :  { %252 = vmatmul.mubr.bf16.gmra.mrb[8].mxu0 %v574_v20  ;;  %284 = vmatmul.mubr.bf16.gmra.mrb[8].mxu1 %v575_v21 }
  0x36   :  { %491 = vmatprep.mubr.msk.bf16.mxu0 %vm178_vm0, %v576_v22  ;;  %495 = vmatprep.mubr.msk.bf16.mxu1 %vm178_vm0, %v578_v23 }
  0x3d   :  { %260 = vmatmul.mubr.bf16.gmra.mrb[12].mxu0 %v580_v24  ;;  %292 = vmatmul.mubr.bf16.gmra.mrb[12].mxu1 %v581_v25 }
  0xf8   :  { %v237_v27 = vpop.f32.mrb[0].mxu0  ;;  %v269_v29 = vpop.f32.mrb[0].mxu1 }
  0xf9   :  { %v307_v30 = vmul.f32 %v694_v26, %v237_v27  ;;  %v315_v31 = vmul.f32 %v694_v26, %v269_v29  ;;  %v239_v32 = vpop.f32.mrb[1].mxu0  ;;  %v271_v33 = vpop.f32.mrb[1].mxu1 }
  0xfa   :  { %v240_v34 = vpop.f32.mrb[2].mxu0  ;;  %v272_v35 = vpop.f32.mrb[2].mxu1 }
  0xfb   :  { %v330_v36 = vadd.f32 %v699_v28, %v307_v30  ;;  %v338_v37 = vadd.f32 %v699_v28, %v315_v31  ;;  %v308_v38 = vmul.f32 %v694_v26, %v240_v34  ;;  %v316_v39 = vmul.f32 %v694_v26, %v272_v35  ;;  %v242_v40 = vpop.f32.mrb[3].mxu0  ;;  %v274_v41 = vpop.f32.mrb[3].mxu1 }
  0xfd   :  { %v346_v42 = vmul.f32 0.1, %v330_v36  ;;  %v354_v43 = vmul.f32 0.1, %v338_v37  ;;  %v331_v44 = vadd.f32 %v699_v28, %v308_v38  ;;  %v339_v45 = vadd.f32 %v699_v28, %v316_v39 }
  0xff   :  { %v362_v46 = vmax.f32 %v330_v36, %v346_v42  ;;  %v370_v47 = vmax.f32 %v338_v37, %v354_v43  ;;  %v347_v48 = vmul.f32 0.1, %v331_v44  ;;  %v355_v49 = vmul.f32 0.1, %v339_v45 }
 0x100   :  { %v245_v50 = vpop.f32.mrb[4].mxu0  ;;  %v277_v51 = vpop.f32.mrb[4].mxu1 }
 0x101   :  { %v514_v52 = vpack.c.bf16 %v362_v46, %v362_v46  ;;  %v522_v53 = vpack.c.bf16 %v370_v47, %v370_v47  ;;  %v363_v54 = vmax.f32 %v331_v44, %v347_v48  ;;  %v371_v55 = vmax.f32 %v339_v45, %v355_v49  ;;  %v247_v56 = vpop.f32.mrb[5].mxu0  ;;  %v279_v57 = vpop.f32.mrb[5].mxu1 }
 0x102   :  { %v309_v58 = vmul.f32 %v694_v26, %v245_v50  ;;  %v317_v59 = vmul.f32 %v694_v26, %v277_v51  ;;  %v248_v60 = vpop.f32.mrb[6].mxu0  ;;  %v280_v61 = vpop.f32.mrb[6].mxu1 }
 0x103   :  { %443 = vst.msk [vmem:[%s801_s4] sm:$0xf] %vm442_vm1, %v514_v52  ;;  %451 = vst.msk [vmem:[%s801_s4 + $0x20] sm:$0xf] %vm442_vm1, %v522_v53  ;;  %v515_v62 = vpack.c.bf16 %v363_v54, %v363_v54  ;;  %v523_v63 = vpack.c.bf16 %v371_v55, %v371_v55  ;;  %v310_v0 = vmul.f32 %v694_v26, %v248_v60  ;;  %v250_v2 = vpop.f32.mrb[7].mxu0  ;;  %v282_v3 = vpop.f32.mrb[7].mxu1 }
 0x104   :  { %v318_v1 = vmul.f32 %v694_v26, %v280_v61  ;;  %v332_v4 = vadd.f32 %v699_v28, %v309_v58  ;;  %v340_v5 = vadd.f32 %v699_v28, %v317_v59 }
 0x105   :  { %444 = vst.msk [vmem:[%s801_s4 + $0x4] sm:$0xf] %vm442_vm1, %v515_v62  ;;  %452 = vst.msk [vmem:[%s801_s4 + $0x24] sm:$0xf] %vm442_vm1, %v523_v63  ;;  %v333_v6 = vadd.f32 %v699_v28, %v310_v0 }
 0x106   :  { %v341_v7 = vadd.f32 %v699_v28, %v318_v1  ;;  %v348_v8 = vmul.f32 0.1, %v332_v4  ;;  %v356_v9 = vmul.f32 0.1, %v340_v5 }
 0x107   :  { %v349_v10 = vmul.f32 0.1, %v333_v6 }
 0x108   :  { %v357_v11 = vmul.f32 0.1, %v341_v7  ;;  %v364_v12 = vmax.f32 %v332_v4, %v348_v8  ;;  %v372_v13 = vmax.f32 %v340_v5, %v356_v9  ;;  %v253_v14 = vpop.f32.mrb[8].mxu0  ;;  %v285_v15 = vpop.f32.mrb[8].mxu1 }
 0x109   :  { %v365_v16 = vmax.f32 %v333_v6, %v349_v10  ;;  %v311_v18 = vmul.f32 %v694_v26, %v253_v14  ;;  %v319_v19 = vmul.f32 %v694_v26, %v285_v15  ;;  %v255_v20 = vpop.f32.mrb[9].mxu0  ;;  %v287_v21 = vpop.f32.mrb[9].mxu1 }
 0x10a   :  { %v373_v17 = vmax.f32 %v341_v7, %v357_v11  ;;  %v516_v22 = vpack.c.bf16 %v364_v12, %v364_v12  ;;  %v524_v23 = vpack.c.bf16 %v372_v13, %v372_v13  ;;  %v256_v24 = vpop.f32.mrb[10].mxu0  ;;  %v288_v25 = vpop.f32.mrb[10].mxu1 }
 0x10b   :  { %v517_v27 = vpack.c.bf16 %v365_v16, %v365_v16  ;;  %v334_v30 = vadd.f32 %v699_v28, %v311_v18  ;;  %v342_v31 = vadd.f32 %v699_v28, %v319_v19  ;;  %v258_v32 = vpop.f32.mrb[11].mxu0  ;;  %v290_v33 = vpop.f32.mrb[11].mxu1  ;;  %v312_v34 = vmul.f32 %v694_v26, %v256_v24 }
 0x10c   :  { %v525_v29 = vpack.c.bf16 %v373_v17, %v373_v17  ;;  %445 = vst.msk [vmem:[%s801_s4 + $0x8] sm:$0xf] %vm442_vm1, %v516_v22  ;;  %453 = vst.msk [vmem:[%s801_s4 + $0x28] sm:$0xf] %vm442_vm1, %v524_v23  ;;  %v320_v35 = vmul.f32 %v694_v26, %v288_v25 }
 0x10d   :  { %446 = vst.msk [vmem:[%s801_s4 + $0xc] sm:$0xf] %vm442_vm1, %v517_v27  ;;  %v350_v36 = vmul.f32 0.1, %v334_v30  ;;  %v358_v37 = vmul.f32 0.1, %v342_v31  ;;  %v335_v38 = vadd.f32 %v699_v28, %v312_v34 }
 0x10e   :  { %454 = vst.msk [vmem:[%s801_s4 + $0x2c] sm:$0xf] %vm442_vm1, %v525_v29  ;;  %v343_v39 = vadd.f32 %v699_v28, %v320_v35 }
 0x10f   :  { %v366_v40 = vmax.f32 %v334_v30, %v350_v36  ;;  %v374_v41 = vmax.f32 %v342_v31, %v358_v37  ;;  %v351_v42 = vmul.f32 0.1, %v335_v38 }
 0x110   :  { %v359_v43 = vmul.f32 0.1, %v343_v39  ;;  %v261_v44 = vpop.f32.mrb[12].mxu0  ;;  %v293_v45 = vpop.f32.mrb[12].mxu1 }
 0x111   :  { %v518_v46 = vpack.c.bf16 %v366_v40, %v366_v40  ;;  %v526_v47 = vpack.c.bf16 %v374_v41, %v374_v41  ;;  %v313_v48 = vmul.f32 %v694_v26, %v261_v44  ;;  %v321_v49 = vmul.f32 %v694_v26, %v293_v45  ;;  %v263_v50 = vpop.f32.mrb[13].mxu0  ;;  %v295_v51 = vpop.f32.mrb[13].mxu1 }
 0x112   :  { %v367_v52 = vmax.f32 %v335_v38, %v351_v42  ;;  %v375_v53 = vmax.f32 %v343_v39, %v359_v43  ;;  %v264_v54 = vpop.f32.mrb[14].mxu0  ;;  %v296_v55 = vpop.f32.mrb[14].mxu1 }
 0x113   :  { %447 = vst.msk [vmem:[%s801_s4 + $0x10] sm:$0xf] %vm442_vm1, %v518_v46  ;;  %455 = vst.msk [vmem:[%s801_s4 + $0x30] sm:$0xf] %vm442_vm1, %v526_v47  ;;  %v336_v56 = vadd.f32 %v699_v28, %v313_v48  ;;  %v344_v57 = vadd.f32 %v699_v28, %v321_v49  ;;  %v314_v58 = vmul.f32 %v694_v26, %v264_v54  ;;  %v266_v60 = vpop.f32.mrb[15].mxu0  ;;  %v298_v61 = vpop.f32.mrb[15].mxu1 }
 0x114   :  { %v322_v59 = vmul.f32 %v694_v26, %v296_v55  ;;  %v519_v62 = vpack.c.bf16 %v367_v52, %v367_v52  ;;  %v527_v63 = vpack.c.bf16 %v375_v53, %v375_v53 }
 0x115   :  { %v352_v0 = vmul.f32 0.1, %v336_v56  ;;  %v360_v1 = vmul.f32 0.1, %v344_v57  ;;  %v337_v2 = vadd.f32 %v699_v28, %v314_v58 }
 0x116   :  { %v345_v3 = vadd.f32 %v699_v28, %v322_v59  ;;  %448 = vst.msk [vmem:[%s801_s4 + $0x14] sm:$0xf] %vm442_vm1, %v519_v62  ;;  %456 = vst.msk [vmem:[%s801_s4 + $0x34] sm:$0xf] %vm442_vm1, %v527_v63 }
 0x117   :  { %v368_v26 = vmax.f32 %v336_v56, %v352_v0  ;;  %v376_v4 = vmax.f32 %v344_v57, %v360_v1  ;;  %v353_v5 = vmul.f32 0.1, %v337_v2 }
 0x118   :  { %v361_v6 = vmul.f32 0.1, %v345_v3 }
 0x119   :  { %v520_v7 = vpack.c.bf16 %v368_v26, %v368_v26  ;;  %v528_v8 = vpack.c.bf16 %v376_v4, %v376_v4  ;;  %v369_v9 = vmax.f32 %v337_v2, %v353_v5 }
 0x11a   :  { %v377_v10 = vmax.f32 %v345_v3, %v361_v6 }
 0x11b   :  { %449 = vst.msk [vmem:[%s801_s4 + $0x18] sm:$0xf] %vm442_vm1, %v520_v7  ;;  %457 = vst.msk [vmem:[%s801_s4 + $0x38] sm:$0xf] %vm442_vm1, %v528_v8  ;;  %v521_v28 = vpack.c.bf16 %v369_v9, %v369_v9 }
 0x11c   :  { %v529_v11 = vpack.c.bf16 %v377_v10, %v377_v10 }
 0x11d   :  { %450 = vst.msk [vmem:[%s801_s4 + $0x1c] sm:$0xf] %vm442_vm1, %v521_v28 }
 0x11e   :  { %458 = vst.msk [vmem:[%s801_s4 + $0x3c] sm:$0xf] %vm442_vm1, %v529_v11 }

// kernel: _lambda_.26
= control target key start
LH: loop header
LB: loop body
LE: loop exit
PB: predicated region body
PF: predicated region fallthrough
CT: control target
= control target key end

     0   :  { %v555_v0 = vmov 0   ;;  %vm280_vm0 = vcmask 392192   ;;  %vm431_vm1 = vcmask 257024   ;;  %s721_s1 = inlined_call_operand.vmem [shape: bf16[432,32], index: 1, kind: input, shape index: {}]   ;;  %s722_s0 = inlined_call_operand.vmem [shape: bf16[32,432], index: 0, kind: input, shape index: {}]   ;;  %s723_s2 = inlined_call_operand.vmem [shape: f32[1,32], index: 2, kind: input, shape index: {}]   ;;  %s724_s3 = inlined_call_operand.vmem [shape: f32[1,32], index: 3, kind: input, shape index: {}]   ;;  %s725_s4 = inlined_call_operand.vmem [shape: bf16[32,32], index: 4, kind: output, shape index: {}]  }
   0x1   :  { %336 = vmatprep.subr.bf16.mxu1 %v555_v0  ;;  %v516_v1 = vld [vmem:[%s721_s1 + $0x80] sm:$0xff]   ;;  %v517_v2 = vld [vmem:[%s721_s1 + $0x88] sm:$0xff]   ;;  %v520_v5 = vld [vmem:[%s721_s1 + $0x90] sm:$0xff]  }
   0x2   :  { %337 = vmatpush1.bf16.msra.mxu1 %v516_v1  ;;  %v518_v3 = vld [vmem:[%s721_s1 + $0x40] sm:$0xff]   ;;  %v521_v6 = vld [vmem:[%s721_s1 + $0x48] sm:$0xff]   ;;  %v524_v8 = vld [vmem:[%s721_s1 + $0x50] sm:$0xff]  }
   0x3   :  { %338 = vmatprep.subr.bf16.mxu1 %v555_v0  ;;  %v519_v4 = vld [vmem:[%s721_s1] sm:$0xff]   ;;  %487 = vmatprep.subr.bf16.mxu0 %v518_v3  ;;  %v522_v7 = vld [vmem:[%s721_s1 + $0x8] sm:$0xff]   ;;  %v525_v9 = vld [vmem:[%s721_s1 + $0x10] sm:$0xff]  }
   0x4   :  { %488 = vmatpush3.bf16.msra.mxu0 %v519_v4  ;;  %v523_v10 = vld [vmem:[%s721_s1 + $0x98] sm:$0xff]   ;;  %v526_v12 = vld [vmem:[%s721_s1 + $0xa0] sm:$0xff]   ;;  %v529_v15 = vld [vmem:[%s721_s1 + $0xa8] sm:$0xff]  }
   0x5   :  { %489 = vmatprep.subr.bf16.mxu0 %v521_v6  ;;  %v527_v11 = vld [vmem:[%s721_s1 + $0x58] sm:$0xff]   ;;  %v530_v14 = vld [vmem:[%s721_s1 + $0x60] sm:$0xff]   ;;  %v533_v17 = vld [vmem:[%s721_s1 + $0x68] sm:$0xff]  }
   0x6   :  { %339 = vmatpush1.bf16.msra.mxu1 %v517_v2  ;;  %v528_v13 = vld [vmem:[%s721_s1 + $0x18] sm:$0xff]   ;;  %v531_v16 = vld [vmem:[%s721_s1 + $0x20] sm:$0xff]   ;;  %v532_v18 = vld [vmem:[%s721_s1 + $0xb0] sm:$0xff]  }
   0x7   :  { %340 = vmatprep.subr.bf16.mxu1 %v555_v0  ;;  %v534_v19 = vld [vmem:[%s721_s1 + $0x28] sm:$0xff]   ;;  %v536_v20 = vld [vmem:[%s721_s1 + $0x70] sm:$0xff]   ;;  %v535_v21 = vld [vmem:[%s721_s1 + $0xb8] sm:$0xff]  }
   0x8   :  { %490 = vmatpush3.bf16.msra.mxu0 %v522_v7  ;;  %v537_v22 = vld [vmem:[%s721_s1 + $0x30] sm:$0xff]   ;;  %v539_v23 = vld [vmem:[%s721_s1 + $0x78] sm:$0xff]   ;;  %v538_v27 = vld [vmem:[%s721_s1 + $0xc0] sm:$0xff]  }
   0x9   :  { %491 = vmatprep.subr.bf16.mxu0 %v524_v8  ;;  %v543_v24 = vld [vmem:[%s722_s0 + $0x4] ss:$16 sps:$4 sm:$0xff]   ;;  %v540_v25 = vld [vmem:[%s721_s1 + $0x38] sm:$0xff]   ;;  %v541_v28 = vld [vmem:[%s722_s0] ss:$16 sps:$4 sm:$0xff]  }
   0xa   :  { %341 = vmatpush1.bf16.msra.mxu1 %v520_v5  ;;  %319 = vmatprep.mubr.bf16.mxu0 %v543_v24  ;;  %v548_v26 = vld [vmem:[%s722_s0 + $0xc] ss:$16 sps:$4 sm:$0xff]   ;;  %v549_v29 = vld [vmem:[%s722_s0 + $0x24] ss:$16 sps:$4 sm:$0xff]   ;;  %v551_v32 = vld [vmem:[%s722_s0 + $0x20] ss:$16 sps:$4 sm:$0xff]  }
   0xb   :  { %342 = vmatprep.subr.bf16.mxu1 %v555_v0  ;;  %475 = vmatprep.mubr.msk.bf16.mxu1 %vm280_vm0, %v548_v26  ;;  %v544_v30 = vld [vmem:[%s721_s1 + $0xc8] sm:$0xff]   ;;  %v545_v31 = vld [vmem:[%s721_s1 + $0xd0] sm:$0xff]   ;;  %v477_v44 = vld [vmem:[%s723_s2] ss:$0 sm:$0xff] }
   0xc   :  { %492 = vmatpush3.bf16.msra.mxu0 %v525_v9  ;;  %v546_v33 = vld [vmem:[%s722_s0 + $0x8] ss:$16 sps:$4 sm:$0xff]   ;;  %v552_v34 = vld [vmem:[%s722_s0 + $0x2c] ss:$16 sps:$4 sm:$0xff]   ;;  %v478_v50 = vld [vmem:[%s724_s3] ss:$0 sm:$0xff] }
   0xd   :  { %493 = vmatprep.subr.bf16.mxu0 %v527_v11  ;;  %v554_v35 = vld [vmem:[%s722_s0 + $0x28] ss:$16 sps:$4 sm:$0xff]  }
   0xe   :  { %343 = vmatpush1.bf16.msra.mxu1 %v523_v10 }
   0xf   :  { %344 = vmatprep.subr.bf16.mxu1 %v555_v0 }
  0x10   :  { %494 = vmatpush3.bf16.msra.mxu0 %v528_v13 }
  0x11   :  { %495 = vmatprep.subr.bf16.mxu0 %v530_v14 }
  0x12   :  { %345 = vmatpush1.bf16.msra.mxu1 %v526_v12 }
  0x13   :  { %346 = vmatprep.subr.bf16.mxu1 %v555_v0 }
  0x14   :  { %496 = vmatpush3.bf16.msra.mxu0 %v531_v16 }
  0x15   :  { %497 = vmatprep.subr.bf16.mxu0 %v533_v17 }
  0x16   :  { %347 = vmatpush1.bf16.msra.mxu1 %v529_v15 }
  0x17   :  { %348 = vmatprep.subr.bf16.mxu1 %v555_v0 }
  0x18   :  { %498 = vmatpush3.bf16.msra.mxu0 %v534_v19 }
  0x19   :  { %499 = vmatprep.subr.bf16.mxu0 %v536_v20 }
  0x1a   :  { %349 = vmatpush1.bf16.msra.mxu1 %v532_v18 }
  0x1b   :  { %350 = vmatprep.subr.bf16.mxu1 %v555_v0 }
  0x1c   :  { %500 = vmatpush3.bf16.msra.mxu0 %v537_v22 }
  0x1d   :  { %501 = vmatprep.subr.bf16.mxu0 %v539_v23 }
  0x1e   :  { %351 = vmatpush1.bf16.msra.mxu1 %v535_v21 }
  0x1f   :  { %352 = vmatprep.subr.bf16.mxu1 %v555_v0 }
  0x20   :  { %502 = vmatpush3.bf16.msra.mxu0 %v540_v25 }
  0x22   :  { %353 = vmatpush1.bf16.msra.mxu1 %v538_v27 }
  0x23   :  { %354 = vmatprep.subr.bf16.mxu1 %v555_v0  ;;  %320 = vmatmul.mubr.bf16.vlgmr.msra.gmra.mrb[0].mxu0 %v541_v28 }
  0x24   :  { %327 = vmatprep.mubr.bf16.mxu0 %v549_v29 }
  0x26   :  { %355 = vmatpush1.bf16.msra.mxu1 %v544_v30 }
  0x27   :  { %356 = vmatprep.subr.bf16.mxu1 %v555_v0 }
  0x2a   :  { %357 = vmatpush1.bf16.msra.mxu1 %v545_v31 }
  0x2b   :  { %328 = vmatmul.mubr.bf16.gmra.mrb[4].mxu0 %v551_v32 }
  0x2d   :  { %369 = vmatmul.mubr.bf16.vlgmr.msra.gmra.mrb[0].mxu1 %v546_v33 }
  0x2e   :  { %476 = vmatprep.mubr.msk.bf16.mxu1 %vm280_vm0, %v552_v34 }
  0x35   :  { %377 = vmatmul.mubr.bf16.gmra.mrb[4].mxu1 %v554_v35 }
  0xf6   :  { %v503_v36 = vpop.f32.mrb[0].mxu0 }
  0xf7   :  { %v504_v37 = vpop.f32.mrb[1].mxu0 }
  0xf8   :  { %v505_v38 = vadd.f32 %v504_v37, %v503_v36  ;;  %v506_v39 = vpop.f32.mrb[2].mxu0 }
  0xf9   :  { %v507_v40 = vpop.f32.mrb[3].mxu0 }
  0xfa   :  { %v508_v41 = vadd.f32 %v507_v40, %v506_v39 }
  0xfe   :  { %v509_v42 = vpop.f32.mrb[4].mxu0 }
  0xff   :  { %v510_v45 = vpop.f32.mrb[5].mxu0 }
 0x100   :  { %v370_v43 = vpop.f32.mrb[0].mxu1  ;;  %v511_v48 = vadd.f32 %v510_v45, %v509_v42  ;;  %v512_v49 = vpop.f32.mrb[6].mxu0 }
 0x101   :  { %v371_v46 = vadd.f32 %v505_v38, %v370_v43  ;;  %v372_v47 = vpop.f32.mrb[1].mxu1  ;;  %v513_v52 = vpop.f32.mrb[7].mxu0 }
 0x102   :  { %v373_v51 = vpop.f32.mrb[2].mxu1  ;;  %v514_v56 = vadd.f32 %v513_v52, %v512_v49 }
 0x103   :  { %v392_v53 = vmul.f32 %v477_v44, %v371_v46  ;;  %v374_v54 = vadd.f32 %v508_v41, %v373_v51  ;;  %v375_v55 = vpop.f32.mrb[3].mxu1 }
 0x105   :  { %v403_v57 = vadd.f32 %v478_v50, %v392_v53  ;;  %v393_v58 = vmul.f32 %v477_v44, %v374_v54 }
 0x107   :  { %v407_v59 = vmul.f32 0.1, %v403_v57  ;;  %v404_v60 = vadd.f32 %v478_v50, %v393_v58 }
 0x108   :  { %v378_v61 = vpop.f32.mrb[4].mxu1 }
 0x109   :  { %v411_v62 = vmax.f32 %v403_v57, %v407_v59  ;;  %v408_v63 = vmul.f32 0.1, %v404_v60  ;;  %v379_v0 = vadd.f32 %v511_v48, %v378_v61  ;;  %v380_v1 = vpop.f32.mrb[5].mxu1 }
 0x10a   :  { %v381_v2 = vpop.f32.mrb[6].mxu1 }
 0x10b   :  { %v483_v3 = vpack.c.bf16 %v411_v62, %v411_v62  ;;  %v412_v4 = vmax.f32 %v404_v60, %v408_v63  ;;  %v394_v5 = vmul.f32 %v477_v44, %v379_v0  ;;  %v382_v6 = vadd.f32 %v514_v56, %v381_v2  ;;  %v383_v7 = vpop.f32.mrb[7].mxu1 }
 0x10d   :  { %432 = vst.msk [vmem:[%s725_s4] sm:$0xf] %vm431_vm1, %v483_v3  ;;  %v484_v8 = vpack.c.bf16 %v412_v4, %v412_v4  ;;  %v405_v9 = vadd.f32 %v478_v50, %v394_v5  ;;  %v395_v10 = vmul.f32 %v477_v44, %v382_v6 }
 0x10f   :  { %433 = vst.msk [vmem:[%s725_s4 + $0x4] sm:$0xf] %vm431_vm1, %v484_v8  ;;  %v409_v11 = vmul.f32 0.1, %v405_v9  ;;  %v406_v12 = vadd.f32 %v478_v50, %v395_v10 }
 0x111   :  { %v413_v13 = vmax.f32 %v405_v9, %v409_v11  ;;  %v410_v14 = vmul.f32 0.1, %v406_v12 }
 0x113   :  { %v485_v15 = vpack.c.bf16 %v413_v13, %v413_v13  ;;  %v414_v16 = vmax.f32 %v406_v12, %v410_v14 }
 0x115   :  { %434 = vst.msk [vmem:[%s725_s4 + $0x8] sm:$0xf] %vm431_vm1, %v485_v15  ;;  %v486_v17 = vpack.c.bf16 %v414_v16, %v414_v16 }
 0x117   :  { %435 = vst.msk [vmem:[%s725_s4 + $0xc] sm:$0xf] %vm431_vm1, %v486_v17 }

// kernel: _lambda_.27
= control target key start
LH: loop header
LB: loop body
LE: loop exit
PB: predicated region body
PF: predicated region fallthrough
CT: control target
= control target key end

     0   :  { %vm80_vm0 = vcmask 785408   ;;  %vm182_vm1 = vcmask 519168   ;;  %s312_s1 = inlined_call_operand.vmem [shape: bf16[96,64], index: 1, kind: input, shape index: {}]   ;;  %s313_s0 = inlined_call_operand.vmem [shape: bf16[32,96], index: 0, kind: input, shape index: {}]   ;;  %s314_s2 = inlined_call_operand.vmem [shape: f32[1,64], index: 2, kind: input, shape index: {}]   ;;  %s315_s3 = inlined_call_operand.vmem [shape: f32[1,64], index: 3, kind: input, shape index: {}]   ;;  %s316_s4 = inlined_call_operand.vmem [shape: bf16[32,64], index: 4, kind: output, shape index: {}]  }
   0x1   :  { %v235_v0 = vld [vmem:[%s312_s1] sm:$0xff]   ;;  %v236_v1 = vld [vmem:[%s312_s1 + $0x8] sm:$0xff]   ;;  %v237_v2 = vld [vmem:[%s312_s1 + $0x10] sm:$0xff]  }
   0x2   :  { %219 = vmatprep.subr.bf16.mxu0 %v235_v0  ;;  %v241_v3 = vld [vmem:[%s313_s0] sm:$0xff]   ;;  %v238_v4 = vld [vmem:[%s312_s1 + $0x18] sm:$0xff]   ;;  %v240_v6 = vld [vmem:[%s312_s1 + $0x28] sm:$0xff]  }
   0x3   :  { %220 = vmatpush3.bf16.msra.mxu0 %v235_v0  ;;  %231 = vmatprep.mubr.msk.bf16.mxu0 %vm80_vm0, %v241_v3  ;;  %v239_v5 = vld [vmem:[%s312_s1 + $0x20] sm:$0xff]   ;;  %v242_v7 = vld [vmem:[%s313_s0 + $0x8] sm:$0xff]  }
   0x4   :  { %221 = vmatprep.subr.bf16.mxu0 %v236_v1  ;;  %v201_v8 = vld [vmem:[%s314_s2] ss:$0 sm:$0xff] }
   0x5   :  { %v202_v10 = vld [vmem:[%s315_s3] ss:$0 sm:$0xff] }
   0x7   :  { %222 = vmatpush3.bf16.msra.mxu0 %v236_v1 }
   0x8   :  { %223 = vmatprep.subr.bf16.mxu0 %v237_v2 }
   0xb   :  { %224 = vmatpush3.bf16.msra.mxu0 %v237_v2 }
   0xc   :  { %225 = vmatprep.subr.bf16.mxu0 %v238_v4 }
   0xf   :  { %226 = vmatpush3.bf16.msra.mxu0 %v238_v4 }
  0x10   :  { %227 = vmatprep.subr.bf16.mxu0 %v239_v5 }
  0x13   :  { %228 = vmatpush3.bf16.msra.mxu0 %v239_v5 }
  0x14   :  { %229 = vmatprep.subr.bf16.mxu0 %v240_v6 }
  0x17   :  { %230 = vmatpush3.bf16.msra.mxu0 %v240_v6 }
  0x1a   :  { %232 = vmatmul.mubr.msk.bf16.vlgmr.msra.gmra.mrb[0].mxu0 %vm80_vm0, %v242_v7 }
  0xed   :  { %v233_v9 = vpop.f32.mrb[0].mxu0 }
  0xee   :  { %v145_v11 = vmul.f32 %v233_v9, %v201_v8  ;;  %v121_v12 = vpop.f32.mrb[1].mxu0 }
  0xef   :  { %v143_v13 = vmul.f32 %v201_v8, %v121_v12  ;;  %v234_v14 = vpop.f32.mrb[2].mxu0 }
  0xf0   :  { %v156_v15 = vadd.f32 %v202_v10, %v145_v11  ;;  %v146_v16 = vmul.f32 %v234_v14, %v201_v8  ;;  %v124_v17 = vpop.f32.mrb[3].mxu0 }
  0xf1   :  { %v154_v18 = vadd.f32 %v202_v10, %v143_v13  ;;  %v144_v19 = vmul.f32 %v201_v8, %v124_v17 }
  0xf2   :  { %v160_v20 = vmul.f32 0.1, %v156_v15  ;;  %v157_v21 = vadd.f32 %v202_v10, %v146_v16 }
  0xf3   :  { %v158_v22 = vmul.f32 0.1, %v154_v18  ;;  %v155_v23 = vadd.f32 %v202_v10, %v144_v19 }
  0xf4   :  { %v164_v24 = vmax.f32 %v156_v15, %v160_v20  ;;  %v161_v25 = vmul.f32 0.1, %v157_v21 }
  0xf5   :  { %v162_v26 = vmax.f32 %v154_v18, %v158_v22  ;;  %v159_v27 = vmul.f32 0.1, %v155_v23 }
  0xf6   :  { %v209_v28 = vpack.c.bf16 %v164_v24, %v164_v24  ;;  %v165_v29 = vmax.f32 %v157_v21, %v161_v25 }
  0xf7   :  { %v207_v30 = vpack.c.bf16 %v162_v26, %v162_v26  ;;  %v163_v31 = vmax.f32 %v155_v23, %v159_v27 }
  0xf8   :  { %185 = vst.msk [vmem:[%s316_s4 + $0x8] sm:$0xf] %vm182_vm1, %v209_v28  ;;  %v210_v32 = vpack.c.bf16 %v165_v29, %v165_v29 }
  0xf9   :  { %183 = vst.msk [vmem:[%s316_s4] sm:$0xf] %vm182_vm1, %v207_v30  ;;  %v208_v33 = vpack.c.bf16 %v163_v31, %v163_v31 }
  0xfa   :  { %186 = vst.msk [vmem:[%s316_s4 + $0xc] sm:$0xf] %vm182_vm1, %v210_v32 }
  0xfb   :  { %184 = vst.msk [vmem:[%s316_s4 + $0x4] sm:$0xf] %vm182_vm1, %v208_v33 }

// kernel: _lambda_.28
= control target key start
LH: loop header
LB: loop body
LE: loop exit
PB: predicated region body
PF: predicated region fallthrough
CT: control target
= control target key end

     0   :  { %s1601_s15 = smov 0   ;;  %s1880_s0 = inlined_call_operand.vmem [shape: f32[2,156,32], index: 0, kind: input, shape index: {}]   ;;  %s1881_s1 = inlined_call_operand.vmem [shape: bf16[288,32], index: 1, kind: input, shape index: {}]   ;;  %s1882_s2 = inlined_call_operand.vmem [shape: f32[1,32], index: 2, kind: input, shape index: {}]   ;;  %s1883_s3 = inlined_call_operand.vmem [shape: f32[1,32], index: 3, kind: input, shape index: {}]   ;;  %s1884_s4 = inlined_call_operand.vmem [shape: bf16[2,48,32], index: 4, kind: output, shape index: {}]  }
   0x1 LB: > { %s1185_s16 = sadd.s32 4294967295, %s1572_s15   ;;  %p1189_p0 = scmp.ge.s32.totalorder %s1572_s15, 1  ;;  %s1572_s15 = sphi %s1601_s15, %s14_s15  }
   0x2   : > { %p162_p1 = scmp.lt.s32.totalorder %s1572_s15, 3 }
   0x4   : > { %p163_p2 = pnand %p1189_p0, %p162_p1 }
   0x5   : > { %v1548_v0 = vld [vmem:[%s1881_s1 + $0x10] sm:$0xff] (!%p163_p2)   ;;  %v1574_v1 = vmov (!%p163_p2), 0.0   ;;  %v1617_v2 = vld [vmem:[%s1881_s1 + $0x40] sm:$0xff] (!%p163_p2)   ;;  %v1550_v3 = vld [vmem:[%s1881_s1 + $0x18] sm:$0xff] (!%p163_p2)   ;;  %vm1575_vm0 = vmmov (!%p163_p2), 0   ;;  %p188_p3 = scmp.lt.s32.totalorder (!%p163_p2), %s1185_s16, 1 }
   0x6   : > { %166 = sbr.rel (%p163_p2) target bundleno = 351 (0x15f), region = 36  ;;  %1298 = vmatprep.subr.bf16.mxu1 (!%p163_p2), %v1574_v1  ;;  %1362 = vmatprep.subr.bf16.mxu0 (!%p163_p2), %v1574_v1  ;;  %v1629_v4 = vld [vmem:[%s1881_s1 + $0x48] sm:$0xff] (!%p163_p2)   ;;  %v1552_v5 = vld [vmem:[%s1881_s1] sm:$0xff] (!%p163_p2)   ;;  %vm237_vm1 = vcmask (!%p163_p2), 261120   ;;  %v1553_v11 = vld [vmem:[%s1881_s1 + $0x50] sm:$0xff] (!%p163_p2)   ;;  %vm1123_vm2 = vcmask (!%p163_p2), 257024  }
   0x7   : > { %1299 = vmatpush3.bf16.msra.mxu1 (!%p163_p2), %v1548_v0  ;;  %1302 = vmatprep.mubr.msk.bf16.mxu1 (!%p163_p2), %vm1575_vm0, %v1574_v1  ;;  %v1555_v13 = vld [vmem:[%s1881_s1 + $0x8] sm:$0xff] (!%p163_p2)   ;;  %v1554_v16 = vld [vmem:[%s1881_s1 + $0x58] sm:$0xff] (!%p163_p2)   ;;  %v1556_v23 = vld [vmem:[%s1881_s1 + $0x60] sm:$0xff] (!%p163_p2)  }
   0x8   : > { %1363 = vmatpush3.bf16.msra.mxu0 (!%p163_p2), %v1617_v2  ;;  %1300 = vmatprep.subr.bf16.mxu1 (!%p163_p2), %v1574_v1  ;;  %v1558_v27 = vld [vmem:[%s1881_s1 + $0x68] sm:$0xff] (!%p163_p2)   ;;  %v1557_v32 = vld [vmem:[%s1881_s1 + $0x20] sm:$0xff] (!%p163_p2)   ;;  %v1560_v44 = vld [vmem:[%s1881_s1 + $0x70] sm:$0xff] (!%p163_p2)  }
   0x9   : > { %1364 = vmatprep.subr.bf16.mxu0 (!%p163_p2), %v1574_v1  ;;  %1366 = vmatprep.mubr.msk.bf16.mxu0 (!%p163_p2), %vm1575_vm0, %v1574_v1  ;;  %v1559_v38 = vld [vmem:[%s1881_s1 + $0x28] sm:$0xff] (!%p163_p2)   ;;  %v1562_v48 = vld [vmem:[%s1881_s1 + $0x78] sm:$0xff] (!%p163_p2)   ;;  %v1561_v51 = vld [vmem:[%s1881_s1 + $0x30] sm:$0xff] (!%p163_p2)  }
   0xa   : > { %v1563_v55 = vld [vmem:[%s1881_s1 + $0x38] sm:$0xff] (!%p163_p2)   ;;  %v1564_v61 = vld [vmem:[%s1881_s1 + $0x80] sm:$0xff] (!%p163_p2)  }
   0xb   : > { %1301 = vmatpush3.bf16.msra.mxu1 (!%p163_p2), %v1550_v3  ;;  %v1565_v3 = vld [vmem:[%s1881_s1 + $0x88] sm:$0xff] (!%p163_p2)  }
   0xc   : > { %1365 = vmatpush3.bf16.msra.mxu0 (!%p163_p2), %v1629_v4  ;;  %1314 = vmatprep.subr.bf16.mxu1 (!%p163_p2), %v1574_v1 }
   0xd   : > { %s1886_s16 = smov (!%p188_p3, %s1185_s16), 1  ;;  %1378 = vmatprep.subr.bf16.mxu0 %v1574_v1 }
   0xe   : > { %s1536_s25 = smul.u32 160, %s1886_s16 }
  0x10   : > { %s1642_s28 = scalar_lea.vmem %s1880_s0, %s1536_s25 }
  0x11   : > { %v212_v6 = vld [vmem:[%s1642_s28 + $0x4] sm:$0xff]  ;;  %v213_v7 = vld [vmem:[%s1642_s28 + $0xc] sm:$0xff]  ;;  %v576_v8 = vld [vmem:[%s1642_s28 + $0x34] sm:$0xff] }
  0x12   : > { %v218_v9 = vpack.c.bf16 %v213_v7, %v212_v6  ;;  %v577_v10 = vld [vmem:[%s1642_s28 + $0x3c] sm:$0xff]  ;;  %v214_v14 = vld [vmem:[%s1642_s28 + $0x14] sm:$0xff]  ;;  %v216_v21 = vld [vmem:[%s1642_s28 + $0x24] sm:$0xff] }
  0x13   : > { %v582_v12 = vpack.c.bf16 %v577_v10, %v576_v8  ;;  %v215_v15 = vld [vmem:[%s1642_s28 + $0x1c] sm:$0xff]  ;;  %v217_v22 = vld [vmem:[%s1642_s28 + $0x2c] sm:$0xff]  ;;  %v867_v57 = vld [vmem:[%s1642_s28 + $0x64] sm:$0xff] }
  0x14   : > { %1303 = vmatmul.mubr.msk.bf16.vlgmr.msra.gmra.mrb[0].mxu1 %vm237_vm1, %v218_v9  ;;  %v219_v17 = vpack.c.bf16 %v215_v15, %v214_v14  ;;  %v1672_v18 = vld [vmem:[%s1642_s28 + $0x38] sm:$0xff]  ;;  %v1675_v19 = vld [vmem:[%s1642_s28 + $0x40] sm:$0xff]  ;;  %v220_v24 = vpack.c.bf16 %v217_v22, %v216_v21  ;;  %v1693_v25 = vld [vmem:[%s1642_s28 + $0x48] sm:$0xff] }
  0x15   : > { %1367 = vmatmul.mubr.msk.bf16.vlgmr.msra.gmra.mrb[0].mxu0 %vm237_vm1, %v582_v12  ;;  %1315 = vmatpush3.bf16.msra.mxu1 %v1552_v5  ;;  %v679_v20 = vpack.c.bf16 %v1675_v19, %v1672_v18  ;;  %v1696_v26 = vld [vmem:[%s1642_s28 + $0x50] sm:$0xff]  ;;  %v199_v29 = vld [vmem:[%s1642_s28] sm:$0xff]  ;;  %v200_v30 = vld [vmem:[%s1642_s28 + $0x8] sm:$0xff]  ;;  %v486_v10 = vpack.c.bf16 %v1693_v25, %v1675_v19 }
  0x16   : > { %1379 = vmatpush3.bf16.msra.mxu0 %v1553_v11  ;;  %1306 = vmatprep.mubr.msk.bf16.mxu1 %vm1575_vm0, %v1574_v1  ;;  %v680_v28 = vpack.c.bf16 %v1696_v26, %v1693_v25  ;;  %v205_v31 = vpack.c.bf16 %v200_v30, %v199_v29  ;;  %v1717_v33 = vld [vmem:[%s1642_s28 + $0x58] sm:$0xff]  ;;  %v678_v34 = vld [vmem:[%s1642_s28 + $0x60] sm:$0xff]  ;;  %v201_v36 = vld [vmem:[%s1642_s28 + $0x10] sm:$0xff] }
  0x17   : > { %1380 = vmatprep.subr.bf16.mxu0 %v1574_v1  ;;  %1382 = vmatprep.mubr.msk.bf16.mxu0 %vm1575_vm0, %v1574_v1  ;;  %v681_v35 = vpack.c.bf16 %v678_v34, %v1717_v33  ;;  %v202_v37 = vld [vmem:[%s1642_s28 + $0x18] sm:$0xff]  ;;  %v1734_v40 = vld [vmem:[%s1642_s28 + $0x68] sm:$0xff]  ;;  %v203_v42 = vld [vmem:[%s1642_s28 + $0x20] sm:$0xff]  ;;  %v388_v50 = vpack.c.bf16 %v201_v36, %v200_v30  ;;  %v487_v11 = vpack.c.bf16 %v1717_v33, %v1696_v26 }
  0x18   : > { %1316 = vmatprep.subr.bf16.mxu1 %v1574_v1  ;;  %v206_v39 = vpack.c.bf16 %v202_v37, %v201_v36  ;;  %v776_v41 = vpack.c.bf16 %v1734_v40, %v678_v34  ;;  %v204_v43 = vld [vmem:[%s1642_s28 + $0x28] sm:$0xff]  ;;  %v1750_v46 = vld [vmem:[%s1642_s28 + $0x70] sm:$0xff]  ;;  %v1753_v47 = vld [vmem:[%s1642_s28 + $0x78] sm:$0xff]  ;;  %v389_v56 = vpack.c.bf16 %v203_v42, %v202_v37 }
  0x19   : > { %1317 = vmatpush3.bf16.msra.mxu1 %v1555_v13  ;;  %v207_v45 = vpack.c.bf16 %v204_v43, %v203_v42  ;;  %v777_v49 = vpack.c.bf16 %v1753_v47, %v1750_v46  ;;  %v774_v52 = vld [vmem:[%s1642_s28 + $0x80] sm:$0xff]  ;;  %v1773_v53 = vld [vmem:[%s1642_s28 + $0x88] sm:$0xff]  ;;  %v387_v60 = vld [vmem:[%s1642_s28 + $0x30] sm:$0xff] }
  0x1a   : > { %1381 = vmatpush3.bf16.msra.mxu0 %v1554_v16  ;;  %1330 = vmatprep.subr.bf16.mxu1 %v1574_v1  ;;  %v778_v54 = vpack.c.bf16 %v1773_v53, %v774_v52  ;;  %v868_v58 = vld [vmem:[%s1642_s28 + $0x6c] sm:$0xff]  ;;  %v390_v62 = vpack.c.bf16 %v387_v60, %v204_v43  ;;  %v869_v63 = vld [vmem:[%s1642_s28 + $0x74] sm:$0xff]  ;;  %v870_v0 = vld [vmem:[%s1642_s28 + $0x7c] sm:$0xff]  ;;  %v485_v6 = vpack.c.bf16 %v1672_v18, %v387_v60 }
  0x1b   : > { %1394 = vmatprep.subr.bf16.mxu0 %v1574_v1  ;;  %v873_v59 = vpack.c.bf16 %v868_v58, %v867_v57  ;;  %v874_v5 = vpack.c.bf16 %v870_v0, %v869_v63  ;;  %v871_v7 = vld [vmem:[%s1642_s28 + $0x84] sm:$0xff]  ;;  %v872_v8 = vld [vmem:[%s1642_s28 + $0x8c] sm:$0xff]  ;;  %v581_v18 = vld [vmem:[%s1642_s28 + $0x5c] sm:$0xff] }
  0x1c   : > { %1307 = vmatmul.mubr.msk.bf16.gmra.mrb[4].mxu1 %vm237_vm1, %v219_v17  ;;  %v875_v9 = vpack.c.bf16 %v872_v8, %v871_v7  ;;  %v578_v12 = vld [vmem:[%s1642_s28 + $0x44] sm:$0xff]  ;;  %v579_v13 = vld [vmem:[%s1642_s28 + $0x4c] sm:$0xff]  ;;  %v580_v17 = vld [vmem:[%s1642_s28 + $0x54] sm:$0xff] }
  0x1d   : > { %1310 = vmatprep.mubr.msk.bf16.mxu1 %vm1575_vm0, %v1574_v1  ;;  %v583_v14 = vpack.c.bf16 %v579_v13, %v578_v12  ;;  %v969_v15 = vld [vmem:[%s1642_s28 + $0x90] sm:$0xff]  ;;  %v584_v19 = vpack.c.bf16 %v581_v18, %v580_v17  ;;  %v1237_v25 = vld [vmem:[%s1882_s2] ss:$0 sm:$0xff]  ;;  %s1537_s28 = smul.u32 24, %s1886_s16 }
  0x1e   : > { %v972_v16 = vpack.c.bf16 %v969_v15, %v1773_v53 }
  0x1f   : > { %s1863_s14 = scalar_lea.vmem %s1884_s4, %s1537_s28 }
  0x21   : > { %1383 = vmatmul.mubr.msk.bf16.vlgmr.msra.gmra.mrb[0].mxu0 %vm237_vm1, %v679_v20 }
  0x22   : > { %1395 = vmatpush3.bf16.msra.mxu0 %v1556_v23  ;;  %1386 = vmatprep.mubr.msk.bf16.mxu0 %vm1575_vm0, %v1574_v1 }
  0x23   : > { %1396 = vmatprep.subr.bf16.mxu0 %v1574_v1 }
  0x24   : > { %1311 = vmatmul.mubr.msk.bf16.gmra.mrb[8].mxu1 %vm237_vm1, %v220_v24 }
  0x25   : > { %1318 = vmatprep.mubr.msk.bf16.mxu1 %vm1575_vm0, %v1574_v1 }
  0x26   : > { %1397 = vmatpush3.bf16.msra.mxu0 %v1558_v27 }
  0x27   : > { %1410 = vmatprep.subr.bf16.mxu0 %v1574_v1 }
  0x29   : > { %1387 = vmatmul.mubr.msk.bf16.gmra.mrb[4].mxu0 %vm237_vm1, %v680_v28 }
  0x2a   : > { %1390 = vmatprep.mubr.msk.bf16.mxu0 %vm1575_vm0, %v1574_v1 }
  0x2c   : > { %1319 = vmatmul.mubr.msk.bf16.vlgmr.msra.gmra.mrb[0].mxu1 %vm237_vm1, %v205_v31 }
  0x2d   : > { %1331 = vmatpush3.bf16.msra.mxu1 %v1557_v32  ;;  %1322 = vmatprep.mubr.msk.bf16.mxu1 %vm1575_vm0, %v1574_v1 }
  0x2e   : > { %1332 = vmatprep.subr.bf16.mxu1 %v1574_v1 }
  0x31   : > { %1391 = vmatmul.mubr.msk.bf16.gmra.mrb[8].mxu0 %vm237_vm1, %v681_v35  ;;  %1333 = vmatpush3.bf16.msra.mxu1 %v1559_v38 }
  0x32   : > { %1398 = vmatprep.mubr.msk.bf16.mxu0 %vm1575_vm0, %v1574_v1  ;;  %1346 = vmatprep.subr.bf16.mxu1 %v1574_v1 }
  0x34   : > { %1323 = vmatmul.mubr.msk.bf16.gmra.mrb[4].mxu1 %vm237_vm1, %v206_v39 }
  0x35   : > { %1326 = vmatprep.mubr.msk.bf16.mxu1 %vm1575_vm0, %v1574_v1 }
  0x39   : > { %1399 = vmatmul.mubr.msk.bf16.vlgmr.msra.gmra.mrb[0].mxu0 %vm237_vm1, %v776_v41 }
  0x3a   : > { %1411 = vmatpush3.bf16.msra.mxu0 %v1560_v44  ;;  %1402 = vmatprep.mubr.msk.bf16.mxu0 %vm1575_vm0, %v1574_v1 }
  0x3b   : > { %1412 = vmatprep.subr.bf16.mxu0 %v1574_v1 }
  0x3c   : > { %1327 = vmatmul.mubr.msk.bf16.gmra.mrb[8].mxu1 %vm237_vm1, %v207_v45 }
  0x3d   : > { %1334 = vmatprep.mubr.msk.bf16.mxu1 %vm1575_vm0, %v1574_v1 }
  0x3e   : > { %1413 = vmatpush3.bf16.msra.mxu0 %v1562_v48 }
  0x3f   : > { %1426 = vmatprep.subr.bf16.mxu0 %v1574_v1 }
  0x41   : > { %1403 = vmatmul.mubr.msk.bf16.gmra.mrb[4].mxu0 %vm237_vm1, %v777_v49 }
  0x42   : > { %1406 = vmatprep.mubr.msk.bf16.mxu0 %vm1575_vm0, %v1574_v1 }
  0x44   : > { %1335 = vmatmul.mubr.msk.bf16.vlgmr.msra.gmra.mrb[0].mxu1 %vm237_vm1, %v388_v50 }
  0x45   : > { %1347 = vmatpush3.bf16.msra.mxu1 %v1561_v51  ;;  %1338 = vmatprep.mubr.msk.bf16.mxu1 %vm1575_vm0, %v1574_v1 }
  0x46   : > { %1348 = vmatprep.subr.bf16.mxu1 %v1574_v1 }
  0x49   : > { %1407 = vmatmul.mubr.msk.bf16.gmra.mrb[8].mxu0 %vm237_vm1, %v778_v54  ;;  %1349 = vmatpush3.bf16.msra.mxu1 %v1563_v55 }
  0x4a   : > { %1414 = vmatprep.mubr.msk.bf16.mxu0 %vm1575_vm0, %v1574_v1  ;;  %1442 = vmatprep.subr.bf16.mxu1 %v1574_v1 }
  0x4c   : > { %1339 = vmatmul.mubr.msk.bf16.gmra.mrb[4].mxu1 %vm237_vm1, %v389_v56 }
  0x4d   : > { %1342 = vmatprep.mubr.msk.bf16.mxu1 %vm1575_vm0, %v1574_v1 }
  0x51   : > { %1415 = vmatmul.mubr.msk.bf16.vlgmr.msra.gmra.mrb[0].mxu0 %vm237_vm1, %v873_v59 }
  0x52   : > { %1427 = vmatpush3.bf16.msra.mxu0 %v1564_v61  ;;  %1418 = vmatprep.mubr.msk.bf16.mxu0 %vm1575_vm0, %v1574_v1 }
  0x53   : > { %1428 = vmatprep.subr.bf16.mxu0 %v1574_v1 }
  0x54   : > { %1343 = vmatmul.mubr.msk.bf16.gmra.mrb[8].mxu1 %vm237_vm1, %v390_v62 }
  0x55   : > { %1350 = vmatprep.mubr.msk.bf16.mxu1 %vm1575_vm0, %v1574_v1 }
  0x56   : > { %1429 = vmatpush3.bf16.msra.mxu0 %v1565_v3 }
  0x59   : > { %1419 = vmatmul.mubr.msk.bf16.gmra.mrb[4].mxu0 %vm237_vm1, %v874_v5 }
  0x5a   : > { %1422 = vmatprep.mubr.msk.bf16.mxu0 %vm1575_vm0, %v1574_v1 }
  0x5c   : > { %1351 = vmatmul.mubr.msk.bf16.vlgmr.msra.gmra.mrb[0].mxu1 %vm237_vm1, %v485_v6 }
  0x5d   : > { %1444 = vmatpush3.bf16.msra.mxu1 %v1617_v2  ;;  %1354 = vmatprep.mubr.msk.bf16.mxu1 %vm1575_vm0, %v1574_v1  ;;  %v970_v2 = vpack.c.bf16 %v1750_v46, %v1734_v40 }
  0x5e   : > { %1443 = vmatprep.subr.bf16.mxu1 %v1574_v1 }
  0x61   : > { %1423 = vmatmul.mubr.msk.bf16.gmra.mrb[8].mxu0 %vm237_vm1, %v875_v9  ;;  %1445 = vmatpush3.bf16.msra.mxu1 %v1629_v4  ;;  %v971_v4 = vpack.c.bf16 %v774_v52, %v1753_v47 }
  0x62   : > { %1430 = vmatprep.mubr.msk.bf16.mxu0 %vm1575_vm0, %v1574_v1 }
  0x64   : > { %1355 = vmatmul.mubr.msk.bf16.gmra.mrb[4].mxu1 %vm237_vm1, %v486_v10 }
  0x65   : > { %1358 = vmatprep.mubr.msk.bf16.mxu1 %vm1575_vm0, %v1574_v1 }
  0x69   : > { %1431 = vmatmul.mubr.msk.bf16.vlgmr.msra.gmra.mrb[0].mxu0 %vm237_vm1, %v970_v2 }
  0x6a   : > { %1434 = vmatprep.mubr.msk.bf16.mxu0 %vm1575_vm0, %v1574_v1 }
  0x6c   : > { %1359 = vmatmul.mubr.msk.bf16.gmra.mrb[8].mxu1 %vm237_vm1, %v487_v11 }
  0x6d   : > { %1370 = vmatprep.mubr.msk.bf16.mxu1 %vm1575_vm0, %v1574_v1 }
  0x71   : > { %1435 = vmatmul.mubr.msk.bf16.gmra.mrb[4].mxu0 %vm237_vm1, %v971_v4 }
  0x72   : > { %1438 = vmatprep.mubr.msk.bf16.mxu0 %vm1575_vm0, %v1574_v1 }
  0x74   : > { %1371 = vmatmul.mubr.msk.bf16.vlgmr.msra.gmra.mrb[4].mxu1 %vm237_vm1, %v583_v14 }
  0x75   : > { %1374 = vmatprep.mubr.msk.bf16.mxu1 %vm1575_vm0, %v1574_v1  ;;  %v1238_v1 = vld [vmem:[%s1883_s3] ss:$0 sm:$0xff] }
  0x79   : > { %1439 = vmatmul.mubr.msk.bf16.gmra.mrb[8].mxu0 %vm237_vm1, %v972_v16 }
  0x7c   : > { %1375 = vmatmul.mubr.msk.bf16.gmra.mrb[8].mxu1 %vm237_vm1, %v584_v19 }
 0x12f   : > { %v547_v20 = vpop.f32.mrb[0].mxu1 }
 0x130   : > { %v1352_v21 = vpop.f32.mrb[1].mxu1 }
 0x131   : > { %v550_v22 = vpop.f32.mrb[2].mxu1 }
 0x132   : > { %v1353_v23 = vpop.f32.mrb[3].mxu1 }
 0x13c   : > { %v1032_v24 = vpop.f32.mrb[0].mxu0 }
 0x13d   : > { %v1446_v26 = vadd.f32 %v1032_v24, %v547_v20  ;;  %v1432_v27 = vpop.f32.mrb[1].mxu0 }
 0x13e   : > { %v1035_v28 = vpop.f32.mrb[2].mxu0 }
 0x13f   : > { %v1068_v29 = vmul.f32 %v1446_v26, %v1237_v25  ;;  %v1447_v30 = vadd.f32 %v1035_v28, %v550_v22  ;;  %v1433_v31 = vpop.f32.mrb[3].mxu0 }
 0x141   : > { %v1081_v32 = vadd.f32 %v1238_v1, %v1068_v29  ;;  %v1069_v33 = vmul.f32 %v1447_v30, %v1237_v25 }
 0x143   : > { %v1087_v34 = vmul.f32 0.1, %v1081_v32  ;;  %v1082_v35 = vadd.f32 %v1238_v1, %v1069_v33 }
 0x144   : > { %v1040_v36 = vpop.f32.mrb[4].mxu0 }
 0x145   : > { %v1093_v37 = vmax.f32 %v1081_v32, %v1087_v34  ;;  %v1088_v38 = vmul.f32 0.1, %v1082_v35  ;;  %v1436_v39 = vpop.f32.mrb[5].mxu0 }
 0x146   : > { %v1043_v40 = vpop.f32.mrb[6].mxu0 }
 0x147   : > { %v1247_v41 = vpack.c.bf16 %v1093_v37, %v1093_v37  ;;  %v1094_v42 = vmax.f32 %v1082_v35, %v1088_v38  ;;  %v1437_v43 = vpop.f32.mrb[7].mxu0  ;;  %v652_v44 = vpop.f32.mrb[4].mxu1 }
 0x148   : > { %v1448_v45 = vadd.f32 %v1040_v36, %v652_v44  ;;  %v1372_v46 = vpop.f32.mrb[5].mxu1 }
 0x149   : > { %1124 = vst.msk [vmem:[%s1863_s14] sm:$0xf] %vm1123_vm2, %v1247_v41  ;;  %v1248_v47 = vpack.c.bf16 %v1094_v42, %v1094_v42  ;;  %v655_v48 = vpop.f32.mrb[6].mxu1 }
 0x14a   : > { %v1070_v49 = vmul.f32 %v1448_v45, %v1237_v25  ;;  %v1449_v50 = vadd.f32 %v1043_v40, %v655_v48  ;;  %v1373_v51 = vpop.f32.mrb[7].mxu1 }
 0x14b   : > { %1125 = vst.msk [vmem:[%s1863_s14 + $0x4] sm:$0xf] %vm1123_vm2, %v1248_v47 }
 0x14c   : > { %v1083_v52 = vadd.f32 %v1238_v1, %v1070_v49  ;;  %v1071_v53 = vmul.f32 %v1449_v50, %v1237_v25  ;;  %v1048_v54 = vpop.f32.mrb[8].mxu0 }
 0x14d   : > { %v1440_v55 = vpop.f32.mrb[9].mxu0 }
 0x14e   : > { %v1089_v56 = vmul.f32 0.1, %v1083_v52  ;;  %v1084_v57 = vadd.f32 %v1238_v1, %v1071_v53  ;;  %v1051_v58 = vpop.f32.mrb[10].mxu0 }
 0x14f   : > { %v1441_v59 = vpop.f32.mrb[11].mxu0  ;;  %v660_v60 = vpop.f32.mrb[8].mxu1 }
 0x150   : > { %v1095_v61 = vmax.f32 %v1083_v52, %v1089_v56  ;;  %v1090_v62 = vmul.f32 0.1, %v1084_v57  ;;  %v1450_v63 = vadd.f32 %v1048_v54, %v660_v60  ;;  %v1376_v0 = vpop.f32.mrb[9].mxu1 }
 0x151   : > { %v663_v3 = vpop.f32.mrb[10].mxu1 }
 0x152   : > { %v1249_v5 = vpack.c.bf16 %v1095_v61, %v1095_v61  ;;  %v1096_v6 = vmax.f32 %v1084_v57, %v1090_v62  ;;  %v1072_v7 = vmul.f32 %v1450_v63, %v1237_v25  ;;  %v1451_v8 = vadd.f32 %v1051_v58, %v663_v3  ;;  %v1377_v9 = vpop.f32.mrb[11].mxu1 }
 0x154   : > { %1126 = vst.msk [vmem:[%s1863_s14 + $0x8] sm:$0xf] %vm1123_vm2, %v1249_v5  ;;  %v1250_v10 = vpack.c.bf16 %v1096_v6, %v1096_v6  ;;  %v1085_v2 = vadd.f32 %v1238_v1, %v1072_v7  ;;  %v1073_v11 = vmul.f32 %v1451_v8, %v1237_v25 }
 0x156   : > { %1127 = vst.msk [vmem:[%s1863_s14 + $0xc] sm:$0xf] %vm1123_vm2, %v1250_v10  ;;  %v1091_v4 = vmul.f32 0.1, %v1085_v2  ;;  %v1086_v12 = vadd.f32 %v1238_v1, %v1073_v11 }
 0x158   : > { %v1097_v13 = vmax.f32 %v1085_v2, %v1091_v4  ;;  %v1092_v14 = vmul.f32 0.1, %v1086_v12 }
 0x15a   : > { %v1251_v15 = vpack.c.bf16 %v1097_v13, %v1097_v13  ;;  %v1098_v16 = vmax.f32 %v1086_v12, %v1092_v14 }
 0x15c   : > { %1128 = vst.msk [vmem:[%s1863_s14 + $0x10] sm:$0xf] %vm1123_vm2, %v1251_v15  ;;  %v1252_v17 = vpack.c.bf16 %v1098_v16, %v1098_v16 }
 0x15e   : > { %1129 = vst.msk [vmem:[%s1863_s14 + $0x14] sm:$0xf] %vm1123_vm2, %v1252_v17 }
 0x15f PF: > { %s14_s15 = sadd.s32 1, %s1572_s15  }
 0x160   : > { %p11_p4 = scmp.ge.s32.totalorder %s14_s15, 4  }
 0x162   :  { %13 = sbr.rel (!%p11_p4) target bundleno = 1 (0x1), region = 66 }

// kernel: _lambda_.29
= control target key start
LH: loop header
LB: loop body
LE: loop exit
PB: predicated region body
PF: predicated region fallthrough
CT: control target
= control target key end

     0   :  { %s1716_s15 = smov 0   ;;  %s1937_s0 = inlined_call_operand.vmem [shape: f32[2,272,32], index: 0, kind: input, shape index: {}]   ;;  %s1938_s1 = inlined_call_operand.vmem [shape: bf16[288,32], index: 1, kind: input, shape index: {}]   ;;  %s1939_s2 = inlined_call_operand.vmem [shape: f32[1,32], index: 2, kind: input, shape index: {}]   ;;  %s1940_s3 = inlined_call_operand.vmem [shape: f32[1,32], index: 3, kind: input, shape index: {}]   ;;  %s1941_s4 = inlined_call_operand.vmem [shape: bf16[2,64,32], index: 4, kind: output, shape index: {}]  }
   0x1 LB: > { %s1343_s16 = sadd.s32 4294967295, %s1689_s15   ;;  %p1347_p0 = scmp.ge.s32.totalorder %s1689_s15, 1  ;;  %s1689_s15 = sphi %s1716_s15, %s14_s15  }
   0x2   : > { %p162_p1 = scmp.lt.s32.totalorder %s1689_s15, 3 }
   0x4   : > { %p163_p2 = pnand %p1347_p0, %p162_p1 }
   0x5   : > { %v1665_v0 = vld [vmem:[%s1938_s1 + $0x10] sm:$0xff] (!%p163_p2)   ;;  %p188_p3 = scmp.lt.s32.totalorder (!%p163_p2), %s1343_s16, 1  ;;  %v1730_v1 = vld [vmem:[%s1938_s1 + $0x40] sm:$0xff] (!%p163_p2)   ;;  %v1667_v2 = vld [vmem:[%s1938_s1 + $0x18] sm:$0xff] (!%p163_p2)   ;;  %vm243_vm0 = vcmask (!%p163_p2), 261120   ;;  %vm1279_vm1 = vcmask (!%p163_p2), 257024  }
   0x6   : > { %166 = sbr.rel (%p163_p2) target bundleno = 318 (0x13e), region = 36  ;;  %1480 = vmatprep.subr.bf16.mxu1 (!%p163_p2), %v1665_v0  ;;  %1528 = vmatprep.subr.bf16.mxu0 (!%p163_p2), %v1730_v1  ;;  %v1741_v3 = vld [vmem:[%s1938_s1 + $0x48] sm:$0xff] (!%p163_p2)   ;;  %v1669_v4 = vld [vmem:[%s1938_s1] sm:$0xff] (!%p163_p2)   ;;  %v1670_v5 = vld [vmem:[%s1938_s1 + $0x50] sm:$0xff] (!%p163_p2)  }
   0x7   : > { %1481 = vmatpush3.bf16.msra.mxu1 (!%p163_p2), %v1665_v0  ;;  %1529 = vmatpush3.bf16.msra.mxu0 (!%p163_p2), %v1730_v1  ;;  %v1671_v19 = vld [vmem:[%s1938_s1 + $0x58] sm:$0xff] (!%p163_p2)   ;;  %v1672_v23 = vld [vmem:[%s1938_s1 + $0x8] sm:$0xff] (!%p163_p2)   ;;  %v1673_v28 = vld [vmem:[%s1938_s1 + $0x60] sm:$0xff] (!%p163_p2)  }
   0x8   : > { %1482 = vmatprep.subr.bf16.mxu1 (!%p163_p2), %v1667_v2  ;;  %1530 = vmatprep.subr.bf16.mxu0 (!%p163_p2), %v1741_v3  ;;  %v1674_v33 = vld [vmem:[%s1938_s1 + $0x20] sm:$0xff] (!%p163_p2)   ;;  %v1675_v44 = vld [vmem:[%s1938_s1 + $0x68] sm:$0xff] (!%p163_p2)   ;;  %v1677_v52 = vld [vmem:[%s1938_s1 + $0x70] sm:$0xff] (!%p163_p2)  }
   0x9   : > { %v1676_v49 = vld [vmem:[%s1938_s1 + $0x28] sm:$0xff] (!%p163_p2)   ;;  %v1678_v59 = vld [vmem:[%s1938_s1 + $0x30] sm:$0xff] (!%p163_p2)  }
   0xb   : > { %1483 = vmatpush3.bf16.msra.mxu1 (!%p163_p2), %v1667_v2  ;;  %1531 = vmatpush3.bf16.msra.mxu0 (!%p163_p2), %v1741_v3 }
   0xc   : > { %1492 = vmatprep.subr.bf16.mxu1 (!%p163_p2), %v1669_v4  ;;  %1540 = vmatprep.subr.bf16.mxu0 (!%p163_p2), %v1670_v5 }
   0xd   : > { %s1943_s16 = smov (!%p188_p3, %s1343_s16), 1 }
   0xe   : > { %s1656_s25 = smul.u32 272, %s1943_s16  ;;  %s1417_s11 = sshll.u32 %s1943_s16, 5 }
   0xf   : > { %s1916_s14 = scalar_lea.vmem %s1941_s4, %s1417_s11 }
  0x10   : > { %s1755_s6 = scalar_lea.vmem %s1937_s0, %s1656_s25 }
  0x11   : > { %v215_v6 = vld [vmem:[%s1755_s6 + $0x6] sm:$0xff]  ;;  %v216_v7 = vld [vmem:[%s1755_s6 + $0xe] sm:$0xff]  ;;  %v217_v11 = vld [vmem:[%s1755_s6 + $0x16] sm:$0xff] }
  0x12   : > { %v636_v8 = vld [vmem:[%s1755_s6 + $0x66] sm:$0xff]  ;;  %v223_v9 = vpack.c.bf16 %v216_v7, %v215_v6  ;;  %v637_v10 = vld [vmem:[%s1755_s6 + $0x6e] sm:$0xff]  ;;  %v218_v12 = vld [vmem:[%s1755_s6 + $0x1e] sm:$0xff] }
  0x13   : > { %v644_v13 = vpack.c.bf16 %v637_v10, %v636_v8  ;;  %v224_v14 = vpack.c.bf16 %v218_v12, %v217_v11  ;;  %v638_v15 = vld [vmem:[%s1755_s6 + $0x76] sm:$0xff]  ;;  %v639_v16 = vld [vmem:[%s1755_s6 + $0x7e] sm:$0xff]  ;;  %v219_v17 = vld [vmem:[%s1755_s6 + $0x26] sm:$0xff] }
  0x14   : > { %1484 = vmatprep.mubr.msk.bf16.mxu1 %vm243_vm0, %v223_v9  ;;  %v645_v18 = vpack.c.bf16 %v639_v16, %v638_v15  ;;  %v220_v20 = vld [vmem:[%s1755_s6 + $0x2e] sm:$0xff]  ;;  %v221_v21 = vld [vmem:[%s1755_s6 + $0x36] sm:$0xff]  ;;  %v222_v24 = vld [vmem:[%s1755_s6 + $0x3e] sm:$0xff] }
  0x15   : > { %1532 = vmatprep.mubr.msk.bf16.mxu0 %vm243_vm0, %v644_v13  ;;  %1485 = vmatmul.mubr.msk.bf16.vlgmr.msra.gmra.mrb[0].mxu1 %vm243_vm0, %v224_v14  ;;  %v225_v22 = vpack.c.bf16 %v220_v20, %v219_v17  ;;  %v749_v25 = vld [vmem:[%s1755_s6 + $0x6c] sm:$0xff]  ;;  %v750_v26 = vld [vmem:[%s1755_s6 + $0x74] sm:$0xff]  ;;  %v199_v29 = vld [vmem:[%s1755_s6] sm:$0xff]  ;;  %v226_v31 = vpack.c.bf16 %v222_v24, %v221_v21 }
  0x16   : > { %1533 = vmatmul.mubr.msk.bf16.vlgmr.msra.gmra.mrb[0].mxu0 %vm243_vm0, %v645_v18  ;;  %1493 = vmatpush3.bf16.msra.mxu1 %v1669_v4  ;;  %v757_v27 = vpack.c.bf16 %v750_v26, %v749_v25  ;;  %v200_v30 = vld [vmem:[%s1755_s6 + $0x8] sm:$0xff]  ;;  %v751_v34 = vld [vmem:[%s1755_s6 + $0x7c] sm:$0xff]  ;;  %v754_v37 = vld [vmem:[%s1755_s6 + $0x94] sm:$0xff] }
  0x17   : > { %1541 = vmatpush3.bf16.msra.mxu0 %v1670_v5  ;;  %1488 = vmatprep.mubr.msk.bf16.mxu1 %vm243_vm0, %v225_v22  ;;  %v207_v32 = vpack.c.bf16 %v200_v30, %v199_v29  ;;  %v752_v35 = vld [vmem:[%s1755_s6 + $0x84] sm:$0xff]  ;;  %v753_v36 = vld [vmem:[%s1755_s6 + $0x8c] sm:$0xff]  ;;  %v202_v40 = vld [vmem:[%s1755_s6 + $0x18] sm:$0xff] }
  0x18   : > { %1542 = vmatprep.subr.bf16.mxu0 %v1671_v19  ;;  %1494 = vmatprep.subr.bf16.mxu1 %v1672_v23  ;;  %v201_v38 = vld [vmem:[%s1755_s6 + $0x10] sm:$0xff]  ;;  %v758_v39 = vpack.c.bf16 %v752_v35, %v751_v34  ;;  %v759_v41 = vpack.c.bf16 %v754_v37, %v753_v36  ;;  %v203_v42 = vld [vmem:[%s1755_s6 + $0x20] sm:$0xff]  ;;  %v204_v43 = vld [vmem:[%s1755_s6 + $0x28] sm:$0xff] }
  0x19   : > { %1544 = vmatprep.mubr.msk.bf16.mxu0 %vm243_vm0, %v757_v27  ;;  %v208_v45 = vpack.c.bf16 %v202_v40, %v201_v38  ;;  %v755_v46 = vld [vmem:[%s1755_s6 + $0x9c] sm:$0xff]  ;;  %v756_v47 = vld [vmem:[%s1755_s6 + $0xa4] sm:$0xff]  ;;  %v209_v48 = vpack.c.bf16 %v204_v43, %v203_v42  ;;  %v205_v54 = vld [vmem:[%s1755_s6 + $0x30] sm:$0xff] }
  0x1a   : > { %1495 = vmatpush3.bf16.msra.mxu1 %v1672_v23  ;;  %v862_v50 = vld [vmem:[%s1755_s6 + $0xc0] sm:$0xff]  ;;  %v863_v51 = vld [vmem:[%s1755_s6 + $0xc8] sm:$0xff]  ;;  %v760_v53 = vpack.c.bf16 %v756_v47, %v755_v46  ;;  %v206_v55 = vld [vmem:[%s1755_s6 + $0x38] sm:$0xff] }
  0x1b   : > { %1543 = vmatpush3.bf16.msra.mxu0 %v1671_v19  ;;  %1504 = vmatprep.subr.bf16.mxu1 %v1674_v33  ;;  %v410_v56 = vld [vmem:[%s1755_s6 + $0xc] sm:$0xff]  ;;  %v870_v57 = vpack.c.bf16 %v863_v51, %v862_v50  ;;  %v411_v58 = vld [vmem:[%s1755_s6 + $0x14] sm:$0xff]  ;;  %v210_v60 = vpack.c.bf16 %v206_v55, %v205_v54  ;;  %v866_v0 = vld [vmem:[%s1755_s6 + $0xe0] sm:$0xff] }
  0x1c   : > { %1552 = vmatprep.subr.bf16.mxu0 %v1673_v28  ;;  %v418_v61 = vpack.c.bf16 %v411_v58, %v410_v56  ;;  %v864_v62 = vld [vmem:[%s1755_s6 + $0xd0] sm:$0xff]  ;;  %v865_v63 = vld [vmem:[%s1755_s6 + $0xd8] sm:$0xff]  ;;  %v867_v2 = vld [vmem:[%s1755_s6 + $0xe8] sm:$0xff] }
  0x1d   : > { %1489 = vmatmul.mubr.msk.bf16.gmra.mrb[4].mxu1 %vm243_vm0, %v226_v31  ;;  %v871_v4 = vpack.c.bf16 %v865_v63, %v864_v62  ;;  %v412_v5 = vld [vmem:[%s1755_s6 + $0x1c] sm:$0xff]  ;;  %v413_v6 = vld [vmem:[%s1755_s6 + $0x24] sm:$0xff]  ;;  %v872_v7 = vpack.c.bf16 %v867_v2, %v866_v0  ;;  %v414_v8 = vld [vmem:[%s1755_s6 + $0x2c] sm:$0xff] }
  0x1e   : > { %1496 = vmatprep.mubr.msk.bf16.mxu1 %vm243_vm0, %v207_v32  ;;  %v415_v9 = vld [vmem:[%s1755_s6 + $0x34] sm:$0xff]  ;;  %v419_v11 = vpack.c.bf16 %v413_v6, %v412_v5  ;;  %v975_v16 = vld [vmem:[%s1755_s6 + $0xc6] sm:$0xff]  ;;  %v416_v20 = vld [vmem:[%s1755_s6 + $0x3c] sm:$0xff] }
  0x1f   : > { %v1679_v10 = vld [vmem:[%s1938_s1 + $0x78] sm:$0xff]   ;;  %v420_v12 = vpack.c.bf16 %v415_v9, %v414_v8  ;;  %v868_v13 = vld [vmem:[%s1755_s6 + $0xf0] sm:$0xff]  ;;  %v1681_v18 = vld [vmem:[%s1938_s1 + $0x80] sm:$0xff]  }
  0x20   : > { %v869_v14 = vld [vmem:[%s1755_s6 + $0xf8] sm:$0xff]  ;;  %v976_v17 = vld [vmem:[%s1755_s6 + $0xce] sm:$0xff]  ;;  %v417_v21 = vld [vmem:[%s1755_s6 + $0x44] sm:$0xff] }
  0x21   : > { %v1680_v15 = vld [vmem:[%s1938_s1 + $0x38] sm:$0xff]   ;;  %v873_v19 = vpack.c.bf16 %v869_v14, %v868_v13  ;;  %v983_v22 = vpack.c.bf16 %v976_v17, %v975_v16  ;;  %v523_v23 = vld [vmem:[%s1755_s6 + $0x60] sm:$0xff]  ;;  %v524_v24 = vld [vmem:[%s1755_s6 + $0x68] sm:$0xff]  ;;  %v421_v25 = vpack.c.bf16 %v417_v21, %v416_v20 }
  0x22   : > { %1545 = vmatmul.mubr.msk.bf16.vlgmr.msra.gmra.mrb[0].mxu0 %vm243_vm0, %v758_v39  ;;  %v531_v26 = vpack.c.bf16 %v524_v24, %v523_v23  ;;  %v977_v27 = vld [vmem:[%s1755_s6 + $0xd6] sm:$0xff]  ;;  %v979_v29 = vld [vmem:[%s1755_s6 + $0xe6] sm:$0xff]  ;;  %v980_v30 = vld [vmem:[%s1755_s6 + $0xee] sm:$0xff] }
  0x23   : > { %1553 = vmatpush3.bf16.msra.mxu0 %v1673_v28  ;;  %1548 = vmatprep.mubr.msk.bf16.mxu0 %vm243_vm0, %v759_v41  ;;  %v978_v28 = vld [vmem:[%s1755_s6 + $0xde] sm:$0xff]  ;;  %v525_v32 = vld [vmem:[%s1755_s6 + $0x70] sm:$0xff]  ;;  %v985_v34 = vpack.c.bf16 %v980_v30, %v979_v29  ;;  %v528_v36 = vld [vmem:[%s1755_s6 + $0x88] sm:$0xff] }
  0x24   : > { %1554 = vmatprep.subr.bf16.mxu0 %v1675_v44  ;;  %v984_v31 = vpack.c.bf16 %v978_v28, %v977_v27  ;;  %v527_v35 = vld [vmem:[%s1755_s6 + $0x80] sm:$0xff]  ;;  %v1682_v37 = vld [vmem:[%s1938_s1 + $0x88] sm:$0xff]   ;;  %v981_v40 = vld [vmem:[%s1755_s6 + $0xf6] sm:$0xff] }
  0x25   : > { %1497 = vmatmul.mubr.msk.bf16.vlgmr.msra.gmra.mrb[0].mxu1 %vm243_vm0, %v208_v45  ;;  %v533_v39 = vpack.c.bf16 %v528_v36, %v527_v35  ;;  %v982_v41 = vld [vmem:[%s1755_s6 + $0xfe] sm:$0xff]  ;;  %v1088_v42 = vld [vmem:[%s1755_s6 + $0xcc] sm:$0xff]  ;;  %v1089_v43 = vld [vmem:[%s1755_s6 + $0xd4] sm:$0xff] }
  0x26   : > { %1505 = vmatpush3.bf16.msra.mxu1 %v1674_v33  ;;  %1500 = vmatprep.mubr.msk.bf16.mxu1 %vm243_vm0, %v209_v48  ;;  %v526_v33 = vld [vmem:[%s1755_s6 + $0x78] sm:$0xff]  ;;  %v529_v45 = vld [vmem:[%s1755_s6 + $0x90] sm:$0xff]  ;;  %v1096_v47 = vpack.c.bf16 %v1089_v43, %v1088_v42  ;;  %v640_v48 = vld [vmem:[%s1755_s6 + $0x86] sm:$0xff] }
  0x27   : > { %1555 = vmatpush3.bf16.msra.mxu0 %v1675_v44  ;;  %1506 = vmatprep.subr.bf16.mxu1 %v1676_v49  ;;  %v532_v38 = vpack.c.bf16 %v526_v33, %v525_v32  ;;  %v986_v44 = vpack.c.bf16 %v982_v41, %v981_v40  ;;  %v530_v46 = vld [vmem:[%s1755_s6 + $0x98] sm:$0xff]  ;;  %v1405_v5 = vld [vmem:[%s1939_s2] ss:$0 sm:$0xff] }
  0x28   : > { %1564 = vmatprep.subr.bf16.mxu0 %v1677_v52  ;;  %v534_v50 = vpack.c.bf16 %v530_v46, %v529_v45  ;;  %v1090_v51 = vld [vmem:[%s1755_s6 + $0xdc] sm:$0xff]  ;;  %v1093_v54 = vld [vmem:[%s1755_s6 + $0xf4] sm:$0xff] }
  0x29   : > { %v643_v58 = vld [vmem:[%s1755_s6 + $0x9e] sm:$0xff] }
  0x2a   : > { %1549 = vmatmul.mubr.msk.bf16.gmra.mrb[4].mxu0 %vm243_vm0, %v760_v53  ;;  %1507 = vmatpush3.bf16.msra.mxu1 %v1676_v49  ;;  %v641_v49 = vld [vmem:[%s1755_s6 + $0x8e] sm:$0xff]  ;;  %v1406_v8 = vld [vmem:[%s1940_s3] ss:$0 sm:$0xff] }
  0x2b   : > { %1556 = vmatprep.mubr.msk.bf16.mxu0 %vm243_vm0, %v870_v57  ;;  %1516 = vmatprep.subr.bf16.mxu1 %v1678_v59  ;;  %v1092_v53 = vld [vmem:[%s1755_s6 + $0xec] sm:$0xff]  ;;  %v642_v57 = vld [vmem:[%s1755_s6 + $0x96] sm:$0xff] }
  0x2c   : > { %v1098_v56 = vpack.c.bf16 %v1093_v54, %v1092_v53 }
  0x2d   : > { %1501 = vmatmul.mubr.msk.bf16.gmra.mrb[4].mxu1 %vm243_vm0, %v210_v60  ;;  %v647_v60 = vpack.c.bf16 %v643_v58, %v642_v57 }
  0x2e   : > { %1508 = vmatprep.mubr.msk.bf16.mxu1 %vm243_vm0, %v418_v61 }
  0x32   : > { %1557 = vmatmul.mubr.msk.bf16.vlgmr.msra.gmra.mrb[0].mxu0 %vm243_vm0, %v871_v4 }
  0x33   : > { %1565 = vmatpush3.bf16.msra.mxu0 %v1677_v52  ;;  %1560 = vmatprep.mubr.msk.bf16.mxu0 %vm243_vm0, %v872_v7  ;;  %v1091_v52 = vld [vmem:[%s1755_s6 + $0xe4] sm:$0xff] }
  0x34   : > { %1566 = vmatprep.subr.bf16.mxu0 %v1679_v10  ;;  %v1097_v55 = vpack.c.bf16 %v1091_v52, %v1090_v51 }
  0x35   : > { %1509 = vmatmul.mubr.msk.bf16.vlgmr.msra.gmra.mrb[0].mxu1 %vm243_vm0, %v419_v11 }
  0x36   : > { %1517 = vmatpush3.bf16.msra.mxu1 %v1678_v59  ;;  %1512 = vmatprep.mubr.msk.bf16.mxu1 %vm243_vm0, %v420_v12  ;;  %v1095_v59 = vld [vmem:[%s1755_s6 + $0x104] sm:$0xff] }
  0x37   : > { %1567 = vmatpush3.bf16.msra.mxu0 %v1679_v10  ;;  %1518 = vmatprep.subr.bf16.mxu1 %v1680_v15 }
  0x38   : > { %1576 = vmatprep.subr.bf16.mxu0 %v1681_v18 }
  0x3a   : > { %1561 = vmatmul.mubr.msk.bf16.gmra.mrb[4].mxu0 %vm243_vm0, %v873_v19  ;;  %1519 = vmatpush3.bf16.msra.mxu1 %v1680_v15 }
  0x3b   : > { %1568 = vmatprep.mubr.msk.bf16.mxu0 %vm243_vm0, %v983_v22  ;;  %1588 = vmatprep.subr.bf16.mxu1 %v1730_v1 }
  0x3d   : > { %1513 = vmatmul.mubr.msk.bf16.gmra.mrb[4].mxu1 %vm243_vm0, %v421_v25 }
  0x3e   : > { %1520 = vmatprep.mubr.msk.bf16.mxu1 %vm243_vm0, %v531_v26 }
  0x42   : > { %1569 = vmatmul.mubr.msk.bf16.vlgmr.msra.gmra.mrb[0].mxu0 %vm243_vm0, %v984_v31 }
  0x43   : > { %1577 = vmatpush3.bf16.msra.mxu0 %v1681_v18  ;;  %1572 = vmatprep.mubr.msk.bf16.mxu0 %vm243_vm0, %v985_v34 }
  0x44   : > { %1578 = vmatprep.subr.bf16.mxu0 %v1682_v37 }
  0x45   : > { %1521 = vmatmul.mubr.msk.bf16.vlgmr.msra.gmra.mrb[0].mxu1 %vm243_vm0, %v532_v38 }
  0x46   : > { %1590 = vmatpush3.bf16.msra.mxu1 %v1730_v1  ;;  %1524 = vmatprep.mubr.msk.bf16.mxu1 %vm243_vm0, %v533_v39  ;;  %v646_v1 = vpack.c.bf16 %v641_v49, %v640_v48 }
  0x47   : > { %1579 = vmatpush3.bf16.msra.mxu0 %v1682_v37  ;;  %1589 = vmatprep.subr.bf16.mxu1 %v1741_v3 }
  0x4a   : > { %1573 = vmatmul.mubr.msk.bf16.gmra.mrb[4].mxu0 %vm243_vm0, %v986_v44  ;;  %1591 = vmatpush3.bf16.msra.mxu1 %v1741_v3  ;;  %v1094_v3 = vld [vmem:[%s1755_s6 + $0xfc] sm:$0xff] }
  0x4b   : > { %1580 = vmatprep.mubr.msk.bf16.mxu0 %vm243_vm0, %v1096_v47  ;;  %v1099_v61 = vpack.c.bf16 %v1095_v59, %v1094_v3 }
  0x4d   : > { %1525 = vmatmul.mubr.msk.bf16.gmra.mrb[4].mxu1 %vm243_vm0, %v534_v50 }
  0x4e   : > { %1536 = vmatprep.mubr.msk.bf16.mxu1 %vm243_vm0, %v646_v1 }
  0x52   : > { %1581 = vmatmul.mubr.msk.bf16.vlgmr.msra.gmra.mrb[0].mxu0 %vm243_vm0, %v1097_v55 }
  0x53   : > { %1584 = vmatprep.mubr.msk.bf16.mxu0 %vm243_vm0, %v1098_v56 }
  0x59   : > { %1537 = vmatmul.mubr.msk.bf16.vlgmr.msra.gmra.mrb[4].mxu1 %vm243_vm0, %v647_v60 }
  0x5a   : > { %1585 = vmatmul.mubr.msk.bf16.gmra.mrb[4].mxu0 %vm243_vm0, %v1099_v61 }
 0x118   : > { %v1522_v62 = vpop.f32.mrb[0].mxu1 }
 0x119   : > { %v597_v63 = vpop.f32.mrb[1].mxu1 }
 0x11a   : > { %v1523_v0 = vpop.f32.mrb[2].mxu1 }
 0x11b   : > { %v600_v2 = vpop.f32.mrb[3].mxu1 }
 0x125   : > { %v1582_v4 = vpop.f32.mrb[0].mxu0 }
 0x126   : > { %v1592_v6 = vadd.f32 %v1582_v4, %v1522_v62  ;;  %v1162_v7 = vpop.f32.mrb[1].mxu0 }
 0x127   : > { %v1593_v9 = vadd.f32 %v1162_v7, %v597_v63  ;;  %v1583_v10 = vpop.f32.mrb[2].mxu0 }
 0x128   : > { %v1210_v11 = vmul.f32 %v1592_v6, %v1405_v5  ;;  %v1594_v12 = vadd.f32 %v1583_v10, %v1523_v0  ;;  %v1165_v13 = vpop.f32.mrb[3].mxu0 }
 0x129   : > { %v1208_v14 = vmul.f32 %v1593_v9, %v1405_v5  ;;  %v1595_v15 = vadd.f32 %v1165_v13, %v600_v2 }
 0x12a   : > { %v1225_v16 = vadd.f32 %v1406_v8, %v1210_v11  ;;  %v1211_v17 = vmul.f32 %v1594_v12, %v1405_v5 }
 0x12b   : > { %v1223_v18 = vadd.f32 %v1406_v8, %v1208_v14  ;;  %v1209_v19 = vmul.f32 %v1595_v15, %v1405_v5 }
 0x12c   : > { %v1233_v20 = vmul.f32 0.1, %v1225_v16  ;;  %v1226_v21 = vadd.f32 %v1406_v8, %v1211_v17  ;;  %v1538_v22 = vpop.f32.mrb[4].mxu1 }
 0x12d   : > { %v1231_v23 = vmul.f32 0.1, %v1223_v18  ;;  %v1224_v24 = vadd.f32 %v1406_v8, %v1209_v19  ;;  %v1586_v25 = vpop.f32.mrb[4].mxu0  ;;  %v726_v26 = vpop.f32.mrb[5].mxu1 }
 0x12e   : > { %v1241_v27 = vmax.f32 %v1225_v16, %v1233_v20  ;;  %v1234_v28 = vmul.f32 0.1, %v1226_v21  ;;  %v1596_v29 = vadd.f32 %v1586_v25, %v1538_v22  ;;  %v1178_v30 = vpop.f32.mrb[5].mxu0  ;;  %v1539_v31 = vpop.f32.mrb[6].mxu1 }
 0x12f   : > { %v1239_v32 = vmax.f32 %v1223_v18, %v1231_v23  ;;  %v1232_v33 = vmul.f32 0.1, %v1224_v24  ;;  %v1597_v34 = vadd.f32 %v1178_v30, %v726_v26  ;;  %v1587_v35 = vpop.f32.mrb[6].mxu0  ;;  %v729_v36 = vpop.f32.mrb[7].mxu1 }
 0x130   : > { %v1420_v37 = vpack.c.bf16 %v1241_v27, %v1241_v27  ;;  %v1242_v38 = vmax.f32 %v1226_v21, %v1234_v28  ;;  %v1214_v39 = vmul.f32 %v1596_v29, %v1405_v5  ;;  %v1598_v40 = vadd.f32 %v1587_v35, %v1539_v31  ;;  %v1181_v41 = vpop.f32.mrb[7].mxu0 }
 0x131   : > { %v1418_v42 = vpack.c.bf16 %v1239_v32, %v1239_v32  ;;  %v1240_v43 = vmax.f32 %v1224_v24, %v1232_v33  ;;  %v1212_v44 = vmul.f32 %v1597_v34, %v1405_v5  ;;  %v1599_v45 = vadd.f32 %v1181_v41, %v729_v36 }
 0x132   : > { %1282 = vst.msk [vmem:[%s1916_s14 + $0x8] sm:$0xf] %vm1279_vm1, %v1420_v37  ;;  %v1421_v46 = vpack.c.bf16 %v1242_v38, %v1242_v38  ;;  %v1229_v47 = vadd.f32 %v1406_v8, %v1214_v39  ;;  %v1215_v48 = vmul.f32 %v1598_v40, %v1405_v5 }
 0x133   : > { %1280 = vst.msk [vmem:[%s1916_s14] sm:$0xf] %vm1279_vm1, %v1418_v42  ;;  %v1419_v49 = vpack.c.bf16 %v1240_v43, %v1240_v43  ;;  %v1227_v50 = vadd.f32 %v1406_v8, %v1212_v44  ;;  %v1213_v1 = vmul.f32 %v1599_v45, %v1405_v5 }
 0x134   : > { %1283 = vst.msk [vmem:[%s1916_s14 + $0xc] sm:$0xf] %vm1279_vm1, %v1421_v46  ;;  %v1237_v51 = vmul.f32 0.1, %v1229_v47  ;;  %v1230_v52 = vadd.f32 %v1406_v8, %v1215_v48 }
 0x135   : > { %1281 = vst.msk [vmem:[%s1916_s14 + $0x4] sm:$0xf] %vm1279_vm1, %v1419_v49  ;;  %v1235_v53 = vmul.f32 0.1, %v1227_v50  ;;  %v1228_v54 = vadd.f32 %v1406_v8, %v1213_v1 }
 0x136   : > { %v1245_v55 = vmax.f32 %v1229_v47, %v1237_v51  ;;  %v1238_v56 = vmul.f32 0.1, %v1230_v52 }
 0x137   : > { %v1243_v57 = vmax.f32 %v1227_v50, %v1235_v53  ;;  %v1236_v58 = vmul.f32 0.1, %v1228_v54 }
 0x138   : > { %v1424_v3 = vpack.c.bf16 %v1245_v55, %v1245_v55  ;;  %v1246_v59 = vmax.f32 %v1230_v52, %v1238_v56 }
 0x139   : > { %v1422_v60 = vpack.c.bf16 %v1243_v57, %v1243_v57  ;;  %v1244_v61 = vmax.f32 %v1228_v54, %v1236_v58 }
 0x13a   : > { %1286 = vst.msk [vmem:[%s1916_s14 + $0x18] sm:$0xf] %vm1279_vm1, %v1424_v3  ;;  %v1425_v62 = vpack.c.bf16 %v1246_v59, %v1246_v59 }
 0x13b   : > { %1284 = vst.msk [vmem:[%s1916_s14 + $0x10] sm:$0xf] %vm1279_vm1, %v1422_v60  ;;  %v1423_v63 = vpack.c.bf16 %v1244_v61, %v1244_v61 }
 0x13c   : > { %1287 = vst.msk [vmem:[%s1916_s14 + $0x1c] sm:$0xf] %vm1279_vm1, %v1425_v62 }
 0x13d   : > { %1285 = vst.msk [vmem:[%s1916_s14 + $0x14] sm:$0xf] %vm1279_vm1, %v1423_v63 }
 0x13e PF: > { %s14_s15 = sadd.s32 1, %s1689_s15  }
 0x13f   : > { %p11_p4 = scmp.ge.s32.totalorder %s14_s15, 4  }
 0x141   :  { %13 = sbr.rel (!%p11_p4) target bundleno = 1 (0x1), region = 66 }

// kernel: _lambda_.30
= control target key start
LH: loop header
LB: loop body
LE: loop exit
PB: predicated region body
PF: predicated region fallthrough
CT: control target
= control target key end

     0   :  { %vm48_vm0 = vcmask 261120   ;;  %vm150_vm1 = vcmask 257024   ;;  %s246_s1 = inlined_call_operand.vmem [shape: bf16[32,32], index: 1, kind: input, shape index: {}]   ;;  %s247_s0 = inlined_call_operand.vmem [shape: bf16[32,32], index: 0, kind: input, shape index: {}]   ;;  %s248_s2 = inlined_call_operand.vmem [shape: f32[1,32], index: 2, kind: input, shape index: {}]   ;;  %s249_s3 = inlined_call_operand.vmem [shape: f32[1,32], index: 3, kind: input, shape index: {}]   ;;  %s250_s4 = inlined_call_operand.vmem [shape: bf16[32,32], index: 4, kind: output, shape index: {}]  }
   0x1   :  { %v187_v0 = vld [vmem:[%s246_s1] sm:$0xff]   ;;  %v188_v1 = vld [vmem:[%s246_s1 + $0x8] sm:$0xff]  }
   0x2   :  { %179 = vmatprep.subr.bf16.mxu0 %v187_v0  ;;  %v189_v2 = vld [vmem:[%s247_s0] sm:$0xff]   ;;  %v190_v3 = vld [vmem:[%s247_s0 + $0x8] sm:$0xff]  }
   0x3   :  { %180 = vmatpush3.bf16.msra.mxu0 %v187_v0  ;;  %183 = vmatprep.mubr.msk.bf16.mxu0 %vm48_vm0, %v189_v2  ;;  %v165_v4 = vld [vmem:[%s248_s2] ss:$0 sm:$0xff] }
   0x4   :  { %181 = vmatprep.subr.bf16.mxu0 %v188_v1  ;;  %v166_v6 = vld [vmem:[%s249_s3] ss:$0 sm:$0xff] }
   0x7   :  { %182 = vmatpush3.bf16.msra.mxu0 %v188_v1 }
   0xa   :  { %184 = vmatmul.mubr.msk.bf16.vlgmr.msra.gmra.mrb[0].mxu0 %vm48_vm0, %v190_v3 }
  0xdd   :  { %v185_v5 = vpop.f32.mrb[0].mxu0 }
  0xde   :  { %v113_v7 = vmul.f32 %v185_v5, %v165_v4  ;;  %v89_v8 = vpop.f32.mrb[1].mxu0 }
  0xdf   :  { %v111_v9 = vmul.f32 %v165_v4, %v89_v8  ;;  %v186_v10 = vpop.f32.mrb[2].mxu0 }
  0xe0   :  { %v124_v11 = vadd.f32 %v166_v6, %v113_v7  ;;  %v114_v12 = vmul.f32 %v186_v10, %v165_v4  ;;  %v92_v13 = vpop.f32.mrb[3].mxu0 }
  0xe1   :  { %v122_v14 = vadd.f32 %v166_v6, %v111_v9  ;;  %v112_v15 = vmul.f32 %v165_v4, %v92_v13 }
  0xe2   :  { %v128_v16 = vmul.f32 0.1, %v124_v11  ;;  %v125_v17 = vadd.f32 %v166_v6, %v114_v12 }
  0xe3   :  { %v126_v18 = vmul.f32 0.1, %v122_v14  ;;  %v123_v19 = vadd.f32 %v166_v6, %v112_v15 }
  0xe4   :  { %v132_v20 = vmax.f32 %v124_v11, %v128_v16  ;;  %v129_v21 = vmul.f32 0.1, %v125_v17 }
  0xe5   :  { %v130_v22 = vmax.f32 %v122_v14, %v126_v18  ;;  %v127_v23 = vmul.f32 0.1, %v123_v19 }
  0xe6   :  { %v173_v24 = vpack.c.bf16 %v132_v20, %v132_v20  ;;  %v133_v25 = vmax.f32 %v125_v17, %v129_v21 }
  0xe7   :  { %v171_v26 = vpack.c.bf16 %v130_v22, %v130_v22  ;;  %v131_v27 = vmax.f32 %v123_v19, %v127_v23 }
  0xe8   :  { %153 = vst.msk [vmem:[%s250_s4 + $0x8] sm:$0xf] %vm150_vm1, %v173_v24  ;;  %v174_v28 = vpack.c.bf16 %v133_v25, %v133_v25 }
  0xe9   :  { %151 = vst.msk [vmem:[%s250_s4] sm:$0xf] %vm150_vm1, %v171_v26  ;;  %v172_v29 = vpack.c.bf16 %v131_v27, %v131_v27 }
  0xea   :  { %154 = vst.msk [vmem:[%s250_s4 + $0xc] sm:$0xf] %vm150_vm1, %v174_v28 }
  0xeb   :  { %152 = vst.msk [vmem:[%s250_s4 + $0x4] sm:$0xf] %vm150_vm1, %v172_v29 }

// kernel: _lambda_.33
= control target key start
LH: loop header
LB: loop body
LE: loop exit
PB: predicated region body
PF: predicated region fallthrough
CT: control target
= control target key end

     0   :  { %vm64_vm0 = vcmask 523264   ;;  %vm142_vm1 = vcmask 261120   ;;  %s246_s1 = inlined_call_operand.vmem [shape: bf16[64,32], index: 1, kind: input, shape index: {}]   ;;  %s247_s0 = inlined_call_operand.vmem [shape: bf16[32,64], index: 0, kind: input, shape index: {}]   ;;  %s248_s2 = inlined_call_operand.vmem [shape: f32[1,32], index: 2, kind: input, shape index: {}]   ;;  %s249_s3 = inlined_call_operand.vmem [shape: f32[1,32], index: 3, kind: input, shape index: {}]   ;;  %s250_s4 = inlined_call_operand.vmem [shape: f32[32,32], index: 4, kind: output, shape index: {}]  }
   0x1   :  { %v179_v0 = vld [vmem:[%s246_s1] sm:$0xff]   ;;  %v180_v1 = vld [vmem:[%s246_s1 + $0x8] sm:$0xff]   ;;  %v181_v2 = vld [vmem:[%s246_s1 + $0x10] sm:$0xff]  }
   0x2   :  { %167 = vmatprep.subr.bf16.mxu0 %v179_v0  ;;  %v183_v3 = vld [vmem:[%s247_s0] sm:$0xff]   ;;  %v182_v4 = vld [vmem:[%s246_s1 + $0x18] sm:$0xff]   ;;  %v184_v5 = vld [vmem:[%s247_s0 + $0x8] sm:$0xff]  }
   0x3   :  { %168 = vmatpush3.bf16.msra.mxu0 %v179_v0  ;;  %175 = vmatprep.mubr.msk.bf16.mxu0 %vm64_vm0, %v183_v3  ;;  %v159_v6 = vld [vmem:[%s248_s2] ss:$0 sm:$0xff] }
   0x4   :  { %169 = vmatprep.subr.bf16.mxu0 %v180_v1  ;;  %v160_v8 = vld [vmem:[%s249_s3] ss:$0 sm:$0xff] }
   0x7   :  { %170 = vmatpush3.bf16.msra.mxu0 %v180_v1 }
   0x8   :  { %171 = vmatprep.subr.bf16.mxu0 %v181_v2 }
   0xb   :  { %172 = vmatpush3.bf16.msra.mxu0 %v181_v2 }
   0xc   :  { %173 = vmatprep.subr.bf16.mxu0 %v182_v4 }
   0xf   :  { %174 = vmatpush3.bf16.msra.mxu0 %v182_v4 }
  0x12   :  { %176 = vmatmul.mubr.msk.bf16.vlgmr.msra.gmra.mrb[0].mxu0 %vm64_vm0, %v184_v5 }
  0xe5   :  { %v177_v7 = vpop.f32.mrb[0].mxu0 }
  0xe6   :  { %v129_v9 = vmul.f32 %v177_v7, %v159_v6  ;;  %v105_v10 = vpop.f32.mrb[1].mxu0 }
  0xe7   :  { %v127_v11 = vmul.f32 %v159_v6, %v105_v10  ;;  %v178_v12 = vpop.f32.mrb[2].mxu0 }
  0xe8   :  { %v140_v13 = vadd.f32 %v160_v8, %v129_v9  ;;  %v130_v14 = vmul.f32 %v178_v12, %v159_v6  ;;  %v108_v15 = vpop.f32.mrb[3].mxu0 }
  0xe9   :  { %v138_v16 = vadd.f32 %v160_v8, %v127_v11  ;;  %v128_v17 = vmul.f32 %v159_v6, %v108_v15 }
  0xea   :  { %145 = vst.msk [vmem:[%s250_s4 + $0x10] sm:$0xff] %vm142_vm1, %v140_v13  ;;  %v141_v18 = vadd.f32 %v160_v8, %v130_v14 }
  0xeb   :  { %143 = vst.msk [vmem:[%s250_s4] sm:$0xff] %vm142_vm1, %v138_v16  ;;  %v139_v19 = vadd.f32 %v160_v8, %v128_v17 }
  0xec   :  { %146 = vst.msk [vmem:[%s250_s4 + $0x18] sm:$0xff] %vm142_vm1, %v141_v18 }
  0xed   :  { %144 = vst.msk [vmem:[%s250_s4 + $0x8] sm:$0xff] %vm142_vm1, %v139_v19 }

// kernel: _lambda_.31
= control target key start
LH: loop header
LB: loop body
LE: loop exit
PB: predicated region body
PF: predicated region fallthrough
CT: control target
= control target key end

     0   :  { %vm98_vm0 = vcmask 392192   ;;  %vm362_vm1 = vcmask 257024   ;;  %s658_s1 = inlined_call_operand.vmem [shape: bf16[48,32], index: 1, kind: input, shape index: {}]   ;;  %s659_s0 = inlined_call_operand.vmem [shape: bf16[128,48], index: 0, kind: input, shape index: {}]   ;;  %s660_s2 = inlined_call_operand.vmem [shape: f32[1,32], index: 2, kind: input, shape index: {}]   ;;  %s661_s3 = inlined_call_operand.vmem [shape: f32[1,32], index: 3, kind: input, shape index: {}]   ;;  %s662_s4 = inlined_call_operand.vmem [shape: bf16[128,32], index: 4, kind: output, shape index: {}]  }
   0x1   :  { %v475_v0 = vld [vmem:[%s658_s1] sm:$0xff]   ;;  %v476_v1 = vld [vmem:[%s658_s1 + $0x8] sm:$0xff]   ;;  %v477_v2 = vld [vmem:[%s658_s1 + $0x10] sm:$0xff]  }
   0x2   :  { %447 = vmatprep.subr.bf16.mxu0 %v475_v0  ;;  %469 = vmatprep.subr.bf16.mxu1 %v475_v0  ;;  %v478_v3 = vld [vmem:[%s659_s0] sm:$0xff]   ;;  %v480_v5 = vld [vmem:[%s659_s0 + $0x8] sm:$0xff]   ;;  %v482_v7 = vld [vmem:[%s659_s0 + $0x10] sm:$0xff]  }
   0x3   :  { %448 = vmatpush3.bf16.msra.mxu0 %v475_v0  ;;  %472 = vmatpush3.bf16.msra.mxu1 %v475_v0  ;;  %v479_v4 = vld [vmem:[%s659_s0 + $0x20] sm:$0xff]   ;;  %v481_v6 = vld [vmem:[%s659_s0 + $0x28] sm:$0xff]   ;;  %v483_v8 = vld [vmem:[%s659_s0 + $0x30] sm:$0xff]  }
   0x4   :  { %449 = vmatprep.subr.bf16.mxu0 %v476_v1  ;;  %470 = vmatprep.subr.bf16.mxu1 %v476_v1  ;;  %v484_v9 = vld [vmem:[%s659_s0 + $0x18] sm:$0xff]   ;;  %v555_v11 = vld [vmem:[%s660_s2] ss:$0 sm:$0xff] }
   0x5   :  { %453 = vmatprep.mubr.msk.bf16.mxu0 %vm98_vm0, %v478_v3  ;;  %461 = vmatprep.mubr.msk.bf16.mxu1 %vm98_vm0, %v479_v4  ;;  %v485_v10 = vld [vmem:[%s659_s0 + $0x38] sm:$0xff]   ;;  %v560_v13 = vld [vmem:[%s661_s3] ss:$0 sm:$0xff] }
   0x7   :  { %450 = vmatpush3.bf16.msra.mxu0 %v476_v1  ;;  %473 = vmatpush3.bf16.msra.mxu1 %v476_v1 }
   0x8   :  { %451 = vmatprep.subr.bf16.mxu0 %v477_v2  ;;  %471 = vmatprep.subr.bf16.mxu1 %v477_v2 }
   0xb   :  { %452 = vmatpush3.bf16.msra.mxu0 %v477_v2  ;;  %474 = vmatpush3.bf16.msra.mxu1 %v477_v2 }
   0xe   :  { %454 = vmatmul.mubr.msk.bf16.vlgmr.msra.gmra.mrb[0].mxu0 %vm98_vm0, %v480_v5  ;;  %462 = vmatmul.mubr.msk.bf16.vlgmr.msra.gmra.mrb[0].mxu1 %vm98_vm0, %v481_v6 }
   0xf   :  { %457 = vmatprep.mubr.msk.bf16.mxu0 %vm98_vm0, %v482_v7  ;;  %465 = vmatprep.mubr.msk.bf16.mxu1 %vm98_vm0, %v483_v8 }
  0x16   :  { %458 = vmatmul.mubr.msk.bf16.gmra.mrb[4].mxu0 %vm98_vm0, %v484_v9  ;;  %466 = vmatmul.mubr.msk.bf16.gmra.mrb[4].mxu1 %vm98_vm0, %v485_v10 }
  0xe1   :  { %v455_v12 = vpop.f32.mrb[0].mxu0  ;;  %v463_v14 = vpop.f32.mrb[0].mxu1 }
  0xe2   :  { %v229_v15 = vmul.f32 %v455_v12, %v555_v11  ;;  %v237_v16 = vmul.f32 %v463_v14, %v555_v11  ;;  %v157_v17 = vpop.f32.mrb[1].mxu0  ;;  %v189_v18 = vpop.f32.mrb[1].mxu1 }
  0xe3   :  { %v227_v19 = vmul.f32 %v555_v11, %v157_v17  ;;  %v235_v20 = vmul.f32 %v555_v11, %v189_v18  ;;  %v456_v21 = vpop.f32.mrb[2].mxu0  ;;  %v464_v22 = vpop.f32.mrb[2].mxu1 }
  0xe4   :  { %v252_v23 = vadd.f32 %v560_v13, %v229_v15  ;;  %v260_v24 = vadd.f32 %v560_v13, %v237_v16  ;;  %v230_v25 = vmul.f32 %v456_v21, %v555_v11  ;;  %v238_v26 = vmul.f32 %v464_v22, %v555_v11  ;;  %v160_v27 = vpop.f32.mrb[3].mxu0  ;;  %v192_v28 = vpop.f32.mrb[3].mxu1 }
  0xe5   :  { %v250_v29 = vadd.f32 %v560_v13, %v227_v19  ;;  %v258_v30 = vadd.f32 %v560_v13, %v235_v20  ;;  %v228_v31 = vmul.f32 %v555_v11, %v160_v27  ;;  %v236_v32 = vmul.f32 %v555_v11, %v192_v28 }
  0xe6   :  { %v268_v33 = vmul.f32 0.1, %v252_v23  ;;  %v276_v34 = vmul.f32 0.1, %v260_v24  ;;  %v253_v35 = vadd.f32 %v560_v13, %v230_v25  ;;  %v261_v36 = vadd.f32 %v560_v13, %v238_v26 }
  0xe7   :  { %v266_v37 = vmul.f32 0.1, %v250_v29  ;;  %v274_v38 = vmul.f32 0.1, %v258_v30  ;;  %v251_v39 = vadd.f32 %v560_v13, %v228_v31  ;;  %v259_v40 = vadd.f32 %v560_v13, %v236_v32 }
  0xe8   :  { %v284_v41 = vmax.f32 %v252_v23, %v268_v33  ;;  %v292_v42 = vmax.f32 %v260_v24, %v276_v34  ;;  %v269_v43 = vmul.f32 0.1, %v253_v35  ;;  %v277_v44 = vmul.f32 0.1, %v261_v36 }
  0xe9   :  { %v282_v45 = vmax.f32 %v250_v29, %v266_v37  ;;  %v290_v46 = vmax.f32 %v258_v30, %v274_v38  ;;  %v267_v47 = vmul.f32 0.1, %v251_v39  ;;  %v275_v48 = vmul.f32 0.1, %v259_v40  ;;  %v459_v49 = vpop.f32.mrb[4].mxu0  ;;  %v467_v50 = vpop.f32.mrb[4].mxu1 }
  0xea   :  { %v422_v51 = vpack.c.bf16 %v284_v41, %v284_v41  ;;  %v430_v52 = vpack.c.bf16 %v292_v42, %v292_v42  ;;  %v285_v53 = vmax.f32 %v253_v35, %v269_v43  ;;  %v293_v54 = vmax.f32 %v261_v36, %v277_v44  ;;  %v173_v55 = vpop.f32.mrb[5].mxu0  ;;  %v205_v56 = vpop.f32.mrb[5].mxu1 }
  0xeb   :  { %v420_v57 = vpack.c.bf16 %v282_v45, %v282_v45  ;;  %v428_v58 = vpack.c.bf16 %v290_v46, %v290_v46  ;;  %v283_v59 = vmax.f32 %v251_v39, %v267_v47  ;;  %v291_v60 = vmax.f32 %v259_v40, %v275_v48  ;;  %v460_v61 = vpop.f32.mrb[6].mxu0  ;;  %v468_v62 = vpop.f32.mrb[6].mxu1 }
  0xec   :  { %365 = vst.msk [vmem:[%s662_s4 + $0x8] sm:$0xf] %vm362_vm1, %v422_v51  ;;  %373 = vst.msk [vmem:[%s662_s4 + $0x28] sm:$0xf] %vm362_vm1, %v430_v52  ;;  %v423_v63 = vpack.c.bf16 %v285_v53, %v285_v53  ;;  %v431_v0 = vpack.c.bf16 %v293_v54, %v293_v54  ;;  %v233_v1 = vmul.f32 %v459_v49, %v555_v11  ;;  %v176_v3 = vpop.f32.mrb[7].mxu0  ;;  %v208_v4 = vpop.f32.mrb[7].mxu1 }
  0xed   :  { %v241_v2 = vmul.f32 %v467_v50, %v555_v11  ;;  %363 = vst.msk [vmem:[%s662_s4] sm:$0xf] %vm362_vm1, %v420_v57  ;;  %371 = vst.msk [vmem:[%s662_s4 + $0x20] sm:$0xf] %vm362_vm1, %v428_v58  ;;  %v421_v5 = vpack.c.bf16 %v283_v59, %v283_v59  ;;  %v429_v6 = vpack.c.bf16 %v291_v60, %v291_v60 }
  0xee   :  { %v231_v7 = vmul.f32 %v555_v11, %v173_v55  ;;  %v239_v8 = vmul.f32 %v555_v11, %v205_v56  ;;  %366 = vst.msk [vmem:[%s662_s4 + $0xc] sm:$0xf] %vm362_vm1, %v423_v63  ;;  %374 = vst.msk [vmem:[%s662_s4 + $0x2c] sm:$0xf] %vm362_vm1, %v431_v0  ;;  %v256_v9 = vadd.f32 %v560_v13, %v233_v1 }
  0xef   :  { %v264_v10 = vadd.f32 %v560_v13, %v241_v2  ;;  %v234_v12 = vmul.f32 %v460_v61, %v555_v11  ;;  %v242_v14 = vmul.f32 %v468_v62, %v555_v11  ;;  %364 = vst.msk [vmem:[%s662_s4 + $0x4] sm:$0xf] %vm362_vm1, %v421_v5  ;;  %372 = vst.msk [vmem:[%s662_s4 + $0x24] sm:$0xf] %vm362_vm1, %v429_v6 }
  0xf0   :  { %v254_v15 = vadd.f32 %v560_v13, %v231_v7  ;;  %v262_v16 = vadd.f32 %v560_v13, %v239_v8  ;;  %v232_v17 = vmul.f32 %v555_v11, %v176_v3  ;;  %v240_v18 = vmul.f32 %v555_v11, %v208_v4 }
  0xf1   :  { %v272_v19 = vmul.f32 0.1, %v256_v9  ;;  %v280_v20 = vmul.f32 0.1, %v264_v10  ;;  %v257_v21 = vadd.f32 %v560_v13, %v234_v12  ;;  %v265_v22 = vadd.f32 %v560_v13, %v242_v14 }
  0xf2   :  { %v270_v23 = vmul.f32 0.1, %v254_v15  ;;  %v278_v24 = vmul.f32 0.1, %v262_v16  ;;  %v255_v25 = vadd.f32 %v560_v13, %v232_v17  ;;  %v263_v26 = vadd.f32 %v560_v13, %v240_v18 }
  0xf3   :  { %v288_v27 = vmax.f32 %v256_v9, %v272_v19  ;;  %v296_v28 = vmax.f32 %v264_v10, %v280_v20  ;;  %v273_v29 = vmul.f32 0.1, %v257_v21  ;;  %v281_v30 = vmul.f32 0.1, %v265_v22 }
  0xf4   :  { %v286_v31 = vmax.f32 %v254_v15, %v270_v23  ;;  %v294_v32 = vmax.f32 %v262_v16, %v278_v24  ;;  %v271_v33 = vmul.f32 0.1, %v255_v25  ;;  %v279_v11 = vmul.f32 0.1, %v263_v26 }
  0xf5   :  { %v426_v34 = vpack.c.bf16 %v288_v27, %v288_v27  ;;  %v434_v35 = vpack.c.bf16 %v296_v28, %v296_v28  ;;  %v289_v36 = vmax.f32 %v257_v21, %v273_v29  ;;  %v297_v37 = vmax.f32 %v265_v22, %v281_v30 }
  0xf6   :  { %v424_v38 = vpack.c.bf16 %v286_v31, %v286_v31  ;;  %v432_v39 = vpack.c.bf16 %v294_v32, %v294_v32  ;;  %v287_v40 = vmax.f32 %v255_v25, %v271_v33  ;;  %v295_v41 = vmax.f32 %v263_v26, %v279_v11 }
  0xf7   :  { %369 = vst.msk [vmem:[%s662_s4 + $0x18] sm:$0xf] %vm362_vm1, %v426_v34  ;;  %377 = vst.msk [vmem:[%s662_s4 + $0x38] sm:$0xf] %vm362_vm1, %v434_v35  ;;  %v427_v13 = vpack.c.bf16 %v289_v36, %v289_v36  ;;  %v435_v42 = vpack.c.bf16 %v297_v37, %v297_v37 }
  0xf8   :  { %367 = vst.msk [vmem:[%s662_s4 + $0x10] sm:$0xf] %vm362_vm1, %v424_v38  ;;  %375 = vst.msk [vmem:[%s662_s4 + $0x30] sm:$0xf] %vm362_vm1, %v432_v39  ;;  %v425_v43 = vpack.c.bf16 %v287_v40, %v287_v40  ;;  %v433_v44 = vpack.c.bf16 %v295_v41, %v295_v41 }
  0xf9   :  { %370 = vst.msk [vmem:[%s662_s4 + $0x1c] sm:$0xf] %vm362_vm1, %v427_v13  ;;  %378 = vst.msk [vmem:[%s662_s4 + $0x3c] sm:$0xf] %vm362_vm1, %v435_v42 }
  0xfa   :  { %368 = vst.msk [vmem:[%s662_s4 + $0x14] sm:$0xf] %vm362_vm1, %v425_v43  ;;  %376 = vst.msk [vmem:[%s662_s4 + $0x34] sm:$0xf] %vm362_vm1, %v433_v44 }

// kernel: _lambda_.32
= control target key start
LH: loop header
LB: loop body
LE: loop exit
PB: predicated region body
PF: predicated region fallthrough
CT: control target
= control target key end

     0   :  { %vm90_vm0 = vcmask 261120   ;;  %vm354_vm1 = vcmask 257024   ;;  %s640_s1 = inlined_call_operand.vmem [shape: bf16[32,32], index: 1, kind: input, shape index: {}]   ;;  %s641_s0 = inlined_call_operand.vmem [shape: bf16[128,32], index: 0, kind: input, shape index: {}]   ;;  %s642_s2 = inlined_call_operand.vmem [shape: f32[1,32], index: 2, kind: input, shape index: {}]   ;;  %s643_s3 = inlined_call_operand.vmem [shape: f32[1,32], index: 3, kind: input, shape index: {}]   ;;  %s644_s4 = inlined_call_operand.vmem [shape: bf16[128,32], index: 4, kind: output, shape index: {}]  }
   0x1   :  { %v461_v0 = vld [vmem:[%s640_s1] sm:$0xff]   ;;  %v462_v1 = vld [vmem:[%s640_s1 + $0x8] sm:$0xff]   ;;  %v467_v6 = vld [vmem:[%s641_s0 + $0x10] sm:$0xff]  }
   0x2   :  { %437 = vmatprep.subr.bf16.mxu0 %v461_v0  ;;  %457 = vmatprep.subr.bf16.mxu1 %v461_v0  ;;  %v463_v2 = vld [vmem:[%s641_s0] sm:$0xff]   ;;  %v465_v4 = vld [vmem:[%s641_s0 + $0x8] sm:$0xff]   ;;  %v468_v7 = vld [vmem:[%s641_s0 + $0x30] sm:$0xff]  }
   0x3   :  { %438 = vmatpush3.bf16.msra.mxu0 %v461_v0  ;;  %459 = vmatpush3.bf16.msra.mxu1 %v461_v0  ;;  %v464_v3 = vld [vmem:[%s641_s0 + $0x20] sm:$0xff]   ;;  %v466_v5 = vld [vmem:[%s641_s0 + $0x28] sm:$0xff]   ;;  %v469_v8 = vld [vmem:[%s641_s0 + $0x18] sm:$0xff]  }
   0x4   :  { %439 = vmatprep.subr.bf16.mxu0 %v462_v1  ;;  %458 = vmatprep.subr.bf16.mxu1 %v462_v1  ;;  %v470_v9 = vld [vmem:[%s641_s0 + $0x38] sm:$0xff]   ;;  %v537_v10 = vld [vmem:[%s642_s2] ss:$0 sm:$0xff] }
   0x5   :  { %441 = vmatprep.mubr.msk.bf16.mxu0 %vm90_vm0, %v463_v2  ;;  %449 = vmatprep.mubr.msk.bf16.mxu1 %vm90_vm0, %v464_v3  ;;  %v542_v12 = vld [vmem:[%s643_s3] ss:$0 sm:$0xff] }
   0x7   :  { %440 = vmatpush3.bf16.msra.mxu0 %v462_v1  ;;  %460 = vmatpush3.bf16.msra.mxu1 %v462_v1 }
   0xa   :  { %442 = vmatmul.mubr.msk.bf16.vlgmr.msra.gmra.mrb[0].mxu0 %vm90_vm0, %v465_v4  ;;  %450 = vmatmul.mubr.msk.bf16.vlgmr.msra.gmra.mrb[0].mxu1 %vm90_vm0, %v466_v5 }
   0xb   :  { %445 = vmatprep.mubr.msk.bf16.mxu0 %vm90_vm0, %v467_v6  ;;  %453 = vmatprep.mubr.msk.bf16.mxu1 %vm90_vm0, %v468_v7 }
  0x12   :  { %446 = vmatmul.mubr.msk.bf16.gmra.mrb[4].mxu0 %vm90_vm0, %v469_v8  ;;  %454 = vmatmul.mubr.msk.bf16.gmra.mrb[4].mxu1 %vm90_vm0, %v470_v9 }
  0xdd   :  { %v443_v11 = vpop.f32.mrb[0].mxu0  ;;  %v451_v13 = vpop.f32.mrb[0].mxu1 }
  0xde   :  { %v221_v14 = vmul.f32 %v443_v11, %v537_v10  ;;  %v229_v15 = vmul.f32 %v451_v13, %v537_v10  ;;  %v149_v16 = vpop.f32.mrb[1].mxu0  ;;  %v181_v17 = vpop.f32.mrb[1].mxu1 }
  0xdf   :  { %v219_v18 = vmul.f32 %v537_v10, %v149_v16  ;;  %v227_v19 = vmul.f32 %v537_v10, %v181_v17  ;;  %v444_v20 = vpop.f32.mrb[2].mxu0  ;;  %v452_v21 = vpop.f32.mrb[2].mxu1 }
  0xe0   :  { %v244_v22 = vadd.f32 %v542_v12, %v221_v14  ;;  %v252_v23 = vadd.f32 %v542_v12, %v229_v15  ;;  %v222_v24 = vmul.f32 %v444_v20, %v537_v10  ;;  %v230_v25 = vmul.f32 %v452_v21, %v537_v10  ;;  %v152_v26 = vpop.f32.mrb[3].mxu0  ;;  %v184_v27 = vpop.f32.mrb[3].mxu1 }
  0xe1   :  { %v242_v28 = vadd.f32 %v542_v12, %v219_v18  ;;  %v250_v29 = vadd.f32 %v542_v12, %v227_v19  ;;  %v220_v30 = vmul.f32 %v537_v10, %v152_v26  ;;  %v228_v31 = vmul.f32 %v537_v10, %v184_v27 }
  0xe2   :  { %v260_v32 = vmul.f32 0.1, %v244_v22  ;;  %v268_v33 = vmul.f32 0.1, %v252_v23  ;;  %v245_v34 = vadd.f32 %v542_v12, %v222_v24  ;;  %v253_v35 = vadd.f32 %v542_v12, %v230_v25 }
  0xe3   :  { %v258_v36 = vmul.f32 0.1, %v242_v28  ;;  %v266_v37 = vmul.f32 0.1, %v250_v29  ;;  %v243_v38 = vadd.f32 %v542_v12, %v220_v30  ;;  %v251_v39 = vadd.f32 %v542_v12, %v228_v31 }
  0xe4   :  { %v276_v40 = vmax.f32 %v244_v22, %v260_v32  ;;  %v284_v41 = vmax.f32 %v252_v23, %v268_v33  ;;  %v261_v42 = vmul.f32 0.1, %v245_v34  ;;  %v269_v43 = vmul.f32 0.1, %v253_v35 }
  0xe5   :  { %v274_v44 = vmax.f32 %v242_v28, %v258_v36  ;;  %v282_v45 = vmax.f32 %v250_v29, %v266_v37  ;;  %v259_v46 = vmul.f32 0.1, %v243_v38  ;;  %v267_v47 = vmul.f32 0.1, %v251_v39  ;;  %v447_v48 = vpop.f32.mrb[4].mxu0  ;;  %v455_v49 = vpop.f32.mrb[4].mxu1 }
  0xe6   :  { %v413_v50 = vpack.c.bf16 %v276_v40, %v276_v40  ;;  %v421_v51 = vpack.c.bf16 %v284_v41, %v284_v41  ;;  %v277_v52 = vmax.f32 %v245_v34, %v261_v42  ;;  %v285_v53 = vmax.f32 %v253_v35, %v269_v43  ;;  %v165_v54 = vpop.f32.mrb[5].mxu0  ;;  %v197_v55 = vpop.f32.mrb[5].mxu1 }
  0xe7   :  { %v411_v56 = vpack.c.bf16 %v274_v44, %v274_v44  ;;  %v419_v57 = vpack.c.bf16 %v282_v45, %v282_v45  ;;  %v275_v58 = vmax.f32 %v243_v38, %v259_v46  ;;  %v283_v59 = vmax.f32 %v251_v39, %v267_v47  ;;  %v448_v60 = vpop.f32.mrb[6].mxu0  ;;  %v456_v61 = vpop.f32.mrb[6].mxu1 }
  0xe8   :  { %357 = vst.msk [vmem:[%s644_s4 + $0x8] sm:$0xf] %vm354_vm1, %v413_v50  ;;  %365 = vst.msk [vmem:[%s644_s4 + $0x28] sm:$0xf] %vm354_vm1, %v421_v51  ;;  %v414_v62 = vpack.c.bf16 %v277_v52, %v277_v52  ;;  %v422_v63 = vpack.c.bf16 %v285_v53, %v285_v53  ;;  %v225_v0 = vmul.f32 %v447_v48, %v537_v10  ;;  %v168_v2 = vpop.f32.mrb[7].mxu0  ;;  %v200_v3 = vpop.f32.mrb[7].mxu1 }
  0xe9   :  { %v233_v1 = vmul.f32 %v455_v49, %v537_v10  ;;  %355 = vst.msk [vmem:[%s644_s4] sm:$0xf] %vm354_vm1, %v411_v56  ;;  %363 = vst.msk [vmem:[%s644_s4 + $0x20] sm:$0xf] %vm354_vm1, %v419_v57  ;;  %v412_v4 = vpack.c.bf16 %v275_v58, %v275_v58  ;;  %v420_v5 = vpack.c.bf16 %v283_v59, %v283_v59 }
  0xea   :  { %v223_v6 = vmul.f32 %v537_v10, %v165_v54  ;;  %v231_v7 = vmul.f32 %v537_v10, %v197_v55  ;;  %358 = vst.msk [vmem:[%s644_s4 + $0xc] sm:$0xf] %vm354_vm1, %v414_v62  ;;  %366 = vst.msk [vmem:[%s644_s4 + $0x2c] sm:$0xf] %vm354_vm1, %v422_v63  ;;  %v248_v8 = vadd.f32 %v542_v12, %v225_v0 }
  0xeb   :  { %v256_v9 = vadd.f32 %v542_v12, %v233_v1  ;;  %v226_v11 = vmul.f32 %v448_v60, %v537_v10  ;;  %v234_v13 = vmul.f32 %v456_v61, %v537_v10  ;;  %356 = vst.msk [vmem:[%s644_s4 + $0x4] sm:$0xf] %vm354_vm1, %v412_v4  ;;  %364 = vst.msk [vmem:[%s644_s4 + $0x24] sm:$0xf] %vm354_vm1, %v420_v5 }
  0xec   :  { %v246_v14 = vadd.f32 %v542_v12, %v223_v6  ;;  %v254_v15 = vadd.f32 %v542_v12, %v231_v7  ;;  %v224_v16 = vmul.f32 %v537_v10, %v168_v2  ;;  %v232_v17 = vmul.f32 %v537_v10, %v200_v3 }
  0xed   :  { %v264_v18 = vmul.f32 0.1, %v248_v8  ;;  %v272_v19 = vmul.f32 0.1, %v256_v9  ;;  %v249_v20 = vadd.f32 %v542_v12, %v226_v11  ;;  %v257_v21 = vadd.f32 %v542_v12, %v234_v13 }
  0xee   :  { %v262_v22 = vmul.f32 0.1, %v246_v14  ;;  %v270_v23 = vmul.f32 0.1, %v254_v15  ;;  %v247_v24 = vadd.f32 %v542_v12, %v224_v16  ;;  %v255_v25 = vadd.f32 %v542_v12, %v232_v17 }
  0xef   :  { %v280_v26 = vmax.f32 %v248_v8, %v264_v18  ;;  %v288_v27 = vmax.f32 %v256_v9, %v272_v19  ;;  %v265_v28 = vmul.f32 0.1, %v249_v20  ;;  %v273_v29 = vmul.f32 0.1, %v257_v21 }
  0xf0   :  { %v278_v30 = vmax.f32 %v246_v14, %v262_v22  ;;  %v286_v31 = vmax.f32 %v254_v15, %v270_v23  ;;  %v263_v32 = vmul.f32 0.1, %v247_v24  ;;  %v271_v10 = vmul.f32 0.1, %v255_v25 }
  0xf1   :  { %v417_v33 = vpack.c.bf16 %v280_v26, %v280_v26  ;;  %v425_v34 = vpack.c.bf16 %v288_v27, %v288_v27  ;;  %v281_v35 = vmax.f32 %v249_v20, %v265_v28  ;;  %v289_v36 = vmax.f32 %v257_v21, %v273_v29 }
  0xf2   :  { %v415_v37 = vpack.c.bf16 %v278_v30, %v278_v30  ;;  %v423_v38 = vpack.c.bf16 %v286_v31, %v286_v31  ;;  %v279_v39 = vmax.f32 %v247_v24, %v263_v32  ;;  %v287_v40 = vmax.f32 %v255_v25, %v271_v10 }
  0xf3   :  { %361 = vst.msk [vmem:[%s644_s4 + $0x18] sm:$0xf] %vm354_vm1, %v417_v33  ;;  %369 = vst.msk [vmem:[%s644_s4 + $0x38] sm:$0xf] %vm354_vm1, %v425_v34  ;;  %v418_v12 = vpack.c.bf16 %v281_v35, %v281_v35  ;;  %v426_v41 = vpack.c.bf16 %v289_v36, %v289_v36 }
  0xf4   :  { %359 = vst.msk [vmem:[%s644_s4 + $0x10] sm:$0xf] %vm354_vm1, %v415_v37  ;;  %367 = vst.msk [vmem:[%s644_s4 + $0x30] sm:$0xf] %vm354_vm1, %v423_v38  ;;  %v416_v42 = vpack.c.bf16 %v279_v39, %v279_v39  ;;  %v424_v43 = vpack.c.bf16 %v287_v40, %v287_v40 }
  0xf5   :  { %362 = vst.msk [vmem:[%s644_s4 + $0x1c] sm:$0xf] %vm354_vm1, %v418_v12  ;;  %370 = vst.msk [vmem:[%s644_s4 + $0x3c] sm:$0xf] %vm354_vm1, %v426_v41 }
  0xf6   :  { %360 = vst.msk [vmem:[%s644_s4 + $0x14] sm:$0xf] %vm354_vm1, %v416_v42  ;;  %368 = vst.msk [vmem:[%s644_s4 + $0x34] sm:$0xf] %vm354_vm1, %v424_v43 }

// kernel: _lambda_.34
= control target key start
LH: loop header
LB: loop body
LE: loop exit
PB: predicated region body
PF: predicated region fallthrough
CT: control target
= control target key end

     0   :  { %vm109_vm0 = vcmask 261120   ;;  %vm373_vm1 = vcmask 257024   ;;  %s712_s1 = inlined_call_operand.vmem [shape: bf16[32,32], index: 1, kind: input, shape index: {}]   ;;  %s713_s0 = inlined_call_operand.vmem [shape: bf16[128,32], index: 0, kind: input, shape index: {}]   ;;  %s714_s2 = inlined_call_operand.vmem [shape: f32[128,32], index: 2, kind: input, shape index: {}]   ;;  %s715_s3 = inlined_call_operand.vmem [shape: f32[1,32], index: 3, kind: input, shape index: {}]   ;;  %s716_s4 = inlined_call_operand.vmem [shape: f32[1,32], index: 4, kind: input, shape index: {}]   ;;  %s717_s5 = inlined_call_operand.vmem [shape: bf16[128,32], index: 5, kind: output, shape index: {}]  }
   0x1   :  { %v480_v0 = vld [vmem:[%s712_s1] sm:$0xff]   ;;  %v481_v1 = vld [vmem:[%s712_s1 + $0x8] sm:$0xff]   ;;  %v486_v6 = vld [vmem:[%s713_s0 + $0x10] sm:$0xff]  }
   0x2   :  { %456 = vmatprep.subr.bf16.mxu0 %v480_v0  ;;  %476 = vmatprep.subr.bf16.mxu1 %v480_v0  ;;  %v482_v2 = vld [vmem:[%s713_s0] sm:$0xff]   ;;  %v484_v4 = vld [vmem:[%s713_s0 + $0x8] sm:$0xff]   ;;  %v487_v7 = vld [vmem:[%s713_s0 + $0x30] sm:$0xff]  }
   0x3   :  { %457 = vmatpush3.bf16.msra.mxu0 %v480_v0  ;;  %478 = vmatpush3.bf16.msra.mxu1 %v480_v0  ;;  %v483_v3 = vld [vmem:[%s713_s0 + $0x20] sm:$0xff]   ;;  %v485_v5 = vld [vmem:[%s713_s0 + $0x28] sm:$0xff]   ;;  %v488_v8 = vld [vmem:[%s713_s0 + $0x18] sm:$0xff]  }
   0x4   :  { %458 = vmatprep.subr.bf16.mxu0 %v481_v1  ;;  %477 = vmatprep.subr.bf16.mxu1 %v481_v1  ;;  %v489_v9 = vld [vmem:[%s713_s0 + $0x38] sm:$0xff]   ;;  %v43_v10 = vld [vmem:[%s714_s2 + $0x10] sm:$0xff]  ;;  %v41_v12 = vld [vmem:[%s714_s2] sm:$0xff] }
   0x5   :  { %460 = vmatprep.mubr.msk.bf16.mxu0 %vm109_vm0, %v482_v2  ;;  %468 = vmatprep.mubr.msk.bf16.mxu1 %vm109_vm0, %v483_v3  ;;  %v51_v11 = vld [vmem:[%s714_s2 + $0x50] sm:$0xff]  ;;  %v49_v13 = vld [vmem:[%s714_s2 + $0x40] sm:$0xff]  ;;  %v44_v17 = vld [vmem:[%s714_s2 + $0x18] sm:$0xff] }
   0x6   :  { %v573_v15 = vld [vmem:[%s715_s3] ss:$0 sm:$0xff]  ;;  %v52_v18 = vld [vmem:[%s714_s2 + $0x58] sm:$0xff]  ;;  %v42_v23 = vld [vmem:[%s714_s2 + $0x8] sm:$0xff] }
   0x7   :  { %459 = vmatpush3.bf16.msra.mxu0 %v481_v1  ;;  %479 = vmatpush3.bf16.msra.mxu1 %v481_v1  ;;  %v50_v24 = vld [vmem:[%s714_s2 + $0x48] sm:$0xff]  ;;  %v590_v25 = vld [vmem:[%s716_s4] ss:$0 sm:$0xff]  ;;  %v47_v56 = vld [vmem:[%s714_s2 + $0x30] sm:$0xff] }
   0x8   :  { %v55_v58 = vld [vmem:[%s714_s2 + $0x70] sm:$0xff] }
   0xa   :  { %461 = vmatmul.mubr.msk.bf16.vlgmr.msra.gmra.mrb[0].mxu0 %vm109_vm0, %v484_v4  ;;  %469 = vmatmul.mubr.msk.bf16.vlgmr.msra.gmra.mrb[0].mxu1 %vm109_vm0, %v485_v5 }
   0xb   :  { %464 = vmatprep.mubr.msk.bf16.mxu0 %vm109_vm0, %v486_v6  ;;  %472 = vmatprep.mubr.msk.bf16.mxu1 %vm109_vm0, %v487_v7 }
  0x12   :  { %465 = vmatmul.mubr.msk.bf16.gmra.mrb[4].mxu0 %vm109_vm0, %v488_v8  ;;  %473 = vmatmul.mubr.msk.bf16.gmra.mrb[4].mxu1 %vm109_vm0, %v489_v9 }
  0xdd   :  { %v462_v14 = vpop.f32.mrb[0].mxu0  ;;  %v470_v16 = vpop.f32.mrb[0].mxu1 }
  0xde   :  { %v177_v19 = vadd.f32 %v462_v14, %v43_v10  ;;  %v209_v20 = vadd.f32 %v470_v16, %v51_v11  ;;  %v168_v21 = vpop.f32.mrb[1].mxu0  ;;  %v200_v22 = vpop.f32.mrb[1].mxu1 }
  0xdf   :  { %v169_v26 = vadd.f32 %v168_v21, %v41_v12  ;;  %v201_v27 = vadd.f32 %v200_v22, %v49_v13  ;;  %v463_v28 = vpop.f32.mrb[2].mxu0  ;;  %v471_v29 = vpop.f32.mrb[2].mxu1  ;;  %v45_v12 = vld [vmem:[%s714_s2 + $0x20] sm:$0xff]  ;;  %v48_v21 = vld [vmem:[%s714_s2 + $0x38] sm:$0xff] }
  0xe0   :  { %v240_v30 = vmul.f32 %v573_v15, %v177_v19  ;;  %v248_v31 = vmul.f32 %v573_v15, %v209_v20  ;;  %v180_v32 = vadd.f32 %v463_v28, %v44_v17  ;;  %v212_v33 = vadd.f32 %v471_v29, %v52_v18  ;;  %v171_v34 = vpop.f32.mrb[3].mxu0  ;;  %v203_v35 = vpop.f32.mrb[3].mxu1  ;;  %v53_v13 = vld [vmem:[%s714_s2 + $0x60] sm:$0xff]  ;;  %v56_v22 = vld [vmem:[%s714_s2 + $0x78] sm:$0xff]  ;;  %v46_v28 = vld [vmem:[%s714_s2 + $0x28] sm:$0xff] }
  0xe1   :  { %v238_v36 = vmul.f32 %v573_v15, %v169_v26  ;;  %v246_v37 = vmul.f32 %v573_v15, %v201_v27  ;;  %v172_v38 = vadd.f32 %v171_v34, %v42_v23  ;;  %v204_v39 = vadd.f32 %v203_v35, %v50_v24  ;;  %v54_v29 = vld [vmem:[%s714_s2 + $0x68] sm:$0xff] }
  0xe2   :  { %v263_v40 = vadd.f32 %v590_v25, %v240_v30  ;;  %v271_v41 = vadd.f32 %v590_v25, %v248_v31  ;;  %v241_v42 = vmul.f32 %v573_v15, %v180_v32  ;;  %v249_v43 = vmul.f32 %v573_v15, %v212_v33 }
  0xe3   :  { %v261_v44 = vadd.f32 %v590_v25, %v238_v36  ;;  %v269_v45 = vadd.f32 %v590_v25, %v246_v37  ;;  %v239_v46 = vmul.f32 %v573_v15, %v172_v38  ;;  %v247_v47 = vmul.f32 %v573_v15, %v204_v39 }
  0xe4   :  { %v279_v48 = vmul.f32 0.1, %v263_v40  ;;  %v287_v49 = vmul.f32 0.1, %v271_v41  ;;  %v264_v50 = vadd.f32 %v590_v25, %v241_v42  ;;  %v272_v51 = vadd.f32 %v590_v25, %v249_v43 }
  0xe5   :  { %v277_v52 = vmul.f32 0.1, %v261_v44  ;;  %v285_v53 = vmul.f32 0.1, %v269_v45  ;;  %v262_v54 = vadd.f32 %v590_v25, %v239_v46  ;;  %v270_v55 = vadd.f32 %v590_v25, %v247_v47  ;;  %v466_v57 = vpop.f32.mrb[4].mxu0  ;;  %v474_v59 = vpop.f32.mrb[4].mxu1 }
  0xe6   :  { %v295_v60 = vmax.f32 %v263_v40, %v279_v48  ;;  %v303_v61 = vmax.f32 %v271_v41, %v287_v49  ;;  %v280_v62 = vmul.f32 0.1, %v264_v50  ;;  %v288_v63 = vmul.f32 0.1, %v272_v51  ;;  %v184_v0 = vpop.f32.mrb[5].mxu0  ;;  %v216_v1 = vpop.f32.mrb[5].mxu1 }
  0xe7   :  { %v293_v2 = vmax.f32 %v261_v44, %v277_v52  ;;  %v301_v3 = vmax.f32 %v269_v45, %v285_v53  ;;  %v278_v4 = vmul.f32 0.1, %v262_v54  ;;  %v286_v5 = vmul.f32 0.1, %v270_v55  ;;  %v467_v6 = vpop.f32.mrb[6].mxu0  ;;  %v475_v7 = vpop.f32.mrb[6].mxu1 }
  0xe8   :  { %v432_v8 = vpack.c.bf16 %v295_v60, %v295_v60  ;;  %v440_v9 = vpack.c.bf16 %v303_v61, %v303_v61  ;;  %v296_v10 = vmax.f32 %v264_v50, %v280_v62  ;;  %v304_v11 = vmax.f32 %v272_v51, %v288_v63  ;;  %v187_v14 = vpop.f32.mrb[7].mxu0  ;;  %v219_v16 = vpop.f32.mrb[7].mxu1 }
  0xe9   :  { %v430_v17 = vpack.c.bf16 %v293_v2, %v293_v2  ;;  %v438_v18 = vpack.c.bf16 %v301_v3, %v301_v3  ;;  %v294_v19 = vmax.f32 %v262_v54, %v278_v4  ;;  %v302_v20 = vmax.f32 %v270_v55, %v286_v5 }
  0xea   :  { %376 = vst.msk [vmem:[%s717_s5 + $0x8] sm:$0xf] %vm373_vm1, %v432_v8  ;;  %384 = vst.msk [vmem:[%s717_s5 + $0x28] sm:$0xf] %vm373_vm1, %v440_v9  ;;  %v433_v23 = vpack.c.bf16 %v296_v10, %v296_v10  ;;  %v441_v24 = vpack.c.bf16 %v304_v11, %v304_v11  ;;  %v193_v26 = vadd.f32 %v466_v57, %v47_v56 }
  0xeb   :  { %v225_v27 = vadd.f32 %v474_v59, %v55_v58  ;;  %374 = vst.msk [vmem:[%s717_s5] sm:$0xf] %vm373_vm1, %v430_v17  ;;  %382 = vst.msk [vmem:[%s717_s5 + $0x20] sm:$0xf] %vm373_vm1, %v438_v18  ;;  %v431_v30 = vpack.c.bf16 %v294_v19, %v294_v19  ;;  %v439_v31 = vpack.c.bf16 %v302_v20, %v302_v20 }
  0xec   :  { %v185_v32 = vadd.f32 %v184_v0, %v45_v12  ;;  %v217_v33 = vadd.f32 %v216_v1, %v53_v13  ;;  %377 = vst.msk [vmem:[%s717_s5 + $0xc] sm:$0xf] %vm373_vm1, %v433_v23  ;;  %385 = vst.msk [vmem:[%s717_s5 + $0x2c] sm:$0xf] %vm373_vm1, %v441_v24  ;;  %v244_v34 = vmul.f32 %v573_v15, %v193_v26 }
  0xed   :  { %v252_v35 = vmul.f32 %v573_v15, %v225_v27  ;;  %v196_v36 = vadd.f32 %v467_v6, %v48_v21  ;;  %v228_v37 = vadd.f32 %v475_v7, %v56_v22  ;;  %375 = vst.msk [vmem:[%s717_s5 + $0x4] sm:$0xf] %vm373_vm1, %v431_v30  ;;  %383 = vst.msk [vmem:[%s717_s5 + $0x24] sm:$0xf] %vm373_vm1, %v439_v31 }
  0xee   :  { %v242_v38 = vmul.f32 %v573_v15, %v185_v32  ;;  %v250_v39 = vmul.f32 %v573_v15, %v217_v33  ;;  %v188_v40 = vadd.f32 %v187_v14, %v46_v28  ;;  %v220_v41 = vadd.f32 %v219_v16, %v54_v29 }
  0xef   :  { %v267_v42 = vadd.f32 %v590_v25, %v244_v34  ;;  %v275_v43 = vadd.f32 %v590_v25, %v252_v35  ;;  %v245_v44 = vmul.f32 %v573_v15, %v196_v36  ;;  %v253_v45 = vmul.f32 %v573_v15, %v228_v37 }
  0xf0   :  { %v265_v46 = vadd.f32 %v590_v25, %v242_v38  ;;  %v273_v47 = vadd.f32 %v590_v25, %v250_v39  ;;  %v243_v48 = vmul.f32 %v573_v15, %v188_v40  ;;  %v251_v49 = vmul.f32 %v573_v15, %v220_v41 }
  0xf1   :  { %v283_v50 = vmul.f32 0.1, %v267_v42  ;;  %v291_v51 = vmul.f32 0.1, %v275_v43  ;;  %v268_v52 = vadd.f32 %v590_v25, %v245_v44  ;;  %v276_v53 = vadd.f32 %v590_v25, %v253_v45 }
  0xf2   :  { %v281_v54 = vmul.f32 0.1, %v265_v46  ;;  %v289_v55 = vmul.f32 0.1, %v273_v47  ;;  %v266_v56 = vadd.f32 %v590_v25, %v243_v48  ;;  %v274_v57 = vadd.f32 %v590_v25, %v251_v49 }
  0xf3   :  { %v299_v58 = vmax.f32 %v267_v42, %v283_v50  ;;  %v307_v59 = vmax.f32 %v275_v43, %v291_v51  ;;  %v284_v60 = vmul.f32 0.1, %v268_v52  ;;  %v292_v61 = vmul.f32 0.1, %v276_v53 }
  0xf4   :  { %v297_v62 = vmax.f32 %v265_v46, %v281_v54  ;;  %v305_v63 = vmax.f32 %v273_v47, %v289_v55  ;;  %v282_v0 = vmul.f32 0.1, %v266_v56  ;;  %v290_v15 = vmul.f32 0.1, %v274_v57 }
  0xf5   :  { %v436_v1 = vpack.c.bf16 %v299_v58, %v299_v58  ;;  %v444_v2 = vpack.c.bf16 %v307_v59, %v307_v59  ;;  %v300_v3 = vmax.f32 %v268_v52, %v284_v60  ;;  %v308_v4 = vmax.f32 %v276_v53, %v292_v61 }
  0xf6   :  { %v434_v5 = vpack.c.bf16 %v297_v62, %v297_v62  ;;  %v442_v6 = vpack.c.bf16 %v305_v63, %v305_v63  ;;  %v298_v7 = vmax.f32 %v266_v56, %v282_v0  ;;  %v306_v8 = vmax.f32 %v274_v57, %v290_v15 }
  0xf7   :  { %380 = vst.msk [vmem:[%s717_s5 + $0x18] sm:$0xf] %vm373_vm1, %v436_v1  ;;  %388 = vst.msk [vmem:[%s717_s5 + $0x38] sm:$0xf] %vm373_vm1, %v444_v2  ;;  %v437_v25 = vpack.c.bf16 %v300_v3, %v300_v3  ;;  %v445_v9 = vpack.c.bf16 %v308_v4, %v308_v4 }
  0xf8   :  { %378 = vst.msk [vmem:[%s717_s5 + $0x10] sm:$0xf] %vm373_vm1, %v434_v5  ;;  %386 = vst.msk [vmem:[%s717_s5 + $0x30] sm:$0xf] %vm373_vm1, %v442_v6  ;;  %v435_v10 = vpack.c.bf16 %v298_v7, %v298_v7  ;;  %v443_v11 = vpack.c.bf16 %v306_v8, %v306_v8 }
  0xf9   :  { %381 = vst.msk [vmem:[%s717_s5 + $0x1c] sm:$0xf] %vm373_vm1, %v437_v25  ;;  %389 = vst.msk [vmem:[%s717_s5 + $0x3c] sm:$0xf] %vm373_vm1, %v445_v9 }
  0xfa   :  { %379 = vst.msk [vmem:[%s717_s5 + $0x14] sm:$0xf] %vm373_vm1, %v435_v10  ;;  %387 = vst.msk [vmem:[%s717_s5 + $0x34] sm:$0xf] %vm373_vm1, %v443_v11 }

// kernel: _lambda_.36
= control target key start
LH: loop header
LB: loop body
LE: loop exit
PB: predicated region body
PF: predicated region fallthrough
CT: control target
= control target key end

     0   :  { %s2466_s15 = smov 0   ;;  %s2904_s0 = inlined_call_operand.vmem [shape: f32[2,210,16], index: 0, kind: input, shape index: {}]   ;;  %s2905_s1 = inlined_call_operand.vmem [shape: bf16[144,16], index: 1, kind: input, shape index: {}]   ;;  %s2906_s2 = inlined_call_operand.vmem [shape: f32[1,16], index: 2, kind: input, shape index: {}]   ;;  %s2907_s3 = inlined_call_operand.vmem [shape: f32[1,16], index: 3, kind: input, shape index: {}]   ;;  %s2908_s4 = inlined_call_operand.vmem [shape: bf16[2,112,16], index: 4, kind: output, shape index: {}]  }
   0x1 LB: > { %s1745_s16 = sadd.s32 4294967295, %s2437_s15   ;;  %p1749_p0 = scmp.ge.s32.totalorder %s2437_s15, 1  ;;  %s2437_s15 = sphi %s2466_s15, %s14_s15  }
   0x2   : > { %p162_p1 = scmp.lt.s32.totalorder %s2437_s15, 3 }
   0x4   : > { %p163_p2 = pnand %p1749_p0, %p162_p1 }
   0x5   : > { %v2477_v0 = vld [vmem:[%s2905_s1 + $0x20] sm:$0xff] (!%p163_p2)   ;;  %v2439_v1 = vmov (!%p163_p2), 0.0   ;;  %v2423_v2 = vld [vmem:[%s2905_s1 + $0x8] sm:$0xff] (!%p163_p2)   ;;  %vm2440_vm0 = vmmov (!%p163_p2), 0   ;;  %p188_p3 = scmp.lt.s32.totalorder (!%p163_p2), %s1745_s16, 1  ;;  %vm251_vm1 = vcmask (!%p163_p2), 130048  }
   0x6   : > { %166 = sbr.rel (%p163_p2) target bundleno = 496 (0x1f0), region = 36  ;;  %2048 = vmatprep.subr.bf16.mxu0 (!%p163_p2), %v2439_v1  ;;  %1928 = vmatprep.subr.bf16.mxu1 (!%p163_p2), %v2439_v1  ;;  %v2424_v8 = vld [vmem:[%s2905_s1 + $0x28] sm:$0xff] (!%p163_p2)   ;;  %v2425_v10 = vld [vmem:[%s2905_s1] sm:$0xff] (!%p163_p2)   ;;  %v2426_v35 = vld [vmem:[%s2905_s1 + $0x30] sm:$0xff] (!%p163_p2)   ;;  %vm1675_vm2 = vcmask (!%p163_p2), 125952  }
   0x7   : > { %2049 = vmatpush3.bf16.msra.mxu0 (!%p163_p2), %v2477_v0  ;;  %1930 = vmatprep.mubr.msk.bf16.mxu1 (!%p163_p2), %vm2440_vm0, %v2439_v1  ;;  %v2427_v54 = vld [vmem:[%s2905_s1 + $0x10] sm:$0xff] (!%p163_p2)  }
   0x8   : > { %1929 = vmatpush3.bf16.msra.mxu1 (!%p163_p2), %v2423_v2  ;;  %2050 = vmatprep.mubr.msk.bf16.mxu0 (!%p163_p2), %vm2440_vm0, %v2439_v1 }
   0x9   : > { %2078 = vmatprep.subr.bf16.mxu0 (!%p163_p2), %v2439_v1  ;;  %1958 = vmatprep.subr.bf16.mxu1 (!%p163_p2), %v2439_v1 }
   0xd   : > { %s2910_s16 = smov (!%p188_p3, %s1745_s16), 1 }
   0xe   : > { %s2410_s21 = smul.u32 216, %s2910_s16 }
   0xf   : > { %s2411_s19 = smul.u32 56, %s2910_s16 }
  0x10   : > { %s2497_s24 = scalar_lea.vmem %s2904_s0, %s2410_s21 }
  0x11   : > { %v222_v3 = vld [vmem:[%s2497_s24 + $0x3] sm:$0xff]  ;;  %v223_v4 = vld [vmem:[%s2497_s24 + $0xb] sm:$0xff]  ;;  %v785_v7 = vld [vmem:[%s2497_s24 + $0x35] sm:$0xff]  ;;  %s2846_s22 = scalar_lea.vmem %s2908_s4, %s2411_s19 }
  0x12   : > { %v784_v5 = vld [vmem:[%s2497_s24 + $0x2d] sm:$0xff]  ;;  %v236_v6 = vpack.c.bf16 %v223_v4, %v222_v3  ;;  %v225_v12 = vld [vmem:[%s2497_s24 + $0x1b] sm:$0xff]  ;;  %v787_v14 = vld [vmem:[%s2497_s24 + $0x45] sm:$0xff] }
  0x13   : > { %v798_v9 = vpack.c.bf16 %v785_v7, %v784_v5  ;;  %v224_v11 = vld [vmem:[%s2497_s24 + $0x13] sm:$0xff]  ;;  %v786_v13 = vld [vmem:[%s2497_s24 + $0x3d] sm:$0xff]  ;;  %v227_v18 = vld [vmem:[%s2497_s24 + $0x2b] sm:$0xff] }
  0x14   : > { %1931 = vmatmul.mubr.msk.bf16.vlgmr.msra.gmra.mrb[0].mxu1 %vm251_vm1, %v236_v6  ;;  %v237_v15 = vpack.c.bf16 %v225_v12, %v224_v11  ;;  %v799_v16 = vpack.c.bf16 %v787_v14, %v786_v13  ;;  %v226_v17 = vld [vmem:[%s2497_s24 + $0x23] sm:$0xff]  ;;  %v788_v19 = vld [vmem:[%s2497_s24 + $0x4d] sm:$0xff]  ;;  %v789_v20 = vld [vmem:[%s2497_s24 + $0x55] sm:$0xff] }
  0x15   : > { %2051 = vmatmul.mubr.msk.bf16.vlgmr.msra.gmra.mrb[0].mxu0 %vm251_vm1, %v798_v9  ;;  %1934 = vmatprep.mubr.msk.bf16.mxu1 %vm2440_vm0, %v2439_v1  ;;  %v238_v21 = vpack.c.bf16 %v227_v18, %v226_v17  ;;  %v800_v22 = vpack.c.bf16 %v789_v20, %v788_v19  ;;  %v228_v23 = vld [vmem:[%s2497_s24 + $0x33] sm:$0xff]  ;;  %v229_v24 = vld [vmem:[%s2497_s24 + $0x3b] sm:$0xff]  ;;  %v791_v26 = vld [vmem:[%s2497_s24 + $0x65] sm:$0xff] }
  0x16   : > { %2079 = vmatpush3.bf16.msra.mxu0 %v2424_v8  ;;  %2054 = vmatprep.mubr.msk.bf16.mxu0 %vm2440_vm0, %v2439_v1  ;;  %v790_v25 = vld [vmem:[%s2497_s24 + $0x5d] sm:$0xff]  ;;  %v239_v27 = vpack.c.bf16 %v229_v24, %v228_v23  ;;  %v231_v30 = vld [vmem:[%s2497_s24 + $0x4b] sm:$0xff]  ;;  %v232_v36 = vld [vmem:[%s2497_s24 + $0x53] sm:$0xff] }
  0x17   : > { %1959 = vmatpush3.bf16.msra.mxu1 %v2425_v10  ;;  %2108 = vmatprep.subr.bf16.mxu0 %v2439_v1  ;;  %v801_v28 = vpack.c.bf16 %v791_v26, %v790_v25  ;;  %v230_v29 = vld [vmem:[%s2497_s24 + $0x43] sm:$0xff]  ;;  %v937_v31 = vld [vmem:[%s2497_s24 + $0x30] sm:$0xff]  ;;  %v938_v32 = vld [vmem:[%s2497_s24 + $0x38] sm:$0xff] }
  0x18   : > { %1988 = vmatprep.subr.bf16.mxu1 %v2439_v1  ;;  %v240_v33 = vpack.c.bf16 %v231_v30, %v230_v29  ;;  %v2551_v34 = vpack.c.bf16 %v938_v32, %v937_v31  ;;  %v233_v37 = vld [vmem:[%s2497_s24 + $0x5b] sm:$0xff]  ;;  %v940_v39 = vld [vmem:[%s2497_s24 + $0x48] sm:$0xff]  ;;  %v941_v44 = vld [vmem:[%s2497_s24 + $0x50] sm:$0xff] }
  0x19   : > { %v939_v38 = vld [vmem:[%s2497_s24 + $0x40] sm:$0xff]  ;;  %v241_v40 = vpack.c.bf16 %v233_v37, %v232_v36  ;;  %v235_v43 = vld [vmem:[%s2497_s24 + $0x6b] sm:$0xff]  ;;  %v942_v45 = vld [vmem:[%s2497_s24 + $0x58] sm:$0xff] }
  0x1a   : > { %v952_v41 = vpack.c.bf16 %v940_v39, %v939_v38  ;;  %v234_v42 = vld [vmem:[%s2497_s24 + $0x63] sm:$0xff]  ;;  %v953_v47 = vpack.c.bf16 %v942_v45, %v941_v44  ;;  %v201_v55 = vld [vmem:[%s2497_s24 + $0x10] sm:$0xff]  ;;  %v202_v56 = vld [vmem:[%s2497_s24 + $0x18] sm:$0xff] }
  0x1b   : > { %v242_v46 = vpack.c.bf16 %v235_v43, %v234_v42  ;;  %v199_v48 = vld [vmem:[%s2497_s24] sm:$0xff]  ;;  %v200_v49 = vld [vmem:[%s2497_s24 + $0x8] sm:$0xff]  ;;  %v945_v57 = vld [vmem:[%s2497_s24 + $0x70] sm:$0xff]  ;;  %v214_v59 = vpack.c.bf16 %v202_v56, %v201_v55 }
  0x1c   : > { %1935 = vmatmul.mubr.msk.bf16.gmra.mrb[4].mxu1 %vm251_vm1, %v237_v15  ;;  %v943_v50 = vld [vmem:[%s2497_s24 + $0x60] sm:$0xff]  ;;  %v944_v51 = vld [vmem:[%s2497_s24 + $0x68] sm:$0xff]  ;;  %v213_v52 = vpack.c.bf16 %v200_v49, %v199_v48  ;;  %v946_v58 = vld [vmem:[%s2497_s24 + $0x78] sm:$0xff] }
  0x1d   : > { %2055 = vmatmul.mubr.msk.bf16.gmra.mrb[4].mxu0 %vm251_vm1, %v799_v16  ;;  %1938 = vmatprep.mubr.msk.bf16.mxu1 %vm2440_vm0, %v2439_v1  ;;  %v954_v53 = vpack.c.bf16 %v944_v51, %v943_v50  ;;  %v955_v60 = vpack.c.bf16 %v946_v58, %v945_v57  ;;  %v203_v61 = vld [vmem:[%s2497_s24 + $0x20] sm:$0xff]  ;;  %v204_v62 = vld [vmem:[%s2497_s24 + $0x28] sm:$0xff]  ;;  %v949_v5 = vld [vmem:[%s2497_s24 + $0x90] sm:$0xff] }
  0x1e   : > { %2058 = vmatprep.mubr.msk.bf16.mxu0 %vm2440_vm0, %v2439_v1  ;;  %v947_v63 = vld [vmem:[%s2497_s24 + $0x80] sm:$0xff]  ;;  %v948_v2 = vld [vmem:[%s2497_s24 + $0x88] sm:$0xff]  ;;  %v215_v3 = vpack.c.bf16 %v204_v62, %v203_v61  ;;  %v950_v6 = vld [vmem:[%s2497_s24 + $0x98] sm:$0xff] }
  0x1f   : > { %v956_v4 = vpack.c.bf16 %v948_v2, %v947_v63  ;;  %v957_v7 = vpack.c.bf16 %v950_v6, %v949_v5  ;;  %v1090_v8 = vld [vmem:[%s2497_s24 + $0x54] sm:$0xff]  ;;  %v1091_v9 = vld [vmem:[%s2497_s24 + $0x5c] sm:$0xff]  ;;  %v1092_v12 = vld [vmem:[%s2497_s24 + $0x64] sm:$0xff] }
  0x20   : > { %v1104_v10 = vpack.c.bf16 %v1091_v9, %v1090_v8  ;;  %v2428_v11 = vld [vmem:[%s2905_s1 + $0x38] sm:$0xff]   ;;  %v1093_v13 = vld [vmem:[%s2497_s24 + $0x6c] sm:$0xff]  ;;  %v1096_v20 = vld [vmem:[%s2497_s24 + $0x84] sm:$0xff] }
  0x21   : > { %v1105_v14 = vpack.c.bf16 %v1093_v13, %v1092_v12  ;;  %v1094_v15 = vld [vmem:[%s2497_s24 + $0x74] sm:$0xff]  ;;  %v1095_v16 = vld [vmem:[%s2497_s24 + $0x7c] sm:$0xff]  ;;  %v478_v18 = vld [vmem:[%s2497_s24 + $0x6] sm:$0xff] }
  0x22   : > { %v1106_v17 = vpack.c.bf16 %v1095_v16, %v1094_v15  ;;  %v479_v19 = vld [vmem:[%s2497_s24 + $0xe] sm:$0xff]  ;;  %v2429_v24 = vld [vmem:[%s2905_s1 + $0x18] sm:$0xff]   ;;  %v482_v31 = vld [vmem:[%s2497_s24 + $0x26] sm:$0xff] }
  0x23   : > { %v480_v25 = vld [vmem:[%s2497_s24 + $0x16] sm:$0xff]  ;;  %v481_v26 = vld [vmem:[%s2497_s24 + $0x1e] sm:$0xff]  ;;  %v483_v32 = vld [vmem:[%s2497_s24 + $0x2e] sm:$0xff] }
  0x24   : > { %1939 = vmatmul.mubr.msk.bf16.gmra.mrb[8].mxu1 %vm251_vm1, %v238_v21  ;;  %v1097_v21 = vld [vmem:[%s2497_s24 + $0x8c] sm:$0xff]  ;;  %v493_v29 = vpack.c.bf16 %v481_v26, %v480_v25  ;;  %v484_v37 = vld [vmem:[%s2497_s24 + $0x36] sm:$0xff]  ;;  %v485_v38 = vld [vmem:[%s2497_s24 + $0x3e] sm:$0xff] }
  0x25   : > { %2059 = vmatmul.mubr.msk.bf16.gmra.mrb[8].mxu0 %vm251_vm1, %v800_v22  ;;  %1942 = vmatprep.mubr.msk.bf16.mxu1 %vm2440_vm0, %v2439_v1  ;;  %v492_v22 = vpack.c.bf16 %v479_v19, %v478_v18  ;;  %v1107_v23 = vpack.c.bf16 %v1097_v21, %v1096_v20  ;;  %v1102_v39 = vld [vmem:[%s2497_s24 + $0xb4] sm:$0xff]  ;;  %v486_v43 = vld [vmem:[%s2497_s24 + $0x46] sm:$0xff]  ;;  %v489_v51 = vld [vmem:[%s2497_s24 + $0x5e] sm:$0xff] }
  0x26   : > { %2062 = vmatprep.mubr.msk.bf16.mxu0 %vm2440_vm0, %v2439_v1  ;;  %v487_v44 = vld [vmem:[%s2497_s24 + $0x4e] sm:$0xff]  ;;  %v1243_v45 = vld [vmem:[%s2497_s24 + $0x57] sm:$0xff]  ;;  %v2430_v49 = vld [vmem:[%s2905_s1 + $0x40] sm:$0xff]  }
  0x27   : > { %v488_v50 = vld [vmem:[%s2497_s24 + $0x56] sm:$0xff]  ;;  %v490_v56 = vld [vmem:[%s2497_s24 + $0x66] sm:$0xff]  ;;  %v491_v57 = vld [vmem:[%s2497_s24 + $0x6e] sm:$0xff] }
  0x28   : > { %v1247_v58 = vld [vmem:[%s2497_s24 + $0x77] sm:$0xff]  ;;  %v631_v62 = vld [vmem:[%s2497_s24 + $0x2a] sm:$0xff]  ;;  %v1252_v9 = vld [vmem:[%s2497_s24 + $0x9f] sm:$0xff] }
  0x29   : > { %v632_v63 = vld [vmem:[%s2497_s24 + $0x32] sm:$0xff]  ;;  %v1249_v2 = vld [vmem:[%s2497_s24 + $0x87] sm:$0xff]  ;;  %v633_v6 = vld [vmem:[%s2497_s24 + $0x3a] sm:$0xff] }
  0x2a   : > { %v1251_v8 = vld [vmem:[%s2497_s24 + $0x97] sm:$0xff]  ;;  %v635_v12 = vld [vmem:[%s2497_s24 + $0x4a] sm:$0xff]  ;;  %v638_v18 = vld [vmem:[%s2497_s24 + $0x62] sm:$0xff] }
  0x2b   : > { %v636_v13 = vld [vmem:[%s2497_s24 + $0x52] sm:$0xff]  ;;  %v1256_v20 = vld [vmem:[%s2497_s24 + $0xbf] sm:$0xff] }
  0x2c   : > { %1943 = vmatmul.mubr.msk.bf16.gmra.mrb[12].mxu1 %vm251_vm1, %v239_v27  ;;  %v1098_v27 = vld [vmem:[%s2497_s24 + $0x94] sm:$0xff]  ;;  %v647_v15 = vpack.c.bf16 %v636_v13, %v635_v12 }
  0x2d   : > { %2063 = vmatmul.mubr.msk.bf16.gmra.mrb[12].mxu0 %vm251_vm1, %v801_v28  ;;  %1946 = vmatprep.mubr.msk.bf16.mxu1 %vm2440_vm0, %v2439_v1  ;;  %v1099_v28 = vld [vmem:[%s2497_s24 + $0x9c] sm:$0xff] }
  0x2e   : > { %2080 = vmatprep.mubr.msk.bf16.mxu0 %vm2440_vm0, %v2439_v1  ;;  %v1108_v30 = vpack.c.bf16 %v1099_v28, %v1098_v27  ;;  %v1255_v19 = vld [vmem:[%s2497_s24 + $0xb7] sm:$0xff]  ;;  %v642_v27 = vld [vmem:[%s2497_s24 + $0x82] sm:$0xff] }
  0x2f   : > { %v641_v26 = vld [vmem:[%s2497_s24 + $0x7a] sm:$0xff] }
  0x30   : > { %v650_v28 = vpack.c.bf16 %v642_v27, %v641_v26 }
  0x34   : > { %1947 = vmatmul.mubr.msk.bf16.gmra.mrb[16].mxu1 %vm251_vm1, %v240_v33  ;;  %v1100_v33 = vld [vmem:[%s2497_s24 + $0xa4] sm:$0xff] }
  0x35   : > { %2081 = vmatmul.mubr.msk.bf16.vlgmr.msra.gmra.mrb[0].mxu0 %vm251_vm1, %v2551_v34  ;;  %1950 = vmatprep.mubr.msk.bf16.mxu1 %vm2440_vm0, %v2439_v1 }
  0x36   : > { %2109 = vmatpush3.bf16.msra.mxu0 %v2426_v35  ;;  %2084 = vmatprep.mubr.msk.bf16.mxu0 %vm2440_vm0, %v2439_v1  ;;  %v494_v35 = vpack.c.bf16 %v483_v32, %v482_v31  ;;  %v792_v32 = vld [vmem:[%s2497_s24 + $0x6d] sm:$0xff] }
  0x37   : > { %2138 = vmatprep.subr.bf16.mxu0 %v2439_v1 }
  0x3c   : > { %1951 = vmatmul.mubr.msk.bf16.gmra.mrb[20].mxu1 %vm251_vm1, %v241_v40  ;;  %v1103_v40 = vld [vmem:[%s2497_s24 + $0xbc] sm:$0xff] }
  0x3d   : > { %2085 = vmatmul.mubr.msk.bf16.gmra.mrb[4].mxu0 %vm251_vm1, %v952_v41  ;;  %1954 = vmatprep.mubr.msk.bf16.mxu1 %vm2440_vm0, %v2439_v1  ;;  %v1110_v42 = vpack.c.bf16 %v1103_v40, %v1102_v39 }
  0x3e   : > { %2088 = vmatprep.mubr.msk.bf16.mxu0 %vm2440_vm0, %v2439_v1 }
  0x44   : > { %1955 = vmatmul.mubr.msk.bf16.gmra.mrb[24].mxu1 %vm251_vm1, %v242_v46  ;;  %v1244_v46 = vld [vmem:[%s2497_s24 + $0x5f] sm:$0xff] }
  0x45   : > { %2089 = vmatmul.mubr.msk.bf16.gmra.mrb[8].mxu0 %vm251_vm1, %v953_v47  ;;  %1960 = vmatprep.mubr.msk.bf16.mxu1 %vm2440_vm0, %v2439_v1  ;;  %v1257_v48 = vpack.c.bf16 %v1244_v46, %v1243_v45 }
  0x46   : > { %2092 = vmatprep.mubr.msk.bf16.mxu0 %vm2440_vm0, %v2439_v1 }
  0x4c   : > { %1961 = vmatmul.mubr.msk.bf16.vlgmr.msra.gmra.mrb[0].mxu1 %vm251_vm1, %v213_v52  ;;  %v1245_v52 = vld [vmem:[%s2497_s24 + $0x67] sm:$0xff] }
  0x4d   : > { %2093 = vmatmul.mubr.msk.bf16.gmra.mrb[12].mxu0 %vm251_vm1, %v954_v53  ;;  %1964 = vmatprep.mubr.msk.bf16.mxu1 %vm2440_vm0, %v2439_v1 }
  0x4e   : > { %2096 = vmatprep.mubr.msk.bf16.mxu0 %vm2440_vm0, %v2439_v1  ;;  %1989 = vmatpush3.bf16.msra.mxu1 %v2427_v54  ;;  %v497_v54 = vpack.c.bf16 %v489_v51, %v488_v50 }
  0x4f   : > { %2018 = vmatprep.subr.bf16.mxu1 %v2439_v1 }
  0x54   : > { %1965 = vmatmul.mubr.msk.bf16.gmra.mrb[4].mxu1 %vm251_vm1, %v214_v59  ;;  %v1248_v59 = vld [vmem:[%s2497_s24 + $0x7f] sm:$0xff] }
  0x55   : > { %2097 = vmatmul.mubr.msk.bf16.gmra.mrb[16].mxu0 %vm251_vm1, %v955_v60  ;;  %1968 = vmatprep.mubr.msk.bf16.mxu1 %vm2440_vm0, %v2439_v1  ;;  %v498_v60 = vpack.c.bf16 %v491_v57, %v490_v56  ;;  %v1259_v61 = vpack.c.bf16 %v1248_v59, %v1247_v58 }
  0x56   : > { %2100 = vmatprep.mubr.msk.bf16.mxu0 %vm2440_vm0, %v2439_v1 }
  0x5c   : > { %1969 = vmatmul.mubr.msk.bf16.gmra.mrb[8].mxu1 %vm251_vm1, %v215_v3  ;;  %v1250_v3 = vld [vmem:[%s2497_s24 + $0x8f] sm:$0xff] }
  0x5d   : > { %2101 = vmatmul.mubr.msk.bf16.gmra.mrb[20].mxu0 %vm251_vm1, %v956_v4  ;;  %1972 = vmatprep.mubr.msk.bf16.mxu1 %vm2440_vm0, %v2439_v1  ;;  %v645_v4 = vpack.c.bf16 %v632_v63, %v631_v62  ;;  %v1260_v5 = vpack.c.bf16 %v1250_v3, %v1249_v2 }
  0x5e   : > { %2104 = vmatprep.mubr.msk.bf16.mxu0 %vm2440_vm0, %v2439_v1 }
  0x64   : > { %1973 = vmatmul.mubr.msk.bf16.gmra.mrb[12].mxu1 %vm251_vm1, %v2551_v34  ;;  %v1101_v34 = vld [vmem:[%s2497_s24 + $0xac] sm:$0xff] }
  0x65   : > { %2105 = vmatmul.mubr.msk.bf16.gmra.mrb[24].mxu0 %vm251_vm1, %v957_v7  ;;  %1976 = vmatprep.mubr.msk.bf16.mxu1 %vm2440_vm0, %v2439_v1  ;;  %v1109_v36 = vpack.c.bf16 %v1101_v34, %v1100_v33  ;;  %v634_v7 = vld [vmem:[%s2497_s24 + $0x42] sm:$0xff]  ;;  %v793_v33 = vld [vmem:[%s2497_s24 + $0x75] sm:$0xff] }
  0x66   : > { %2110 = vmatprep.mubr.msk.bf16.mxu0 %vm2440_vm0, %v2439_v1  ;;  %v802_v34 = vpack.c.bf16 %v793_v33, %v792_v32 }
  0x6c   : > { %1977 = vmatmul.mubr.msk.bf16.gmra.mrb[16].mxu1 %vm251_vm1, %v952_v41  ;;  %v495_v41 = vpack.c.bf16 %v485_v38, %v484_v37  ;;  %v1404_v37 = vld [vmem:[%s2497_s24 + $0x9a] sm:$0xff]  ;;  %v1405_v38 = vld [vmem:[%s2497_s24 + $0xa2] sm:$0xff] }
  0x6d   : > { %2111 = vmatmul.mubr.msk.bf16.vlgmr.msra.gmra.mrb[0].mxu0 %vm251_vm1, %v1104_v10  ;;  %1980 = vmatprep.mubr.msk.bf16.mxu1 %vm2440_vm0, %v2439_v1  ;;  %v646_v10 = vpack.c.bf16 %v634_v7, %v633_v6  ;;  %v1414_v40 = vpack.c.bf16 %v1405_v38, %v1404_v37  ;;  %v2836_v7 = vld [vmem:[%s2907_s3] ss:$0 sm:$0xff] }
  0x6e   : > { %2139 = vmatpush3.bf16.msra.mxu0 %v2428_v11  ;;  %2114 = vmatprep.mubr.msk.bf16.mxu0 %vm2440_vm0, %v2439_v1  ;;  %v1261_v11 = vpack.c.bf16 %v1252_v9, %v1251_v8 }
  0x6f   : > { %2168 = vmatprep.subr.bf16.mxu0 %v2439_v1 }
  0x74   : > { %1981 = vmatmul.mubr.msk.bf16.gmra.mrb[20].mxu1 %vm251_vm1, %v953_v47  ;;  %v496_v47 = vpack.c.bf16 %v487_v44, %v486_v43  ;;  %v1406_v43 = vld [vmem:[%s2497_s24 + $0xaa] sm:$0xff]  ;;  %v1407_v44 = vld [vmem:[%s2497_s24 + $0xb2] sm:$0xff] }
  0x75   : > { %2115 = vmatmul.mubr.msk.bf16.gmra.mrb[4].mxu0 %vm251_vm1, %v1105_v14  ;;  %1984 = vmatprep.mubr.msk.bf16.mxu1 %vm2440_vm0, %v2439_v1  ;;  %v1254_v14 = vld [vmem:[%s2497_s24 + $0xaf] sm:$0xff]  ;;  %v1415_v46 = vpack.c.bf16 %v1407_v44, %v1406_v43 }
  0x76   : > { %2118 = vmatprep.mubr.msk.bf16.mxu0 %vm2440_vm0, %v2439_v1 }
  0x7c   : > { %1985 = vmatmul.mubr.msk.bf16.gmra.mrb[24].mxu1 %vm251_vm1, %v954_v53  ;;  %v1246_v53 = vld [vmem:[%s2497_s24 + $0x6f] sm:$0xff] }
  0x7d   : > { %2119 = vmatmul.mubr.msk.bf16.gmra.mrb[8].mxu0 %vm251_vm1, %v1106_v17  ;;  %1990 = vmatprep.mubr.msk.bf16.mxu1 %vm2440_vm0, %v2439_v1  ;;  %v1258_v55 = vpack.c.bf16 %v1246_v53, %v1245_v52  ;;  %v637_v17 = vld [vmem:[%s2497_s24 + $0x5a] sm:$0xff] }
  0x7e   : > { %2122 = vmatprep.mubr.msk.bf16.mxu0 %vm2440_vm0, %v2439_v1  ;;  %v648_v21 = vpack.c.bf16 %v638_v18, %v637_v17 }
  0x84   : > { %1991 = vmatmul.mubr.msk.bf16.vlgmr.msra.gmra.mrb[0].mxu1 %vm251_vm1, %v492_v22  ;;  %v1263_v22 = vpack.c.bf16 %v1256_v20, %v1255_v19 }
  0x85   : > { %2123 = vmatmul.mubr.msk.bf16.gmra.mrb[12].mxu0 %vm251_vm1, %v1107_v23  ;;  %1994 = vmatprep.mubr.msk.bf16.mxu1 %vm2440_vm0, %v2439_v1  ;;  %v639_v23 = vld [vmem:[%s2497_s24 + $0x6a] sm:$0xff] }
  0x86   : > { %2126 = vmatprep.mubr.msk.bf16.mxu0 %vm2440_vm0, %v2439_v1  ;;  %2019 = vmatpush3.bf16.msra.mxu1 %v2429_v24  ;;  %v640_v24 = vld [vmem:[%s2497_s24 + $0x72] sm:$0xff] }
  0x87   : > { %2198 = vmatprep.subr.bf16.mxu1 %v2439_v1  ;;  %v649_v25 = vpack.c.bf16 %v640_v24, %v639_v23 }
  0x8c   : > { %1995 = vmatmul.mubr.msk.bf16.gmra.mrb[4].mxu1 %vm251_vm1, %v493_v29  ;;  %v643_v29 = vld [vmem:[%s2497_s24 + $0x8a] sm:$0xff] }
  0x8d   : > { %2127 = vmatmul.mubr.msk.bf16.gmra.mrb[16].mxu0 %vm251_vm1, %v1108_v30  ;;  %1998 = vmatprep.mubr.msk.bf16.mxu1 %vm2440_vm0, %v2439_v1  ;;  %v644_v30 = vld [vmem:[%s2497_s24 + $0x92] sm:$0xff] }
  0x8e   : > { %2130 = vmatprep.mubr.msk.bf16.mxu0 %vm2440_vm0, %v2439_v1  ;;  %v651_v31 = vpack.c.bf16 %v644_v30, %v643_v29 }
  0x94   : > { %1999 = vmatmul.mubr.msk.bf16.gmra.mrb[8].mxu1 %vm251_vm1, %v494_v35  ;;  %v794_v35 = vld [vmem:[%s2497_s24 + $0x7d] sm:$0xff] }
  0x95   : > { %2131 = vmatmul.mubr.msk.bf16.gmra.mrb[20].mxu0 %vm251_vm1, %v1109_v36  ;;  %2002 = vmatprep.mubr.msk.bf16.mxu1 %vm2440_vm0, %v2439_v1  ;;  %v795_v36 = vld [vmem:[%s2497_s24 + $0x85] sm:$0xff] }
  0x96   : > { %2134 = vmatprep.mubr.msk.bf16.mxu0 %vm2440_vm0, %v2439_v1  ;;  %v803_v39 = vpack.c.bf16 %v795_v36, %v794_v35 }
  0x9c   : > { %2003 = vmatmul.mubr.msk.bf16.gmra.mrb[12].mxu1 %vm251_vm1, %v495_v41  ;;  %v796_v41 = vld [vmem:[%s2497_s24 + $0x8d] sm:$0xff] }
  0x9d   : > { %2135 = vmatmul.mubr.msk.bf16.gmra.mrb[24].mxu0 %vm251_vm1, %v1110_v42  ;;  %2006 = vmatprep.mubr.msk.bf16.mxu1 %vm2440_vm0, %v2439_v1  ;;  %v797_v42 = vld [vmem:[%s2497_s24 + $0x95] sm:$0xff] }
  0x9e   : > { %2140 = vmatprep.mubr.msk.bf16.mxu0 %vm2440_vm0, %v2439_v1  ;;  %v804_v45 = vpack.c.bf16 %v797_v42, %v796_v41 }
  0xa4   : > { %2007 = vmatmul.mubr.msk.bf16.gmra.mrb[16].mxu1 %vm251_vm1, %v496_v47  ;;  %v1408_v47 = vld [vmem:[%s2497_s24 + $0xba] sm:$0xff] }
  0xa5   : > { %2141 = vmatmul.mubr.msk.bf16.vlgmr.msra.gmra.mrb[0].mxu0 %vm251_vm1, %v1257_v48  ;;  %2010 = vmatprep.mubr.msk.bf16.mxu1 %vm2440_vm0, %v2439_v1  ;;  %v1409_v48 = vld [vmem:[%s2497_s24 + $0xc2] sm:$0xff] }
  0xa6   : > { %2169 = vmatpush3.bf16.msra.mxu0 %v2430_v49  ;;  %2144 = vmatprep.mubr.msk.bf16.mxu0 %vm2440_vm0, %v2439_v1  ;;  %v1416_v49 = vpack.c.bf16 %v1409_v48, %v1408_v47 }
  0xac   : > { %2011 = vmatmul.mubr.msk.bf16.gmra.mrb[20].mxu1 %vm251_vm1, %v497_v54 }
  0xad   : > { %2145 = vmatmul.mubr.msk.bf16.gmra.mrb[4].mxu0 %vm251_vm1, %v1258_v55  ;;  %2014 = vmatprep.mubr.msk.bf16.mxu1 %vm2440_vm0, %v2439_v1 }
  0xae   : > { %2148 = vmatprep.mubr.msk.bf16.mxu0 %vm2440_vm0, %v2439_v1 }
  0xb4   : > { %2015 = vmatmul.mubr.msk.bf16.gmra.mrb[24].mxu1 %vm251_vm1, %v498_v60 }
  0xb5   : > { %2149 = vmatmul.mubr.msk.bf16.gmra.mrb[8].mxu0 %vm251_vm1, %v1259_v61  ;;  %2020 = vmatprep.mubr.msk.bf16.mxu1 %vm2440_vm0, %v2439_v1 }
  0xb6   : > { %2152 = vmatprep.mubr.msk.bf16.mxu0 %vm2440_vm0, %v2439_v1 }
  0xbc   : > { %2021 = vmatmul.mubr.msk.bf16.vlgmr.msra.gmra.mrb[0].mxu1 %vm251_vm1, %v645_v4  ;;  %v2831_v4 = vld [vmem:[%s2906_s2] ss:$0 sm:$0xff] }
  0xbd   : > { %2153 = vmatmul.mubr.msk.bf16.gmra.mrb[12].mxu0 %vm251_vm1, %v1260_v5  ;;  %2024 = vmatprep.mubr.msk.bf16.mxu1 %vm2440_vm0, %v2439_v1 }
  0xbe   : > { %2156 = vmatprep.mubr.msk.bf16.mxu0 %vm2440_vm0, %v2439_v1  ;;  %2199 = vmatpush3.bf16.msra.mxu1 %v2477_v0  ;;  %v1253_v0 = vld [vmem:[%s2497_s24 + $0xa7] sm:$0xff] }
  0xbf   : > { %v1262_v16 = vpack.c.bf16 %v1254_v14, %v1253_v0 }
  0xc4   : > { %2025 = vmatmul.mubr.msk.bf16.gmra.mrb[4].mxu1 %vm251_vm1, %v646_v10 }
  0xc5   : > { %2157 = vmatmul.mubr.msk.bf16.gmra.mrb[16].mxu0 %vm251_vm1, %v1261_v11  ;;  %2028 = vmatprep.mubr.msk.bf16.mxu1 %vm2440_vm0, %v2439_v1 }
  0xc6   : > { %2160 = vmatprep.mubr.msk.bf16.mxu0 %vm2440_vm0, %v2439_v1 }
  0xcc   : > { %2029 = vmatmul.mubr.msk.bf16.gmra.mrb[8].mxu1 %vm251_vm1, %v647_v15 }
  0xcd   : > { %2161 = vmatmul.mubr.msk.bf16.gmra.mrb[20].mxu0 %vm251_vm1, %v1262_v16  ;;  %2032 = vmatprep.mubr.msk.bf16.mxu1 %vm2440_vm0, %v2439_v1 }
  0xce   : > { %2164 = vmatprep.mubr.msk.bf16.mxu0 %vm2440_vm0, %v2439_v1 }
  0xd4   : > { %2033 = vmatmul.mubr.msk.bf16.gmra.mrb[12].mxu1 %vm251_vm1, %v648_v21 }
  0xd5   : > { %2165 = vmatmul.mubr.msk.bf16.gmra.mrb[24].mxu0 %vm251_vm1, %v1263_v22  ;;  %2036 = vmatprep.mubr.msk.bf16.mxu1 %vm2440_vm0, %v2439_v1 }
  0xd6   : > { %2170 = vmatprep.mubr.msk.bf16.mxu0 %vm2440_vm0, %v2439_v1 }
  0xdc   : > { %2037 = vmatmul.mubr.msk.bf16.gmra.mrb[16].mxu1 %vm251_vm1, %v649_v25 }
  0xdd   : > { %2171 = vmatmul.mubr.msk.bf16.vlgmr.msra.gmra.mrb[0].mxu0 %vm251_vm1, %v648_v21  ;;  %2040 = vmatprep.mubr.msk.bf16.mxu1 %vm2440_vm0, %v2439_v1 }
  0xde   : > { %2174 = vmatprep.mubr.msk.bf16.mxu0 %vm2440_vm0, %v2439_v1 }
  0xe4   : > { %2041 = vmatmul.mubr.msk.bf16.gmra.mrb[20].mxu1 %vm251_vm1, %v650_v28 }
  0xe5   : > { %2175 = vmatmul.mubr.msk.bf16.gmra.mrb[4].mxu0 %vm251_vm1, %v649_v25  ;;  %2044 = vmatprep.mubr.msk.bf16.mxu1 %vm2440_vm0, %v2439_v1 }
  0xe6   : > { %2178 = vmatprep.mubr.msk.bf16.mxu0 %vm2440_vm0, %v2439_v1 }
  0xec   : > { %2045 = vmatmul.mubr.msk.bf16.gmra.mrb[24].mxu1 %vm251_vm1, %v651_v31 }
  0xed   : > { %2179 = vmatmul.mubr.msk.bf16.gmra.mrb[8].mxu0 %vm251_vm1, %v650_v28  ;;  %2066 = vmatprep.mubr.msk.bf16.mxu1 %vm2440_vm0, %v2439_v1 }
  0xee   : > { %2182 = vmatprep.mubr.msk.bf16.mxu0 %vm2440_vm0, %v2439_v1 }
  0xf4   : > { %2067 = vmatmul.mubr.msk.bf16.vlgmr.msra.gmra.mrb[16].mxu1 %vm251_vm1, %v802_v34 }
  0xf5   : > { %2183 = vmatmul.mubr.msk.bf16.gmra.mrb[12].mxu0 %vm251_vm1, %v651_v31  ;;  %2070 = vmatprep.mubr.msk.bf16.mxu1 %vm2440_vm0, %v2439_v1 }
  0xf6   : > { %2186 = vmatprep.mubr.msk.bf16.mxu0 %vm2440_vm0, %v2439_v1 }
  0xfc   : > { %2071 = vmatmul.mubr.msk.bf16.gmra.mrb[20].mxu1 %vm251_vm1, %v803_v39 }
  0xfd   : > { %2187 = vmatmul.mubr.msk.bf16.gmra.mrb[16].mxu0 %vm251_vm1, %v1414_v40  ;;  %2074 = vmatprep.mubr.msk.bf16.mxu1 %vm2440_vm0, %v2439_v1 }
  0xfe   : > { %2190 = vmatprep.mubr.msk.bf16.mxu0 %vm2440_vm0, %v2439_v1 }
 0x104   : > { %2075 = vmatmul.mubr.msk.bf16.gmra.mrb[24].mxu1 %vm251_vm1, %v804_v45 }
 0x105   : > { %2191 = vmatmul.mubr.msk.bf16.gmra.mrb[20].mxu0 %vm251_vm1, %v1415_v46 }
 0x106   : > { %2194 = vmatprep.mubr.msk.bf16.mxu0 %vm2440_vm0, %v2439_v1 }
 0x10d   : > { %2195 = vmatmul.mubr.msk.bf16.gmra.mrb[24].mxu0 %vm251_vm1, %v1416_v49 }
 0x18f   : > { %v715_v50 = vpop.f32.mrb[0].mxu1 }
 0x190   : > { %v2022_v51 = vpop.f32.mrb[1].mxu1 }
 0x191   : > { %v718_v52 = vpop.f32.mrb[2].mxu1 }
 0x192   : > { %v2023_v53 = vpop.f32.mrb[3].mxu1 }
 0x197   : > { %v723_v54 = vpop.f32.mrb[4].mxu1 }
 0x198   : > { %v2026_v55 = vpop.f32.mrb[5].mxu1 }
 0x199   : > { %v726_v56 = vpop.f32.mrb[6].mxu1 }
 0x19a   : > { %v2027_v57 = vpop.f32.mrb[7].mxu1 }
 0x19f   : > { %v731_v58 = vpop.f32.mrb[8].mxu1 }
 0x1a0   : > { %v2030_v59 = vpop.f32.mrb[9].mxu1 }
 0x1a1   : > { %v734_v60 = vpop.f32.mrb[10].mxu1 }
 0x1a2   : > { %v2031_v61 = vpop.f32.mrb[11].mxu1 }
 0x1a7   : > { %v739_v62 = vpop.f32.mrb[12].mxu1 }
 0x1a8   : > { %v2034_v1 = vpop.f32.mrb[13].mxu1 }
 0x1a9   : > { %v2826_v63 = vpop.f32.mrb[14].mxu1 }
 0x1aa   : > { %v2035_v2 = vpop.f32.mrb[15].mxu1 }
 0x1b0   : > { %v1480_v3 = vpop.f32.mrb[0].mxu0 }
 0x1b1   : > { %v2200_v5 = vadd.f32 %v1480_v3, %v715_v50  ;;  %v2172_v6 = vpop.f32.mrb[1].mxu0 }
 0x1b2   : > { %v1483_v8 = vpop.f32.mrb[2].mxu0 }
 0x1b3   : > { %v1556_v9 = vmul.f32 %v2200_v5, %v2831_v4  ;;  %v2201_v10 = vadd.f32 %v1483_v8, %v718_v52  ;;  %v2173_v11 = vpop.f32.mrb[3].mxu0 }
 0x1b5   : > { %v1577_v12 = vadd.f32 %v2836_v7, %v1556_v9  ;;  %v1557_v13 = vmul.f32 %v2201_v10, %v2831_v4 }
 0x1b7   : > { %v1591_v0 = vmul.f32 0.1, %v1577_v12  ;;  %v1578_v14 = vadd.f32 %v2836_v7, %v1557_v13 }
 0x1b8   : > { %v1488_v15 = vpop.f32.mrb[4].mxu0 }
 0x1b9   : > { %v1605_v16 = vmax.f32 %v1577_v12, %v1591_v0  ;;  %v1592_v17 = vmul.f32 0.1, %v1578_v14  ;;  %v2202_v18 = vadd.f32 %v1488_v15, %v723_v54  ;;  %v2176_v19 = vpop.f32.mrb[5].mxu0 }
 0x1ba   : > { %v1491_v20 = vpop.f32.mrb[6].mxu0 }
 0x1bb   : > { %v1842_v21 = vpack.c.bf16 %v1605_v16, %v1605_v16  ;;  %v1606_v22 = vmax.f32 %v1578_v14, %v1592_v17  ;;  %v1558_v23 = vmul.f32 %v2202_v18, %v2831_v4  ;;  %v2203_v24 = vadd.f32 %v1491_v20, %v726_v56  ;;  %v2177_v25 = vpop.f32.mrb[7].mxu0 }
 0x1bd   : > { %1676 = vst.msk [vmem:[%s2846_s22] sm:$0xf] %vm1675_vm2, %v1842_v21  ;;  %v1843_v26 = vpack.c.bf16 %v1606_v22, %v1606_v22  ;;  %v1579_v27 = vadd.f32 %v2836_v7, %v1558_v23  ;;  %v1559_v28 = vmul.f32 %v2203_v24, %v2831_v4 }
 0x1bf   : > { %1677 = vst.msk [vmem:[%s2846_s22 + $0x4] sm:$0xf] %vm1675_vm2, %v1843_v26  ;;  %v1593_v29 = vmul.f32 0.1, %v1579_v27  ;;  %v1580_v30 = vadd.f32 %v2836_v7, %v1559_v28 }
 0x1c0   : > { %v1496_v31 = vpop.f32.mrb[8].mxu0 }
 0x1c1   : > { %v1607_v32 = vmax.f32 %v1579_v27, %v1593_v29  ;;  %v1594_v33 = vmul.f32 0.1, %v1580_v30  ;;  %v2204_v34 = vadd.f32 %v1496_v31, %v731_v58  ;;  %v2180_v35 = vpop.f32.mrb[9].mxu0 }
 0x1c2   : > { %v1499_v36 = vpop.f32.mrb[10].mxu0 }
 0x1c3   : > { %v1844_v37 = vpack.c.bf16 %v1607_v32, %v1607_v32  ;;  %v1608_v38 = vmax.f32 %v1580_v30, %v1594_v33  ;;  %v1560_v39 = vmul.f32 %v2204_v34, %v2831_v4  ;;  %v2205_v40 = vadd.f32 %v1499_v36, %v734_v60  ;;  %v2181_v41 = vpop.f32.mrb[11].mxu0 }
 0x1c5   : > { %1678 = vst.msk [vmem:[%s2846_s22 + $0x8] sm:$0xf] %vm1675_vm2, %v1844_v37  ;;  %v1845_v42 = vpack.c.bf16 %v1608_v38, %v1608_v38  ;;  %v1581_v43 = vadd.f32 %v2836_v7, %v1560_v39  ;;  %v1561_v44 = vmul.f32 %v2205_v40, %v2831_v4 }
 0x1c7   : > { %1679 = vst.msk [vmem:[%s2846_s22 + $0xc] sm:$0xf] %vm1675_vm2, %v1845_v42  ;;  %v1595_v45 = vmul.f32 0.1, %v1581_v43  ;;  %v1582_v46 = vadd.f32 %v2836_v7, %v1561_v44  ;;  %v900_v47 = vpop.f32.mrb[16].mxu1 }
 0x1c8   : > { %v1504_v48 = vpop.f32.mrb[12].mxu0  ;;  %v2068_v49 = vpop.f32.mrb[17].mxu1 }
 0x1c9   : > { %v1609_v50 = vmax.f32 %v1581_v43, %v1595_v45  ;;  %v1596_v51 = vmul.f32 0.1, %v1582_v46  ;;  %v2206_v52 = vadd.f32 %v1504_v48, %v739_v62  ;;  %v2184_v53 = vpop.f32.mrb[13].mxu0  ;;  %v903_v54 = vpop.f32.mrb[18].mxu1 }
 0x1ca   : > { %v1507_v55 = vpop.f32.mrb[14].mxu0  ;;  %v2069_v56 = vpop.f32.mrb[19].mxu1 }
 0x1cb   : > { %v1846_v57 = vpack.c.bf16 %v1609_v50, %v1609_v50  ;;  %v1610_v58 = vmax.f32 %v1582_v46, %v1596_v51  ;;  %v1562_v59 = vmul.f32 %v2206_v52, %v2831_v4  ;;  %v2207_v60 = vadd.f32 %v1507_v55, %v2826_v63  ;;  %v2185_v61 = vpop.f32.mrb[15].mxu0 }
 0x1cd   : > { %1680 = vst.msk [vmem:[%s2846_s22 + $0x10] sm:$0xf] %vm1675_vm2, %v1846_v57  ;;  %v1847_v1 = vpack.c.bf16 %v1610_v58, %v1610_v58  ;;  %v1583_v2 = vadd.f32 %v2836_v7, %v1562_v59  ;;  %v1563_v3 = vmul.f32 %v2207_v60, %v2831_v4 }
 0x1cf   : > { %1681 = vst.msk [vmem:[%s2846_s22 + $0x14] sm:$0xf] %vm1675_vm2, %v1847_v1  ;;  %v1597_v62 = vmul.f32 0.1, %v1583_v2  ;;  %v1584_v5 = vadd.f32 %v2836_v7, %v1563_v3  ;;  %v908_v6 = vpop.f32.mrb[20].mxu1 }
 0x1d0   : > { %v1512_v8 = vpop.f32.mrb[16].mxu0  ;;  %v2072_v9 = vpop.f32.mrb[21].mxu1 }
 0x1d1   : > { %v1611_v10 = vmax.f32 %v1583_v2, %v1597_v62  ;;  %v1598_v63 = vmul.f32 0.1, %v1584_v5  ;;  %v2208_v11 = vadd.f32 %v1512_v8, %v900_v47  ;;  %v2188_v12 = vpop.f32.mrb[17].mxu0  ;;  %v911_v13 = vpop.f32.mrb[22].mxu1 }
 0x1d2   : > { %v1515_v0 = vpop.f32.mrb[18].mxu0  ;;  %v2073_v14 = vpop.f32.mrb[23].mxu1 }
 0x1d3   : > { %v1848_v15 = vpack.c.bf16 %v1611_v10, %v1611_v10  ;;  %v1612_v16 = vmax.f32 %v1584_v5, %v1598_v63  ;;  %v1564_v17 = vmul.f32 %v2208_v11, %v2831_v4  ;;  %v2209_v18 = vadd.f32 %v1515_v0, %v903_v54  ;;  %v2189_v19 = vpop.f32.mrb[19].mxu0 }
 0x1d5   : > { %1682 = vst.msk [vmem:[%s2846_s22 + $0x18] sm:$0xf] %vm1675_vm2, %v1848_v15  ;;  %v1849_v20 = vpack.c.bf16 %v1612_v16, %v1612_v16  ;;  %v1585_v21 = vadd.f32 %v2836_v7, %v1564_v17  ;;  %v1565_v22 = vmul.f32 %v2209_v18, %v2831_v4 }
 0x1d7   : > { %1683 = vst.msk [vmem:[%s2846_s22 + $0x1c] sm:$0xf] %vm1675_vm2, %v1849_v20  ;;  %v1599_v23 = vmul.f32 0.1, %v1585_v21  ;;  %v1586_v24 = vadd.f32 %v2836_v7, %v1565_v22  ;;  %v916_v25 = vpop.f32.mrb[24].mxu1 }
 0x1d8   : > { %v1520_v26 = vpop.f32.mrb[20].mxu0  ;;  %v2076_v27 = vpop.f32.mrb[25].mxu1 }
 0x1d9   : > { %v1613_v28 = vmax.f32 %v1585_v21, %v1599_v23  ;;  %v1600_v29 = vmul.f32 0.1, %v1586_v24  ;;  %v2210_v30 = vadd.f32 %v1520_v26, %v908_v6  ;;  %v2192_v31 = vpop.f32.mrb[21].mxu0  ;;  %v919_v32 = vpop.f32.mrb[26].mxu1 }
 0x1da   : > { %v1523_v33 = vpop.f32.mrb[22].mxu0  ;;  %v2077_v34 = vpop.f32.mrb[27].mxu1 }
 0x1db   : > { %v1850_v35 = vpack.c.bf16 %v1613_v28, %v1613_v28  ;;  %v1614_v36 = vmax.f32 %v1586_v24, %v1600_v29  ;;  %v1566_v37 = vmul.f32 %v2210_v30, %v2831_v4  ;;  %v2211_v38 = vadd.f32 %v1523_v33, %v911_v13  ;;  %v2193_v39 = vpop.f32.mrb[23].mxu0 }
 0x1dd   : > { %1684 = vst.msk [vmem:[%s2846_s22 + $0x20] sm:$0xf] %vm1675_vm2, %v1850_v35  ;;  %v1851_v40 = vpack.c.bf16 %v1614_v36, %v1614_v36  ;;  %v1587_v41 = vadd.f32 %v2836_v7, %v1566_v37  ;;  %v1567_v42 = vmul.f32 %v2211_v38, %v2831_v4 }
 0x1df   : > { %1685 = vst.msk [vmem:[%s2846_s22 + $0x24] sm:$0xf] %vm1675_vm2, %v1851_v40  ;;  %v1601_v43 = vmul.f32 0.1, %v1587_v41  ;;  %v1588_v44 = vadd.f32 %v2836_v7, %v1567_v42 }
 0x1e0   : > { %v1528_v45 = vpop.f32.mrb[24].mxu0 }
 0x1e1   : > { %v1615_v46 = vmax.f32 %v1587_v41, %v1601_v43  ;;  %v1602_v47 = vmul.f32 0.1, %v1588_v44  ;;  %v2212_v48 = vadd.f32 %v1528_v45, %v916_v25  ;;  %v2196_v49 = vpop.f32.mrb[25].mxu0 }
 0x1e2   : > { %v1531_v50 = vpop.f32.mrb[26].mxu0 }
 0x1e3   : > { %v1852_v51 = vpack.c.bf16 %v1615_v46, %v1615_v46  ;;  %v1616_v52 = vmax.f32 %v1588_v44, %v1602_v47  ;;  %v1568_v53 = vmul.f32 %v2212_v48, %v2831_v4  ;;  %v2213_v54 = vadd.f32 %v1531_v50, %v919_v32  ;;  %v2197_v55 = vpop.f32.mrb[27].mxu0 }
 0x1e5   : > { %1686 = vst.msk [vmem:[%s2846_s22 + $0x28] sm:$0xf] %vm1675_vm2, %v1852_v51  ;;  %v1853_v56 = vpack.c.bf16 %v1616_v52, %v1616_v52  ;;  %v1589_v57 = vadd.f32 %v2836_v7, %v1568_v53  ;;  %v1569_v58 = vmul.f32 %v2213_v54, %v2831_v4 }
 0x1e7   : > { %1687 = vst.msk [vmem:[%s2846_s22 + $0x2c] sm:$0xf] %vm1675_vm2, %v1853_v56  ;;  %v1603_v59 = vmul.f32 0.1, %v1589_v57  ;;  %v1590_v60 = vadd.f32 %v2836_v7, %v1569_v58 }
 0x1e9   : > { %v1617_v61 = vmax.f32 %v1589_v57, %v1603_v59  ;;  %v1604_v1 = vmul.f32 0.1, %v1590_v60 }
 0x1eb   : > { %v1854_v2 = vpack.c.bf16 %v1617_v61, %v1617_v61  ;;  %v1618_v3 = vmax.f32 %v1590_v60, %v1604_v1 }
 0x1ed   : > { %1688 = vst.msk [vmem:[%s2846_s22 + $0x30] sm:$0xf] %vm1675_vm2, %v1854_v2  ;;  %v1855_v62 = vpack.c.bf16 %v1618_v3, %v1618_v3 }
 0x1ef   : > { %1689 = vst.msk [vmem:[%s2846_s22 + $0x34] sm:$0xf] %vm1675_vm2, %v1855_v62 }
 0x1f0 PF: > { %s14_s15 = sadd.s32 1, %s2437_s15  }
 0x1f1   : > { %p11_p4 = scmp.ge.s32.totalorder %s14_s15, 4  }
 0x1f3   :  { %13 = sbr.rel (!%p11_p4) target bundleno = 1 (0x1), region = 66 }

// kernel: _lambda_.35
= control target key start
LH: loop header
LB: loop body
LE: loop exit
PB: predicated region body
PF: predicated region fallthrough
CT: control target
= control target key end

     0   :  { %s2024_s15 = smov 0   ;;  %s2386_s0 = inlined_call_operand.vmem [shape: f32[2,156,16], index: 0, kind: input, shape index: {}]   ;;  %s2387_s1 = inlined_call_operand.vmem [shape: bf16[144,16], index: 1, kind: input, shape index: {}]   ;;  %s2388_s2 = inlined_call_operand.vmem [shape: f32[1,16], index: 2, kind: input, shape index: {}]   ;;  %s2389_s3 = inlined_call_operand.vmem [shape: f32[1,16], index: 3, kind: input, shape index: {}]   ;;  %s2390_s4 = inlined_call_operand.vmem [shape: bf16[2,96,16], index: 4, kind: output, shape index: {}]  }
   0x1 LB: > { %s1587_s16 = sadd.s32 4294967295, %s1997_s15   ;;  %p1591_p0 = scmp.ge.s32.totalorder %s1997_s15, 1  ;;  %s1997_s15 = sphi %s2024_s15, %s14_s15  }
   0x2   : > { %p162_p1 = scmp.lt.s32.totalorder %s1997_s15, 3 }
   0x4   : > { %p163_p2 = pnand %p1591_p0, %p162_p1 }
   0x5   : > { %v1982_v0 = vld [vmem:[%s2387_s1 + $0x8] sm:$0xff] (!%p163_p2)   ;;  %p188_p3 = scmp.lt.s32.totalorder (!%p163_p2), %s1587_s16, 1  ;;  %v2038_v1 = vld [vmem:[%s2387_s1 + $0x20] sm:$0xff] (!%p163_p2)   ;;  %vm245_vm0 = vcmask (!%p163_p2), 130048   ;;  %v1986_v16 = vld [vmem:[%s2387_s1 + $0x30] sm:$0xff] (!%p163_p2)   ;;  %vm1519_vm1 = vcmask (!%p163_p2), 125952  }
   0x6   : > { %166 = sbr.rel (%p163_p2) target bundleno = 353 (0x161), region = 36  ;;  %1748 = vmatprep.subr.bf16.mxu1 (!%p163_p2), %v1982_v0  ;;  %v1984_v2 = vld [vmem:[%s2387_s1] sm:$0xff] (!%p163_p2)   ;;  %1804 = vmatprep.subr.bf16.mxu0 (!%p163_p2), %v2038_v1  ;;  %v1985_v3 = vld [vmem:[%s2387_s1 + $0x28] sm:$0xff] (!%p163_p2)   ;;  %v1987_v20 = vld [vmem:[%s2387_s1 + $0x10] sm:$0xff] (!%p163_p2)  }
   0x7   : > { %1749 = vmatpush3.bf16.msra.mxu1 (!%p163_p2), %v1982_v0  ;;  %1805 = vmatpush3.bf16.msra.mxu0 (!%p163_p2), %v2038_v1  ;;  %v1988_v41 = vld [vmem:[%s2387_s1 + $0x38] sm:$0xff] (!%p163_p2)  }
   0x8   : > { %1762 = vmatprep.subr.bf16.mxu1 (!%p163_p2), %v1984_v2  ;;  %1818 = vmatprep.subr.bf16.mxu0 (!%p163_p2), %v1985_v3  ;;  %v1989_v60 = vld [vmem:[%s2387_s1 + $0x18] sm:$0xff] (!%p163_p2)  }
   0xd   : > { %s2392_s16 = smov (!%p188_p3, %s1587_s16), 1 }
   0xe   : > { %s1972_s25 = smul.u32 160, %s2392_s16 }
   0xf   : > { %s1973_s19 = smul.u32 48, %s2392_s16 }
  0x10   : > { %s2054_s28 = scalar_lea.vmem %s2386_s0, %s1972_s25 }
  0x11   : > { %v219_v4 = vld [vmem:[%s2054_s28 + $0x2] sm:$0xff]  ;;  %v220_v5 = vld [vmem:[%s2054_s28 + $0xa] sm:$0xff]  ;;  %v724_v6 = vld [vmem:[%s2054_s28 + $0x1a] sm:$0xff]  ;;  %s2341_s22 = scalar_lea.vmem %s2390_s4, %s1973_s19 }
  0x12   : > { %v231_v7 = vpack.c.bf16 %v220_v5, %v219_v4  ;;  %v725_v8 = vld [vmem:[%s2054_s28 + $0x22] sm:$0xff]  ;;  %v221_v9 = vld [vmem:[%s2054_s28 + $0x12] sm:$0xff]  ;;  %v726_v10 = vld [vmem:[%s2054_s28 + $0x2a] sm:$0xff] }
  0x13   : > { %v736_v11 = vpack.c.bf16 %v725_v8, %v724_v6  ;;  %v232_v12 = vpack.c.bf16 %v724_v6, %v221_v9  ;;  %v727_v13 = vld [vmem:[%s2054_s28 + $0x32] sm:$0xff]  ;;  %v233_v14 = vpack.c.bf16 %v726_v10, %v725_v8  ;;  %v2064_v15 = vld [vmem:[%s2054_s28 + $0x1c] sm:$0xff]  ;;  %v2074_v19 = vld [vmem:[%s2054_s28 + $0x24] sm:$0xff] }
  0x14   : > { %1750 = vmatprep.mubr.msk.bf16.mxu1 %vm245_vm0, %v231_v7  ;;  %v737_v17 = vpack.c.bf16 %v727_v13, %v726_v10  ;;  %v2071_v18 = vld [vmem:[%s2054_s28 + $0x3a] sm:$0xff]  ;;  %v873_v21 = vpack.c.bf16 %v2074_v19, %v2064_v15  ;;  %v2084_v22 = vld [vmem:[%s2054_s28 + $0x42] sm:$0xff]  ;;  %v2087_v23 = vld [vmem:[%s2054_s28 + $0x4a] sm:$0xff] }
  0x15   : > { %1806 = vmatprep.mubr.msk.bf16.mxu0 %vm245_vm0, %v736_v11  ;;  %1751 = vmatmul.mubr.msk.bf16.vlgmr.msra.gmra.mrb[0].mxu1 %vm245_vm0, %v232_v12  ;;  %v2090_v24 = vld [vmem:[%s2054_s28 + $0x52] sm:$0xff]  ;;  %v738_v25 = vpack.c.bf16 %v2084_v22, %v2071_v18  ;;  %v2100_v27 = vpack.c.bf16 %v2071_v18, %v727_v13  ;;  %v2103_v28 = vld [vmem:[%s2054_s28 + $0x64] sm:$0xff]  ;;  %v2110_v30 = vpack.c.bf16 %v2087_v23, %v2084_v22  ;;  %v2121_v34 = vld [vmem:[%s2054_s28 + $0x3c] sm:$0xff] }
  0x16   : > { %1763 = vmatpush3.bf16.msra.mxu1 %v1984_v2  ;;  %1807 = vmatmul.mubr.msk.bf16.vlgmr.msra.gmra.mrb[0].mxu0 %vm245_vm0, %v737_v17  ;;  %v739_v26 = vpack.c.bf16 %v2090_v24, %v2087_v23  ;;  %v2106_v29 = vld [vmem:[%s2054_s28 + $0x6c] sm:$0xff]  ;;  %v2118_v33 = vld [vmem:[%s2054_s28 + $0x34] sm:$0xff]  ;;  %v2124_v35 = vld [vmem:[%s2054_s28 + $0x44] sm:$0xff] }
  0x17   : > { %1819 = vmatpush3.bf16.msra.mxu0 %v1985_v3  ;;  %1754 = vmatprep.mubr.msk.bf16.mxu1 %vm245_vm0, %v233_v14  ;;  %v1287_v31 = vpack.c.bf16 %v2106_v29, %v2103_v28  ;;  %v2115_v32 = vld [vmem:[%s2054_s28 + $0x2c] sm:$0xff]  ;;  %v2133_v37 = vld [vmem:[%s2054_s28 + $0x5a] sm:$0xff]  ;;  %v875_v38 = vpack.c.bf16 %v2124_v35, %v2121_v34  ;;  %v2148_v44 = vld [vmem:[%s2054_s28 + $0x62] sm:$0xff] }
  0x18   : > { %1820 = vmatprep.mubr.msk.bf16.mxu0 %vm245_vm0, %v873_v21  ;;  %1832 = vmatprep.subr.bf16.mxu0 %v1986_v16  ;;  %v874_v36 = vpack.c.bf16 %v2118_v33, %v2115_v32  ;;  %v199_v39 = vld [vmem:[%s2054_s28] sm:$0xff]  ;;  %v200_v40 = vld [vmem:[%s2054_s28 + $0x8] sm:$0xff]  ;;  %v2144_v42 = vpack.c.bf16 %v2133_v37, %v2090_v24  ;;  %v2155_v46 = vld [vmem:[%s2054_s28 + $0x54] sm:$0xff]  ;;  %v740_v47 = vpack.c.bf16 %v2148_v44, %v2133_v37 }
  0x19   : > { %1776 = vmatprep.subr.bf16.mxu1 %v1987_v20  ;;  %v211_v43 = vpack.c.bf16 %v200_v40, %v199_v39  ;;  %v2152_v45 = vld [vmem:[%s2054_s28 + $0x4c] sm:$0xff]  ;;  %v2160_v48 = vld [vmem:[%s2054_s28 + $0x5c] sm:$0xff]  ;;  %v2163_v49 = vld [vmem:[%s2054_s28 + $0x74] sm:$0xff] }
  0x1a   : > { %v2166_v50 = vld [vmem:[%s2054_s28 + $0x7c] sm:$0xff]  ;;  %v876_v52 = vpack.c.bf16 %v2155_v46, %v2152_v45  ;;  %v201_v53 = vld [vmem:[%s2054_s28 + $0x10] sm:$0xff]  ;;  %v877_v55 = vpack.c.bf16 %v2103_v28, %v2160_v48  ;;  %v2185_v57 = vld [vmem:[%s2054_s28 + $0x28] sm:$0xff]  ;;  %v878_v61 = vpack.c.bf16 %v2163_v49, %v2106_v29 }
  0x1b   : > { %v1288_v51 = vpack.c.bf16 %v2166_v50, %v2163_v49  ;;  %v2177_v54 = vld [vmem:[%s2054_s28 + $0x18] sm:$0xff]  ;;  %v2182_v56 = vld [vmem:[%s2054_s28 + $0x20] sm:$0xff]  ;;  %v2200_v62 = vld [vmem:[%s2054_s28 + $0x30] sm:$0xff] }
  0x1c   : > { %v212_v58 = vpack.c.bf16 %v2177_v54, %v201_v53  ;;  %v213_v59 = vpack.c.bf16 %v2185_v57, %v2182_v56  ;;  %v2203_v63 = vld [vmem:[%s2054_s28 + $0x38] sm:$0xff]  ;;  %v2208_v2 = vld [vmem:[%s2054_s28 + $0x40] sm:$0xff]  ;;  %v2211_v3 = vld [vmem:[%s2054_s28 + $0x48] sm:$0xff] }
  0x1d   : > { %1755 = vmatmul.mubr.msk.bf16.gmra.mrb[4].mxu1 %vm245_vm0, %v2100_v27  ;;  %v214_v0 = vpack.c.bf16 %v2203_v63, %v2200_v62  ;;  %v1011_v4 = vpack.c.bf16 %v2211_v3, %v2208_v2  ;;  %v2220_v5 = vld [vmem:[%s2054_s28 + $0x50] sm:$0xff]  ;;  %v2223_v6 = vld [vmem:[%s2054_s28 + $0x58] sm:$0xff]  ;;  %v450_v7 = vld [vmem:[%s2054_s28 + $0x4] sm:$0xff] }
  0x1e   : > { %1758 = vmatprep.mubr.msk.bf16.mxu1 %vm245_vm0, %v2110_v30  ;;  %v451_v8 = vld [vmem:[%s2054_s28 + $0xc] sm:$0xff]  ;;  %v1990_v9 = vld [vmem:[%s2387_s1 + $0x40] sm:$0xff]   ;;  %v216_v10 = vpack.c.bf16 %v2223_v6, %v2220_v5  ;;  %v602_v53 = vpack.c.bf16 %v2220_v5, %v2211_v3 }
  0x1f   : > { %v462_v11 = vpack.c.bf16 %v451_v8, %v450_v7  ;;  %v1004_v12 = vld [vmem:[%s2054_s28 + $0x60] sm:$0xff]  ;;  %v1005_v13 = vld [vmem:[%s2054_s28 + $0x68] sm:$0xff]  ;;  %v1006_v14 = vld [vmem:[%s2054_s28 + $0x70] sm:$0xff] }
  0x20   : > { %v1013_v17 = vpack.c.bf16 %v1005_v13, %v1004_v12  ;;  %v1008_v39 = vld [vmem:[%s2054_s28 + $0x80] sm:$0xff]  ;;  %v1009_v40 = vld [vmem:[%s2054_s28 + $0x88] sm:$0xff] }
  0x21   : > { %v2322_v23 = vld [vmem:[%s2388_s2] ss:$0 sm:$0xff] }
  0x22   : > { %1821 = vmatmul.mubr.msk.bf16.vlgmr.msra.gmra.mrb[0].mxu0 %vm245_vm0, %v874_v36  ;;  %v2327_v37 = vld [vmem:[%s2389_s3] ss:$0 sm:$0xff] }
  0x23   : > { %1833 = vmatpush3.bf16.msra.mxu0 %v1986_v16  ;;  %1824 = vmatprep.mubr.msk.bf16.mxu0 %vm245_vm0, %v875_v38  ;;  %v1007_v16 = vld [vmem:[%s2054_s28 + $0x78] sm:$0xff]  ;;  %v464_v38 = vpack.c.bf16 %v2115_v32, %v2074_v19  ;;  %v466_v19 = vpack.c.bf16 %v2152_v45, %v2124_v35  ;;  %v467_v32 = vpack.c.bf16 %v2160_v48, %v2155_v46  ;;  %v1146_v48 = vld [vmem:[%s2054_s28 + $0x8a] sm:$0xff] }
  0x24   : > { %1846 = vmatprep.subr.bf16.mxu0 %v1988_v41  ;;  %v1014_v21 = vpack.c.bf16 %v1007_v16, %v1006_v14  ;;  %v1144_v35 = vld [vmem:[%s2054_s28 + $0x7a] sm:$0xff]  ;;  %v601_v46 = vpack.c.bf16 %v2208_v2, %v2203_v63 }
  0x25   : > { %1759 = vmatmul.mubr.msk.bf16.gmra.mrb[8].mxu1 %vm245_vm0, %v2144_v42 }
  0x26   : > { %1764 = vmatprep.mubr.msk.bf16.mxu1 %vm245_vm0, %v211_v43 }
  0x2a   : > { %1825 = vmatmul.mubr.msk.bf16.gmra.mrb[4].mxu0 %vm245_vm0, %v876_v52 }
  0x2b   : > { %1828 = vmatprep.mubr.msk.bf16.mxu0 %vm245_vm0, %v877_v55  ;;  %v604_v55 = vpack.c.bf16 %v1006_v14, %v1005_v13 }
  0x2d   : > { %1765 = vmatmul.mubr.msk.bf16.vlgmr.msra.gmra.mrb[0].mxu1 %vm245_vm0, %v212_v58 }
  0x2e   : > { %1777 = vmatpush3.bf16.msra.mxu1 %v1987_v20  ;;  %1768 = vmatprep.mubr.msk.bf16.mxu1 %vm245_vm0, %v213_v59  ;;  %v452_v20 = vld [vmem:[%s2054_s28 + $0x14] sm:$0xff] }
  0x2f   : > { %1790 = vmatprep.subr.bf16.mxu1 %v1989_v60  ;;  %v463_v36 = vpack.c.bf16 %v2064_v15, %v452_v20  ;;  %v465_v15 = vpack.c.bf16 %v2121_v34, %v2118_v33  ;;  %v599_v33 = vpack.c.bf16 %v2182_v56, %v2177_v54  ;;  %v1143_v34 = vld [vmem:[%s2054_s28 + $0x72] sm:$0xff]  ;;  %v603_v54 = vpack.c.bf16 %v1004_v12, %v2223_v6 }
  0x30   : > { %v1151_v45 = vpack.c.bf16 %v1144_v35, %v1143_v34  ;;  %v1283_v56 = vld [vmem:[%s2054_s28 + $0x8c] sm:$0xff] }
  0x32   : > { %1829 = vmatmul.mubr.msk.bf16.gmra.mrb[8].mxu0 %vm245_vm0, %v878_v61 }
  0x33   : > { %1834 = vmatprep.mubr.msk.bf16.mxu0 %vm245_vm0, %v214_v0 }
  0x35   : > { %1769 = vmatmul.mubr.msk.bf16.gmra.mrb[4].mxu1 %vm245_vm0, %v214_v0 }
  0x36   : > { %1772 = vmatprep.mubr.msk.bf16.mxu1 %vm245_vm0, %v1011_v4 }
  0x3a   : > { %1835 = vmatmul.mubr.msk.bf16.vlgmr.msra.gmra.mrb[0].mxu0 %vm245_vm0, %v1011_v4 }
  0x3b   : > { %1847 = vmatpush3.bf16.msra.mxu0 %v1988_v41  ;;  %1838 = vmatprep.mubr.msk.bf16.mxu0 %vm245_vm0, %v216_v10  ;;  %v1015_v41 = vpack.c.bf16 %v1009_v40, %v1008_v39 }
  0x3c   : > { %1860 = vmatprep.subr.bf16.mxu0 %v1990_v9 }
  0x3d   : > { %1773 = vmatmul.mubr.msk.bf16.gmra.mrb[8].mxu1 %vm245_vm0, %v216_v10 }
  0x3e   : > { %1778 = vmatprep.mubr.msk.bf16.mxu1 %vm245_vm0, %v462_v11 }
  0x42   : > { %1839 = vmatmul.mubr.msk.bf16.gmra.mrb[4].mxu0 %vm245_vm0, %v1013_v17 }
  0x43   : > { %1842 = vmatprep.mubr.msk.bf16.mxu0 %vm245_vm0, %v1014_v21 }
  0x45   : > { %1779 = vmatmul.mubr.msk.bf16.vlgmr.msra.gmra.mrb[0].mxu1 %vm245_vm0, %v463_v36 }
  0x46   : > { %1791 = vmatpush3.bf16.msra.mxu1 %v1989_v60  ;;  %1782 = vmatprep.mubr.msk.bf16.mxu1 %vm245_vm0, %v464_v38 }
  0x47   : > { %1874 = vmatprep.subr.bf16.mxu1 %v2038_v1 }
  0x4a   : > { %1843 = vmatmul.mubr.msk.bf16.gmra.mrb[8].mxu0 %vm245_vm0, %v1015_v41 }
  0x4b   : > { %1848 = vmatprep.mubr.msk.bf16.mxu0 %vm245_vm0, %v2100_v27  ;;  %v1142_v27 = vld [vmem:[%s2054_s28 + $0x6a] sm:$0xff] }
  0x4c   : > { %v1150_v43 = vpack.c.bf16 %v1142_v27, %v2148_v44  ;;  %v741_v22 = vpack.c.bf16 %v1143_v34, %v1142_v27 }
  0x4d   : > { %1783 = vmatmul.mubr.msk.bf16.gmra.mrb[4].mxu1 %vm245_vm0, %v465_v15 }
  0x4e   : > { %1786 = vmatprep.mubr.msk.bf16.mxu1 %vm245_vm0, %v466_v19 }
  0x52   : > { %1849 = vmatmul.mubr.msk.bf16.vlgmr.msra.gmra.mrb[0].mxu0 %vm245_vm0, %v2110_v30  ;;  %v600_v30 = vpack.c.bf16 %v2200_v62, %v2185_v57 }
  0x53   : > { %1861 = vmatpush3.bf16.msra.mxu0 %v1990_v9  ;;  %1852 = vmatprep.mubr.msk.bf16.mxu0 %vm245_vm0, %v2144_v42  ;;  %v1145_v42 = vld [vmem:[%s2054_s28 + $0x82] sm:$0xff] }
  0x54   : > { %v1152_v52 = vpack.c.bf16 %v1146_v48, %v1145_v42 }
  0x55   : > { %1787 = vmatmul.mubr.msk.bf16.gmra.mrb[8].mxu1 %vm245_vm0, %v467_v32 }
  0x56   : > { %1792 = vmatprep.mubr.msk.bf16.mxu1 %vm245_vm0, %v599_v33 }
  0x5a   : > { %1853 = vmatmul.mubr.msk.bf16.gmra.mrb[4].mxu0 %vm245_vm0, %v1150_v43 }
  0x5b   : > { %1856 = vmatprep.mubr.msk.bf16.mxu0 %vm245_vm0, %v1151_v45 }
  0x5d   : > { %1793 = vmatmul.mubr.msk.bf16.vlgmr.msra.gmra.mrb[0].mxu1 %vm245_vm0, %v600_v30 }
  0x5e   : > { %1875 = vmatpush3.bf16.msra.mxu1 %v2038_v1  ;;  %1796 = vmatprep.mubr.msk.bf16.mxu1 %vm245_vm0, %v601_v46  ;;  %v1282_v1 = vld [vmem:[%s2054_s28 + $0x84] sm:$0xff] }
  0x5f   : > { %v1289_v18 = vpack.c.bf16 %v1283_v56, %v1282_v1 }
  0x62   : > { %1857 = vmatmul.mubr.msk.bf16.gmra.mrb[8].mxu0 %vm245_vm0, %v1152_v52 }
  0x63   : > { %1862 = vmatprep.mubr.msk.bf16.mxu0 %vm245_vm0, %v465_v15 }
  0x65   : > { %1797 = vmatmul.mubr.msk.bf16.gmra.mrb[4].mxu1 %vm245_vm0, %v602_v53 }
  0x66   : > { %1800 = vmatprep.mubr.msk.bf16.mxu1 %vm245_vm0, %v603_v54 }
  0x6a   : > { %1863 = vmatmul.mubr.msk.bf16.vlgmr.msra.gmra.mrb[0].mxu0 %vm245_vm0, %v466_v19 }
  0x6b   : > { %1866 = vmatprep.mubr.msk.bf16.mxu0 %vm245_vm0, %v467_v32 }
  0x6d   : > { %1801 = vmatmul.mubr.msk.bf16.gmra.mrb[8].mxu1 %vm245_vm0, %v604_v55 }
  0x6e   : > { %1810 = vmatprep.mubr.msk.bf16.mxu1 %vm245_vm0, %v738_v25 }
  0x72   : > { %1867 = vmatmul.mubr.msk.bf16.gmra.mrb[4].mxu0 %vm245_vm0, %v1287_v31 }
  0x73   : > { %1870 = vmatprep.mubr.msk.bf16.mxu0 %vm245_vm0, %v1288_v51 }
  0x75   : > { %1811 = vmatmul.mubr.msk.bf16.vlgmr.msra.gmra.mrb[4].mxu1 %vm245_vm0, %v739_v26 }
  0x76   : > { %1814 = vmatprep.mubr.msk.bf16.mxu1 %vm245_vm0, %v740_v47 }
  0x7a   : > { %1871 = vmatmul.mubr.msk.bf16.gmra.mrb[8].mxu0 %vm245_vm0, %v1289_v18 }
  0x7d   : > { %1815 = vmatmul.mubr.msk.bf16.gmra.mrb[8].mxu1 %vm245_vm0, %v741_v22 }
 0x130   : > { %v1794_v25 = vpop.f32.mrb[0].mxu1 }
 0x131   : > { %v665_v28 = vpop.f32.mrb[1].mxu1 }
 0x132   : > { %v1795_v29 = vpop.f32.mrb[2].mxu1 }
 0x133   : > { %v668_v31 = vpop.f32.mrb[3].mxu1 }
 0x13d   : > { %v1864_v49 = vpop.f32.mrb[0].mxu0 }
 0x13e   : > { %v1876_v24 = vadd.f32 %v1864_v49, %v1794_v25  ;;  %v1350_v26 = vpop.f32.mrb[1].mxu0 }
 0x13f   : > { %v1877_v44 = vadd.f32 %v1350_v26, %v665_v28  ;;  %v1865_v47 = vpop.f32.mrb[2].mxu0 }
 0x140   : > { %v1418_v50 = vmul.f32 %v1876_v24, %v2322_v23  ;;  %v1878_v51 = vadd.f32 %v1865_v47, %v1795_v29  ;;  %v1353_v57 = vpop.f32.mrb[3].mxu0 }
 0x141   : > { %v1416_v58 = vmul.f32 %v1877_v44, %v2322_v23  ;;  %v1879_v59 = vadd.f32 %v1353_v57, %v668_v31 }
 0x142   : > { %v1437_v60 = vadd.f32 %v2327_v37, %v1418_v50  ;;  %v1419_v61 = vmul.f32 %v1878_v51, %v2322_v23 }
 0x143   : > { %v1435_v62 = vadd.f32 %v2327_v37, %v1416_v58  ;;  %v1417_v63 = vmul.f32 %v1879_v59, %v2322_v23 }
 0x144   : > { %v1449_v0 = vmul.f32 0.1, %v1437_v60  ;;  %v1438_v2 = vadd.f32 %v2327_v37, %v1419_v61 }
 0x145   : > { %v1447_v3 = vmul.f32 0.1, %v1435_v62  ;;  %v1436_v4 = vadd.f32 %v2327_v37, %v1417_v63  ;;  %v1868_v5 = vpop.f32.mrb[4].mxu0 }
 0x146   : > { %v1461_v6 = vmax.f32 %v1437_v60, %v1449_v0  ;;  %v1450_v7 = vmul.f32 0.1, %v1438_v2  ;;  %v1366_v8 = vpop.f32.mrb[5].mxu0 }
 0x147   : > { %v1459_v9 = vmax.f32 %v1435_v62, %v1447_v3  ;;  %v1448_v10 = vmul.f32 0.1, %v1436_v4  ;;  %v1869_v11 = vpop.f32.mrb[6].mxu0 }
 0x148   : > { %v1675_v12 = vpack.c.bf16 %v1461_v6, %v1461_v6  ;;  %v1462_v13 = vmax.f32 %v1438_v2, %v1450_v7  ;;  %v1369_v14 = vpop.f32.mrb[7].mxu0  ;;  %v1812_v16 = vpop.f32.mrb[4].mxu1 }
 0x149   : > { %v1673_v17 = vpack.c.bf16 %v1459_v9, %v1459_v9  ;;  %v1460_v20 = vmax.f32 %v1436_v4, %v1448_v10  ;;  %v1880_v21 = vadd.f32 %v1868_v5, %v1812_v16  ;;  %v818_v36 = vpop.f32.mrb[5].mxu1 }
 0x14a   : > { %1522 = vst.msk [vmem:[%s2341_s22 + $0x8] sm:$0xf] %vm1519_vm1, %v1675_v12  ;;  %v1676_v38 = vpack.c.bf16 %v1462_v13, %v1462_v13  ;;  %v1881_v39 = vadd.f32 %v1366_v8, %v818_v36  ;;  %v1813_v40 = vpop.f32.mrb[6].mxu1 }
 0x14b   : > { %1520 = vst.msk [vmem:[%s2341_s22] sm:$0xf] %vm1519_vm1, %v1673_v17  ;;  %v1674_v41 = vpack.c.bf16 %v1460_v20, %v1460_v20  ;;  %v1422_v15 = vmul.f32 %v1880_v21, %v2322_v23  ;;  %v1882_v19 = vadd.f32 %v1869_v11, %v1813_v40  ;;  %v821_v32 = vpop.f32.mrb[7].mxu1 }
 0x14c   : > { %1523 = vst.msk [vmem:[%s2341_s22 + $0xc] sm:$0xf] %vm1519_vm1, %v1676_v38  ;;  %v1420_v33 = vmul.f32 %v1881_v39, %v2322_v23  ;;  %v1883_v27 = vadd.f32 %v1369_v14, %v821_v32 }
 0x14d   : > { %1521 = vst.msk [vmem:[%s2341_s22 + $0x4] sm:$0xf] %vm1519_vm1, %v1674_v41  ;;  %v1441_v34 = vadd.f32 %v2327_v37, %v1422_v15  ;;  %v1423_v35 = vmul.f32 %v1882_v19, %v2322_v23  ;;  %v1872_v43 = vpop.f32.mrb[8].mxu0 }
 0x14e   : > { %v1439_v45 = vadd.f32 %v2327_v37, %v1420_v33  ;;  %v1421_v30 = vmul.f32 %v1883_v27, %v2322_v23  ;;  %v1382_v46 = vpop.f32.mrb[9].mxu0 }
 0x14f   : > { %v1453_v42 = vmul.f32 0.1, %v1441_v34  ;;  %v1442_v48 = vadd.f32 %v2327_v37, %v1423_v35  ;;  %v1873_v52 = vpop.f32.mrb[10].mxu0 }
 0x150   : > { %v1451_v53 = vmul.f32 0.1, %v1439_v45  ;;  %v1440_v54 = vadd.f32 %v2327_v37, %v1421_v30  ;;  %v1385_v55 = vpop.f32.mrb[11].mxu0  ;;  %v1816_v1 = vpop.f32.mrb[8].mxu1 }
 0x151   : > { %v1465_v56 = vmax.f32 %v1441_v34, %v1453_v42  ;;  %v1454_v18 = vmul.f32 0.1, %v1442_v48  ;;  %v1884_v22 = vadd.f32 %v1872_v43, %v1816_v1  ;;  %v834_v25 = vpop.f32.mrb[9].mxu1 }
 0x152   : > { %v1463_v28 = vmax.f32 %v1439_v45, %v1451_v53  ;;  %v1452_v29 = vmul.f32 0.1, %v1440_v54  ;;  %v1885_v31 = vadd.f32 %v1382_v46, %v834_v25  ;;  %v1817_v49 = vpop.f32.mrb[10].mxu1 }
 0x153   : > { %v1679_v24 = vpack.c.bf16 %v1465_v56, %v1465_v56  ;;  %v1466_v26 = vmax.f32 %v1442_v48, %v1454_v18  ;;  %v1426_v44 = vmul.f32 %v1884_v22, %v2322_v23  ;;  %v1886_v47 = vadd.f32 %v1873_v52, %v1817_v49  ;;  %v837_v50 = vpop.f32.mrb[11].mxu1 }
 0x154   : > { %v1677_v51 = vpack.c.bf16 %v1463_v28, %v1463_v28  ;;  %v1464_v57 = vmax.f32 %v1440_v54, %v1452_v29  ;;  %v1424_v58 = vmul.f32 %v1885_v31, %v2322_v23  ;;  %v1887_v59 = vadd.f32 %v1385_v55, %v837_v50 }
 0x155   : > { %1526 = vst.msk [vmem:[%s2341_s22 + $0x18] sm:$0xf] %vm1519_vm1, %v1679_v24  ;;  %v1680_v60 = vpack.c.bf16 %v1466_v26, %v1466_v26  ;;  %v1445_v61 = vadd.f32 %v2327_v37, %v1426_v44  ;;  %v1427_v62 = vmul.f32 %v1886_v47, %v2322_v23 }
 0x156   : > { %1524 = vst.msk [vmem:[%s2341_s22 + $0x10] sm:$0xf] %vm1519_vm1, %v1677_v51  ;;  %v1678_v63 = vpack.c.bf16 %v1464_v57, %v1464_v57  ;;  %v1443_v0 = vadd.f32 %v2327_v37, %v1424_v58  ;;  %v1425_v2 = vmul.f32 %v1887_v59, %v2322_v23 }
 0x157   : > { %1527 = vst.msk [vmem:[%s2341_s22 + $0x1c] sm:$0xf] %vm1519_vm1, %v1680_v60  ;;  %v1457_v3 = vmul.f32 0.1, %v1445_v61  ;;  %v1446_v4 = vadd.f32 %v2327_v37, %v1427_v62 }
 0x158   : > { %1525 = vst.msk [vmem:[%s2341_s22 + $0x14] sm:$0xf] %vm1519_vm1, %v1678_v63  ;;  %v1455_v5 = vmul.f32 0.1, %v1443_v0  ;;  %v1444_v6 = vadd.f32 %v2327_v37, %v1425_v2 }
 0x159   : > { %v1469_v7 = vmax.f32 %v1445_v61, %v1457_v3  ;;  %v1458_v8 = vmul.f32 0.1, %v1446_v4 }
 0x15a   : > { %v1467_v9 = vmax.f32 %v1443_v0, %v1455_v5  ;;  %v1456_v10 = vmul.f32 0.1, %v1444_v6 }
 0x15b   : > { %v1683_v11 = vpack.c.bf16 %v1469_v7, %v1469_v7  ;;  %v1470_v12 = vmax.f32 %v1446_v4, %v1458_v8 }
 0x15c   : > { %v1681_v23 = vpack.c.bf16 %v1467_v9, %v1467_v9  ;;  %v1468_v13 = vmax.f32 %v1444_v6, %v1456_v10 }
 0x15d   : > { %1530 = vst.msk [vmem:[%s2341_s22 + $0x28] sm:$0xf] %vm1519_vm1, %v1683_v11  ;;  %v1684_v14 = vpack.c.bf16 %v1470_v12, %v1470_v12 }
 0x15e   : > { %1528 = vst.msk [vmem:[%s2341_s22 + $0x20] sm:$0xf] %vm1519_vm1, %v1681_v23  ;;  %v1682_v16 = vpack.c.bf16 %v1468_v13, %v1468_v13 }
 0x15f   : > { %1531 = vst.msk [vmem:[%s2341_s22 + $0x2c] sm:$0xf] %vm1519_vm1, %v1684_v14 }
 0x160   : > { %1529 = vst.msk [vmem:[%s2341_s22 + $0x24] sm:$0xf] %vm1519_vm1, %v1682_v16 }
 0x161 PF: > { %s14_s15 = sadd.s32 1, %s1997_s15  }
 0x162   : > { %p11_p4 = scmp.ge.s32.totalorder %s14_s15, 4  }
 0x164   :  { %13 = sbr.rel (!%p11_p4) target bundleno = 1 (0x1), region = 66 }

// kernel: _lambda_.37
= control target key start
LH: loop header
LB: loop body
LE: loop exit
PB: predicated region body
PF: predicated region fallthrough
CT: control target
= control target key end

     0   :  { %vm82_vm0 = vcmask 130048   ;;  %vm346_vm1 = vcmask 125952   ;;  %s622_s1 = inlined_call_operand.vmem [shape: bf16[16,16], index: 1, kind: input, shape index: {}]   ;;  %s623_s0 = inlined_call_operand.vmem [shape: bf16[128,16], index: 0, kind: input, shape index: {}]   ;;  %s624_s2 = inlined_call_operand.vmem [shape: f32[1,16], index: 2, kind: input, shape index: {}]   ;;  %s625_s3 = inlined_call_operand.vmem [shape: f32[1,16], index: 3, kind: input, shape index: {}]   ;;  %s626_s4 = inlined_call_operand.vmem [shape: bf16[128,16], index: 4, kind: output, shape index: {}]  }
   0x1   :  { %v447_v0 = vld [vmem:[%s622_s1] sm:$0xff]   ;;  %v450_v3 = vld [vmem:[%s623_s0 + $0x8] sm:$0xff]   ;;  %v452_v5 = vld [vmem:[%s623_s0 + $0x10] sm:$0xff]  }
   0x2   :  { %v448_v1 = vld [vmem:[%s623_s0] sm:$0xff]   ;;  %427 = vmatprep.subr.bf16.mxu0 %v447_v0  ;;  %445 = vmatprep.subr.bf16.mxu1 %v447_v0  ;;  %v451_v4 = vld [vmem:[%s623_s0 + $0x28] sm:$0xff]   ;;  %v453_v6 = vld [vmem:[%s623_s0 + $0x30] sm:$0xff]  }
   0x3   :  { %v449_v2 = vld [vmem:[%s623_s0 + $0x20] sm:$0xff]   ;;  %428 = vmatpush3.bf16.msra.mxu0 %v447_v0  ;;  %446 = vmatpush3.bf16.msra.mxu1 %v447_v0  ;;  %v454_v7 = vld [vmem:[%s623_s0 + $0x18] sm:$0xff]  }
   0x4   :  { %429 = vmatprep.mubr.msk.bf16.mxu0 %vm82_vm0, %v448_v1  ;;  %437 = vmatprep.mubr.msk.bf16.mxu1 %vm82_vm0, %v449_v2  ;;  %v455_v8 = vld [vmem:[%s623_s0 + $0x38] sm:$0xff]   ;;  %v519_v9 = vld [vmem:[%s624_s2] ss:$0 sm:$0xff] }
   0x5   :  { %v524_v11 = vld [vmem:[%s625_s3] ss:$0 sm:$0xff] }
   0x6   :  { %430 = vmatmul.mubr.msk.bf16.vlgmr.msra.gmra.mrb[0].mxu0 %vm82_vm0, %v450_v3  ;;  %438 = vmatmul.mubr.msk.bf16.vlgmr.msra.gmra.mrb[0].mxu1 %vm82_vm0, %v451_v4 }
   0x7   :  { %433 = vmatprep.mubr.msk.bf16.mxu0 %vm82_vm0, %v452_v5  ;;  %441 = vmatprep.mubr.msk.bf16.mxu1 %vm82_vm0, %v453_v6 }
   0xe   :  { %434 = vmatmul.mubr.msk.bf16.gmra.mrb[4].mxu0 %vm82_vm0, %v454_v7  ;;  %442 = vmatmul.mubr.msk.bf16.gmra.mrb[4].mxu1 %vm82_vm0, %v455_v8 }
  0xd9   :  { %v431_v10 = vpop.f32.mrb[0].mxu0  ;;  %v439_v12 = vpop.f32.mrb[0].mxu1 }
  0xda   :  { %v213_v13 = vmul.f32 %v431_v10, %v519_v9  ;;  %v221_v14 = vmul.f32 %v439_v12, %v519_v9  ;;  %v141_v15 = vpop.f32.mrb[1].mxu0  ;;  %v173_v16 = vpop.f32.mrb[1].mxu1 }
  0xdb   :  { %v211_v17 = vmul.f32 %v519_v9, %v141_v15  ;;  %v219_v18 = vmul.f32 %v519_v9, %v173_v16  ;;  %v432_v19 = vpop.f32.mrb[2].mxu0  ;;  %v440_v20 = vpop.f32.mrb[2].mxu1 }
  0xdc   :  { %v236_v21 = vadd.f32 %v524_v11, %v213_v13  ;;  %v244_v22 = vadd.f32 %v524_v11, %v221_v14  ;;  %v214_v23 = vmul.f32 %v432_v19, %v519_v9  ;;  %v222_v24 = vmul.f32 %v440_v20, %v519_v9  ;;  %v144_v25 = vpop.f32.mrb[3].mxu0  ;;  %v176_v26 = vpop.f32.mrb[3].mxu1 }
  0xdd   :  { %v234_v27 = vadd.f32 %v524_v11, %v211_v17  ;;  %v242_v28 = vadd.f32 %v524_v11, %v219_v18  ;;  %v212_v29 = vmul.f32 %v519_v9, %v144_v25  ;;  %v220_v30 = vmul.f32 %v519_v9, %v176_v26 }
  0xde   :  { %v252_v31 = vmul.f32 0.1, %v236_v21  ;;  %v260_v32 = vmul.f32 0.1, %v244_v22  ;;  %v237_v33 = vadd.f32 %v524_v11, %v214_v23  ;;  %v245_v34 = vadd.f32 %v524_v11, %v222_v24 }
  0xdf   :  { %v250_v35 = vmul.f32 0.1, %v234_v27  ;;  %v258_v36 = vmul.f32 0.1, %v242_v28  ;;  %v235_v37 = vadd.f32 %v524_v11, %v212_v29  ;;  %v243_v38 = vadd.f32 %v524_v11, %v220_v30 }
  0xe0   :  { %v268_v39 = vmax.f32 %v236_v21, %v252_v31  ;;  %v276_v40 = vmax.f32 %v244_v22, %v260_v32  ;;  %v253_v41 = vmul.f32 0.1, %v237_v33  ;;  %v261_v42 = vmul.f32 0.1, %v245_v34 }
  0xe1   :  { %v266_v43 = vmax.f32 %v234_v27, %v250_v35  ;;  %v274_v44 = vmax.f32 %v242_v28, %v258_v36  ;;  %v251_v45 = vmul.f32 0.1, %v235_v37  ;;  %v259_v46 = vmul.f32 0.1, %v243_v38  ;;  %v435_v47 = vpop.f32.mrb[4].mxu0  ;;  %v443_v48 = vpop.f32.mrb[4].mxu1 }
  0xe2   :  { %v404_v49 = vpack.c.bf16 %v268_v39, %v268_v39  ;;  %v412_v50 = vpack.c.bf16 %v276_v40, %v276_v40  ;;  %v269_v51 = vmax.f32 %v237_v33, %v253_v41  ;;  %v277_v52 = vmax.f32 %v245_v34, %v261_v42  ;;  %v157_v53 = vpop.f32.mrb[5].mxu0  ;;  %v189_v54 = vpop.f32.mrb[5].mxu1 }
  0xe3   :  { %v402_v55 = vpack.c.bf16 %v266_v43, %v266_v43  ;;  %v410_v56 = vpack.c.bf16 %v274_v44, %v274_v44  ;;  %v267_v57 = vmax.f32 %v235_v37, %v251_v45  ;;  %v275_v58 = vmax.f32 %v243_v38, %v259_v46  ;;  %v436_v59 = vpop.f32.mrb[6].mxu0  ;;  %v444_v60 = vpop.f32.mrb[6].mxu1 }
  0xe4   :  { %349 = vst.msk [vmem:[%s626_s4 + $0x8] sm:$0xf] %vm346_vm1, %v404_v49  ;;  %357 = vst.msk [vmem:[%s626_s4 + $0x28] sm:$0xf] %vm346_vm1, %v412_v50  ;;  %v405_v61 = vpack.c.bf16 %v269_v51, %v269_v51  ;;  %v413_v62 = vpack.c.bf16 %v277_v52, %v277_v52  ;;  %v217_v63 = vmul.f32 %v435_v47, %v519_v9  ;;  %v160_v1 = vpop.f32.mrb[7].mxu0  ;;  %v192_v2 = vpop.f32.mrb[7].mxu1 }
  0xe5   :  { %v225_v0 = vmul.f32 %v443_v48, %v519_v9  ;;  %347 = vst.msk [vmem:[%s626_s4] sm:$0xf] %vm346_vm1, %v402_v55  ;;  %355 = vst.msk [vmem:[%s626_s4 + $0x20] sm:$0xf] %vm346_vm1, %v410_v56  ;;  %v403_v3 = vpack.c.bf16 %v267_v57, %v267_v57  ;;  %v411_v4 = vpack.c.bf16 %v275_v58, %v275_v58 }
  0xe6   :  { %v215_v5 = vmul.f32 %v519_v9, %v157_v53  ;;  %v223_v6 = vmul.f32 %v519_v9, %v189_v54  ;;  %350 = vst.msk [vmem:[%s626_s4 + $0xc] sm:$0xf] %vm346_vm1, %v405_v61  ;;  %358 = vst.msk [vmem:[%s626_s4 + $0x2c] sm:$0xf] %vm346_vm1, %v413_v62  ;;  %v240_v7 = vadd.f32 %v524_v11, %v217_v63 }
  0xe7   :  { %v248_v8 = vadd.f32 %v524_v11, %v225_v0  ;;  %v218_v10 = vmul.f32 %v436_v59, %v519_v9  ;;  %v226_v12 = vmul.f32 %v444_v60, %v519_v9  ;;  %348 = vst.msk [vmem:[%s626_s4 + $0x4] sm:$0xf] %vm346_vm1, %v403_v3  ;;  %356 = vst.msk [vmem:[%s626_s4 + $0x24] sm:$0xf] %vm346_vm1, %v411_v4 }
  0xe8   :  { %v238_v13 = vadd.f32 %v524_v11, %v215_v5  ;;  %v246_v14 = vadd.f32 %v524_v11, %v223_v6  ;;  %v216_v15 = vmul.f32 %v519_v9, %v160_v1  ;;  %v224_v16 = vmul.f32 %v519_v9, %v192_v2 }
  0xe9   :  { %v256_v17 = vmul.f32 0.1, %v240_v7  ;;  %v264_v18 = vmul.f32 0.1, %v248_v8  ;;  %v241_v19 = vadd.f32 %v524_v11, %v218_v10  ;;  %v249_v20 = vadd.f32 %v524_v11, %v226_v12 }
  0xea   :  { %v254_v21 = vmul.f32 0.1, %v238_v13  ;;  %v262_v22 = vmul.f32 0.1, %v246_v14  ;;  %v239_v23 = vadd.f32 %v524_v11, %v216_v15  ;;  %v247_v24 = vadd.f32 %v524_v11, %v224_v16 }
  0xeb   :  { %v272_v25 = vmax.f32 %v240_v7, %v256_v17  ;;  %v280_v26 = vmax.f32 %v248_v8, %v264_v18  ;;  %v257_v27 = vmul.f32 0.1, %v241_v19  ;;  %v265_v28 = vmul.f32 0.1, %v249_v20 }
  0xec   :  { %v270_v29 = vmax.f32 %v238_v13, %v254_v21  ;;  %v278_v30 = vmax.f32 %v246_v14, %v262_v22  ;;  %v255_v31 = vmul.f32 0.1, %v239_v23  ;;  %v263_v9 = vmul.f32 0.1, %v247_v24 }
  0xed   :  { %v408_v32 = vpack.c.bf16 %v272_v25, %v272_v25  ;;  %v416_v33 = vpack.c.bf16 %v280_v26, %v280_v26  ;;  %v273_v34 = vmax.f32 %v241_v19, %v257_v27  ;;  %v281_v35 = vmax.f32 %v249_v20, %v265_v28 }
  0xee   :  { %v406_v36 = vpack.c.bf16 %v270_v29, %v270_v29  ;;  %v414_v37 = vpack.c.bf16 %v278_v30, %v278_v30  ;;  %v271_v38 = vmax.f32 %v239_v23, %v255_v31  ;;  %v279_v39 = vmax.f32 %v247_v24, %v263_v9 }
  0xef   :  { %353 = vst.msk [vmem:[%s626_s4 + $0x18] sm:$0xf] %vm346_vm1, %v408_v32  ;;  %361 = vst.msk [vmem:[%s626_s4 + $0x38] sm:$0xf] %vm346_vm1, %v416_v33  ;;  %v409_v11 = vpack.c.bf16 %v273_v34, %v273_v34  ;;  %v417_v40 = vpack.c.bf16 %v281_v35, %v281_v35 }
  0xf0   :  { %351 = vst.msk [vmem:[%s626_s4 + $0x10] sm:$0xf] %vm346_vm1, %v406_v36  ;;  %359 = vst.msk [vmem:[%s626_s4 + $0x30] sm:$0xf] %vm346_vm1, %v414_v37  ;;  %v407_v41 = vpack.c.bf16 %v271_v38, %v271_v38  ;;  %v415_v42 = vpack.c.bf16 %v279_v39, %v279_v39 }
  0xf1   :  { %354 = vst.msk [vmem:[%s626_s4 + $0x1c] sm:$0xf] %vm346_vm1, %v409_v11  ;;  %362 = vst.msk [vmem:[%s626_s4 + $0x3c] sm:$0xf] %vm346_vm1, %v417_v40 }
  0xf2   :  { %352 = vst.msk [vmem:[%s626_s4 + $0x14] sm:$0xf] %vm346_vm1, %v407_v41  ;;  %360 = vst.msk [vmem:[%s626_s4 + $0x34] sm:$0xf] %vm346_vm1, %v415_v42 }

// kernel: _lambda_.40
= control target key start
LH: loop header
LB: loop body
LE: loop exit
PB: predicated region body
PF: predicated region fallthrough
CT: control target
= control target key end

     0   :  { %vm90_vm0 = vcmask 261120   ;;  %vm258_vm1 = vcmask 130048   ;;  %s476_s1 = inlined_call_operand.vmem [shape: bf16[32,16], index: 1, kind: input, shape index: {}]   ;;  %s477_s0 = inlined_call_operand.vmem [shape: bf16[128,32], index: 0, kind: input, shape index: {}]   ;;  %s478_s2 = inlined_call_operand.vmem [shape: f32[1,16], index: 2, kind: input, shape index: {}]   ;;  %s479_s3 = inlined_call_operand.vmem [shape: f32[1,16], index: 3, kind: input, shape index: {}]   ;;  %s480_s4 = inlined_call_operand.vmem [shape: f32[128,16], index: 4, kind: output, shape index: {}]  }
   0x1   :  { %v333_v0 = vld [vmem:[%s476_s1] sm:$0xff]   ;;  %v334_v1 = vld [vmem:[%s476_s1 + $0x8] sm:$0xff]   ;;  %v339_v6 = vld [vmem:[%s477_s0 + $0x10] sm:$0xff]  }
   0x2   :  { %309 = vmatprep.subr.bf16.mxu0 %v333_v0  ;;  %329 = vmatprep.subr.bf16.mxu1 %v333_v0  ;;  %v335_v2 = vld [vmem:[%s477_s0] sm:$0xff]   ;;  %v337_v4 = vld [vmem:[%s477_s0 + $0x8] sm:$0xff]   ;;  %v340_v7 = vld [vmem:[%s477_s0 + $0x30] sm:$0xff]  }
   0x3   :  { %310 = vmatpush3.bf16.msra.mxu0 %v333_v0  ;;  %331 = vmatpush3.bf16.msra.mxu1 %v333_v0  ;;  %v336_v3 = vld [vmem:[%s477_s0 + $0x20] sm:$0xff]   ;;  %v338_v5 = vld [vmem:[%s477_s0 + $0x28] sm:$0xff]   ;;  %v341_v8 = vld [vmem:[%s477_s0 + $0x18] sm:$0xff]  }
   0x4   :  { %311 = vmatprep.subr.bf16.mxu0 %v334_v1  ;;  %330 = vmatprep.subr.bf16.mxu1 %v334_v1  ;;  %v342_v9 = vld [vmem:[%s477_s0 + $0x38] sm:$0xff]   ;;  %v297_v10 = vld [vmem:[%s478_s2] ss:$0 sm:$0xff] }
   0x5   :  { %313 = vmatprep.mubr.msk.bf16.mxu0 %vm90_vm0, %v335_v2  ;;  %321 = vmatprep.mubr.msk.bf16.mxu1 %vm90_vm0, %v336_v3  ;;  %v298_v12 = vld [vmem:[%s479_s3] ss:$0 sm:$0xff] }
   0x7   :  { %312 = vmatpush3.bf16.msra.mxu0 %v334_v1  ;;  %332 = vmatpush3.bf16.msra.mxu1 %v334_v1 }
   0xa   :  { %314 = vmatmul.mubr.msk.bf16.vlgmr.msra.gmra.mrb[0].mxu0 %vm90_vm0, %v337_v4  ;;  %322 = vmatmul.mubr.msk.bf16.vlgmr.msra.gmra.mrb[0].mxu1 %vm90_vm0, %v338_v5 }
   0xb   :  { %317 = vmatprep.mubr.msk.bf16.mxu0 %vm90_vm0, %v339_v6  ;;  %325 = vmatprep.mubr.msk.bf16.mxu1 %vm90_vm0, %v340_v7 }
  0x12   :  { %318 = vmatmul.mubr.msk.bf16.gmra.mrb[4].mxu0 %vm90_vm0, %v341_v8  ;;  %326 = vmatmul.mubr.msk.bf16.gmra.mrb[4].mxu1 %vm90_vm0, %v342_v9 }
  0xdd   :  { %v315_v11 = vpop.f32.mrb[0].mxu0  ;;  %v323_v13 = vpop.f32.mrb[0].mxu1 }
  0xde   :  { %v221_v14 = vmul.f32 %v315_v11, %v297_v10  ;;  %v229_v15 = vmul.f32 %v323_v13, %v297_v10  ;;  %v149_v16 = vpop.f32.mrb[1].mxu0  ;;  %v181_v17 = vpop.f32.mrb[1].mxu1 }
  0xdf   :  { %v219_v18 = vmul.f32 %v297_v10, %v149_v16  ;;  %v227_v19 = vmul.f32 %v297_v10, %v181_v17  ;;  %v316_v20 = vpop.f32.mrb[2].mxu0  ;;  %v324_v21 = vpop.f32.mrb[2].mxu1 }
  0xe0   :  { %v244_v22 = vadd.f32 %v298_v12, %v221_v14  ;;  %v252_v23 = vadd.f32 %v298_v12, %v229_v15  ;;  %v222_v24 = vmul.f32 %v316_v20, %v297_v10  ;;  %v230_v25 = vmul.f32 %v324_v21, %v297_v10  ;;  %v152_v26 = vpop.f32.mrb[3].mxu0  ;;  %v184_v27 = vpop.f32.mrb[3].mxu1 }
  0xe1   :  { %v242_v28 = vadd.f32 %v298_v12, %v219_v18  ;;  %v250_v29 = vadd.f32 %v298_v12, %v227_v19  ;;  %v220_v30 = vmul.f32 %v297_v10, %v152_v26  ;;  %v228_v31 = vmul.f32 %v297_v10, %v184_v27 }
  0xe2   :  { %261 = vst.msk [vmem:[%s480_s4 + $0x10] sm:$0xff] %vm258_vm1, %v244_v22  ;;  %269 = vst.msk [vmem:[%s480_s4 + $0x50] sm:$0xff] %vm258_vm1, %v252_v23  ;;  %v245_v32 = vadd.f32 %v298_v12, %v222_v24  ;;  %v253_v33 = vadd.f32 %v298_v12, %v230_v25 }
  0xe3   :  { %259 = vst.msk [vmem:[%s480_s4] sm:$0xff] %vm258_vm1, %v242_v28  ;;  %267 = vst.msk [vmem:[%s480_s4 + $0x40] sm:$0xff] %vm258_vm1, %v250_v29  ;;  %v243_v34 = vadd.f32 %v298_v12, %v220_v30  ;;  %v251_v35 = vadd.f32 %v298_v12, %v228_v31 }
  0xe4   :  { %262 = vst.msk [vmem:[%s480_s4 + $0x18] sm:$0xff] %vm258_vm1, %v245_v32  ;;  %270 = vst.msk [vmem:[%s480_s4 + $0x58] sm:$0xff] %vm258_vm1, %v253_v33 }
  0xe5   :  { %260 = vst.msk [vmem:[%s480_s4 + $0x8] sm:$0xff] %vm258_vm1, %v243_v34  ;;  %268 = vst.msk [vmem:[%s480_s4 + $0x48] sm:$0xff] %vm258_vm1, %v251_v35  ;;  %v319_v36 = vpop.f32.mrb[4].mxu0  ;;  %v327_v37 = vpop.f32.mrb[4].mxu1 }
  0xe6   :  { %v225_v38 = vmul.f32 %v319_v36, %v297_v10  ;;  %v233_v39 = vmul.f32 %v327_v37, %v297_v10  ;;  %v165_v40 = vpop.f32.mrb[5].mxu0  ;;  %v197_v41 = vpop.f32.mrb[5].mxu1 }
  0xe7   :  { %v223_v42 = vmul.f32 %v297_v10, %v165_v40  ;;  %v231_v43 = vmul.f32 %v297_v10, %v197_v41  ;;  %v320_v44 = vpop.f32.mrb[6].mxu0  ;;  %v328_v45 = vpop.f32.mrb[6].mxu1 }
  0xe8   :  { %v248_v46 = vadd.f32 %v298_v12, %v225_v38  ;;  %v256_v47 = vadd.f32 %v298_v12, %v233_v39  ;;  %v226_v48 = vmul.f32 %v320_v44, %v297_v10  ;;  %v234_v49 = vmul.f32 %v328_v45, %v297_v10  ;;  %v168_v50 = vpop.f32.mrb[7].mxu0  ;;  %v200_v51 = vpop.f32.mrb[7].mxu1 }
  0xe9   :  { %v246_v52 = vadd.f32 %v298_v12, %v223_v42  ;;  %v254_v53 = vadd.f32 %v298_v12, %v231_v43  ;;  %v224_v54 = vmul.f32 %v297_v10, %v168_v50  ;;  %v232_v55 = vmul.f32 %v297_v10, %v200_v51 }
  0xea   :  { %265 = vst.msk [vmem:[%s480_s4 + $0x30] sm:$0xff] %vm258_vm1, %v248_v46  ;;  %273 = vst.msk [vmem:[%s480_s4 + $0x70] sm:$0xff] %vm258_vm1, %v256_v47  ;;  %v249_v56 = vadd.f32 %v298_v12, %v226_v48  ;;  %v257_v57 = vadd.f32 %v298_v12, %v234_v49 }
  0xeb   :  { %263 = vst.msk [vmem:[%s480_s4 + $0x20] sm:$0xff] %vm258_vm1, %v246_v52  ;;  %271 = vst.msk [vmem:[%s480_s4 + $0x60] sm:$0xff] %vm258_vm1, %v254_v53  ;;  %v247_v58 = vadd.f32 %v298_v12, %v224_v54  ;;  %v255_v59 = vadd.f32 %v298_v12, %v232_v55 }
  0xec   :  { %266 = vst.msk [vmem:[%s480_s4 + $0x38] sm:$0xff] %vm258_vm1, %v249_v56  ;;  %274 = vst.msk [vmem:[%s480_s4 + $0x78] sm:$0xff] %vm258_vm1, %v257_v57 }
  0xed   :  { %264 = vst.msk [vmem:[%s480_s4 + $0x28] sm:$0xff] %vm258_vm1, %v247_v58  ;;  %272 = vst.msk [vmem:[%s480_s4 + $0x68] sm:$0xff] %vm258_vm1, %v255_v59 }

// kernel: _lambda_.47
= control target key start
LH: loop header
LB: loop body
LE: loop exit
PB: predicated region body
PF: predicated region fallthrough
CT: control target
= control target key end

     0   :  { %vm91_vm0 = vcmask 261120   ;;  %s501_s0 = inlined_call_operand.vmem [shape: bf16[128,32], index: 0, kind: input, shape index: {}]   ;;  %s502_s1 = inlined_call_operand.vmem [shape: bf16[32,36], index: 1, kind: input, shape index: {}]   ;;  %s503_s2 = inlined_call_operand.vmem [shape: f32[1,36], index: 2, kind: input, shape index: {}]   ;;  %s504_s3 = inlined_call_operand.vmem [shape: f32[1,36], index: 3, kind: input, shape index: {}]   ;;  %s505_s4 = inlined_call_operand.hbm [shape: f32[128,36], index: 4, kind: output, shape index: {}]  }
   0x1   :  { %v349_v0 = vld [vmem:[%s502_s1] sm:$0xff]   ;;  %v350_v1 = vld [vmem:[%s502_s1 + $0x8] sm:$0xff]   ;;  %v355_v6 = vld [vmem:[%s501_s0 + $0x10] sm:$0xff]  }
   0x2   :  { %322 = vmatprep.subr.bf16.mxu0 %v349_v0  ;;  %342 = vmatprep.subr.bf16.mxu1 %v349_v0  ;;  %v351_v2 = vld [vmem:[%s501_s0] sm:$0xff]   ;;  %v353_v4 = vld [vmem:[%s501_s0 + $0x8] sm:$0xff]   ;;  %v356_v7 = vld [vmem:[%s501_s0 + $0x30] sm:$0xff]  }
   0x3   :  { %323 = vmatpush3.bf16.msra.mxu0 %v349_v0  ;;  %344 = vmatpush3.bf16.msra.mxu1 %v349_v0  ;;  %v352_v3 = vld [vmem:[%s501_s0 + $0x20] sm:$0xff]   ;;  %v354_v5 = vld [vmem:[%s501_s0 + $0x28] sm:$0xff]  }
   0x4   :  { %324 = vmatprep.subr.bf16.mxu0 %v350_v1  ;;  %343 = vmatprep.subr.bf16.mxu1 %v350_v1 }
   0x5   :  { %326 = vmatprep.mubr.msk.bf16.mxu0 %vm91_vm0, %v351_v2  ;;  %334 = vmatprep.mubr.msk.bf16.mxu1 %vm91_vm0, %v352_v3 }
   0x7   :  { %325 = vmatpush3.bf16.msra.mxu0 %v350_v1  ;;  %345 = vmatpush3.bf16.msra.mxu1 %v350_v1 }
   0xa   :  { %327 = vmatmul.mubr.msk.bf16.vlgmr.msra.gmra.mrb[0].mxu0 %vm91_vm0, %v353_v4  ;;  %335 = vmatmul.mubr.msk.bf16.vlgmr.msra.gmra.mrb[0].mxu1 %vm91_vm0, %v354_v5 }
   0xb   :  { %9 = vsyncpa [#allocation3], 0  ;;  %330 = vmatprep.mubr.msk.bf16.mxu0 %vm91_vm0, %v355_v6  ;;  %338 = vmatprep.mubr.msk.bf16.mxu1 %vm91_vm0, %v356_v7  ;;  %v357_v8 = vld [vmem:[%s501_s0 + $0x18] sm:$0xff]   ;;  %v310_v10 = vld [vmem:[%s503_s2] ss:$0 sm:$0xff]  ;;  %vm259_vm1 = vcmask 293888  }
   0xc   :  { %v358_v9 = vld [vmem:[%s501_s0 + $0x38] sm:$0xff]   ;;  %v455_v12 = vld [vmem:[%s504_s3] ss:$0 sm:$0xff]  ;;  %s383_s0 = smov [#allocation2]  }
   0xd   :  { %s281_s2 = sshll.u32 %s383_s0, 4  ;;  %s282_s2 = int_to_ptr.vmem [resolvable:$true] %s281_s2 }
   0xe   :  { %s359_s3 = scalar_lea.vmem %s282_s2, 2048  ;;  %p364_p1 = scmp.lt.s32.totalorder %s282_s2, %s282_s2 }
   0xf   :  { %p360_p0 = scmp.ne.s32.totalorder %s282_s2, %s359_s3  ;;  %p365_p2 = scmp.lt.s32.totalorder %s359_s3, %s359_s3 }
  0x11   :  { %p366_p3 = por %p365_p2, %p364_p1 }
  0x12   :  { %331 = vmatmul.mubr.msk.bf16.gmra.mrb[4].mxu0 %vm91_vm0, %v357_v8  ;;  %339 = vmatmul.mubr.msk.bf16.gmra.mrb[4].mxu1 %vm91_vm0, %v358_v9 }
  0x13   :  { %p367_p4 = pnand %p366_p3, %p360_p0 }
  0xdd   :  { %v328_v11 = vpop.f32.mrb[0].mxu0  ;;  %v336_v13 = vpop.f32.mrb[0].mxu1 }
  0xde   :  { %v222_v14 = vmul.f32 %v328_v11, %v310_v10  ;;  %v230_v15 = vmul.f32 %v336_v13, %v310_v10  ;;  %v150_v16 = vpop.f32.mrb[1].mxu0  ;;  %v182_v17 = vpop.f32.mrb[1].mxu1 }
  0xdf   :  { %v220_v18 = vmul.f32 %v310_v10, %v150_v16  ;;  %v228_v19 = vmul.f32 %v310_v10, %v182_v17  ;;  %v329_v20 = vpop.f32.mrb[2].mxu0  ;;  %v337_v21 = vpop.f32.mrb[2].mxu1 }
  0xe0   :  { %v245_v22 = vadd.f32 %v455_v12, %v222_v14  ;;  %v253_v23 = vadd.f32 %v455_v12, %v230_v15  ;;  %v223_v24 = vmul.f32 %v329_v20, %v310_v10  ;;  %v231_v25 = vmul.f32 %v337_v21, %v310_v10  ;;  %v153_v26 = vpop.f32.mrb[3].mxu0  ;;  %v185_v27 = vpop.f32.mrb[3].mxu1 }
  0xe1   :  { %v243_v28 = vadd.f32 %v455_v12, %v220_v18  ;;  %v251_v29 = vadd.f32 %v455_v12, %v228_v19  ;;  %v221_v30 = vmul.f32 %v310_v10, %v153_v26  ;;  %v229_v31 = vmul.f32 %v310_v10, %v185_v27 }
  0xe2   :  { %262 = vst.msk [vmem:[#allocation2 + $0x10] sm:$0xff] %vm259_vm1, %v245_v22  ;;  %270 = vst.msk [vmem:[#allocation2 + $0x50] sm:$0xff] %vm259_vm1, %v253_v23  ;;  %v246_v32 = vadd.f32 %v455_v12, %v223_v24  ;;  %v254_v33 = vadd.f32 %v455_v12, %v231_v25 }
  0xe3   :  { %260 = vst.msk [vmem:[#allocation2] sm:$0xff] %vm259_vm1, %v243_v28  ;;  %268 = vst.msk [vmem:[#allocation2 + $0x40] sm:$0xff] %vm259_vm1, %v251_v29  ;;  %v244_v34 = vadd.f32 %v455_v12, %v221_v30  ;;  %v252_v35 = vadd.f32 %v455_v12, %v229_v31 }
  0xe4   :  { %263 = vst.msk [vmem:[#allocation2 + $0x18] sm:$0xff] %vm259_vm1, %v246_v32  ;;  %271 = vst.msk [vmem:[#allocation2 + $0x58] sm:$0xff] %vm259_vm1, %v254_v33 }
  0xe5   :  { %261 = vst.msk [vmem:[#allocation2 + $0x8] sm:$0xff] %vm259_vm1, %v244_v34  ;;  %269 = vst.msk [vmem:[#allocation2 + $0x48] sm:$0xff] %vm259_vm1, %v252_v35  ;;  %v332_v36 = vpop.f32.mrb[4].mxu0  ;;  %v340_v37 = vpop.f32.mrb[4].mxu1 }
  0xe6   :  { %v226_v38 = vmul.f32 %v332_v36, %v310_v10  ;;  %v234_v39 = vmul.f32 %v340_v37, %v310_v10  ;;  %v166_v40 = vpop.f32.mrb[5].mxu0  ;;  %v198_v41 = vpop.f32.mrb[5].mxu1 }
  0xe7   :  { %v224_v42 = vmul.f32 %v310_v10, %v166_v40  ;;  %v232_v43 = vmul.f32 %v310_v10, %v198_v41  ;;  %v333_v44 = vpop.f32.mrb[6].mxu0  ;;  %v341_v45 = vpop.f32.mrb[6].mxu1 }
  0xe8   :  { %v249_v46 = vadd.f32 %v455_v12, %v226_v38  ;;  %v257_v47 = vadd.f32 %v455_v12, %v234_v39  ;;  %v227_v48 = vmul.f32 %v333_v44, %v310_v10  ;;  %v235_v49 = vmul.f32 %v341_v45, %v310_v10  ;;  %v169_v50 = vpop.f32.mrb[7].mxu0  ;;  %v201_v51 = vpop.f32.mrb[7].mxu1 }
  0xe9   :  { %v247_v52 = vadd.f32 %v455_v12, %v224_v42  ;;  %v255_v53 = vadd.f32 %v455_v12, %v232_v43  ;;  %v225_v54 = vmul.f32 %v310_v10, %v169_v50  ;;  %v233_v55 = vmul.f32 %v310_v10, %v201_v51 }
  0xea   :  { %266 = vst.msk [vmem:[#allocation2 + $0x30] sm:$0xff] %vm259_vm1, %v249_v46  ;;  %274 = vst.msk [vmem:[#allocation2 + $0x70] sm:$0xff] %vm259_vm1, %v257_v47  ;;  %v250_v56 = vadd.f32 %v455_v12, %v227_v48  ;;  %v258_v57 = vadd.f32 %v455_v12, %v235_v49 }
  0xeb   :  { %264 = vst.msk [vmem:[#allocation2 + $0x20] sm:$0xff] %vm259_vm1, %v247_v52  ;;  %272 = vst.msk [vmem:[#allocation2 + $0x60] sm:$0xff] %vm259_vm1, %v255_v53  ;;  %v248_v58 = vadd.f32 %v455_v12, %v225_v54  ;;  %v256_v59 = vadd.f32 %v455_v12, %v233_v55 }
  0xec   :  { %267 = vst.msk [vmem:[#allocation2 + $0x38] sm:$0xff] %vm259_vm1, %v250_v56  ;;  %275 = vst.msk [vmem:[#allocation2 + $0x78] sm:$0xff] %vm259_vm1, %v258_v57 }
  0xed   :  { %265 = vst.msk [vmem:[#allocation2 + $0x28] sm:$0xff] %vm259_vm1, %v248_v58  ;;  %273 = vst.msk [vmem:[#allocation2 + $0x68] sm:$0xff] %vm259_vm1, %v256_v59 }
  0xee   :  { %370 = shalt.err (!%p367_p4)
}
  0xef   :  { %s371_s14 = scalar_lea.hbm %s505_s4, 2048 }
  0xf0   :  { %p372_p5 = scmp.ne.s32.totalorder %s505_s4, %s371_s14  ;;  %p375_p6 = scmp.lt.u32.totalorder %s371_s14, %s505_s4 }
  0xf2   :  { %p377_p7 = pnand %p375_p6, %p372_p5 }
  0xf4   :  { %380 = shalt.err (!%p377_p7)
}
  0xf5   :  { %s384_s19 = smov 128   ;;  %s385_s20 = smov 8  }
  0xf6   :  { %287 = dma.vmem_to_hbm [thread:$0]  %s282_s2, 2048, %s505_s4, [#allocation3], %s384_s19, %s384_s19, %s385_s20  }
  0xf7   :  { %381 = dma.done.wait [#allocation3], 2048  }
  0xf8   :  { %382 = vsyncadd [#allocation3], 4294965248 }
  0xf9   :  { %291 = vsyncpa [#allocation3], 1 }

// kernel: _lambda_.38
= control target key start
LH: loop header
LB: loop body
LE: loop exit
PB: predicated region body
PF: predicated region fallthrough
CT: control target
= control target key end

     0   :  { %vm250_vm0 = vcmask 130048   ;;  %vm1162_vm1 = vcmask 125952   ;;  %s2176_s1 = inlined_call_operand.vmem [shape: bf16[16,16], index: 1, kind: input, shape index: {}]   ;;  %s2177_s0 = inlined_call_operand.vmem [shape: bf16[512,16], index: 0, kind: input, shape index: {}]   ;;  %s2178_s2 = inlined_call_operand.vmem [shape: f32[1,16], index: 2, kind: input, shape index: {}]   ;;  %s2179_s3 = inlined_call_operand.vmem [shape: f32[1,16], index: 3, kind: input, shape index: {}]   ;;  %s2180_s4 = inlined_call_operand.vmem [shape: bf16[512,16], index: 4, kind: output, shape index: {}]  }
   0x1   :  { %v1527_v0 = vld [vmem:[%s2176_s1] sm:$0xff]   ;;  %v1530_v3 = vld [vmem:[%s2177_s0 + $0x8] sm:$0xff]   ;;  %v1532_v5 = vld [vmem:[%s2177_s0 + $0x10] sm:$0xff]  }
   0x2   :  { %v1528_v1 = vld [vmem:[%s2177_s0] sm:$0xff]   ;;  %1459 = vmatprep.subr.bf16.mxu0 %v1527_v0  ;;  %1525 = vmatprep.subr.bf16.mxu1 %v1527_v0  ;;  %v1531_v4 = vld [vmem:[%s2177_s0 + $0x88] sm:$0xff]   ;;  %v1533_v6 = vld [vmem:[%s2177_s0 + $0x90] sm:$0xff]  }
   0x3   :  { %v1529_v2 = vld [vmem:[%s2177_s0 + $0x80] sm:$0xff]   ;;  %1460 = vmatpush3.bf16.msra.mxu0 %v1527_v0  ;;  %1526 = vmatpush3.bf16.msra.mxu1 %v1527_v0  ;;  %v1534_v7 = vld [vmem:[%s2177_s0 + $0x18] sm:$0xff]   ;;  %v1538_v11 = vld [vmem:[%s2177_s0 + $0x28] sm:$0xff]  }
   0x4   :  { %1461 = vmatprep.mubr.msk.bf16.mxu0 %vm250_vm0, %v1528_v1  ;;  %1493 = vmatprep.mubr.msk.bf16.mxu1 %vm250_vm0, %v1529_v2  ;;  %v1535_v8 = vld [vmem:[%s2177_s0 + $0x98] sm:$0xff]   ;;  %v1536_v9 = vld [vmem:[%s2177_s0 + $0x20] sm:$0xff]   ;;  %v1539_v12 = vld [vmem:[%s2177_s0 + $0xa8] sm:$0xff]  }
   0x5   :  { %v1537_v10 = vld [vmem:[%s2177_s0 + $0xa0] sm:$0xff]   ;;  %v1540_v13 = vld [vmem:[%s2177_s0 + $0x30] sm:$0xff]   ;;  %v1542_v15 = vld [vmem:[%s2177_s0 + $0x38] sm:$0xff]  }
   0x6   :  { %1462 = vmatmul.mubr.msk.bf16.vlgmr.msra.gmra.mrb[0].mxu0 %vm250_vm0, %v1530_v3  ;;  %1494 = vmatmul.mubr.msk.bf16.vlgmr.msra.gmra.mrb[0].mxu1 %vm250_vm0, %v1531_v4  ;;  %v1541_v14 = vld [vmem:[%s2177_s0 + $0xb0] sm:$0xff]   ;;  %v1543_v16 = vld [vmem:[%s2177_s0 + $0xb8] sm:$0xff]   ;;  %v1544_v17 = vld [vmem:[%s2177_s0 + $0x40] sm:$0xff]  }
   0x7   :  { %1465 = vmatprep.mubr.msk.bf16.mxu0 %vm250_vm0, %v1532_v5  ;;  %1497 = vmatprep.mubr.msk.bf16.mxu1 %vm250_vm0, %v1533_v6  ;;  %v1545_v18 = vld [vmem:[%s2177_s0 + $0xc0] sm:$0xff]   ;;  %v1546_v19 = vld [vmem:[%s2177_s0 + $0x48] sm:$0xff]   ;;  %v1548_v21 = vld [vmem:[%s2177_s0 + $0x50] sm:$0xff]  }
   0x8   :  { %v1547_v20 = vld [vmem:[%s2177_s0 + $0xc8] sm:$0xff]   ;;  %v1549_v22 = vld [vmem:[%s2177_s0 + $0xd0] sm:$0xff]   ;;  %v1550_v23 = vld [vmem:[%s2177_s0 + $0x58] sm:$0xff]  }
   0x9   :  { %v1551_v24 = vld [vmem:[%s2177_s0 + $0xd8] sm:$0xff]   ;;  %v1552_v25 = vld [vmem:[%s2177_s0 + $0x60] sm:$0xff]   ;;  %v1554_v27 = vld [vmem:[%s2177_s0 + $0x68] sm:$0xff]  }
   0xa   :  { %v1553_v26 = vld [vmem:[%s2177_s0 + $0xe0] sm:$0xff]   ;;  %v1555_v28 = vld [vmem:[%s2177_s0 + $0xe8] sm:$0xff]   ;;  %v1556_v29 = vld [vmem:[%s2177_s0 + $0x70] sm:$0xff]  }
   0xb   :  { %v1557_v30 = vld [vmem:[%s2177_s0 + $0xf0] sm:$0xff]   ;;  %v1558_v31 = vld [vmem:[%s2177_s0 + $0x78] sm:$0xff]   ;;  %v1719_v33 = vld [vmem:[%s2178_s2] ss:$0 sm:$0xff] }
   0xc   :  { %v1559_v32 = vld [vmem:[%s2177_s0 + $0xf8] sm:$0xff]   ;;  %v1724_v35 = vld [vmem:[%s2179_s3] ss:$0 sm:$0xff] }
   0xe   :  { %1466 = vmatmul.mubr.msk.bf16.gmra.mrb[4].mxu0 %vm250_vm0, %v1534_v7  ;;  %1498 = vmatmul.mubr.msk.bf16.gmra.mrb[4].mxu1 %vm250_vm0, %v1535_v8 }
   0xf   :  { %1469 = vmatprep.mubr.msk.bf16.mxu0 %vm250_vm0, %v1536_v9  ;;  %1501 = vmatprep.mubr.msk.bf16.mxu1 %vm250_vm0, %v1537_v10 }
  0x16   :  { %1470 = vmatmul.mubr.msk.bf16.gmra.mrb[8].mxu0 %vm250_vm0, %v1538_v11  ;;  %1502 = vmatmul.mubr.msk.bf16.gmra.mrb[8].mxu1 %vm250_vm0, %v1539_v12 }
  0x17   :  { %1473 = vmatprep.mubr.msk.bf16.mxu0 %vm250_vm0, %v1540_v13  ;;  %1505 = vmatprep.mubr.msk.bf16.mxu1 %vm250_vm0, %v1541_v14 }
  0x1e   :  { %1474 = vmatmul.mubr.msk.bf16.gmra.mrb[12].mxu0 %vm250_vm0, %v1542_v15  ;;  %1506 = vmatmul.mubr.msk.bf16.gmra.mrb[12].mxu1 %vm250_vm0, %v1543_v16 }
  0x1f   :  { %1477 = vmatprep.mubr.msk.bf16.mxu0 %vm250_vm0, %v1544_v17  ;;  %1509 = vmatprep.mubr.msk.bf16.mxu1 %vm250_vm0, %v1545_v18 }
  0x26   :  { %1478 = vmatmul.mubr.msk.bf16.gmra.mrb[16].mxu0 %vm250_vm0, %v1546_v19  ;;  %1510 = vmatmul.mubr.msk.bf16.gmra.mrb[16].mxu1 %vm250_vm0, %v1547_v20 }
  0x27   :  { %1481 = vmatprep.mubr.msk.bf16.mxu0 %vm250_vm0, %v1548_v21  ;;  %1513 = vmatprep.mubr.msk.bf16.mxu1 %vm250_vm0, %v1549_v22 }
  0x2e   :  { %1482 = vmatmul.mubr.msk.bf16.gmra.mrb[20].mxu0 %vm250_vm0, %v1550_v23  ;;  %1514 = vmatmul.mubr.msk.bf16.gmra.mrb[20].mxu1 %vm250_vm0, %v1551_v24 }
  0x2f   :  { %1485 = vmatprep.mubr.msk.bf16.mxu0 %vm250_vm0, %v1552_v25  ;;  %1517 = vmatprep.mubr.msk.bf16.mxu1 %vm250_vm0, %v1553_v26 }
  0x36   :  { %1486 = vmatmul.mubr.msk.bf16.gmra.mrb[24].mxu0 %vm250_vm0, %v1554_v27  ;;  %1518 = vmatmul.mubr.msk.bf16.gmra.mrb[24].mxu1 %vm250_vm0, %v1555_v28 }
  0x37   :  { %1489 = vmatprep.mubr.msk.bf16.mxu0 %vm250_vm0, %v1556_v29  ;;  %1521 = vmatprep.mubr.msk.bf16.mxu1 %vm250_vm0, %v1557_v30 }
  0x3e   :  { %1490 = vmatmul.mubr.msk.bf16.gmra.mrb[28].mxu0 %vm250_vm0, %v1558_v31  ;;  %1522 = vmatmul.mubr.msk.bf16.gmra.mrb[28].mxu1 %vm250_vm0, %v1559_v32 }
  0xd9   :  { %v1463_v34 = vpop.f32.mrb[0].mxu0  ;;  %v1495_v36 = vpop.f32.mrb[0].mxu1 }
  0xda   :  { %v645_v37 = vmul.f32 %v1463_v34, %v1719_v33  ;;  %v677_v38 = vmul.f32 %v1495_v36, %v1719_v33  ;;  %v381_v39 = vpop.f32.mrb[1].mxu0  ;;  %v509_v40 = vpop.f32.mrb[1].mxu1 }
  0xdb   :  { %v643_v41 = vmul.f32 %v1719_v33, %v381_v39  ;;  %v675_v42 = vmul.f32 %v1719_v33, %v509_v40  ;;  %v1464_v43 = vpop.f32.mrb[2].mxu0  ;;  %v1496_v44 = vpop.f32.mrb[2].mxu1 }
  0xdc   :  { %v716_v45 = vadd.f32 %v1724_v35, %v645_v37  ;;  %v748_v46 = vadd.f32 %v1724_v35, %v677_v38  ;;  %v646_v47 = vmul.f32 %v1464_v43, %v1719_v33  ;;  %v678_v48 = vmul.f32 %v1496_v44, %v1719_v33  ;;  %v384_v49 = vpop.f32.mrb[3].mxu0  ;;  %v512_v50 = vpop.f32.mrb[3].mxu1 }
  0xdd   :  { %v714_v51 = vadd.f32 %v1724_v35, %v643_v41  ;;  %v746_v52 = vadd.f32 %v1724_v35, %v675_v42  ;;  %v644_v53 = vmul.f32 %v1719_v33, %v384_v49  ;;  %v676_v54 = vmul.f32 %v1719_v33, %v512_v50 }
  0xde   :  { %v780_v55 = vmul.f32 0.1, %v716_v45  ;;  %v812_v56 = vmul.f32 0.1, %v748_v46  ;;  %v717_v57 = vadd.f32 %v1724_v35, %v646_v47  ;;  %v749_v58 = vadd.f32 %v1724_v35, %v678_v48 }
  0xdf   :  { %v778_v59 = vmul.f32 0.1, %v714_v51  ;;  %v810_v60 = vmul.f32 0.1, %v746_v52  ;;  %v715_v61 = vadd.f32 %v1724_v35, %v644_v53  ;;  %v747_v62 = vadd.f32 %v1724_v35, %v676_v54 }
  0xe0   :  { %v844_v63 = vmax.f32 %v716_v45, %v780_v55  ;;  %v876_v0 = vmax.f32 %v748_v46, %v812_v56  ;;  %v781_v1 = vmul.f32 0.1, %v717_v57  ;;  %v813_v2 = vmul.f32 0.1, %v749_v58 }
  0xe1   :  { %v842_v3 = vmax.f32 %v714_v51, %v778_v59  ;;  %v874_v4 = vmax.f32 %v746_v52, %v810_v60  ;;  %v779_v5 = vmul.f32 0.1, %v715_v61  ;;  %v811_v6 = vmul.f32 0.1, %v747_v62  ;;  %v1467_v7 = vpop.f32.mrb[4].mxu0  ;;  %v1499_v8 = vpop.f32.mrb[4].mxu1 }
  0xe2   :  { %v1364_v9 = vpack.c.bf16 %v844_v63, %v844_v63  ;;  %v1396_v10 = vpack.c.bf16 %v876_v0, %v876_v0  ;;  %v845_v11 = vmax.f32 %v717_v57, %v781_v1  ;;  %v877_v12 = vmax.f32 %v749_v58, %v813_v2  ;;  %v397_v13 = vpop.f32.mrb[5].mxu0  ;;  %v525_v14 = vpop.f32.mrb[5].mxu1 }
  0xe3   :  { %v1362_v15 = vpack.c.bf16 %v842_v3, %v842_v3  ;;  %v1394_v16 = vpack.c.bf16 %v874_v4, %v874_v4  ;;  %v843_v17 = vmax.f32 %v715_v61, %v779_v5  ;;  %v875_v18 = vmax.f32 %v747_v62, %v811_v6  ;;  %v1468_v19 = vpop.f32.mrb[6].mxu0  ;;  %v1500_v20 = vpop.f32.mrb[6].mxu1 }
  0xe4   :  { %1165 = vst.msk [vmem:[%s2180_s4 + $0x8] sm:$0xf] %vm1162_vm1, %v1364_v9  ;;  %1197 = vst.msk [vmem:[%s2180_s4 + $0x88] sm:$0xf] %vm1162_vm1, %v1396_v10  ;;  %v1365_v21 = vpack.c.bf16 %v845_v11, %v845_v11  ;;  %v1397_v22 = vpack.c.bf16 %v877_v12, %v877_v12  ;;  %v649_v23 = vmul.f32 %v1467_v7, %v1719_v33  ;;  %v400_v25 = vpop.f32.mrb[7].mxu0  ;;  %v528_v26 = vpop.f32.mrb[7].mxu1 }
  0xe5   :  { %v681_v24 = vmul.f32 %v1499_v8, %v1719_v33  ;;  %1163 = vst.msk [vmem:[%s2180_s4] sm:$0xf] %vm1162_vm1, %v1362_v15  ;;  %1195 = vst.msk [vmem:[%s2180_s4 + $0x80] sm:$0xf] %vm1162_vm1, %v1394_v16  ;;  %v1363_v27 = vpack.c.bf16 %v843_v17, %v843_v17  ;;  %v1395_v28 = vpack.c.bf16 %v875_v18, %v875_v18 }
  0xe6   :  { %v647_v29 = vmul.f32 %v1719_v33, %v397_v13  ;;  %v679_v30 = vmul.f32 %v1719_v33, %v525_v14  ;;  %1166 = vst.msk [vmem:[%s2180_s4 + $0xc] sm:$0xf] %vm1162_vm1, %v1365_v21  ;;  %1198 = vst.msk [vmem:[%s2180_s4 + $0x8c] sm:$0xf] %vm1162_vm1, %v1397_v22  ;;  %v720_v31 = vadd.f32 %v1724_v35, %v649_v23 }
  0xe7   :  { %v752_v32 = vadd.f32 %v1724_v35, %v681_v24  ;;  %v650_v34 = vmul.f32 %v1468_v19, %v1719_v33  ;;  %v682_v36 = vmul.f32 %v1500_v20, %v1719_v33  ;;  %1164 = vst.msk [vmem:[%s2180_s4 + $0x4] sm:$0xf] %vm1162_vm1, %v1363_v27  ;;  %1196 = vst.msk [vmem:[%s2180_s4 + $0x84] sm:$0xf] %vm1162_vm1, %v1395_v28 }
  0xe8   :  { %v718_v37 = vadd.f32 %v1724_v35, %v647_v29  ;;  %v750_v38 = vadd.f32 %v1724_v35, %v679_v30  ;;  %v648_v39 = vmul.f32 %v1719_v33, %v400_v25  ;;  %v680_v40 = vmul.f32 %v1719_v33, %v528_v26 }
  0xe9   :  { %v784_v41 = vmul.f32 0.1, %v720_v31  ;;  %v816_v42 = vmul.f32 0.1, %v752_v32  ;;  %v721_v43 = vadd.f32 %v1724_v35, %v650_v34  ;;  %v753_v44 = vadd.f32 %v1724_v35, %v682_v36  ;;  %v1471_v49 = vpop.f32.mrb[8].mxu0  ;;  %v1503_v50 = vpop.f32.mrb[8].mxu1 }
  0xea   :  { %v782_v45 = vmul.f32 0.1, %v718_v37  ;;  %v814_v46 = vmul.f32 0.1, %v750_v38  ;;  %v719_v47 = vadd.f32 %v1724_v35, %v648_v39  ;;  %v751_v48 = vadd.f32 %v1724_v35, %v680_v40  ;;  %v413_v55 = vpop.f32.mrb[9].mxu0  ;;  %v541_v56 = vpop.f32.mrb[9].mxu1 }
  0xeb   :  { %v848_v51 = vmax.f32 %v720_v31, %v784_v41  ;;  %v880_v52 = vmax.f32 %v752_v32, %v816_v42  ;;  %v785_v53 = vmul.f32 0.1, %v721_v43  ;;  %v817_v54 = vmul.f32 0.1, %v753_v44  ;;  %v1472_v61 = vpop.f32.mrb[10].mxu0  ;;  %v1504_v62 = vpop.f32.mrb[10].mxu1 }
  0xec   :  { %v846_v57 = vmax.f32 %v718_v37, %v782_v45  ;;  %v878_v58 = vmax.f32 %v750_v38, %v814_v46  ;;  %v783_v59 = vmul.f32 0.1, %v719_v47  ;;  %v815_v60 = vmul.f32 0.1, %v751_v48  ;;  %v416_v3 = vpop.f32.mrb[11].mxu0  ;;  %v544_v4 = vpop.f32.mrb[11].mxu1 }
  0xed   :  { %v1368_v63 = vpack.c.bf16 %v848_v51, %v848_v51  ;;  %v1400_v0 = vpack.c.bf16 %v880_v52, %v880_v52  ;;  %v849_v1 = vmax.f32 %v721_v43, %v785_v53  ;;  %v881_v2 = vmax.f32 %v753_v44, %v817_v54 }
  0xee   :  { %v1366_v5 = vpack.c.bf16 %v846_v57, %v846_v57  ;;  %v1398_v6 = vpack.c.bf16 %v878_v58, %v878_v58  ;;  %v847_v7 = vmax.f32 %v719_v47, %v783_v59  ;;  %v879_v8 = vmax.f32 %v751_v48, %v815_v60 }
  0xef   :  { %1169 = vst.msk [vmem:[%s2180_s4 + $0x18] sm:$0xf] %vm1162_vm1, %v1368_v63  ;;  %1201 = vst.msk [vmem:[%s2180_s4 + $0x98] sm:$0xf] %vm1162_vm1, %v1400_v0  ;;  %v1369_v9 = vpack.c.bf16 %v849_v1, %v849_v1  ;;  %v1401_v10 = vpack.c.bf16 %v881_v2, %v881_v2  ;;  %v653_v11 = vmul.f32 %v1471_v49, %v1719_v33 }
  0xf0   :  { %v685_v12 = vmul.f32 %v1503_v50, %v1719_v33  ;;  %1167 = vst.msk [vmem:[%s2180_s4 + $0x10] sm:$0xf] %vm1162_vm1, %v1366_v5  ;;  %1199 = vst.msk [vmem:[%s2180_s4 + $0x90] sm:$0xf] %vm1162_vm1, %v1398_v6  ;;  %v1367_v13 = vpack.c.bf16 %v847_v7, %v847_v7  ;;  %v1399_v14 = vpack.c.bf16 %v879_v8, %v879_v8 }
  0xf1   :  { %v651_v15 = vmul.f32 %v1719_v33, %v413_v55  ;;  %v683_v16 = vmul.f32 %v1719_v33, %v541_v56  ;;  %1170 = vst.msk [vmem:[%s2180_s4 + $0x1c] sm:$0xf] %vm1162_vm1, %v1369_v9  ;;  %1202 = vst.msk [vmem:[%s2180_s4 + $0x9c] sm:$0xf] %vm1162_vm1, %v1401_v10  ;;  %v724_v17 = vadd.f32 %v1724_v35, %v653_v11  ;;  %v1475_v25 = vpop.f32.mrb[12].mxu0  ;;  %v1507_v26 = vpop.f32.mrb[12].mxu1 }
  0xf2   :  { %v756_v18 = vadd.f32 %v1724_v35, %v685_v12  ;;  %v654_v19 = vmul.f32 %v1472_v61, %v1719_v33  ;;  %v686_v20 = vmul.f32 %v1504_v62, %v1719_v33  ;;  %1168 = vst.msk [vmem:[%s2180_s4 + $0x14] sm:$0xf] %vm1162_vm1, %v1367_v13  ;;  %1200 = vst.msk [vmem:[%s2180_s4 + $0x94] sm:$0xf] %vm1162_vm1, %v1399_v14  ;;  %v429_v31 = vpop.f32.mrb[13].mxu0  ;;  %v557_v32 = vpop.f32.mrb[13].mxu1 }
  0xf3   :  { %v722_v21 = vadd.f32 %v1724_v35, %v651_v15  ;;  %v754_v22 = vadd.f32 %v1724_v35, %v683_v16  ;;  %v652_v23 = vmul.f32 %v1719_v33, %v416_v3  ;;  %v684_v24 = vmul.f32 %v1719_v33, %v544_v4  ;;  %v1476_v39 = vpop.f32.mrb[14].mxu0  ;;  %v1508_v40 = vpop.f32.mrb[14].mxu1 }
  0xf4   :  { %v788_v27 = vmul.f32 0.1, %v724_v17  ;;  %v820_v28 = vmul.f32 0.1, %v756_v18  ;;  %v725_v29 = vadd.f32 %v1724_v35, %v654_v19  ;;  %v757_v30 = vadd.f32 %v1724_v35, %v686_v20  ;;  %v432_v45 = vpop.f32.mrb[15].mxu0  ;;  %v560_v46 = vpop.f32.mrb[15].mxu1 }
  0xf5   :  { %v786_v34 = vmul.f32 0.1, %v722_v21  ;;  %v818_v36 = vmul.f32 0.1, %v754_v22  ;;  %v723_v37 = vadd.f32 %v1724_v35, %v652_v23  ;;  %v755_v38 = vadd.f32 %v1724_v35, %v684_v24 }
  0xf6   :  { %v852_v41 = vmax.f32 %v724_v17, %v788_v27  ;;  %v884_v42 = vmax.f32 %v756_v18, %v820_v28  ;;  %v789_v43 = vmul.f32 0.1, %v725_v29  ;;  %v821_v44 = vmul.f32 0.1, %v757_v30 }
  0xf7   :  { %v850_v47 = vmax.f32 %v722_v21, %v786_v34  ;;  %v882_v48 = vmax.f32 %v754_v22, %v818_v36  ;;  %v787_v49 = vmul.f32 0.1, %v723_v37  ;;  %v819_v50 = vmul.f32 0.1, %v755_v38 }
  0xf8   :  { %v1372_v51 = vpack.c.bf16 %v852_v41, %v852_v41  ;;  %v1404_v52 = vpack.c.bf16 %v884_v42, %v884_v42  ;;  %v853_v53 = vmax.f32 %v725_v29, %v789_v43  ;;  %v885_v54 = vmax.f32 %v757_v30, %v821_v44 }
  0xf9   :  { %v1370_v55 = vpack.c.bf16 %v850_v47, %v850_v47  ;;  %v1402_v56 = vpack.c.bf16 %v882_v48, %v882_v48  ;;  %v851_v57 = vmax.f32 %v723_v37, %v787_v49  ;;  %v883_v58 = vmax.f32 %v755_v38, %v819_v50  ;;  %v1479_v3 = vpop.f32.mrb[16].mxu0  ;;  %v1511_v4 = vpop.f32.mrb[16].mxu1 }
  0xfa   :  { %1173 = vst.msk [vmem:[%s2180_s4 + $0x28] sm:$0xf] %vm1162_vm1, %v1372_v51  ;;  %1205 = vst.msk [vmem:[%s2180_s4 + $0xa8] sm:$0xf] %vm1162_vm1, %v1404_v52  ;;  %v1373_v59 = vpack.c.bf16 %v853_v53, %v853_v53  ;;  %v1405_v60 = vpack.c.bf16 %v885_v54, %v885_v54  ;;  %v657_v61 = vmul.f32 %v1475_v25, %v1719_v33  ;;  %v445_v9 = vpop.f32.mrb[17].mxu0  ;;  %v573_v10 = vpop.f32.mrb[17].mxu1 }
  0xfb   :  { %v689_v62 = vmul.f32 %v1507_v26, %v1719_v33  ;;  %1171 = vst.msk [vmem:[%s2180_s4 + $0x20] sm:$0xf] %vm1162_vm1, %v1370_v55  ;;  %1203 = vst.msk [vmem:[%s2180_s4 + $0xa0] sm:$0xf] %vm1162_vm1, %v1402_v56  ;;  %v1371_v63 = vpack.c.bf16 %v851_v57, %v851_v57  ;;  %v1403_v0 = vpack.c.bf16 %v883_v58, %v883_v58  ;;  %v1480_v15 = vpop.f32.mrb[18].mxu0  ;;  %v1512_v16 = vpop.f32.mrb[18].mxu1 }
  0xfc   :  { %v655_v1 = vmul.f32 %v1719_v33, %v429_v31  ;;  %v687_v2 = vmul.f32 %v1719_v33, %v557_v32  ;;  %1174 = vst.msk [vmem:[%s2180_s4 + $0x2c] sm:$0xf] %vm1162_vm1, %v1373_v59  ;;  %1206 = vst.msk [vmem:[%s2180_s4 + $0xac] sm:$0xf] %vm1162_vm1, %v1405_v60  ;;  %v728_v5 = vadd.f32 %v1724_v35, %v657_v61  ;;  %v448_v21 = vpop.f32.mrb[19].mxu0  ;;  %v576_v22 = vpop.f32.mrb[19].mxu1 }
  0xfd   :  { %v760_v6 = vadd.f32 %v1724_v35, %v689_v62  ;;  %v658_v7 = vmul.f32 %v1476_v39, %v1719_v33  ;;  %v690_v8 = vmul.f32 %v1508_v40, %v1719_v33  ;;  %1172 = vst.msk [vmem:[%s2180_s4 + $0x24] sm:$0xf] %vm1162_vm1, %v1371_v63  ;;  %1204 = vst.msk [vmem:[%s2180_s4 + $0xa4] sm:$0xf] %vm1162_vm1, %v1403_v0 }
  0xfe   :  { %v726_v11 = vadd.f32 %v1724_v35, %v655_v1  ;;  %v758_v12 = vadd.f32 %v1724_v35, %v687_v2  ;;  %v656_v13 = vmul.f32 %v1719_v33, %v432_v45  ;;  %v688_v14 = vmul.f32 %v1719_v33, %v560_v46 }
  0xff   :  { %v792_v17 = vmul.f32 0.1, %v728_v5  ;;  %v824_v18 = vmul.f32 0.1, %v760_v6  ;;  %v729_v19 = vadd.f32 %v1724_v35, %v658_v7  ;;  %v761_v20 = vadd.f32 %v1724_v35, %v690_v8 }
 0x100   :  { %v790_v23 = vmul.f32 0.1, %v726_v11  ;;  %v822_v24 = vmul.f32 0.1, %v758_v12  ;;  %v727_v25 = vadd.f32 %v1724_v35, %v656_v13  ;;  %v759_v26 = vadd.f32 %v1724_v35, %v688_v14 }
 0x101   :  { %v856_v27 = vmax.f32 %v728_v5, %v792_v17  ;;  %v888_v28 = vmax.f32 %v760_v6, %v824_v18  ;;  %v793_v29 = vmul.f32 0.1, %v729_v19  ;;  %v825_v30 = vmul.f32 0.1, %v761_v20  ;;  %v1886_v45 = vpop.f32.mrb[20].mxu0  ;;  %v1888_v46 = vpop.f32.mrb[20].mxu1 }
 0x102   :  { %v854_v31 = vmax.f32 %v726_v11, %v790_v23  ;;  %v886_v32 = vmax.f32 %v758_v12, %v822_v24  ;;  %v791_v34 = vmul.f32 0.1, %v727_v25  ;;  %v823_v36 = vmul.f32 0.1, %v759_v26  ;;  %v1900_v51 = vpop.f32.mrb[21].mxu0  ;;  %v1902_v52 = vpop.f32.mrb[21].mxu1 }
 0x103   :  { %v1376_v37 = vpack.c.bf16 %v856_v27, %v856_v27  ;;  %v1408_v38 = vpack.c.bf16 %v888_v28, %v888_v28  ;;  %v857_v39 = vmax.f32 %v729_v19, %v793_v29  ;;  %v889_v40 = vmax.f32 %v761_v20, %v825_v30  ;;  %v1914_v57 = vpop.f32.mrb[22].mxu0  ;;  %v1916_v58 = vpop.f32.mrb[22].mxu1 }
 0x104   :  { %v1374_v41 = vpack.c.bf16 %v854_v31, %v854_v31  ;;  %v1406_v42 = vpack.c.bf16 %v886_v32, %v886_v32  ;;  %v855_v43 = vmax.f32 %v727_v25, %v791_v34  ;;  %v887_v44 = vmax.f32 %v759_v26, %v823_v36  ;;  %v464_v63 = vpop.f32.mrb[23].mxu0  ;;  %v592_v0 = vpop.f32.mrb[23].mxu1 }
 0x105   :  { %1177 = vst.msk [vmem:[%s2180_s4 + $0x38] sm:$0xf] %vm1162_vm1, %v1376_v37  ;;  %1209 = vst.msk [vmem:[%s2180_s4 + $0xb8] sm:$0xf] %vm1162_vm1, %v1408_v38  ;;  %v1377_v47 = vpack.c.bf16 %v857_v39, %v857_v39  ;;  %v1409_v48 = vpack.c.bf16 %v889_v40, %v889_v40  ;;  %v661_v49 = vmul.f32 %v1479_v3, %v1719_v33 }
 0x106   :  { %v693_v50 = vmul.f32 %v1511_v4, %v1719_v33  ;;  %1175 = vst.msk [vmem:[%s2180_s4 + $0x30] sm:$0xf] %vm1162_vm1, %v1374_v41  ;;  %1207 = vst.msk [vmem:[%s2180_s4 + $0xb0] sm:$0xf] %vm1162_vm1, %v1406_v42  ;;  %v1375_v53 = vpack.c.bf16 %v855_v43, %v855_v43  ;;  %v1407_v54 = vpack.c.bf16 %v887_v44, %v887_v44 }
 0x107   :  { %v659_v55 = vmul.f32 %v1719_v33, %v445_v9  ;;  %v691_v56 = vmul.f32 %v1719_v33, %v573_v10  ;;  %1178 = vst.msk [vmem:[%s2180_s4 + $0x3c] sm:$0xf] %vm1162_vm1, %v1377_v47  ;;  %1210 = vst.msk [vmem:[%s2180_s4 + $0xbc] sm:$0xf] %vm1162_vm1, %v1409_v48  ;;  %v732_v59 = vadd.f32 %v1724_v35, %v661_v49 }
 0x108   :  { %v764_v60 = vadd.f32 %v1724_v35, %v693_v50  ;;  %v662_v61 = vmul.f32 %v1480_v15, %v1719_v33  ;;  %v694_v62 = vmul.f32 %v1512_v16, %v1719_v33  ;;  %1176 = vst.msk [vmem:[%s2180_s4 + $0x34] sm:$0xf] %vm1162_vm1, %v1375_v53  ;;  %1208 = vst.msk [vmem:[%s2180_s4 + $0xb4] sm:$0xf] %vm1162_vm1, %v1407_v54 }
 0x109   :  { %v730_v1 = vadd.f32 %v1724_v35, %v659_v55  ;;  %v762_v2 = vadd.f32 %v1724_v35, %v691_v56  ;;  %v660_v3 = vmul.f32 %v1719_v33, %v448_v21  ;;  %v692_v4 = vmul.f32 %v1719_v33, %v576_v22  ;;  %v1946_v21 = vpop.f32.mrb[24].mxu0  ;;  %v1948_v22 = vpop.f32.mrb[24].mxu1 }
 0x10a   :  { %v796_v5 = vmul.f32 0.1, %v732_v59  ;;  %v828_v6 = vmul.f32 0.1, %v764_v60  ;;  %v733_v7 = vadd.f32 %v1724_v35, %v662_v61  ;;  %v765_v8 = vadd.f32 %v1724_v35, %v694_v62  ;;  %v1950_v27 = vpop.f32.mrb[25].mxu0  ;;  %v1952_v28 = vpop.f32.mrb[25].mxu1 }
 0x10b   :  { %v794_v9 = vmul.f32 0.1, %v730_v1  ;;  %v826_v10 = vmul.f32 0.1, %v762_v2  ;;  %v731_v11 = vadd.f32 %v1724_v35, %v660_v3  ;;  %v763_v12 = vadd.f32 %v1724_v35, %v692_v4  ;;  %v1954_v34 = vpop.f32.mrb[26].mxu0  ;;  %v1956_v36 = vpop.f32.mrb[26].mxu1 }
 0x10c   :  { %v860_v13 = vmax.f32 %v732_v59, %v796_v5  ;;  %v892_v14 = vmax.f32 %v764_v60, %v828_v6  ;;  %v797_v15 = vmul.f32 0.1, %v733_v7  ;;  %v829_v16 = vmul.f32 0.1, %v765_v8  ;;  %v1970_v41 = vpop.f32.mrb[27].mxu0  ;;  %v1972_v42 = vpop.f32.mrb[27].mxu1 }
 0x10d   :  { %v858_v17 = vmax.f32 %v730_v1, %v794_v9  ;;  %v890_v18 = vmax.f32 %v762_v2, %v826_v10  ;;  %v795_v19 = vmul.f32 0.1, %v731_v11  ;;  %v827_v20 = vmul.f32 0.1, %v763_v12 }
 0x10e   :  { %v1380_v23 = vpack.c.bf16 %v860_v13, %v860_v13  ;;  %v1412_v24 = vpack.c.bf16 %v892_v14, %v892_v14  ;;  %v861_v25 = vmax.f32 %v733_v7, %v797_v15  ;;  %v893_v26 = vmax.f32 %v765_v8, %v829_v16 }
 0x10f   :  { %v1378_v29 = vpack.c.bf16 %v858_v17, %v858_v17  ;;  %v1410_v30 = vpack.c.bf16 %v890_v18, %v890_v18  ;;  %v859_v31 = vmax.f32 %v731_v11, %v795_v19  ;;  %v891_v32 = vmax.f32 %v763_v12, %v827_v20 }
 0x110   :  { %1181 = vst.msk [vmem:[%s2180_s4 + $0x48] sm:$0xf] %vm1162_vm1, %v1380_v23  ;;  %1213 = vst.msk [vmem:[%s2180_s4 + $0xc8] sm:$0xf] %vm1162_vm1, %v1412_v24  ;;  %v1381_v37 = vpack.c.bf16 %v861_v25, %v861_v25  ;;  %v1413_v38 = vpack.c.bf16 %v893_v26, %v893_v26  ;;  %v665_v39 = vmul.f32 %v1886_v45, %v1719_v33 }
 0x111   :  { %v697_v40 = vmul.f32 %v1888_v46, %v1719_v33  ;;  %1179 = vst.msk [vmem:[%s2180_s4 + $0x40] sm:$0xf] %vm1162_vm1, %v1378_v29  ;;  %1211 = vst.msk [vmem:[%s2180_s4 + $0xc0] sm:$0xf] %vm1162_vm1, %v1410_v30  ;;  %v1379_v43 = vpack.c.bf16 %v859_v31, %v859_v31  ;;  %v1411_v44 = vpack.c.bf16 %v891_v32, %v891_v32  ;;  %v2016_v1 = vpop.f32.mrb[28].mxu0  ;;  %v2018_v2 = vpop.f32.mrb[28].mxu1 }
 0x112   :  { %v663_v45 = vmul.f32 %v1719_v33, %v1900_v51  ;;  %v695_v46 = vmul.f32 %v1719_v33, %v1902_v52  ;;  %1182 = vst.msk [vmem:[%s2180_s4 + $0x4c] sm:$0xf] %vm1162_vm1, %v1381_v37  ;;  %1214 = vst.msk [vmem:[%s2180_s4 + $0xcc] sm:$0xf] %vm1162_vm1, %v1413_v38  ;;  %v736_v47 = vadd.f32 %v1724_v35, %v665_v39  ;;  %v2020_v5 = vpop.f32.mrb[29].mxu0  ;;  %v2022_v6 = vpop.f32.mrb[29].mxu1 }
 0x113   :  { %v768_v48 = vadd.f32 %v1724_v35, %v697_v40  ;;  %v666_v49 = vmul.f32 %v1914_v57, %v1719_v33  ;;  %v698_v50 = vmul.f32 %v1916_v58, %v1719_v33  ;;  %1180 = vst.msk [vmem:[%s2180_s4 + $0x44] sm:$0xf] %vm1162_vm1, %v1379_v43  ;;  %1212 = vst.msk [vmem:[%s2180_s4 + $0xc4] sm:$0xf] %vm1162_vm1, %v1411_v44  ;;  %v2024_v11 = vpop.f32.mrb[30].mxu0  ;;  %v2026_v12 = vpop.f32.mrb[30].mxu1 }
 0x114   :  { %v734_v51 = vadd.f32 %v1724_v35, %v663_v45  ;;  %v766_v52 = vadd.f32 %v1724_v35, %v695_v46  ;;  %v664_v53 = vmul.f32 %v1719_v33, %v464_v63  ;;  %v696_v54 = vmul.f32 %v1719_v33, %v592_v0  ;;  %v2028_v17 = vpop.f32.mrb[31].mxu0  ;;  %v2030_v18 = vpop.f32.mrb[31].mxu1 }
 0x115   :  { %v800_v55 = vmul.f32 0.1, %v736_v47  ;;  %v832_v56 = vmul.f32 0.1, %v768_v48  ;;  %v737_v57 = vadd.f32 %v1724_v35, %v666_v49  ;;  %v769_v58 = vadd.f32 %v1724_v35, %v698_v50 }
 0x116   :  { %v798_v59 = vmul.f32 0.1, %v734_v51  ;;  %v830_v60 = vmul.f32 0.1, %v766_v52  ;;  %v735_v61 = vadd.f32 %v1724_v35, %v664_v53  ;;  %v767_v62 = vadd.f32 %v1724_v35, %v696_v54 }
 0x117   :  { %v864_v3 = vmax.f32 %v736_v47, %v800_v55  ;;  %v896_v63 = vmax.f32 %v768_v48, %v832_v56  ;;  %v801_v4 = vmul.f32 0.1, %v737_v57  ;;  %v833_v0 = vmul.f32 0.1, %v769_v58 }
 0x118   :  { %v862_v7 = vmax.f32 %v734_v51, %v798_v59  ;;  %v894_v8 = vmax.f32 %v766_v52, %v830_v60  ;;  %v799_v9 = vmul.f32 0.1, %v735_v61  ;;  %v831_v10 = vmul.f32 0.1, %v767_v62 }
 0x119   :  { %v1384_v13 = vpack.c.bf16 %v864_v3, %v864_v3  ;;  %v1416_v14 = vpack.c.bf16 %v896_v63, %v896_v63  ;;  %v865_v15 = vmax.f32 %v737_v57, %v801_v4  ;;  %v897_v16 = vmax.f32 %v769_v58, %v833_v0 }
 0x11a   :  { %v1382_v19 = vpack.c.bf16 %v862_v7, %v862_v7  ;;  %v1414_v20 = vpack.c.bf16 %v894_v8, %v894_v8  ;;  %v863_v23 = vmax.f32 %v735_v61, %v799_v9  ;;  %v895_v24 = vmax.f32 %v767_v62, %v831_v10 }
 0x11b   :  { %1185 = vst.msk [vmem:[%s2180_s4 + $0x58] sm:$0xf] %vm1162_vm1, %v1384_v13  ;;  %1217 = vst.msk [vmem:[%s2180_s4 + $0xd8] sm:$0xf] %vm1162_vm1, %v1416_v14  ;;  %v1385_v25 = vpack.c.bf16 %v865_v15, %v865_v15  ;;  %v1417_v26 = vpack.c.bf16 %v897_v16, %v897_v16  ;;  %v669_v29 = vmul.f32 %v1946_v21, %v1719_v33 }
 0x11c   :  { %v701_v30 = vmul.f32 %v1948_v22, %v1719_v33  ;;  %1183 = vst.msk [vmem:[%s2180_s4 + $0x50] sm:$0xf] %vm1162_vm1, %v1382_v19  ;;  %1215 = vst.msk [vmem:[%s2180_s4 + $0xd0] sm:$0xf] %vm1162_vm1, %v1414_v20  ;;  %v1383_v31 = vpack.c.bf16 %v863_v23, %v863_v23  ;;  %v1415_v32 = vpack.c.bf16 %v895_v24, %v895_v24 }
 0x11d   :  { %v667_v37 = vmul.f32 %v1719_v33, %v1950_v27  ;;  %v699_v21 = vmul.f32 %v1719_v33, %v1952_v28  ;;  %1186 = vst.msk [vmem:[%s2180_s4 + $0x5c] sm:$0xf] %vm1162_vm1, %v1385_v25  ;;  %1218 = vst.msk [vmem:[%s2180_s4 + $0xdc] sm:$0xf] %vm1162_vm1, %v1417_v26  ;;  %v740_v22 = vadd.f32 %v1724_v35, %v669_v29 }
 0x11e   :  { %v772_v38 = vadd.f32 %v1724_v35, %v701_v30  ;;  %v670_v27 = vmul.f32 %v1954_v34, %v1719_v33  ;;  %v702_v28 = vmul.f32 %v1956_v36, %v1719_v33  ;;  %1184 = vst.msk [vmem:[%s2180_s4 + $0x54] sm:$0xf] %vm1162_vm1, %v1383_v31  ;;  %1216 = vst.msk [vmem:[%s2180_s4 + $0xd4] sm:$0xf] %vm1162_vm1, %v1415_v32 }
 0x11f   :  { %v738_v39 = vadd.f32 %v1724_v35, %v667_v37  ;;  %v770_v40 = vadd.f32 %v1724_v35, %v699_v21  ;;  %v668_v34 = vmul.f32 %v1719_v33, %v1970_v41  ;;  %v700_v36 = vmul.f32 %v1719_v33, %v1972_v42 }
 0x120   :  { %v804_v43 = vmul.f32 0.1, %v740_v22  ;;  %v836_v44 = vmul.f32 0.1, %v772_v38  ;;  %v741_v45 = vadd.f32 %v1724_v35, %v670_v27  ;;  %v773_v46 = vadd.f32 %v1724_v35, %v702_v28 }
 0x121   :  { %v802_v47 = vmul.f32 0.1, %v738_v39  ;;  %v834_v48 = vmul.f32 0.1, %v770_v40  ;;  %v739_v49 = vadd.f32 %v1724_v35, %v668_v34  ;;  %v771_v50 = vadd.f32 %v1724_v35, %v700_v36 }
 0x122   :  { %v868_v51 = vmax.f32 %v740_v22, %v804_v43  ;;  %v900_v52 = vmax.f32 %v772_v38, %v836_v44  ;;  %v805_v53 = vmul.f32 0.1, %v741_v45  ;;  %v837_v54 = vmul.f32 0.1, %v773_v46 }
 0x123   :  { %v866_v41 = vmax.f32 %v738_v39, %v802_v47  ;;  %v898_v55 = vmax.f32 %v770_v40, %v834_v48  ;;  %v803_v56 = vmul.f32 0.1, %v739_v49  ;;  %v835_v42 = vmul.f32 0.1, %v771_v50 }
 0x124   :  { %v1388_v57 = vpack.c.bf16 %v868_v51, %v868_v51  ;;  %v1420_v58 = vpack.c.bf16 %v900_v52, %v900_v52  ;;  %v869_v59 = vmax.f32 %v741_v45, %v805_v53  ;;  %v901_v60 = vmax.f32 %v773_v46, %v837_v54 }
 0x125   :  { %v1386_v61 = vpack.c.bf16 %v866_v41, %v866_v41  ;;  %v1418_v62 = vpack.c.bf16 %v898_v55, %v898_v55  ;;  %v867_v3 = vmax.f32 %v739_v49, %v803_v56  ;;  %v899_v63 = vmax.f32 %v771_v50, %v835_v42 }
 0x126   :  { %1189 = vst.msk [vmem:[%s2180_s4 + $0x68] sm:$0xf] %vm1162_vm1, %v1388_v57  ;;  %1221 = vst.msk [vmem:[%s2180_s4 + $0xe8] sm:$0xf] %vm1162_vm1, %v1420_v58  ;;  %v1389_v4 = vpack.c.bf16 %v869_v59, %v869_v59  ;;  %v1421_v0 = vpack.c.bf16 %v901_v60, %v901_v60  ;;  %v673_v7 = vmul.f32 %v2016_v1, %v1719_v33 }
 0x127   :  { %v705_v8 = vmul.f32 %v2018_v2, %v1719_v33  ;;  %1187 = vst.msk [vmem:[%s2180_s4 + $0x60] sm:$0xf] %vm1162_vm1, %v1386_v61  ;;  %1219 = vst.msk [vmem:[%s2180_s4 + $0xe0] sm:$0xf] %vm1162_vm1, %v1418_v62  ;;  %v1387_v9 = vpack.c.bf16 %v867_v3, %v867_v3  ;;  %v1419_v10 = vpack.c.bf16 %v899_v63, %v899_v63 }
 0x128   :  { %v671_v13 = vmul.f32 %v1719_v33, %v2020_v5  ;;  %v703_v1 = vmul.f32 %v1719_v33, %v2022_v6  ;;  %1190 = vst.msk [vmem:[%s2180_s4 + $0x6c] sm:$0xf] %vm1162_vm1, %v1389_v4  ;;  %1222 = vst.msk [vmem:[%s2180_s4 + $0xec] sm:$0xf] %vm1162_vm1, %v1421_v0  ;;  %v744_v2 = vadd.f32 %v1724_v35, %v673_v7 }
 0x129   :  { %v776_v14 = vadd.f32 %v1724_v35, %v705_v8  ;;  %v674_v5 = vmul.f32 %v2024_v11, %v1719_v33  ;;  %v706_v6 = vmul.f32 %v2026_v12, %v1719_v33  ;;  %1188 = vst.msk [vmem:[%s2180_s4 + $0x64] sm:$0xf] %vm1162_vm1, %v1387_v9  ;;  %1220 = vst.msk [vmem:[%s2180_s4 + $0xe4] sm:$0xf] %vm1162_vm1, %v1419_v10 }
 0x12a   :  { %v742_v15 = vadd.f32 %v1724_v35, %v671_v13  ;;  %v774_v16 = vadd.f32 %v1724_v35, %v703_v1  ;;  %v672_v11 = vmul.f32 %v1719_v33, %v2028_v17  ;;  %v704_v12 = vmul.f32 %v1719_v33, %v2030_v18 }
 0x12b   :  { %v808_v19 = vmul.f32 0.1, %v744_v2  ;;  %v840_v20 = vmul.f32 0.1, %v776_v14  ;;  %v745_v23 = vadd.f32 %v1724_v35, %v674_v5  ;;  %v777_v24 = vadd.f32 %v1724_v35, %v706_v6 }
 0x12c   :  { %v806_v25 = vmul.f32 0.1, %v742_v15  ;;  %v838_v26 = vmul.f32 0.1, %v774_v16  ;;  %v743_v29 = vadd.f32 %v1724_v35, %v672_v11  ;;  %v775_v30 = vadd.f32 %v1724_v35, %v704_v12 }
 0x12d   :  { %v872_v31 = vmax.f32 %v744_v2, %v808_v19  ;;  %v904_v32 = vmax.f32 %v776_v14, %v840_v20  ;;  %v809_v37 = vmul.f32 0.1, %v745_v23  ;;  %v841_v21 = vmul.f32 0.1, %v777_v24 }
 0x12e   :  { %v870_v17 = vmax.f32 %v742_v15, %v806_v25  ;;  %v902_v22 = vmax.f32 %v774_v16, %v838_v26  ;;  %v807_v38 = vmul.f32 0.1, %v743_v29  ;;  %v839_v33 = vmul.f32 0.1, %v775_v30 }
 0x12f   :  { %v1392_v18 = vpack.c.bf16 %v872_v31, %v872_v31  ;;  %v1424_v27 = vpack.c.bf16 %v904_v32, %v904_v32  ;;  %v873_v28 = vmax.f32 %v745_v23, %v809_v37  ;;  %v905_v39 = vmax.f32 %v777_v24, %v841_v21 }
 0x130   :  { %v1390_v40 = vpack.c.bf16 %v870_v17, %v870_v17  ;;  %v1422_v34 = vpack.c.bf16 %v902_v22, %v902_v22  ;;  %v871_v36 = vmax.f32 %v743_v29, %v807_v38  ;;  %v903_v43 = vmax.f32 %v775_v30, %v839_v33 }
 0x131   :  { %1193 = vst.msk [vmem:[%s2180_s4 + $0x78] sm:$0xf] %vm1162_vm1, %v1392_v18  ;;  %1225 = vst.msk [vmem:[%s2180_s4 + $0xf8] sm:$0xf] %vm1162_vm1, %v1424_v27  ;;  %v1393_v35 = vpack.c.bf16 %v873_v28, %v873_v28  ;;  %v1425_v44 = vpack.c.bf16 %v905_v39, %v905_v39 }
 0x132   :  { %1191 = vst.msk [vmem:[%s2180_s4 + $0x70] sm:$0xf] %vm1162_vm1, %v1390_v40  ;;  %1223 = vst.msk [vmem:[%s2180_s4 + $0xf0] sm:$0xf] %vm1162_vm1, %v1422_v34  ;;  %v1391_v45 = vpack.c.bf16 %v871_v36, %v871_v36  ;;  %v1423_v46 = vpack.c.bf16 %v903_v43, %v903_v43 }
 0x133   :  { %1194 = vst.msk [vmem:[%s2180_s4 + $0x7c] sm:$0xf] %vm1162_vm1, %v1393_v35  ;;  %1226 = vst.msk [vmem:[%s2180_s4 + $0xfc] sm:$0xf] %vm1162_vm1, %v1425_v44 }
 0x134   :  { %1192 = vst.msk [vmem:[%s2180_s4 + $0x74] sm:$0xf] %vm1162_vm1, %v1391_v45  ;;  %1224 = vst.msk [vmem:[%s2180_s4 + $0xf4] sm:$0xf] %vm1162_vm1, %v1423_v46 }

// kernel: _lambda_.41
= control target key start
LH: loop header
LB: loop body
LE: loop exit
PB: predicated region body
PF: predicated region fallthrough
CT: control target
= control target key end

     0   :  { %vm317_vm0 = vcmask 130048   ;;  %vm1229_vm1 = vcmask 125952   ;;  %s2486_s1 = inlined_call_operand.vmem [shape: bf16[16,16], index: 1, kind: input, shape index: {}]   ;;  %s2487_s0 = inlined_call_operand.vmem [shape: bf16[512,16], index: 0, kind: input, shape index: {}]   ;;  %s2488_s2 = inlined_call_operand.vmem [shape: f32[512,16], index: 2, kind: input, shape index: {}]   ;;  %s2489_s3 = inlined_call_operand.vmem [shape: f32[1,16], index: 3, kind: input, shape index: {}]   ;;  %s2490_s4 = inlined_call_operand.vmem [shape: f32[1,16], index: 4, kind: input, shape index: {}]   ;;  %s2491_s5 = inlined_call_operand.vmem [shape: bf16[512,16], index: 5, kind: output, shape index: {}]  }
   0x1   :  { %v1594_v0 = vld [vmem:[%s2486_s1] sm:$0xff]   ;;  %v1597_v3 = vld [vmem:[%s2487_s0 + $0x8] sm:$0xff]   ;;  %v1599_v5 = vld [vmem:[%s2487_s0 + $0x10] sm:$0xff]  }
   0x2   :  { %v1595_v1 = vld [vmem:[%s2487_s0] sm:$0xff]   ;;  %1526 = vmatprep.subr.bf16.mxu0 %v1594_v0  ;;  %1592 = vmatprep.subr.bf16.mxu1 %v1594_v0  ;;  %v1598_v4 = vld [vmem:[%s2487_s0 + $0x88] sm:$0xff]   ;;  %v1600_v6 = vld [vmem:[%s2487_s0 + $0x90] sm:$0xff]  }
   0x3   :  { %v1596_v2 = vld [vmem:[%s2487_s0 + $0x80] sm:$0xff]   ;;  %1527 = vmatpush3.bf16.msra.mxu0 %v1594_v0  ;;  %1593 = vmatpush3.bf16.msra.mxu1 %v1594_v0  ;;  %v1601_v7 = vld [vmem:[%s2487_s0 + $0x18] sm:$0xff]   ;;  %v1605_v11 = vld [vmem:[%s2487_s0 + $0x28] sm:$0xff]  }
   0x4   :  { %1528 = vmatprep.mubr.msk.bf16.mxu0 %vm317_vm0, %v1595_v1  ;;  %1560 = vmatprep.mubr.msk.bf16.mxu1 %vm317_vm0, %v1596_v2  ;;  %v1602_v8 = vld [vmem:[%s2487_s0 + $0x98] sm:$0xff]   ;;  %v1603_v9 = vld [vmem:[%s2487_s0 + $0x20] sm:$0xff]   ;;  %v1606_v12 = vld [vmem:[%s2487_s0 + $0xa8] sm:$0xff]  }
   0x5   :  { %v1604_v10 = vld [vmem:[%s2487_s0 + $0xa0] sm:$0xff]   ;;  %v1607_v13 = vld [vmem:[%s2487_s0 + $0x30] sm:$0xff]   ;;  %v1609_v15 = vld [vmem:[%s2487_s0 + $0x38] sm:$0xff]  }
   0x6   :  { %1529 = vmatmul.mubr.msk.bf16.vlgmr.msra.gmra.mrb[0].mxu0 %vm317_vm0, %v1597_v3  ;;  %1561 = vmatmul.mubr.msk.bf16.vlgmr.msra.gmra.mrb[0].mxu1 %vm317_vm0, %v1598_v4  ;;  %v1608_v14 = vld [vmem:[%s2487_s0 + $0xb0] sm:$0xff]   ;;  %v1610_v16 = vld [vmem:[%s2487_s0 + $0xb8] sm:$0xff]   ;;  %v1611_v17 = vld [vmem:[%s2487_s0 + $0x40] sm:$0xff]  }
   0x7   :  { %1532 = vmatprep.mubr.msk.bf16.mxu0 %vm317_vm0, %v1599_v5  ;;  %1564 = vmatprep.mubr.msk.bf16.mxu1 %vm317_vm0, %v1600_v6  ;;  %v1612_v18 = vld [vmem:[%s2487_s0 + $0xc0] sm:$0xff]   ;;  %v1613_v19 = vld [vmem:[%s2487_s0 + $0x48] sm:$0xff]   ;;  %v1615_v21 = vld [vmem:[%s2487_s0 + $0x50] sm:$0xff]  }
   0x8   :  { %v1614_v20 = vld [vmem:[%s2487_s0 + $0xc8] sm:$0xff]   ;;  %v1616_v22 = vld [vmem:[%s2487_s0 + $0xd0] sm:$0xff]   ;;  %v1617_v23 = vld [vmem:[%s2487_s0 + $0x58] sm:$0xff]  }
   0x9   :  { %v1618_v24 = vld [vmem:[%s2487_s0 + $0xd8] sm:$0xff]   ;;  %v1619_v25 = vld [vmem:[%s2487_s0 + $0x60] sm:$0xff]   ;;  %v1621_v27 = vld [vmem:[%s2487_s0 + $0x68] sm:$0xff]  }
   0xa   :  { %v1620_v26 = vld [vmem:[%s2487_s0 + $0xe0] sm:$0xff]   ;;  %v1622_v28 = vld [vmem:[%s2487_s0 + $0xe8] sm:$0xff]   ;;  %v1623_v29 = vld [vmem:[%s2487_s0 + $0x70] sm:$0xff]  }
   0xb   :  { %v1624_v30 = vld [vmem:[%s2487_s0 + $0xf0] sm:$0xff]   ;;  %v1625_v31 = vld [vmem:[%s2487_s0 + $0x78] sm:$0xff]   ;;  %v87_v35 = vld [vmem:[%s2488_s2] sm:$0xff] }
   0xc   :  { %v1626_v32 = vld [vmem:[%s2487_s0 + $0xf8] sm:$0xff]   ;;  %v89_v33 = vld [vmem:[%s2488_s2 + $0x10] sm:$0xff]  ;;  %v119_v36 = vld [vmem:[%s2488_s2 + $0x100] sm:$0xff] }
   0xd   :  { %v121_v34 = vld [vmem:[%s2488_s2 + $0x110] sm:$0xff]  ;;  %v1805_v38 = vld [vmem:[%s2489_s3] ss:$0 sm:$0xff]  ;;  %v90_v40 = vld [vmem:[%s2488_s2 + $0x18] sm:$0xff] }
   0xe   :  { %1533 = vmatmul.mubr.msk.bf16.gmra.mrb[4].mxu0 %vm317_vm0, %v1601_v7  ;;  %1565 = vmatmul.mubr.msk.bf16.gmra.mrb[4].mxu1 %vm317_vm0, %v1602_v8  ;;  %v122_v41 = vld [vmem:[%s2488_s2 + $0x118] sm:$0xff]  ;;  %v88_v46 = vld [vmem:[%s2488_s2 + $0x8] sm:$0xff]  ;;  %v1822_v48 = vld [vmem:[%s2490_s4] ss:$0 sm:$0xff] }
   0xf   :  { %1536 = vmatprep.mubr.msk.bf16.mxu0 %vm317_vm0, %v1603_v9  ;;  %1568 = vmatprep.mubr.msk.bf16.mxu1 %vm317_vm0, %v1604_v10  ;;  %v120_v47 = vld [vmem:[%s2488_s2 + $0x108] sm:$0xff] }
  0x16   :  { %1537 = vmatmul.mubr.msk.bf16.gmra.mrb[8].mxu0 %vm317_vm0, %v1605_v11  ;;  %1569 = vmatmul.mubr.msk.bf16.gmra.mrb[8].mxu1 %vm317_vm0, %v1606_v12 }
  0x17   :  { %1540 = vmatprep.mubr.msk.bf16.mxu0 %vm317_vm0, %v1607_v13  ;;  %1572 = vmatprep.mubr.msk.bf16.mxu1 %vm317_vm0, %v1608_v14 }
  0x1e   :  { %1541 = vmatmul.mubr.msk.bf16.gmra.mrb[12].mxu0 %vm317_vm0, %v1609_v15  ;;  %1573 = vmatmul.mubr.msk.bf16.gmra.mrb[12].mxu1 %vm317_vm0, %v1610_v16  ;;  %v93_v15 = vld [vmem:[%s2488_s2 + $0x30] sm:$0xff] }
  0x1f   :  { %1544 = vmatprep.mubr.msk.bf16.mxu0 %vm317_vm0, %v1611_v17  ;;  %1576 = vmatprep.mubr.msk.bf16.mxu1 %vm317_vm0, %v1612_v18  ;;  %v125_v17 = vld [vmem:[%s2488_s2 + $0x130] sm:$0xff] }
  0x26   :  { %1545 = vmatmul.mubr.msk.bf16.gmra.mrb[16].mxu0 %vm317_vm0, %v1613_v19  ;;  %1577 = vmatmul.mubr.msk.bf16.gmra.mrb[16].mxu1 %vm317_vm0, %v1614_v20 }
  0x27   :  { %1548 = vmatprep.mubr.msk.bf16.mxu0 %vm317_vm0, %v1615_v21  ;;  %1580 = vmatprep.mubr.msk.bf16.mxu1 %vm317_vm0, %v1616_v22 }
  0x2e   :  { %1549 = vmatmul.mubr.msk.bf16.gmra.mrb[20].mxu0 %vm317_vm0, %v1617_v23  ;;  %1581 = vmatmul.mubr.msk.bf16.gmra.mrb[20].mxu1 %vm317_vm0, %v1618_v24 }
  0x2f   :  { %1552 = vmatprep.mubr.msk.bf16.mxu0 %vm317_vm0, %v1619_v25  ;;  %1584 = vmatprep.mubr.msk.bf16.mxu1 %vm317_vm0, %v1620_v26 }
  0x36   :  { %1553 = vmatmul.mubr.msk.bf16.gmra.mrb[24].mxu0 %vm317_vm0, %v1621_v27  ;;  %1585 = vmatmul.mubr.msk.bf16.gmra.mrb[24].mxu1 %vm317_vm0, %v1622_v28 }
  0x37   :  { %1556 = vmatprep.mubr.msk.bf16.mxu0 %vm317_vm0, %v1623_v29  ;;  %1588 = vmatprep.mubr.msk.bf16.mxu1 %vm317_vm0, %v1624_v30 }
  0x3e   :  { %1557 = vmatmul.mubr.msk.bf16.gmra.mrb[28].mxu0 %vm317_vm0, %v1625_v31  ;;  %1589 = vmatmul.mubr.msk.bf16.gmra.mrb[28].mxu1 %vm317_vm0, %v1626_v32 }
  0xd9   :  { %v1530_v37 = vpop.f32.mrb[0].mxu0  ;;  %v1562_v39 = vpop.f32.mrb[0].mxu1 }
  0xda   :  { %v457_v42 = vadd.f32 %v1530_v37, %v89_v33  ;;  %v585_v43 = vadd.f32 %v1562_v39, %v121_v34  ;;  %v448_v44 = vpop.f32.mrb[1].mxu0  ;;  %v576_v45 = vpop.f32.mrb[1].mxu1 }
  0xdb   :  { %v449_v49 = vadd.f32 %v448_v44, %v87_v35  ;;  %v577_v50 = vadd.f32 %v576_v45, %v119_v36  ;;  %v1531_v51 = vpop.f32.mrb[2].mxu0  ;;  %v1563_v52 = vpop.f32.mrb[2].mxu1  ;;  %v91_v35 = vld [vmem:[%s2488_s2 + $0x20] sm:$0xff]  ;;  %v94_v44 = vld [vmem:[%s2488_s2 + $0x38] sm:$0xff] }
  0xdc   :  { %v712_v53 = vmul.f32 %v1805_v38, %v457_v42  ;;  %v744_v54 = vmul.f32 %v1805_v38, %v585_v43  ;;  %v460_v55 = vadd.f32 %v1531_v51, %v90_v40  ;;  %v588_v56 = vadd.f32 %v1563_v52, %v122_v41  ;;  %v451_v57 = vpop.f32.mrb[3].mxu0  ;;  %v579_v58 = vpop.f32.mrb[3].mxu1  ;;  %v123_v36 = vld [vmem:[%s2488_s2 + $0x120] sm:$0xff]  ;;  %v126_v45 = vld [vmem:[%s2488_s2 + $0x138] sm:$0xff]  ;;  %v92_v51 = vld [vmem:[%s2488_s2 + $0x28] sm:$0xff] }
  0xdd   :  { %v710_v59 = vmul.f32 %v1805_v38, %v449_v49  ;;  %v742_v60 = vmul.f32 %v1805_v38, %v577_v50  ;;  %v452_v61 = vadd.f32 %v451_v57, %v88_v46  ;;  %v580_v62 = vadd.f32 %v579_v58, %v120_v47  ;;  %v124_v52 = vld [vmem:[%s2488_s2 + $0x128] sm:$0xff] }
  0xde   :  { %v783_v63 = vadd.f32 %v1822_v48, %v712_v53  ;;  %v815_v0 = vadd.f32 %v1822_v48, %v744_v54  ;;  %v713_v1 = vmul.f32 %v1805_v38, %v460_v55  ;;  %v745_v2 = vmul.f32 %v1805_v38, %v588_v56 }
  0xdf   :  { %v781_v3 = vadd.f32 %v1822_v48, %v710_v59  ;;  %v813_v4 = vadd.f32 %v1822_v48, %v742_v60  ;;  %v711_v5 = vmul.f32 %v1805_v38, %v452_v61  ;;  %v743_v6 = vmul.f32 %v1805_v38, %v580_v62 }
  0xe0   :  { %v847_v7 = vmul.f32 0.1, %v783_v63  ;;  %v879_v8 = vmul.f32 0.1, %v815_v0  ;;  %v784_v9 = vadd.f32 %v1822_v48, %v713_v1  ;;  %v816_v10 = vadd.f32 %v1822_v48, %v745_v2 }
  0xe1   :  { %v845_v11 = vmul.f32 0.1, %v781_v3  ;;  %v877_v12 = vmul.f32 0.1, %v813_v4  ;;  %v782_v13 = vadd.f32 %v1822_v48, %v711_v5  ;;  %v814_v14 = vadd.f32 %v1822_v48, %v743_v6  ;;  %v1534_v16 = vpop.f32.mrb[4].mxu0  ;;  %v1566_v18 = vpop.f32.mrb[4].mxu1 }
  0xe2   :  { %v911_v19 = vmax.f32 %v783_v63, %v847_v7  ;;  %v943_v20 = vmax.f32 %v815_v0, %v879_v8  ;;  %v848_v21 = vmul.f32 0.1, %v784_v9  ;;  %v880_v22 = vmul.f32 0.1, %v816_v10  ;;  %v464_v23 = vpop.f32.mrb[5].mxu0  ;;  %v592_v24 = vpop.f32.mrb[5].mxu1 }
  0xe3   :  { %v909_v25 = vmax.f32 %v781_v3, %v845_v11  ;;  %v941_v26 = vmax.f32 %v813_v4, %v877_v12  ;;  %v846_v27 = vmul.f32 0.1, %v782_v13  ;;  %v878_v28 = vmul.f32 0.1, %v814_v14  ;;  %v1535_v29 = vpop.f32.mrb[6].mxu0  ;;  %v1567_v30 = vpop.f32.mrb[6].mxu1 }
  0xe4   :  { %v1431_v31 = vpack.c.bf16 %v911_v19, %v911_v19  ;;  %v1463_v32 = vpack.c.bf16 %v943_v20, %v943_v20  ;;  %v912_v33 = vmax.f32 %v784_v9, %v848_v21  ;;  %v944_v34 = vmax.f32 %v816_v10, %v880_v22  ;;  %v467_v37 = vpop.f32.mrb[7].mxu0  ;;  %v595_v39 = vpop.f32.mrb[7].mxu1 }
  0xe5   :  { %v1429_v40 = vpack.c.bf16 %v909_v25, %v909_v25  ;;  %v1461_v41 = vpack.c.bf16 %v941_v26, %v941_v26  ;;  %v910_v42 = vmax.f32 %v782_v13, %v846_v27  ;;  %v942_v43 = vmax.f32 %v814_v14, %v878_v28 }
  0xe6   :  { %1232 = vst.msk [vmem:[%s2491_s5 + $0x8] sm:$0xf] %vm1229_vm1, %v1431_v31  ;;  %1264 = vst.msk [vmem:[%s2491_s5 + $0x88] sm:$0xf] %vm1229_vm1, %v1463_v32  ;;  %v1432_v46 = vpack.c.bf16 %v912_v33, %v912_v33  ;;  %v1464_v47 = vpack.c.bf16 %v944_v34, %v944_v34  ;;  %v473_v49 = vadd.f32 %v1534_v16, %v93_v15  ;;  %v97_v33 = vld [vmem:[%s2488_s2 + $0x50] sm:$0xff] }
  0xe7   :  { %v601_v50 = vadd.f32 %v1566_v18, %v125_v17  ;;  %1230 = vst.msk [vmem:[%s2491_s5] sm:$0xf] %vm1229_vm1, %v1429_v40  ;;  %1262 = vst.msk [vmem:[%s2491_s5 + $0x80] sm:$0xf] %vm1229_vm1, %v1461_v41  ;;  %v1430_v53 = vpack.c.bf16 %v910_v42, %v910_v42  ;;  %v1462_v54 = vpack.c.bf16 %v942_v43, %v942_v43  ;;  %v129_v34 = vld [vmem:[%s2488_s2 + $0x150] sm:$0xff]  ;;  %v95_v40 = vld [vmem:[%s2488_s2 + $0x40] sm:$0xff] }
  0xe8   :  { %v465_v55 = vadd.f32 %v464_v23, %v91_v35  ;;  %v593_v56 = vadd.f32 %v592_v24, %v123_v36  ;;  %1233 = vst.msk [vmem:[%s2491_s5 + $0xc] sm:$0xf] %vm1229_vm1, %v1432_v46  ;;  %1265 = vst.msk [vmem:[%s2491_s5 + $0x8c] sm:$0xf] %vm1229_vm1, %v1464_v47  ;;  %v716_v57 = vmul.f32 %v1805_v38, %v473_v49  ;;  %v127_v41 = vld [vmem:[%s2488_s2 + $0x140] sm:$0xff]  ;;  %v98_v46 = vld [vmem:[%s2488_s2 + $0x58] sm:$0xff] }
  0xe9   :  { %v748_v58 = vmul.f32 %v1805_v38, %v601_v50  ;;  %v476_v59 = vadd.f32 %v1535_v29, %v94_v44  ;;  %v604_v60 = vadd.f32 %v1567_v30, %v126_v45  ;;  %1231 = vst.msk [vmem:[%s2491_s5 + $0x4] sm:$0xf] %vm1229_vm1, %v1430_v53  ;;  %1263 = vst.msk [vmem:[%s2491_s5 + $0x84] sm:$0xf] %vm1229_vm1, %v1462_v54  ;;  %v1538_v1 = vpop.f32.mrb[8].mxu0  ;;  %v1570_v2 = vpop.f32.mrb[8].mxu1 }
  0xea   :  { %v714_v61 = vmul.f32 %v1805_v38, %v465_v55  ;;  %v746_v62 = vmul.f32 %v1805_v38, %v593_v56  ;;  %v468_v63 = vadd.f32 %v467_v37, %v92_v51  ;;  %v596_v0 = vadd.f32 %v595_v39, %v124_v52  ;;  %v480_v7 = vpop.f32.mrb[9].mxu0  ;;  %v608_v8 = vpop.f32.mrb[9].mxu1  ;;  %v130_v47 = vld [vmem:[%s2488_s2 + $0x158] sm:$0xff]  ;;  %v96_v55 = vld [vmem:[%s2488_s2 + $0x48] sm:$0xff] }
  0xeb   :  { %v787_v3 = vadd.f32 %v1822_v48, %v716_v57  ;;  %v819_v4 = vadd.f32 %v1822_v48, %v748_v58  ;;  %v717_v5 = vmul.f32 %v1805_v38, %v476_v59  ;;  %v749_v6 = vmul.f32 %v1805_v38, %v604_v60  ;;  %v1539_v13 = vpop.f32.mrb[10].mxu0  ;;  %v1571_v14 = vpop.f32.mrb[10].mxu1  ;;  %v128_v56 = vld [vmem:[%s2488_s2 + $0x148] sm:$0xff] }
  0xec   :  { %v785_v9 = vadd.f32 %v1822_v48, %v714_v61  ;;  %v817_v10 = vadd.f32 %v1822_v48, %v746_v62  ;;  %v715_v11 = vmul.f32 %v1805_v38, %v468_v63  ;;  %v747_v12 = vmul.f32 %v1805_v38, %v596_v0  ;;  %v483_v19 = vpop.f32.mrb[11].mxu0  ;;  %v611_v20 = vpop.f32.mrb[11].mxu1 }
  0xed   :  { %v851_v15 = vmul.f32 0.1, %v787_v3  ;;  %v883_v16 = vmul.f32 0.1, %v819_v4  ;;  %v788_v17 = vadd.f32 %v1822_v48, %v717_v5  ;;  %v820_v18 = vadd.f32 %v1822_v48, %v749_v6 }
  0xee   :  { %v849_v21 = vmul.f32 0.1, %v785_v9  ;;  %v881_v22 = vmul.f32 0.1, %v817_v10  ;;  %v786_v23 = vadd.f32 %v1822_v48, %v715_v11  ;;  %v818_v24 = vadd.f32 %v1822_v48, %v747_v12 }
  0xef   :  { %v915_v25 = vmax.f32 %v787_v3, %v851_v15  ;;  %v947_v26 = vmax.f32 %v819_v4, %v883_v16  ;;  %v852_v27 = vmul.f32 0.1, %v788_v17  ;;  %v884_v28 = vmul.f32 0.1, %v820_v18 }
  0xf0   :  { %v913_v29 = vmax.f32 %v785_v9, %v849_v21  ;;  %v945_v30 = vmax.f32 %v817_v10, %v881_v22  ;;  %v850_v31 = vmul.f32 0.1, %v786_v23  ;;  %v882_v32 = vmul.f32 0.1, %v818_v24 }
  0xf1   :  { %v1435_v35 = vpack.c.bf16 %v915_v25, %v915_v25  ;;  %v1467_v36 = vpack.c.bf16 %v947_v26, %v947_v26  ;;  %v916_v37 = vmax.f32 %v788_v17, %v852_v27  ;;  %v948_v39 = vmax.f32 %v820_v18, %v884_v28  ;;  %v1930_v49 = vpop.f32.mrb[12].mxu0  ;;  %v1932_v50 = vpop.f32.mrb[12].mxu1  ;;  %v101_v27 = vld [vmem:[%s2488_s2 + $0x70] sm:$0xff] }
  0xf2   :  { %v1433_v42 = vpack.c.bf16 %v913_v29, %v913_v29  ;;  %v1465_v43 = vpack.c.bf16 %v945_v30, %v945_v30  ;;  %v914_v44 = vmax.f32 %v786_v23, %v850_v31  ;;  %v946_v45 = vmax.f32 %v818_v24, %v882_v32  ;;  %v1948_v57 = vpop.f32.mrb[13].mxu0  ;;  %v1950_v58 = vpop.f32.mrb[13].mxu1  ;;  %v133_v28 = vld [vmem:[%s2488_s2 + $0x170] sm:$0xff] }
  0xf3   :  { %1236 = vst.msk [vmem:[%s2491_s5 + $0x18] sm:$0xf] %vm1229_vm1, %v1435_v35  ;;  %1268 = vst.msk [vmem:[%s2491_s5 + $0x98] sm:$0xf] %vm1229_vm1, %v1467_v36  ;;  %v1436_v51 = vpack.c.bf16 %v916_v37, %v916_v37  ;;  %v1468_v52 = vpack.c.bf16 %v948_v39, %v948_v39  ;;  %v489_v53 = vadd.f32 %v1538_v1, %v97_v33  ;;  %v1960_v63 = vpop.f32.mrb[14].mxu0  ;;  %v1962_v0 = vpop.f32.mrb[14].mxu1 }
  0xf4   :  { %v617_v54 = vadd.f32 %v1570_v2, %v129_v34  ;;  %1234 = vst.msk [vmem:[%s2491_s5 + $0x10] sm:$0xf] %vm1229_vm1, %v1433_v42  ;;  %1266 = vst.msk [vmem:[%s2491_s5 + $0x90] sm:$0xf] %vm1229_vm1, %v1465_v43  ;;  %v1434_v59 = vpack.c.bf16 %v914_v44, %v914_v44  ;;  %v1466_v60 = vpack.c.bf16 %v946_v45, %v946_v45  ;;  %v1974_v5 = vpop.f32.mrb[15].mxu0  ;;  %v1976_v6 = vpop.f32.mrb[15].mxu1 }
  0xf5   :  { %v481_v61 = vadd.f32 %v480_v7, %v95_v40  ;;  %v609_v62 = vadd.f32 %v608_v8, %v127_v41  ;;  %1237 = vst.msk [vmem:[%s2491_s5 + $0x1c] sm:$0xf] %vm1229_vm1, %v1436_v51  ;;  %1269 = vst.msk [vmem:[%s2491_s5 + $0x9c] sm:$0xf] %vm1229_vm1, %v1468_v52  ;;  %v720_v1 = vmul.f32 %v1805_v38, %v489_v53  ;;  %v99_v51 = vld [vmem:[%s2488_s2 + $0x60] sm:$0xff] }
  0xf6   :  { %v752_v2 = vmul.f32 %v1805_v38, %v617_v54  ;;  %v492_v3 = vadd.f32 %v1539_v13, %v98_v46  ;;  %v620_v4 = vadd.f32 %v1571_v14, %v130_v47  ;;  %1235 = vst.msk [vmem:[%s2491_s5 + $0x14] sm:$0xf] %vm1229_vm1, %v1434_v59  ;;  %1267 = vst.msk [vmem:[%s2491_s5 + $0x94] sm:$0xf] %vm1229_vm1, %v1466_v60  ;;  %v131_v52 = vld [vmem:[%s2488_s2 + $0x160] sm:$0xff] }
  0xf7   :  { %v718_v7 = vmul.f32 %v1805_v38, %v481_v61  ;;  %v750_v8 = vmul.f32 %v1805_v38, %v609_v62  ;;  %v484_v9 = vadd.f32 %v483_v19, %v96_v55  ;;  %v612_v10 = vadd.f32 %v611_v20, %v128_v56  ;;  %v102_v61 = vld [vmem:[%s2488_s2 + $0x78] sm:$0xff] }
  0xf8   :  { %v791_v11 = vadd.f32 %v1822_v48, %v720_v1  ;;  %v823_v12 = vadd.f32 %v1822_v48, %v752_v2  ;;  %v721_v13 = vmul.f32 %v1805_v38, %v492_v3  ;;  %v753_v14 = vmul.f32 %v1805_v38, %v620_v4  ;;  %v134_v62 = vld [vmem:[%s2488_s2 + $0x178] sm:$0xff] }
  0xf9   :  { %v789_v15 = vadd.f32 %v1822_v48, %v718_v7  ;;  %v821_v16 = vadd.f32 %v1822_v48, %v750_v8  ;;  %v719_v17 = vmul.f32 %v1805_v38, %v484_v9  ;;  %v751_v18 = vmul.f32 %v1805_v38, %v612_v10  ;;  %v2006_v29 = vpop.f32.mrb[16].mxu0  ;;  %v2008_v30 = vpop.f32.mrb[16].mxu1  ;;  %v100_v7 = vld [vmem:[%s2488_s2 + $0x68] sm:$0xff] }
  0xfa   :  { %v855_v21 = vmul.f32 0.1, %v791_v11  ;;  %v887_v22 = vmul.f32 0.1, %v823_v12  ;;  %v792_v19 = vadd.f32 %v1822_v48, %v721_v13  ;;  %v824_v20 = vadd.f32 %v1822_v48, %v753_v14  ;;  %v2010_v35 = vpop.f32.mrb[17].mxu0  ;;  %v2012_v36 = vpop.f32.mrb[17].mxu1 }
  0xfb   :  { %v853_v23 = vmul.f32 0.1, %v789_v15  ;;  %v885_v24 = vmul.f32 0.1, %v821_v16  ;;  %v790_v25 = vadd.f32 %v1822_v48, %v719_v17  ;;  %v822_v26 = vadd.f32 %v1822_v48, %v751_v18  ;;  %v2014_v42 = vpop.f32.mrb[18].mxu0  ;;  %v2016_v43 = vpop.f32.mrb[18].mxu1 }
  0xfc   :  { %v919_v31 = vmax.f32 %v791_v11, %v855_v21  ;;  %v951_v32 = vmax.f32 %v823_v12, %v887_v22  ;;  %v856_v33 = vmul.f32 0.1, %v792_v19  ;;  %v888_v34 = vmul.f32 0.1, %v824_v20  ;;  %v2024_v53 = vpop.f32.mrb[19].mxu0  ;;  %v2026_v54 = vpop.f32.mrb[19].mxu1 }
  0xfd   :  { %v917_v37 = vmax.f32 %v789_v15, %v853_v23  ;;  %v949_v39 = vmax.f32 %v821_v16, %v885_v24  ;;  %v854_v40 = vmul.f32 0.1, %v790_v25  ;;  %v886_v41 = vmul.f32 0.1, %v822_v26  ;;  %v132_v8 = vld [vmem:[%s2488_s2 + $0x168] sm:$0xff] }
  0xfe   :  { %v1439_v44 = vpack.c.bf16 %v919_v31, %v919_v31  ;;  %v1471_v45 = vpack.c.bf16 %v951_v32, %v951_v32  ;;  %v920_v46 = vmax.f32 %v792_v19, %v856_v33  ;;  %v952_v47 = vmax.f32 %v824_v20, %v888_v34 }
  0xff   :  { %v1437_v55 = vpack.c.bf16 %v917_v37, %v917_v37  ;;  %v1469_v56 = vpack.c.bf16 %v949_v39, %v949_v39  ;;  %v918_v59 = vmax.f32 %v790_v25, %v854_v40  ;;  %v950_v60 = vmax.f32 %v822_v26, %v886_v41 }
 0x100   :  { %1240 = vst.msk [vmem:[%s2491_s5 + $0x28] sm:$0xf] %vm1229_vm1, %v1439_v44  ;;  %1272 = vst.msk [vmem:[%s2491_s5 + $0xa8] sm:$0xf] %vm1229_vm1, %v1471_v45  ;;  %v1440_v1 = vpack.c.bf16 %v920_v46, %v920_v46  ;;  %v1472_v2 = vpack.c.bf16 %v952_v47, %v952_v47  ;;  %v505_v3 = vadd.f32 %v1930_v49, %v101_v27 }
 0x101   :  { %v633_v4 = vadd.f32 %v1932_v50, %v133_v28  ;;  %1238 = vst.msk [vmem:[%s2491_s5 + $0x20] sm:$0xf] %vm1229_vm1, %v1437_v55  ;;  %1270 = vst.msk [vmem:[%s2491_s5 + $0xa0] sm:$0xf] %vm1229_vm1, %v1469_v56  ;;  %v1438_v49 = vpack.c.bf16 %v918_v59, %v918_v59  ;;  %v1470_v50 = vpack.c.bf16 %v950_v60, %v950_v60  ;;  %v2084_v16 = vpop.f32.mrb[20].mxu0  ;;  %v105_v59 = vld [vmem:[%s2488_s2 + $0x90] sm:$0xff] }
 0x102   :  { %v497_v9 = vadd.f32 %v1948_v57, %v99_v51  ;;  %v625_v10 = vadd.f32 %v1950_v58, %v131_v52  ;;  %1241 = vst.msk [vmem:[%s2491_s5 + $0x2c] sm:$0xf] %vm1229_vm1, %v1440_v1  ;;  %1273 = vst.msk [vmem:[%s2491_s5 + $0xac] sm:$0xf] %vm1229_vm1, %v1472_v2  ;;  %v724_v11 = vmul.f32 %v1805_v38, %v505_v3  ;;  %v2092_v19 = vpop.f32.mrb[21].mxu0  ;;  %v137_v60 = vld [vmem:[%s2488_s2 + $0x190] sm:$0xff] }
 0x103   :  { %v756_v12 = vmul.f32 %v1805_v38, %v633_v4  ;;  %v508_v13 = vadd.f32 %v1960_v63, %v102_v61  ;;  %v636_v57 = vadd.f32 %v1962_v0, %v134_v62  ;;  %1239 = vst.msk [vmem:[%s2491_s5 + $0x24] sm:$0xf] %vm1229_vm1, %v1438_v49  ;;  %1271 = vst.msk [vmem:[%s2491_s5 + $0xa4] sm:$0xf] %vm1229_vm1, %v1470_v50  ;;  %v2086_v0 = vpop.f32.mrb[20].mxu1  ;;  %v2100_v25 = vpop.f32.mrb[22].mxu0 }
 0x104   :  { %v722_v58 = vmul.f32 %v1805_v38, %v497_v9  ;;  %v754_v14 = vmul.f32 %v1805_v38, %v625_v10  ;;  %v500_v15 = vadd.f32 %v1974_v5, %v100_v7  ;;  %v628_v63 = vadd.f32 %v1976_v6, %v132_v8  ;;  %v2094_v20 = vpop.f32.mrb[21].mxu1  ;;  %v2106_v33 = vpop.f32.mrb[23].mxu0  ;;  %v103_v3 = vld [vmem:[%s2488_s2 + $0x80] sm:$0xff]  ;;  %v106_v9 = vld [vmem:[%s2488_s2 + $0x98] sm:$0xff] }
 0x105   :  { %v795_v17 = vadd.f32 %v1822_v48, %v724_v11  ;;  %v827_v18 = vadd.f32 %v1822_v48, %v756_v12  ;;  %v725_v21 = vmul.f32 %v1805_v38, %v508_v13  ;;  %v757_v22 = vmul.f32 %v1805_v38, %v636_v57  ;;  %v2102_v26 = vpop.f32.mrb[22].mxu1  ;;  %v135_v4 = vld [vmem:[%s2488_s2 + $0x180] sm:$0xff]  ;;  %v138_v10 = vld [vmem:[%s2488_s2 + $0x198] sm:$0xff] }
 0x106   :  { %v793_v5 = vadd.f32 %v1822_v48, %v722_v58  ;;  %v825_v6 = vadd.f32 %v1822_v48, %v754_v14  ;;  %v723_v23 = vmul.f32 %v1805_v38, %v500_v15  ;;  %v755_v24 = vmul.f32 %v1805_v38, %v628_v63  ;;  %v2108_v34 = vpop.f32.mrb[23].mxu1  ;;  %v104_v15 = vld [vmem:[%s2488_s2 + $0x88] sm:$0xff] }
 0x107   :  { %v859_v27 = vmul.f32 0.1, %v795_v17  ;;  %v891_v28 = vmul.f32 0.1, %v827_v18  ;;  %v796_v31 = vadd.f32 %v1822_v48, %v725_v21  ;;  %v828_v32 = vadd.f32 %v1822_v48, %v757_v22  ;;  %v136_v63 = vld [vmem:[%s2488_s2 + $0x188] sm:$0xff] }
 0x108   :  { %v857_v37 = vmul.f32 0.1, %v793_v5  ;;  %v889_v39 = vmul.f32 0.1, %v825_v6  ;;  %v794_v40 = vadd.f32 %v1822_v48, %v723_v23  ;;  %v826_v41 = vadd.f32 %v1822_v48, %v755_v24 }
 0x109   :  { %v923_v44 = vmax.f32 %v795_v17, %v859_v27  ;;  %v955_v45 = vmax.f32 %v827_v18, %v891_v28  ;;  %v860_v46 = vmul.f32 0.1, %v796_v31  ;;  %v892_v47 = vmul.f32 0.1, %v828_v32  ;;  %v2130_v11 = vpop.f32.mrb[24].mxu0  ;;  %v2132_v12 = vpop.f32.mrb[24].mxu1 }
 0x10a   :  { %v921_v51 = vmax.f32 %v793_v5, %v857_v37  ;;  %v953_v52 = vmax.f32 %v825_v6, %v889_v39  ;;  %v858_v55 = vmul.f32 0.1, %v794_v40  ;;  %v890_v56 = vmul.f32 0.1, %v826_v41  ;;  %v2150_v17 = vpop.f32.mrb[25].mxu0  ;;  %v2152_v18 = vpop.f32.mrb[25].mxu1 }
 0x10b   :  { %v1443_v61 = vpack.c.bf16 %v923_v44, %v923_v44  ;;  %v1475_v62 = vpack.c.bf16 %v955_v45, %v955_v45  ;;  %v924_v1 = vmax.f32 %v796_v31, %v860_v46  ;;  %v956_v2 = vmax.f32 %v828_v32, %v892_v47  ;;  %v2164_v5 = vpop.f32.mrb[26].mxu0  ;;  %v2166_v6 = vpop.f32.mrb[26].mxu1 }
 0x10c   :  { %v1441_v7 = vpack.c.bf16 %v921_v51, %v921_v51  ;;  %v1473_v8 = vpack.c.bf16 %v953_v52, %v953_v52  ;;  %v922_v49 = vmax.f32 %v794_v40, %v858_v55  ;;  %v954_v50 = vmax.f32 %v826_v41, %v890_v56  ;;  %v2180_v27 = vpop.f32.mrb[27].mxu0  ;;  %v2182_v28 = vpop.f32.mrb[27].mxu1 }
 0x10d   :  { %1244 = vst.msk [vmem:[%s2491_s5 + $0x38] sm:$0xf] %vm1229_vm1, %v1443_v61  ;;  %1276 = vst.msk [vmem:[%s2491_s5 + $0xb8] sm:$0xf] %vm1229_vm1, %v1475_v62  ;;  %v1444_v13 = vpack.c.bf16 %v924_v1, %v924_v1  ;;  %v1476_v57 = vpack.c.bf16 %v956_v2, %v956_v2  ;;  %v521_v58 = vadd.f32 %v2006_v29, %v105_v59  ;;  %v109_v61 = vld [vmem:[%s2488_s2 + $0xb0] sm:$0xff] }
 0x10e   :  { %v649_v14 = vadd.f32 %v2008_v30, %v137_v60  ;;  %1242 = vst.msk [vmem:[%s2491_s5 + $0x30] sm:$0xf] %vm1229_vm1, %v1441_v7  ;;  %1274 = vst.msk [vmem:[%s2491_s5 + $0xb0] sm:$0xf] %vm1229_vm1, %v1473_v8  ;;  %v1442_v29 = vpack.c.bf16 %v922_v49, %v922_v49  ;;  %v1474_v30 = vpack.c.bf16 %v954_v50, %v954_v50  ;;  %v141_v62 = vld [vmem:[%s2488_s2 + $0x1b0] sm:$0xff] }
 0x10f   :  { %v513_v21 = vadd.f32 %v2010_v35, %v103_v3  ;;  %v641_v22 = vadd.f32 %v2012_v36, %v135_v4  ;;  %1245 = vst.msk [vmem:[%s2491_s5 + $0x3c] sm:$0xf] %vm1229_vm1, %v1444_v13  ;;  %1277 = vst.msk [vmem:[%s2491_s5 + $0xbc] sm:$0xf] %vm1229_vm1, %v1476_v57  ;;  %v728_v23 = vmul.f32 %v1805_v38, %v521_v58 }
 0x110   :  { %v760_v35 = vmul.f32 %v1805_v38, %v649_v14  ;;  %v524_v36 = vadd.f32 %v2014_v42, %v106_v9  ;;  %v652_v24 = vadd.f32 %v2016_v43, %v138_v10  ;;  %1243 = vst.msk [vmem:[%s2491_s5 + $0x34] sm:$0xf] %vm1229_vm1, %v1442_v29  ;;  %1275 = vst.msk [vmem:[%s2491_s5 + $0xb4] sm:$0xf] %vm1229_vm1, %v1474_v30 }
 0x111   :  { %v726_v31 = vmul.f32 %v1805_v38, %v513_v21  ;;  %v758_v42 = vmul.f32 %v1805_v38, %v641_v22  ;;  %v516_v43 = vadd.f32 %v2024_v53, %v104_v15  ;;  %v644_v32 = vadd.f32 %v2026_v54, %v136_v63  ;;  %v2214_v1 = vpop.f32.mrb[28].mxu0  ;;  %v2216_v2 = vpop.f32.mrb[28].mxu1  ;;  %v107_v21 = vld [vmem:[%s2488_s2 + $0xa0] sm:$0xff] }
 0x112   :  { %v799_v37 = vadd.f32 %v1822_v48, %v728_v23  ;;  %v831_v39 = vadd.f32 %v1822_v48, %v760_v35  ;;  %v729_v40 = vmul.f32 %v1805_v38, %v524_v36  ;;  %v761_v41 = vmul.f32 %v1805_v38, %v652_v24  ;;  %v2218_v49 = vpop.f32.mrb[29].mxu0  ;;  %v2220_v50 = vpop.f32.mrb[29].mxu1  ;;  %v139_v22 = vld [vmem:[%s2488_s2 + $0x1a0] sm:$0xff] }
 0x113   :  { %v797_v44 = vadd.f32 %v1822_v48, %v726_v31  ;;  %v829_v45 = vadd.f32 %v1822_v48, %v758_v42  ;;  %v727_v46 = vmul.f32 %v1805_v38, %v516_v43  ;;  %v759_v47 = vmul.f32 %v1805_v38, %v644_v32  ;;  %v2222_v58 = vpop.f32.mrb[30].mxu0  ;;  %v2224_v14 = vpop.f32.mrb[30].mxu1  ;;  %v110_v43 = vld [vmem:[%s2488_s2 + $0xb8] sm:$0xff] }
 0x114   :  { %v863_v51 = vmul.f32 0.1, %v799_v37  ;;  %v895_v53 = vmul.f32 0.1, %v831_v39  ;;  %v800_v54 = vadd.f32 %v1822_v48, %v729_v40  ;;  %v832_v52 = vadd.f32 %v1822_v48, %v761_v41  ;;  %v2232_v23 = vpop.f32.mrb[31].mxu0  ;;  %v2234_v35 = vpop.f32.mrb[31].mxu1 }
 0x115   :  { %v861_v55 = vmul.f32 0.1, %v797_v44  ;;  %v893_v56 = vmul.f32 0.1, %v829_v45  ;;  %v798_v59 = vadd.f32 %v1822_v48, %v727_v46  ;;  %v830_v60 = vadd.f32 %v1822_v48, %v759_v47  ;;  %v142_v32 = vld [vmem:[%s2488_s2 + $0x1b8] sm:$0xff] }
 0x116   :  { %v927_v3 = vmax.f32 %v799_v37, %v863_v51  ;;  %v959_v4 = vmax.f32 %v831_v39, %v895_v53  ;;  %v864_v7 = vmul.f32 0.1, %v800_v54  ;;  %v896_v8 = vmul.f32 0.1, %v832_v52 }
 0x117   :  { %v925_v9 = vmax.f32 %v797_v44, %v861_v55  ;;  %v957_v10 = vmax.f32 %v829_v45, %v893_v56  ;;  %v862_v13 = vmul.f32 0.1, %v798_v59  ;;  %v894_v57 = vmul.f32 0.1, %v830_v60  ;;  %v108_v44 = vld [vmem:[%s2488_s2 + $0xa8] sm:$0xff] }
 0x118   :  { %v1447_v15 = vpack.c.bf16 %v927_v3, %v927_v3  ;;  %v1479_v63 = vpack.c.bf16 %v959_v4, %v959_v4  ;;  %v928_v29 = vmax.f32 %v800_v54, %v864_v7  ;;  %v960_v30 = vmax.f32 %v832_v52, %v896_v8  ;;  %v140_v45 = vld [vmem:[%s2488_s2 + $0x1a8] sm:$0xff] }
 0x119   :  { %v1445_v36 = vpack.c.bf16 %v925_v9, %v925_v9  ;;  %v1477_v24 = vpack.c.bf16 %v957_v10, %v957_v10  ;;  %v926_v31 = vmax.f32 %v798_v59, %v862_v13  ;;  %v958_v42 = vmax.f32 %v830_v60, %v894_v57 }
 0x11a   :  { %1248 = vst.msk [vmem:[%s2491_s5 + $0x48] sm:$0xf] %vm1229_vm1, %v1447_v15  ;;  %1280 = vst.msk [vmem:[%s2491_s5 + $0xc8] sm:$0xf] %vm1229_vm1, %v1479_v63  ;;  %v1448_v37 = vpack.c.bf16 %v928_v29, %v928_v29  ;;  %v1480_v39 = vpack.c.bf16 %v960_v30, %v960_v30  ;;  %v537_v40 = vadd.f32 %v2084_v16, %v109_v61 }
 0x11b   :  { %v665_v41 = vadd.f32 %v2086_v0, %v141_v62  ;;  %1246 = vst.msk [vmem:[%s2491_s5 + $0x40] sm:$0xf] %vm1229_vm1, %v1445_v36  ;;  %1278 = vst.msk [vmem:[%s2491_s5 + $0xc0] sm:$0xf] %vm1229_vm1, %v1477_v24  ;;  %v1446_v16 = vpack.c.bf16 %v926_v31, %v926_v31  ;;  %v1478_v0 = vpack.c.bf16 %v958_v42, %v958_v42  ;;  %v113_v31 = vld [vmem:[%s2488_s2 + $0xd0] sm:$0xff] }
 0x11c   :  { %v529_v46 = vadd.f32 %v2092_v19, %v107_v21  ;;  %v657_v47 = vadd.f32 %v2094_v20, %v139_v22  ;;  %1249 = vst.msk [vmem:[%s2491_s5 + $0x4c] sm:$0xf] %vm1229_vm1, %v1448_v37  ;;  %1281 = vst.msk [vmem:[%s2491_s5 + $0xcc] sm:$0xf] %vm1229_vm1, %v1480_v39  ;;  %v732_v51 = vmul.f32 %v1805_v38, %v537_v40  ;;  %v145_v42 = vld [vmem:[%s2488_s2 + $0x1d0] sm:$0xff]  ;;  %v111_v40 = vld [vmem:[%s2488_s2 + $0xc0] sm:$0xff] }
 0x11d   :  { %v764_v53 = vmul.f32 %v1805_v38, %v665_v41  ;;  %v540_v54 = vadd.f32 %v2100_v25, %v110_v43  ;;  %v668_v19 = vadd.f32 %v2102_v26, %v142_v32  ;;  %1247 = vst.msk [vmem:[%s2491_s5 + $0x44] sm:$0xf] %vm1229_vm1, %v1446_v16  ;;  %1279 = vst.msk [vmem:[%s2491_s5 + $0xc4] sm:$0xf] %vm1229_vm1, %v1478_v0  ;;  %v143_v41 = vld [vmem:[%s2488_s2 + $0x1c0] sm:$0xff] }
 0x11e   :  { %v730_v20 = vmul.f32 %v1805_v38, %v529_v46  ;;  %v762_v52 = vmul.f32 %v1805_v38, %v657_v47  ;;  %v532_v55 = vadd.f32 %v2106_v33, %v108_v44  ;;  %v660_v25 = vadd.f32 %v2108_v34, %v140_v45  ;;  %v114_v46 = vld [vmem:[%s2488_s2 + $0xd8] sm:$0xff] }
 0x11f   :  { %v803_v26 = vadd.f32 %v1822_v48, %v732_v51  ;;  %v835_v56 = vadd.f32 %v1822_v48, %v764_v53  ;;  %v733_v59 = vmul.f32 %v1805_v38, %v540_v54  ;;  %v765_v60 = vmul.f32 %v1805_v38, %v668_v19  ;;  %v146_v47 = vld [vmem:[%s2488_s2 + $0x1d8] sm:$0xff] }
 0x120   :  { %v801_v61 = vadd.f32 %v1822_v48, %v730_v20  ;;  %v833_v62 = vadd.f32 %v1822_v48, %v762_v52  ;;  %v731_v3 = vmul.f32 %v1805_v38, %v532_v55  ;;  %v763_v4 = vmul.f32 %v1805_v38, %v660_v25  ;;  %v112_v20 = vld [vmem:[%s2488_s2 + $0xc8] sm:$0xff] }
 0x121   :  { %v867_v7 = vmul.f32 0.1, %v803_v26  ;;  %v899_v33 = vmul.f32 0.1, %v835_v56  ;;  %v804_v34 = vadd.f32 %v1822_v48, %v733_v59  ;;  %v836_v8 = vadd.f32 %v1822_v48, %v765_v60  ;;  %v144_v52 = vld [vmem:[%s2488_s2 + $0x1c8] sm:$0xff] }
 0x122   :  { %v865_v9 = vmul.f32 0.1, %v801_v61  ;;  %v897_v10 = vmul.f32 0.1, %v833_v62  ;;  %v802_v13 = vadd.f32 %v1822_v48, %v731_v3  ;;  %v834_v57 = vadd.f32 %v1822_v48, %v763_v4 }
 0x123   :  { %v931_v15 = vmax.f32 %v803_v26, %v867_v7  ;;  %v963_v63 = vmax.f32 %v835_v56, %v899_v33  ;;  %v868_v29 = vmul.f32 0.1, %v804_v34  ;;  %v900_v30 = vmul.f32 0.1, %v836_v8 }
 0x124   :  { %v929_v21 = vmax.f32 %v801_v61, %v865_v9  ;;  %v961_v22 = vmax.f32 %v833_v62, %v897_v10  ;;  %v866_v36 = vmul.f32 0.1, %v802_v13  ;;  %v898_v24 = vmul.f32 0.1, %v834_v57 }
 0x125   :  { %v1451_v43 = vpack.c.bf16 %v931_v15, %v931_v15  ;;  %v1483_v32 = vpack.c.bf16 %v963_v63, %v963_v63  ;;  %v932_v37 = vmax.f32 %v804_v34, %v868_v29  ;;  %v964_v39 = vmax.f32 %v836_v8, %v900_v30 }
 0x126   :  { %v1449_v44 = vpack.c.bf16 %v929_v21, %v929_v21  ;;  %v1481_v45 = vpack.c.bf16 %v961_v22, %v961_v22  ;;  %v930_v16 = vmax.f32 %v802_v13, %v866_v36  ;;  %v962_v0 = vmax.f32 %v834_v57, %v898_v24 }
 0x127   :  { %1252 = vst.msk [vmem:[%s2491_s5 + $0x58] sm:$0xf] %vm1229_vm1, %v1451_v43  ;;  %1284 = vst.msk [vmem:[%s2491_s5 + $0xd8] sm:$0xf] %vm1229_vm1, %v1483_v32  ;;  %v1452_v51 = vpack.c.bf16 %v932_v37, %v932_v37  ;;  %v1484_v53 = vpack.c.bf16 %v964_v39, %v964_v39  ;;  %v553_v54 = vadd.f32 %v2130_v11, %v113_v31  ;;  %v149_v43 = vld [vmem:[%s2488_s2 + $0x1f0] sm:$0xff] }
 0x128   :  { %v681_v19 = vadd.f32 %v2132_v12, %v145_v42  ;;  %1250 = vst.msk [vmem:[%s2491_s5 + $0x50] sm:$0xf] %vm1229_vm1, %v1449_v44  ;;  %1282 = vst.msk [vmem:[%s2491_s5 + $0xd0] sm:$0xf] %vm1229_vm1, %v1481_v45  ;;  %v1450_v11 = vpack.c.bf16 %v930_v16, %v930_v16  ;;  %v1482_v12 = vpack.c.bf16 %v962_v0, %v962_v0  ;;  %v117_v42 = vld [vmem:[%s2488_s2 + $0xf0] sm:$0xff] }
 0x129   :  { %v545_v55 = vadd.f32 %v2150_v17, %v111_v40  ;;  %v673_v25 = vadd.f32 %v2152_v18, %v143_v41  ;;  %1253 = vst.msk [vmem:[%s2491_s5 + $0x5c] sm:$0xf] %vm1229_vm1, %v1452_v51  ;;  %1285 = vst.msk [vmem:[%s2491_s5 + $0xdc] sm:$0xf] %vm1229_vm1, %v1484_v53  ;;  %v736_v26 = vmul.f32 %v1805_v38, %v553_v54  ;;  %v115_v40 = vld [vmem:[%s2488_s2 + $0xe0] sm:$0xff] }
 0x12a   :  { %v768_v56 = vmul.f32 %v1805_v38, %v681_v19  ;;  %v556_v59 = vadd.f32 %v2164_v5, %v114_v46  ;;  %v684_v17 = vadd.f32 %v2166_v6, %v146_v47  ;;  %1251 = vst.msk [vmem:[%s2491_s5 + $0x54] sm:$0xf] %vm1229_vm1, %v1450_v11  ;;  %1283 = vst.msk [vmem:[%s2491_s5 + $0xd4] sm:$0xf] %vm1229_vm1, %v1482_v12  ;;  %v147_v41 = vld [vmem:[%s2488_s2 + $0x1e0] sm:$0xff]  ;;  %v118_v46 = vld [vmem:[%s2488_s2 + $0xf8] sm:$0xff] }
 0x12b   :  { %v734_v18 = vmul.f32 %v1805_v38, %v545_v55  ;;  %v766_v60 = vmul.f32 %v1805_v38, %v673_v25  ;;  %v548_v61 = vadd.f32 %v2180_v27, %v112_v20  ;;  %v676_v5 = vadd.f32 %v2182_v28, %v144_v52  ;;  %v150_v47 = vld [vmem:[%s2488_s2 + $0x1f8] sm:$0xff]  ;;  %v116_v20 = vld [vmem:[%s2488_s2 + $0xe8] sm:$0xff]  ;;  %v1627_v55 = vld [vmem:[%s2489_s3] ss:$0 sm:$0xff] }
 0x12c   :  { %v807_v6 = vadd.f32 %v1822_v48, %v736_v26  ;;  %v839_v62 = vadd.f32 %v1822_v48, %v768_v56  ;;  %v737_v3 = vmul.f32 %v1805_v38, %v556_v59  ;;  %v769_v4 = vmul.f32 %v1805_v38, %v684_v17  ;;  %v148_v52 = vld [vmem:[%s2488_s2 + $0x1e8] sm:$0xff] }
 0x12d   :  { %v805_v7 = vadd.f32 %v1822_v48, %v734_v18  ;;  %v837_v33 = vadd.f32 %v1822_v48, %v766_v60  ;;  %v735_v34 = vmul.f32 %v1805_v38, %v548_v61  ;;  %v767_v8 = vmul.f32 %v1805_v38, %v676_v5 }
 0x12e   :  { %v871_v9 = vmul.f32 0.1, %v807_v6  ;;  %v903_v27 = vmul.f32 0.1, %v839_v62  ;;  %v808_v28 = vadd.f32 %v1822_v48, %v737_v3  ;;  %v840_v10 = vadd.f32 %v1822_v48, %v769_v4 }
 0x12f   :  { %v869_v13 = vmul.f32 0.1, %v805_v7  ;;  %v901_v57 = vmul.f32 0.1, %v837_v33  ;;  %v806_v15 = vadd.f32 %v1822_v48, %v735_v34  ;;  %v838_v63 = vadd.f32 %v1822_v48, %v767_v8 }
 0x130   :  { %v935_v29 = vmax.f32 %v807_v6, %v871_v9  ;;  %v967_v30 = vmax.f32 %v839_v62, %v903_v27  ;;  %v872_v21 = vmul.f32 0.1, %v808_v28  ;;  %v904_v22 = vmul.f32 0.1, %v840_v10 }
 0x131   :  { %v933_v36 = vmax.f32 %v805_v7, %v869_v13  ;;  %v965_v24 = vmax.f32 %v837_v33, %v901_v57  ;;  %v870_v31 = vmul.f32 0.1, %v806_v15  ;;  %v902_v38 = vmul.f32 0.1, %v838_v63 }
 0x132   :  { %v1455_v32 = vpack.c.bf16 %v935_v29, %v935_v29  ;;  %v1487_v37 = vpack.c.bf16 %v967_v30, %v967_v30  ;;  %v936_v39 = vmax.f32 %v808_v28, %v872_v21  ;;  %v968_v48 = vmax.f32 %v840_v10, %v904_v22 }
 0x133   :  { %v1453_v44 = vpack.c.bf16 %v933_v36, %v933_v36  ;;  %v1485_v45 = vpack.c.bf16 %v965_v24, %v965_v24  ;;  %v934_v16 = vmax.f32 %v806_v15, %v870_v31  ;;  %v966_v0 = vmax.f32 %v838_v63, %v902_v38 }
 0x134   :  { %1256 = vst.msk [vmem:[%s2491_s5 + $0x68] sm:$0xf] %vm1229_vm1, %v1455_v32  ;;  %1288 = vst.msk [vmem:[%s2491_s5 + $0xe8] sm:$0xf] %vm1229_vm1, %v1487_v37  ;;  %v1456_v51 = vpack.c.bf16 %v936_v39, %v936_v39  ;;  %v1488_v53 = vpack.c.bf16 %v968_v48, %v968_v48  ;;  %v569_v54 = vadd.f32 %v2214_v1, %v117_v42 }
 0x135   :  { %v697_v19 = vadd.f32 %v2216_v2, %v149_v43  ;;  %1254 = vst.msk [vmem:[%s2491_s5 + $0x60] sm:$0xf] %vm1229_vm1, %v1453_v44  ;;  %1286 = vst.msk [vmem:[%s2491_s5 + $0xe0] sm:$0xf] %vm1229_vm1, %v1485_v45  ;;  %v1454_v1 = vpack.c.bf16 %v934_v16, %v934_v16  ;;  %v1486_v2 = vpack.c.bf16 %v966_v0, %v966_v0 }
 0x136   :  { %v561_v11 = vadd.f32 %v2218_v49, %v115_v40  ;;  %v689_v12 = vadd.f32 %v2220_v50, %v147_v41  ;;  %1257 = vst.msk [vmem:[%s2491_s5 + $0x6c] sm:$0xf] %vm1229_vm1, %v1456_v51  ;;  %1289 = vst.msk [vmem:[%s2491_s5 + $0xec] sm:$0xf] %vm1229_vm1, %v1488_v53  ;;  %v740_v25 = vmul.f32 %v1627_v55, %v569_v54 }
 0x137   :  { %v772_v26 = vmul.f32 %v1627_v55, %v697_v19  ;;  %v572_v49 = vadd.f32 %v2222_v58, %v118_v46  ;;  %v700_v50 = vadd.f32 %v2224_v14, %v150_v47  ;;  %1255 = vst.msk [vmem:[%s2491_s5 + $0x64] sm:$0xf] %vm1229_vm1, %v1454_v1  ;;  %1287 = vst.msk [vmem:[%s2491_s5 + $0xe4] sm:$0xf] %vm1229_vm1, %v1486_v2  ;;  %v1628_v58 = vld [vmem:[%s2490_s4] ss:$0 sm:$0xff] }
 0x138   :  { %v738_v56 = vmul.f32 %v1627_v55, %v561_v11  ;;  %v770_v59 = vmul.f32 %v1627_v55, %v689_v12  ;;  %v564_v17 = vadd.f32 %v2232_v23, %v116_v20  ;;  %v692_v18 = vadd.f32 %v2234_v35, %v148_v52 }
 0x139   :  { %v811_v14 = vadd.f32 %v1628_v58, %v740_v25  ;;  %v843_v60 = vadd.f32 %v1628_v58, %v772_v26  ;;  %v741_v61 = vmul.f32 %v1627_v55, %v572_v49  ;;  %v773_v5 = vmul.f32 %v1627_v55, %v700_v50 }
 0x13a   :  { %v809_v6 = vadd.f32 %v1628_v58, %v738_v56  ;;  %v841_v62 = vadd.f32 %v1628_v58, %v770_v59  ;;  %v739_v3 = vmul.f32 %v1627_v55, %v564_v17  ;;  %v771_v4 = vmul.f32 %v1627_v55, %v692_v18 }
 0x13b   :  { %v875_v7 = vmul.f32 0.1, %v811_v14  ;;  %v907_v33 = vmul.f32 0.1, %v843_v60  ;;  %v812_v34 = vadd.f32 %v1628_v58, %v741_v61  ;;  %v844_v8 = vadd.f32 %v1628_v58, %v773_v5 }
 0x13c   :  { %v873_v9 = vmul.f32 0.1, %v809_v6  ;;  %v905_v23 = vmul.f32 0.1, %v841_v62  ;;  %v810_v27 = vadd.f32 %v1628_v58, %v739_v3  ;;  %v842_v35 = vadd.f32 %v1628_v58, %v771_v4 }
 0x13d   :  { %v939_v28 = vmax.f32 %v811_v14, %v875_v7  ;;  %v971_v10 = vmax.f32 %v843_v60, %v907_v33  ;;  %v876_v13 = vmul.f32 0.1, %v812_v34  ;;  %v908_v57 = vmul.f32 0.1, %v844_v8 }
 0x13e   :  { %v937_v15 = vmax.f32 %v809_v6, %v873_v9  ;;  %v969_v63 = vmax.f32 %v841_v62, %v905_v23  ;;  %v874_v29 = vmul.f32 0.1, %v810_v27  ;;  %v906_v30 = vmul.f32 0.1, %v842_v35 }
 0x13f   :  { %v1459_v21 = vpack.c.bf16 %v939_v28, %v939_v28  ;;  %v1491_v22 = vpack.c.bf16 %v971_v10, %v971_v10  ;;  %v940_v36 = vmax.f32 %v812_v34, %v876_v13  ;;  %v972_v24 = vmax.f32 %v844_v8, %v908_v57 }
 0x140   :  { %v1457_v31 = vpack.c.bf16 %v937_v15, %v937_v15  ;;  %v1489_v38 = vpack.c.bf16 %v969_v63, %v969_v63  ;;  %v938_v42 = vmax.f32 %v810_v27, %v874_v29  ;;  %v970_v43 = vmax.f32 %v842_v35, %v906_v30 }
 0x141   :  { %1260 = vst.msk [vmem:[%s2491_s5 + $0x78] sm:$0xf] %vm1229_vm1, %v1459_v21  ;;  %1292 = vst.msk [vmem:[%s2491_s5 + $0xf8] sm:$0xf] %vm1229_vm1, %v1491_v22  ;;  %v1460_v32 = vpack.c.bf16 %v940_v36, %v940_v36  ;;  %v1492_v37 = vpack.c.bf16 %v972_v24, %v972_v24 }
 0x142   :  { %1258 = vst.msk [vmem:[%s2491_s5 + $0x70] sm:$0xf] %vm1229_vm1, %v1457_v31  ;;  %1290 = vst.msk [vmem:[%s2491_s5 + $0xf0] sm:$0xf] %vm1229_vm1, %v1489_v38  ;;  %v1458_v39 = vpack.c.bf16 %v938_v42, %v938_v42  ;;  %v1490_v48 = vpack.c.bf16 %v970_v43, %v970_v43 }
 0x143   :  { %1261 = vst.msk [vmem:[%s2491_s5 + $0x7c] sm:$0xf] %vm1229_vm1, %v1460_v32  ;;  %1293 = vst.msk [vmem:[%s2491_s5 + $0xfc] sm:$0xf] %vm1229_vm1, %v1492_v37 }
 0x144   :  { %1259 = vst.msk [vmem:[%s2491_s5 + $0x74] sm:$0xf] %vm1229_vm1, %v1458_v39  ;;  %1291 = vst.msk [vmem:[%s2491_s5 + $0xf4] sm:$0xf] %vm1229_vm1, %v1490_v48 }

// kernel: _lambda_.49
= control target key start
LH: loop header
LB: loop body
LE: loop exit
PB: predicated region body
PF: predicated region fallthrough
CT: control target
= control target key end

     0   :  { %vm251_vm0 = vcmask 130048   ;;  %s1461_s0 = inlined_call_operand.vmem [shape: bf16[512,16], index: 0, kind: input, shape index: {}]   ;;  %s1462_s1 = inlined_call_operand.vmem [shape: bf16[16,36], index: 1, kind: input, shape index: {}]   ;;  %s1463_s2 = inlined_call_operand.vmem [shape: f32[1,36], index: 2, kind: input, shape index: {}]   ;;  %s1464_s3 = inlined_call_operand.vmem [shape: f32[1,36], index: 3, kind: input, shape index: {}]   ;;  %s1465_s4 = inlined_call_operand.hbm [shape: f32[512,36], index: 4, kind: output, shape index: {}]  }
   0x1   :  { %v1031_v0 = vld [vmem:[%s1462_s1] sm:$0xff]   ;;  %v1034_v3 = vld [vmem:[%s1461_s0 + $0x8] sm:$0xff]   ;;  %v1036_v5 = vld [vmem:[%s1461_s0 + $0x10] sm:$0xff]  }
   0x2   :  { %v1032_v1 = vld [vmem:[%s1461_s0] sm:$0xff]   ;;  %960 = vmatprep.subr.bf16.mxu0 %v1031_v0  ;;  %1026 = vmatprep.subr.bf16.mxu1 %v1031_v0  ;;  %v1035_v4 = vld [vmem:[%s1461_s0 + $0x88] sm:$0xff]   ;;  %v1037_v6 = vld [vmem:[%s1461_s0 + $0x90] sm:$0xff]  }
   0x3   :  { %v1033_v2 = vld [vmem:[%s1461_s0 + $0x80] sm:$0xff]   ;;  %961 = vmatpush3.bf16.msra.mxu0 %v1031_v0  ;;  %1027 = vmatpush3.bf16.msra.mxu1 %v1031_v0  ;;  %v1038_v7 = vld [vmem:[%s1461_s0 + $0x18] sm:$0xff]   ;;  %v1042_v11 = vld [vmem:[%s1461_s0 + $0x28] sm:$0xff]  }
   0x4   :  { %962 = vmatprep.mubr.msk.bf16.mxu0 %vm251_vm0, %v1032_v1  ;;  %994 = vmatprep.mubr.msk.bf16.mxu1 %vm251_vm0, %v1033_v2  ;;  %v1039_v8 = vld [vmem:[%s1461_s0 + $0x98] sm:$0xff]   ;;  %v1040_v9 = vld [vmem:[%s1461_s0 + $0x20] sm:$0xff]   ;;  %v1043_v12 = vld [vmem:[%s1461_s0 + $0xa8] sm:$0xff]  }
   0x5   :  { %v1041_v10 = vld [vmem:[%s1461_s0 + $0xa0] sm:$0xff]   ;;  %v1044_v13 = vld [vmem:[%s1461_s0 + $0x30] sm:$0xff]   ;;  %v1046_v15 = vld [vmem:[%s1461_s0 + $0x38] sm:$0xff]  }
   0x6   :  { %963 = vmatmul.mubr.msk.bf16.vlgmr.msra.gmra.mrb[0].mxu0 %vm251_vm0, %v1034_v3  ;;  %995 = vmatmul.mubr.msk.bf16.vlgmr.msra.gmra.mrb[0].mxu1 %vm251_vm0, %v1035_v4  ;;  %v1045_v14 = vld [vmem:[%s1461_s0 + $0xb0] sm:$0xff]   ;;  %v1047_v16 = vld [vmem:[%s1461_s0 + $0xb8] sm:$0xff]   ;;  %v1048_v17 = vld [vmem:[%s1461_s0 + $0x40] sm:$0xff]  }
   0x7   :  { %966 = vmatprep.mubr.msk.bf16.mxu0 %vm251_vm0, %v1036_v5  ;;  %998 = vmatprep.mubr.msk.bf16.mxu1 %vm251_vm0, %v1037_v6  ;;  %v1049_v18 = vld [vmem:[%s1461_s0 + $0xc0] sm:$0xff]  }
   0xe   :  { %967 = vmatmul.mubr.msk.bf16.gmra.mrb[4].mxu0 %vm251_vm0, %v1038_v7  ;;  %999 = vmatmul.mubr.msk.bf16.gmra.mrb[4].mxu1 %vm251_vm0, %v1039_v8 }
   0xf   :  { %970 = vmatprep.mubr.msk.bf16.mxu0 %vm251_vm0, %v1040_v9  ;;  %1002 = vmatprep.mubr.msk.bf16.mxu1 %vm251_vm0, %v1041_v10 }
  0x16   :  { %971 = vmatmul.mubr.msk.bf16.gmra.mrb[8].mxu0 %vm251_vm0, %v1042_v11  ;;  %1003 = vmatmul.mubr.msk.bf16.gmra.mrb[8].mxu1 %vm251_vm0, %v1043_v12 }
  0x17   :  { %974 = vmatprep.mubr.msk.bf16.mxu0 %vm251_vm0, %v1044_v13  ;;  %1006 = vmatprep.mubr.msk.bf16.mxu1 %vm251_vm0, %v1045_v14 }
  0x1e   :  { %975 = vmatmul.mubr.msk.bf16.gmra.mrb[12].mxu0 %vm251_vm0, %v1046_v15  ;;  %1007 = vmatmul.mubr.msk.bf16.gmra.mrb[12].mxu1 %vm251_vm0, %v1047_v16 }
  0x1f   :  { %978 = vmatprep.mubr.msk.bf16.mxu0 %vm251_vm0, %v1048_v17  ;;  %1010 = vmatprep.mubr.msk.bf16.mxu1 %vm251_vm0, %v1049_v18 }
  0x20   :  { %9 = vsyncpa [#allocation3], 0  ;;  %v1050_v19 = vld [vmem:[%s1461_s0 + $0x48] sm:$0xff]   ;;  %v1052_v21 = vld [vmem:[%s1461_s0 + $0x50] sm:$0xff]   ;;  %vm779_vm1 = vcmask 293888  }
  0x21   :  { %v1051_v20 = vld [vmem:[%s1461_s0 + $0xc8] sm:$0xff]   ;;  %v1053_v22 = vld [vmem:[%s1461_s0 + $0xd0] sm:$0xff]   ;;  %v1054_v23 = vld [vmem:[%s1461_s0 + $0x58] sm:$0xff]  }
  0x22   :  { %v1055_v24 = vld [vmem:[%s1461_s0 + $0xd8] sm:$0xff]   ;;  %v1056_v25 = vld [vmem:[%s1461_s0 + $0x60] sm:$0xff]   ;;  %v1058_v27 = vld [vmem:[%s1461_s0 + $0x68] sm:$0xff]  }
  0x23   :  { %v1057_v26 = vld [vmem:[%s1461_s0 + $0xe0] sm:$0xff]   ;;  %v1059_v28 = vld [vmem:[%s1461_s0 + $0xe8] sm:$0xff]   ;;  %v1060_v29 = vld [vmem:[%s1461_s0 + $0x70] sm:$0xff]  }
  0x24   :  { %v1061_v30 = vld [vmem:[%s1461_s0 + $0xf0] sm:$0xff]   ;;  %v1062_v31 = vld [vmem:[%s1461_s0 + $0x78] sm:$0xff]   ;;  %v1250_v33 = vld [vmem:[%s1463_s2] ss:$0 sm:$0xff] }
  0x25   :  { %v1063_v32 = vld [vmem:[%s1461_s0 + $0xf8] sm:$0xff]   ;;  %v1255_v35 = vld [vmem:[%s1464_s3] ss:$0 sm:$0xff]  ;;  %s1088_s0 = smov [#allocation2]  }
  0x26   :  { %979 = vmatmul.mubr.msk.bf16.gmra.mrb[16].mxu0 %vm251_vm0, %v1050_v19  ;;  %1011 = vmatmul.mubr.msk.bf16.gmra.mrb[16].mxu1 %vm251_vm0, %v1051_v20  ;;  %s849_s2 = sshll.u32 %s1088_s0, 4  ;;  %s850_s2 = int_to_ptr.vmem [resolvable:$true] %s849_s2 }
  0x27   :  { %982 = vmatprep.mubr.msk.bf16.mxu0 %vm251_vm0, %v1052_v21  ;;  %1014 = vmatprep.mubr.msk.bf16.mxu1 %vm251_vm0, %v1053_v22  ;;  %s1064_s3 = scalar_lea.vmem %s850_s2, 8192  ;;  %p1069_p1 = scmp.lt.s32.totalorder %s850_s2, %s850_s2 }
  0x28   :  { %p1065_p0 = scmp.ne.s32.totalorder %s850_s2, %s1064_s3  ;;  %p1070_p2 = scmp.lt.s32.totalorder %s1064_s3, %s1064_s3 }
  0x2a   :  { %p1071_p3 = por %p1070_p2, %p1069_p1 }
  0x2c   :  { %p1072_p4 = pnand %p1071_p3, %p1065_p0 }
  0x2e   :  { %983 = vmatmul.mubr.msk.bf16.gmra.mrb[20].mxu0 %vm251_vm0, %v1054_v23  ;;  %1015 = vmatmul.mubr.msk.bf16.gmra.mrb[20].mxu1 %vm251_vm0, %v1055_v24 }
  0x2f   :  { %986 = vmatprep.mubr.msk.bf16.mxu0 %vm251_vm0, %v1056_v25  ;;  %1018 = vmatprep.mubr.msk.bf16.mxu1 %vm251_vm0, %v1057_v26 }
  0x36   :  { %987 = vmatmul.mubr.msk.bf16.gmra.mrb[24].mxu0 %vm251_vm0, %v1058_v27  ;;  %1019 = vmatmul.mubr.msk.bf16.gmra.mrb[24].mxu1 %vm251_vm0, %v1059_v28 }
  0x37   :  { %990 = vmatprep.mubr.msk.bf16.mxu0 %vm251_vm0, %v1060_v29  ;;  %1022 = vmatprep.mubr.msk.bf16.mxu1 %vm251_vm0, %v1061_v30 }
  0x3e   :  { %991 = vmatmul.mubr.msk.bf16.gmra.mrb[28].mxu0 %vm251_vm0, %v1062_v31  ;;  %1023 = vmatmul.mubr.msk.bf16.gmra.mrb[28].mxu1 %vm251_vm0, %v1063_v32 }
  0xd9   :  { %v964_v34 = vpop.f32.mrb[0].mxu0  ;;  %v996_v36 = vpop.f32.mrb[0].mxu1 }
  0xda   :  { %v646_v37 = vmul.f32 %v964_v34, %v1250_v33  ;;  %v678_v38 = vmul.f32 %v996_v36, %v1250_v33  ;;  %v382_v39 = vpop.f32.mrb[1].mxu0  ;;  %v510_v40 = vpop.f32.mrb[1].mxu1 }
  0xdb   :  { %v644_v41 = vmul.f32 %v1250_v33, %v382_v39  ;;  %v676_v42 = vmul.f32 %v1250_v33, %v510_v40  ;;  %v965_v43 = vpop.f32.mrb[2].mxu0  ;;  %v997_v44 = vpop.f32.mrb[2].mxu1 }
  0xdc   :  { %v717_v45 = vadd.f32 %v1255_v35, %v646_v37  ;;  %v749_v46 = vadd.f32 %v1255_v35, %v678_v38  ;;  %v647_v47 = vmul.f32 %v965_v43, %v1250_v33  ;;  %v679_v48 = vmul.f32 %v997_v44, %v1250_v33  ;;  %v385_v49 = vpop.f32.mrb[3].mxu0  ;;  %v513_v50 = vpop.f32.mrb[3].mxu1 }
  0xdd   :  { %v715_v51 = vadd.f32 %v1255_v35, %v644_v41  ;;  %v747_v52 = vadd.f32 %v1255_v35, %v676_v42  ;;  %v645_v53 = vmul.f32 %v1250_v33, %v385_v49  ;;  %v677_v54 = vmul.f32 %v1250_v33, %v513_v50 }
  0xde   :  { %782 = vst.msk [vmem:[#allocation2 + $0x10] sm:$0xff] %vm779_vm1, %v717_v45  ;;  %814 = vst.msk [vmem:[#allocation2 + $0x110] sm:$0xff] %vm779_vm1, %v749_v46  ;;  %v718_v55 = vadd.f32 %v1255_v35, %v647_v47  ;;  %v750_v56 = vadd.f32 %v1255_v35, %v679_v48 }
  0xdf   :  { %780 = vst.msk [vmem:[#allocation2] sm:$0xff] %vm779_vm1, %v715_v51  ;;  %812 = vst.msk [vmem:[#allocation2 + $0x100] sm:$0xff] %vm779_vm1, %v747_v52  ;;  %v716_v57 = vadd.f32 %v1255_v35, %v645_v53  ;;  %v748_v58 = vadd.f32 %v1255_v35, %v677_v54 }
  0xe0   :  { %783 = vst.msk [vmem:[#allocation2 + $0x18] sm:$0xff] %vm779_vm1, %v718_v55  ;;  %815 = vst.msk [vmem:[#allocation2 + $0x118] sm:$0xff] %vm779_vm1, %v750_v56 }
  0xe1   :  { %781 = vst.msk [vmem:[#allocation2 + $0x8] sm:$0xff] %vm779_vm1, %v716_v57  ;;  %813 = vst.msk [vmem:[#allocation2 + $0x108] sm:$0xff] %vm779_vm1, %v748_v58  ;;  %v968_v59 = vpop.f32.mrb[4].mxu0  ;;  %v1000_v60 = vpop.f32.mrb[4].mxu1 }
  0xe2   :  { %v650_v61 = vmul.f32 %v968_v59, %v1250_v33  ;;  %v682_v62 = vmul.f32 %v1000_v60, %v1250_v33  ;;  %v398_v63 = vpop.f32.mrb[5].mxu0  ;;  %v526_v0 = vpop.f32.mrb[5].mxu1 }
  0xe3   :  { %v648_v1 = vmul.f32 %v1250_v33, %v398_v63  ;;  %v680_v2 = vmul.f32 %v1250_v33, %v526_v0  ;;  %v969_v3 = vpop.f32.mrb[6].mxu0  ;;  %v1001_v4 = vpop.f32.mrb[6].mxu1 }
  0xe4   :  { %v721_v5 = vadd.f32 %v1255_v35, %v650_v61  ;;  %v753_v6 = vadd.f32 %v1255_v35, %v682_v62  ;;  %v651_v7 = vmul.f32 %v969_v3, %v1250_v33  ;;  %v683_v8 = vmul.f32 %v1001_v4, %v1250_v33  ;;  %v401_v9 = vpop.f32.mrb[7].mxu0  ;;  %v529_v10 = vpop.f32.mrb[7].mxu1 }
  0xe5   :  { %v719_v11 = vadd.f32 %v1255_v35, %v648_v1  ;;  %v751_v12 = vadd.f32 %v1255_v35, %v680_v2  ;;  %v649_v13 = vmul.f32 %v1250_v33, %v401_v9  ;;  %v681_v14 = vmul.f32 %v1250_v33, %v529_v10 }
  0xe6   :  { %786 = vst.msk [vmem:[#allocation2 + $0x30] sm:$0xff] %vm779_vm1, %v721_v5  ;;  %818 = vst.msk [vmem:[#allocation2 + $0x130] sm:$0xff] %vm779_vm1, %v753_v6  ;;  %v722_v15 = vadd.f32 %v1255_v35, %v651_v7  ;;  %v754_v16 = vadd.f32 %v1255_v35, %v683_v8 }
  0xe7   :  { %784 = vst.msk [vmem:[#allocation2 + $0x20] sm:$0xff] %vm779_vm1, %v719_v11  ;;  %816 = vst.msk [vmem:[#allocation2 + $0x120] sm:$0xff] %vm779_vm1, %v751_v12  ;;  %v720_v17 = vadd.f32 %v1255_v35, %v649_v13  ;;  %v752_v18 = vadd.f32 %v1255_v35, %v681_v14 }
  0xe8   :  { %787 = vst.msk [vmem:[#allocation2 + $0x38] sm:$0xff] %vm779_vm1, %v722_v15  ;;  %819 = vst.msk [vmem:[#allocation2 + $0x138] sm:$0xff] %vm779_vm1, %v754_v16 }
  0xe9   :  { %785 = vst.msk [vmem:[#allocation2 + $0x28] sm:$0xff] %vm779_vm1, %v720_v17  ;;  %817 = vst.msk [vmem:[#allocation2 + $0x128] sm:$0xff] %vm779_vm1, %v752_v18  ;;  %v972_v19 = vpop.f32.mrb[8].mxu0  ;;  %v1004_v20 = vpop.f32.mrb[8].mxu1 }
  0xea   :  { %v654_v21 = vmul.f32 %v972_v19, %v1250_v33  ;;  %v686_v22 = vmul.f32 %v1004_v20, %v1250_v33  ;;  %v414_v23 = vpop.f32.mrb[9].mxu0  ;;  %v542_v24 = vpop.f32.mrb[9].mxu1 }
  0xeb   :  { %v652_v25 = vmul.f32 %v1250_v33, %v414_v23  ;;  %v684_v26 = vmul.f32 %v1250_v33, %v542_v24  ;;  %v973_v27 = vpop.f32.mrb[10].mxu0  ;;  %v1005_v28 = vpop.f32.mrb[10].mxu1 }
  0xec   :  { %v725_v29 = vadd.f32 %v1255_v35, %v654_v21  ;;  %v757_v30 = vadd.f32 %v1255_v35, %v686_v22  ;;  %v655_v31 = vmul.f32 %v973_v27, %v1250_v33  ;;  %v687_v32 = vmul.f32 %v1005_v28, %v1250_v33  ;;  %v417_v34 = vpop.f32.mrb[11].mxu0  ;;  %v545_v36 = vpop.f32.mrb[11].mxu1 }
  0xed   :  { %v723_v37 = vadd.f32 %v1255_v35, %v652_v25  ;;  %v755_v38 = vadd.f32 %v1255_v35, %v684_v26  ;;  %v653_v39 = vmul.f32 %v1250_v33, %v417_v34  ;;  %v685_v40 = vmul.f32 %v1250_v33, %v545_v36 }
  0xee   :  { %790 = vst.msk [vmem:[#allocation2 + $0x50] sm:$0xff] %vm779_vm1, %v725_v29  ;;  %822 = vst.msk [vmem:[#allocation2 + $0x150] sm:$0xff] %vm779_vm1, %v757_v30  ;;  %v726_v41 = vadd.f32 %v1255_v35, %v655_v31  ;;  %v758_v42 = vadd.f32 %v1255_v35, %v687_v32 }
  0xef   :  { %788 = vst.msk [vmem:[#allocation2 + $0x40] sm:$0xff] %vm779_vm1, %v723_v37  ;;  %820 = vst.msk [vmem:[#allocation2 + $0x140] sm:$0xff] %vm779_vm1, %v755_v38  ;;  %v724_v43 = vadd.f32 %v1255_v35, %v653_v39  ;;  %v756_v44 = vadd.f32 %v1255_v35, %v685_v40 }
  0xf0   :  { %791 = vst.msk [vmem:[#allocation2 + $0x58] sm:$0xff] %vm779_vm1, %v726_v41  ;;  %823 = vst.msk [vmem:[#allocation2 + $0x158] sm:$0xff] %vm779_vm1, %v758_v42 }
  0xf1   :  { %789 = vst.msk [vmem:[#allocation2 + $0x48] sm:$0xff] %vm779_vm1, %v724_v43  ;;  %821 = vst.msk [vmem:[#allocation2 + $0x148] sm:$0xff] %vm779_vm1, %v756_v44  ;;  %v976_v45 = vpop.f32.mrb[12].mxu0  ;;  %v1008_v46 = vpop.f32.mrb[12].mxu1 }
  0xf2   :  { %v658_v47 = vmul.f32 %v976_v45, %v1250_v33  ;;  %v690_v48 = vmul.f32 %v1008_v46, %v1250_v33  ;;  %v430_v49 = vpop.f32.mrb[13].mxu0  ;;  %v558_v50 = vpop.f32.mrb[13].mxu1 }
  0xf3   :  { %v656_v51 = vmul.f32 %v1250_v33, %v430_v49  ;;  %v688_v52 = vmul.f32 %v1250_v33, %v558_v50  ;;  %v977_v53 = vpop.f32.mrb[14].mxu0  ;;  %v1009_v54 = vpop.f32.mrb[14].mxu1 }
  0xf4   :  { %v729_v55 = vadd.f32 %v1255_v35, %v658_v47  ;;  %v761_v56 = vadd.f32 %v1255_v35, %v690_v48  ;;  %v659_v57 = vmul.f32 %v977_v53, %v1250_v33  ;;  %v691_v58 = vmul.f32 %v1009_v54, %v1250_v33  ;;  %v433_v59 = vpop.f32.mrb[15].mxu0  ;;  %v561_v60 = vpop.f32.mrb[15].mxu1 }
  0xf5   :  { %v727_v61 = vadd.f32 %v1255_v35, %v656_v51  ;;  %v759_v62 = vadd.f32 %v1255_v35, %v688_v52  ;;  %v657_v63 = vmul.f32 %v1250_v33, %v433_v59  ;;  %v689_v0 = vmul.f32 %v1250_v33, %v561_v60 }
  0xf6   :  { %794 = vst.msk [vmem:[#allocation2 + $0x70] sm:$0xff] %vm779_vm1, %v729_v55  ;;  %826 = vst.msk [vmem:[#allocation2 + $0x170] sm:$0xff] %vm779_vm1, %v761_v56  ;;  %v730_v1 = vadd.f32 %v1255_v35, %v659_v57  ;;  %v762_v2 = vadd.f32 %v1255_v35, %v691_v58 }
  0xf7   :  { %792 = vst.msk [vmem:[#allocation2 + $0x60] sm:$0xff] %vm779_vm1, %v727_v61  ;;  %824 = vst.msk [vmem:[#allocation2 + $0x160] sm:$0xff] %vm779_vm1, %v759_v62  ;;  %v728_v3 = vadd.f32 %v1255_v35, %v657_v63  ;;  %v760_v4 = vadd.f32 %v1255_v35, %v689_v0 }
  0xf8   :  { %795 = vst.msk [vmem:[#allocation2 + $0x78] sm:$0xff] %vm779_vm1, %v730_v1  ;;  %827 = vst.msk [vmem:[#allocation2 + $0x178] sm:$0xff] %vm779_vm1, %v762_v2 }
  0xf9   :  { %793 = vst.msk [vmem:[#allocation2 + $0x68] sm:$0xff] %vm779_vm1, %v728_v3  ;;  %825 = vst.msk [vmem:[#allocation2 + $0x168] sm:$0xff] %vm779_vm1, %v760_v4  ;;  %v980_v5 = vpop.f32.mrb[16].mxu0  ;;  %v1012_v6 = vpop.f32.mrb[16].mxu1 }
  0xfa   :  { %v662_v7 = vmul.f32 %v980_v5, %v1250_v33  ;;  %v694_v8 = vmul.f32 %v1012_v6, %v1250_v33  ;;  %v446_v9 = vpop.f32.mrb[17].mxu0  ;;  %v574_v10 = vpop.f32.mrb[17].mxu1 }
  0xfb   :  { %v660_v11 = vmul.f32 %v1250_v33, %v446_v9  ;;  %v692_v12 = vmul.f32 %v1250_v33, %v574_v10  ;;  %v981_v13 = vpop.f32.mrb[18].mxu0  ;;  %v1013_v14 = vpop.f32.mrb[18].mxu1 }
  0xfc   :  { %v733_v15 = vadd.f32 %v1255_v35, %v662_v7  ;;  %v765_v16 = vadd.f32 %v1255_v35, %v694_v8  ;;  %v663_v17 = vmul.f32 %v981_v13, %v1250_v33  ;;  %v695_v18 = vmul.f32 %v1013_v14, %v1250_v33  ;;  %v449_v19 = vpop.f32.mrb[19].mxu0  ;;  %v577_v20 = vpop.f32.mrb[19].mxu1 }
  0xfd   :  { %v731_v21 = vadd.f32 %v1255_v35, %v660_v11  ;;  %v763_v22 = vadd.f32 %v1255_v35, %v692_v12  ;;  %v661_v23 = vmul.f32 %v1250_v33, %v449_v19  ;;  %v693_v24 = vmul.f32 %v1250_v33, %v577_v20 }
  0xfe   :  { %798 = vst.msk [vmem:[#allocation2 + $0x90] sm:$0xff] %vm779_vm1, %v733_v15  ;;  %830 = vst.msk [vmem:[#allocation2 + $0x190] sm:$0xff] %vm779_vm1, %v765_v16  ;;  %v734_v25 = vadd.f32 %v1255_v35, %v663_v17  ;;  %v766_v26 = vadd.f32 %v1255_v35, %v695_v18 }
  0xff   :  { %796 = vst.msk [vmem:[#allocation2 + $0x80] sm:$0xff] %vm779_vm1, %v731_v21  ;;  %828 = vst.msk [vmem:[#allocation2 + $0x180] sm:$0xff] %vm779_vm1, %v763_v22  ;;  %v732_v27 = vadd.f32 %v1255_v35, %v661_v23  ;;  %v764_v28 = vadd.f32 %v1255_v35, %v693_v24 }
 0x100   :  { %799 = vst.msk [vmem:[#allocation2 + $0x98] sm:$0xff] %vm779_vm1, %v734_v25  ;;  %831 = vst.msk [vmem:[#allocation2 + $0x198] sm:$0xff] %vm779_vm1, %v766_v26 }
 0x101   :  { %797 = vst.msk [vmem:[#allocation2 + $0x88] sm:$0xff] %vm779_vm1, %v732_v27  ;;  %829 = vst.msk [vmem:[#allocation2 + $0x188] sm:$0xff] %vm779_vm1, %v764_v28  ;;  %v984_v29 = vpop.f32.mrb[20].mxu0  ;;  %v1016_v30 = vpop.f32.mrb[20].mxu1 }
 0x102   :  { %v666_v31 = vmul.f32 %v984_v29, %v1250_v33  ;;  %v698_v32 = vmul.f32 %v1016_v30, %v1250_v33  ;;  %v462_v34 = vpop.f32.mrb[21].mxu0  ;;  %v590_v36 = vpop.f32.mrb[21].mxu1 }
 0x103   :  { %v664_v37 = vmul.f32 %v1250_v33, %v462_v34  ;;  %v696_v38 = vmul.f32 %v1250_v33, %v590_v36  ;;  %v985_v39 = vpop.f32.mrb[22].mxu0  ;;  %v1017_v40 = vpop.f32.mrb[22].mxu1 }
 0x104   :  { %v737_v41 = vadd.f32 %v1255_v35, %v666_v31  ;;  %v769_v42 = vadd.f32 %v1255_v35, %v698_v32  ;;  %v667_v43 = vmul.f32 %v985_v39, %v1250_v33  ;;  %v699_v44 = vmul.f32 %v1017_v40, %v1250_v33  ;;  %v465_v45 = vpop.f32.mrb[23].mxu0  ;;  %v593_v46 = vpop.f32.mrb[23].mxu1 }
 0x105   :  { %v735_v47 = vadd.f32 %v1255_v35, %v664_v37  ;;  %v767_v48 = vadd.f32 %v1255_v35, %v696_v38  ;;  %v665_v49 = vmul.f32 %v1250_v33, %v465_v45  ;;  %v697_v50 = vmul.f32 %v1250_v33, %v593_v46 }
 0x106   :  { %802 = vst.msk [vmem:[#allocation2 + $0xb0] sm:$0xff] %vm779_vm1, %v737_v41  ;;  %834 = vst.msk [vmem:[#allocation2 + $0x1b0] sm:$0xff] %vm779_vm1, %v769_v42  ;;  %v738_v51 = vadd.f32 %v1255_v35, %v667_v43  ;;  %v770_v52 = vadd.f32 %v1255_v35, %v699_v44 }
 0x107   :  { %800 = vst.msk [vmem:[#allocation2 + $0xa0] sm:$0xff] %vm779_vm1, %v735_v47  ;;  %832 = vst.msk [vmem:[#allocation2 + $0x1a0] sm:$0xff] %vm779_vm1, %v767_v48  ;;  %v736_v53 = vadd.f32 %v1255_v35, %v665_v49  ;;  %v768_v54 = vadd.f32 %v1255_v35, %v697_v50 }
 0x108   :  { %803 = vst.msk [vmem:[#allocation2 + $0xb8] sm:$0xff] %vm779_vm1, %v738_v51  ;;  %835 = vst.msk [vmem:[#allocation2 + $0x1b8] sm:$0xff] %vm779_vm1, %v770_v52 }
 0x109   :  { %801 = vst.msk [vmem:[#allocation2 + $0xa8] sm:$0xff] %vm779_vm1, %v736_v53  ;;  %833 = vst.msk [vmem:[#allocation2 + $0x1a8] sm:$0xff] %vm779_vm1, %v768_v54  ;;  %v988_v55 = vpop.f32.mrb[24].mxu0  ;;  %v1020_v56 = vpop.f32.mrb[24].mxu1 }
 0x10a   :  { %v670_v57 = vmul.f32 %v988_v55, %v1250_v33  ;;  %v702_v58 = vmul.f32 %v1020_v56, %v1250_v33  ;;  %v478_v59 = vpop.f32.mrb[25].mxu0  ;;  %v606_v60 = vpop.f32.mrb[25].mxu1 }
 0x10b   :  { %v668_v61 = vmul.f32 %v1250_v33, %v478_v59  ;;  %v700_v62 = vmul.f32 %v1250_v33, %v606_v60  ;;  %v989_v63 = vpop.f32.mrb[26].mxu0  ;;  %v1021_v0 = vpop.f32.mrb[26].mxu1 }
 0x10c   :  { %v741_v1 = vadd.f32 %v1255_v35, %v670_v57  ;;  %v773_v2 = vadd.f32 %v1255_v35, %v702_v58  ;;  %v671_v3 = vmul.f32 %v989_v63, %v1250_v33  ;;  %v703_v4 = vmul.f32 %v1021_v0, %v1250_v33  ;;  %v481_v5 = vpop.f32.mrb[27].mxu0  ;;  %v609_v6 = vpop.f32.mrb[27].mxu1 }
 0x10d   :  { %v739_v7 = vadd.f32 %v1255_v35, %v668_v61  ;;  %v771_v8 = vadd.f32 %v1255_v35, %v700_v62  ;;  %v669_v9 = vmul.f32 %v1250_v33, %v481_v5  ;;  %v701_v10 = vmul.f32 %v1250_v33, %v609_v6 }
 0x10e   :  { %806 = vst.msk [vmem:[#allocation2 + $0xd0] sm:$0xff] %vm779_vm1, %v741_v1  ;;  %838 = vst.msk [vmem:[#allocation2 + $0x1d0] sm:$0xff] %vm779_vm1, %v773_v2  ;;  %v742_v11 = vadd.f32 %v1255_v35, %v671_v3  ;;  %v774_v12 = vadd.f32 %v1255_v35, %v703_v4 }
 0x10f   :  { %804 = vst.msk [vmem:[#allocation2 + $0xc0] sm:$0xff] %vm779_vm1, %v739_v7  ;;  %836 = vst.msk [vmem:[#allocation2 + $0x1c0] sm:$0xff] %vm779_vm1, %v771_v8  ;;  %v740_v13 = vadd.f32 %v1255_v35, %v669_v9  ;;  %v772_v14 = vadd.f32 %v1255_v35, %v701_v10 }
 0x110   :  { %807 = vst.msk [vmem:[#allocation2 + $0xd8] sm:$0xff] %vm779_vm1, %v742_v11  ;;  %839 = vst.msk [vmem:[#allocation2 + $0x1d8] sm:$0xff] %vm779_vm1, %v774_v12 }
 0x111   :  { %805 = vst.msk [vmem:[#allocation2 + $0xc8] sm:$0xff] %vm779_vm1, %v740_v13  ;;  %837 = vst.msk [vmem:[#allocation2 + $0x1c8] sm:$0xff] %vm779_vm1, %v772_v14  ;;  %v992_v15 = vpop.f32.mrb[28].mxu0  ;;  %v1024_v16 = vpop.f32.mrb[28].mxu1 }
 0x112   :  { %v674_v17 = vmul.f32 %v992_v15, %v1250_v33  ;;  %v706_v18 = vmul.f32 %v1024_v16, %v1250_v33  ;;  %v494_v19 = vpop.f32.mrb[29].mxu0  ;;  %v622_v20 = vpop.f32.mrb[29].mxu1 }
 0x113   :  { %v672_v21 = vmul.f32 %v1250_v33, %v494_v19  ;;  %v704_v22 = vmul.f32 %v1250_v33, %v622_v20  ;;  %v993_v23 = vpop.f32.mrb[30].mxu0  ;;  %v1025_v24 = vpop.f32.mrb[30].mxu1 }
 0x114   :  { %v745_v25 = vadd.f32 %v1255_v35, %v674_v17  ;;  %v777_v26 = vadd.f32 %v1255_v35, %v706_v18  ;;  %v675_v27 = vmul.f32 %v993_v23, %v1250_v33  ;;  %v707_v28 = vmul.f32 %v1025_v24, %v1250_v33  ;;  %v497_v29 = vpop.f32.mrb[31].mxu0  ;;  %v625_v30 = vpop.f32.mrb[31].mxu1 }
 0x115   :  { %v743_v31 = vadd.f32 %v1255_v35, %v672_v21  ;;  %v775_v32 = vadd.f32 %v1255_v35, %v704_v22  ;;  %v673_v34 = vmul.f32 %v1250_v33, %v497_v29  ;;  %v705_v36 = vmul.f32 %v1250_v33, %v625_v30 }
 0x116   :  { %810 = vst.msk [vmem:[#allocation2 + $0xf0] sm:$0xff] %vm779_vm1, %v745_v25  ;;  %842 = vst.msk [vmem:[#allocation2 + $0x1f0] sm:$0xff] %vm779_vm1, %v777_v26  ;;  %v746_v37 = vadd.f32 %v1255_v35, %v675_v27  ;;  %v778_v38 = vadd.f32 %v1255_v35, %v707_v28 }
 0x117   :  { %808 = vst.msk [vmem:[#allocation2 + $0xe0] sm:$0xff] %vm779_vm1, %v743_v31  ;;  %840 = vst.msk [vmem:[#allocation2 + $0x1e0] sm:$0xff] %vm779_vm1, %v775_v32  ;;  %v744_v39 = vadd.f32 %v1255_v35, %v673_v34  ;;  %v776_v40 = vadd.f32 %v1255_v35, %v705_v36 }
 0x118   :  { %811 = vst.msk [vmem:[#allocation2 + $0xf8] sm:$0xff] %vm779_vm1, %v746_v37  ;;  %843 = vst.msk [vmem:[#allocation2 + $0x1f8] sm:$0xff] %vm779_vm1, %v778_v38 }
 0x119   :  { %809 = vst.msk [vmem:[#allocation2 + $0xe8] sm:$0xff] %vm779_vm1, %v744_v39  ;;  %841 = vst.msk [vmem:[#allocation2 + $0x1e8] sm:$0xff] %vm779_vm1, %v776_v40 }
 0x11a   :  { %1075 = shalt.err (!%p1072_p4)
}
 0x11b   :  { %s1076_s6 = scalar_lea.hbm %s1465_s4, 8192 }
 0x11c   :  { %p1077_p5 = scmp.ne.s32.totalorder %s1465_s4, %s1076_s6  ;;  %p1080_p6 = scmp.lt.u32.totalorder %s1076_s6, %s1465_s4 }
 0x11e   :  { %p1082_p7 = pnand %p1080_p6, %p1077_p5 }
 0x120   :  { %1085 = shalt.err (!%p1082_p7)
}
 0x121   :  { %s1089_s11 = smov 128   ;;  %s1090_s12 = smov 8  }
 0x122   :  { %855 = dma.vmem_to_hbm [thread:$0]  %s850_s2, 8192, %s1465_s4, [#allocation3], %s1089_s11, %s1089_s11, %s1090_s12  }
 0x123   :  { %1086 = dma.done.wait [#allocation3], 8192  }
 0x124   :  { %1087 = vsyncadd [#allocation3], 4294959104 }
 0x125   :  { %859 = vsyncpa [#allocation3], 1 }

// kernel: _lambda_.44
= control target key start
LH: loop header
LB: loop body
LE: loop exit
PB: predicated region body
PF: predicated region fallthrough
CT: control target
= control target key end

     0   :  { %vm64_vm0 = vcmask 523264   ;;  %vm166_vm1 = vcmask 519168   ;;  %s278_s1 = inlined_call_operand.vmem [shape: bf16[64,64], index: 1, kind: input, shape index: {}]   ;;  %s279_s0 = inlined_call_operand.vmem [shape: bf16[32,64], index: 0, kind: input, shape index: {}]   ;;  %s280_s2 = inlined_call_operand.vmem [shape: f32[1,64], index: 2, kind: input, shape index: {}]   ;;  %s281_s3 = inlined_call_operand.vmem [shape: f32[1,64], index: 3, kind: input, shape index: {}]   ;;  %s282_s4 = inlined_call_operand.vmem [shape: bf16[32,64], index: 4, kind: output, shape index: {}]  }
   0x1   :  { %v211_v0 = vld [vmem:[%s278_s1] sm:$0xff]   ;;  %v212_v1 = vld [vmem:[%s278_s1 + $0x8] sm:$0xff]   ;;  %v213_v2 = vld [vmem:[%s278_s1 + $0x10] sm:$0xff]  }
   0x2   :  { %199 = vmatprep.subr.bf16.mxu0 %v211_v0  ;;  %v215_v3 = vld [vmem:[%s279_s0] sm:$0xff]   ;;  %v214_v4 = vld [vmem:[%s278_s1 + $0x18] sm:$0xff]   ;;  %v216_v5 = vld [vmem:[%s279_s0 + $0x8] sm:$0xff]  }
   0x3   :  { %200 = vmatpush3.bf16.msra.mxu0 %v211_v0  ;;  %207 = vmatprep.mubr.msk.bf16.mxu0 %vm64_vm0, %v215_v3  ;;  %v183_v6 = vld [vmem:[%s280_s2] ss:$0 sm:$0xff] }
   0x4   :  { %201 = vmatprep.subr.bf16.mxu0 %v212_v1  ;;  %v184_v8 = vld [vmem:[%s281_s3] ss:$0 sm:$0xff] }
   0x7   :  { %202 = vmatpush3.bf16.msra.mxu0 %v212_v1 }
   0x8   :  { %203 = vmatprep.subr.bf16.mxu0 %v213_v2 }
   0xb   :  { %204 = vmatpush3.bf16.msra.mxu0 %v213_v2 }
   0xc   :  { %205 = vmatprep.subr.bf16.mxu0 %v214_v4 }
   0xf   :  { %206 = vmatpush3.bf16.msra.mxu0 %v214_v4 }
  0x12   :  { %208 = vmatmul.mubr.msk.bf16.vlgmr.msra.gmra.mrb[0].mxu0 %vm64_vm0, %v216_v5 }
  0xe5   :  { %v209_v7 = vpop.f32.mrb[0].mxu0 }
  0xe6   :  { %v129_v9 = vmul.f32 %v209_v7, %v183_v6  ;;  %v105_v10 = vpop.f32.mrb[1].mxu0 }
  0xe7   :  { %v127_v11 = vmul.f32 %v183_v6, %v105_v10  ;;  %v210_v12 = vpop.f32.mrb[2].mxu0 }
  0xe8   :  { %v140_v13 = vadd.f32 %v184_v8, %v129_v9  ;;  %v130_v14 = vmul.f32 %v210_v12, %v183_v6  ;;  %v108_v15 = vpop.f32.mrb[3].mxu0 }
  0xe9   :  { %v138_v16 = vadd.f32 %v184_v8, %v127_v11  ;;  %v128_v17 = vmul.f32 %v183_v6, %v108_v15 }
  0xea   :  { %v144_v18 = vmul.f32 0.1, %v140_v13  ;;  %v141_v19 = vadd.f32 %v184_v8, %v130_v14 }
  0xeb   :  { %v142_v20 = vmul.f32 0.1, %v138_v16  ;;  %v139_v21 = vadd.f32 %v184_v8, %v128_v17 }
  0xec   :  { %v148_v22 = vmax.f32 %v140_v13, %v144_v18  ;;  %v145_v23 = vmul.f32 0.1, %v141_v19 }
  0xed   :  { %v146_v24 = vmax.f32 %v138_v16, %v142_v20  ;;  %v143_v25 = vmul.f32 0.1, %v139_v21 }
  0xee   :  { %v191_v26 = vpack.c.bf16 %v148_v22, %v148_v22  ;;  %v149_v27 = vmax.f32 %v141_v19, %v145_v23 }
  0xef   :  { %v189_v28 = vpack.c.bf16 %v146_v24, %v146_v24  ;;  %v147_v29 = vmax.f32 %v139_v21, %v143_v25 }
  0xf0   :  { %169 = vst.msk [vmem:[%s282_s4 + $0x8] sm:$0xf] %vm166_vm1, %v191_v26  ;;  %v192_v30 = vpack.c.bf16 %v149_v27, %v149_v27 }
  0xf1   :  { %167 = vst.msk [vmem:[%s282_s4] sm:$0xf] %vm166_vm1, %v189_v28  ;;  %v190_v31 = vpack.c.bf16 %v147_v29, %v147_v29 }
  0xf2   :  { %170 = vst.msk [vmem:[%s282_s4 + $0xc] sm:$0xf] %vm166_vm1, %v192_v30 }
  0xf3   :  { %168 = vst.msk [vmem:[%s282_s4 + $0x4] sm:$0xf] %vm166_vm1, %v190_v31 }

// kernel: _lambda_.45
= control target key start
LH: loop header
LB: loop body
LE: loop exit
PB: predicated region body
PF: predicated region fallthrough
CT: control target
= control target key end

     0   :  { %vm65_vm0 = vcmask 523264   ;;  %s293_s0 = inlined_call_operand.vmem [shape: bf16[32,64], index: 0, kind: input, shape index: {}]   ;;  %s294_s1 = inlined_call_operand.vmem [shape: bf16[64,36], index: 1, kind: input, shape index: {}]   ;;  %s295_s2 = inlined_call_operand.vmem [shape: f32[1,36], index: 2, kind: input, shape index: {}]   ;;  %s296_s3 = inlined_call_operand.vmem [shape: f32[1,36], index: 3, kind: input, shape index: {}]   ;;  %s297_s4 = inlined_call_operand.hbm [shape: f32[32,36], index: 4, kind: output, shape index: {}]  }
   0x1   :  { %v195_v0 = vld [vmem:[%s294_s1] sm:$0xff]   ;;  %v196_v1 = vld [vmem:[%s294_s1 + $0x8] sm:$0xff]   ;;  %v197_v2 = vld [vmem:[%s294_s1 + $0x10] sm:$0xff]  }
   0x2   :  { %180 = vmatprep.subr.bf16.mxu0 %v195_v0  ;;  %v199_v3 = vld [vmem:[%s293_s0] sm:$0xff]  }
   0x3   :  { %181 = vmatpush3.bf16.msra.mxu0 %v195_v0  ;;  %188 = vmatprep.mubr.msk.bf16.mxu0 %vm65_vm0, %v199_v3 }
   0x4   :  { %182 = vmatprep.subr.bf16.mxu0 %v196_v1 }
   0x5   :  { %9 = vsyncpa [#allocation3], 0  ;;  %v198_v4 = vld [vmem:[%s294_s1 + $0x18] sm:$0xff]   ;;  %v200_v5 = vld [vmem:[%s293_s0 + $0x8] sm:$0xff]   ;;  %vm143_vm1 = vcmask 293888   ;;  %s225_s1 = smov [#allocation2]  }
   0x6   :  { %v172_v6 = vld [vmem:[%s295_s2] ss:$0 sm:$0xff]  ;;  %s153_s5 = sshll.u32 %s225_s1, 4  ;;  %s154_s5 = int_to_ptr.vmem [resolvable:$true] %s153_s5 }
   0x7   :  { %183 = vmatpush3.bf16.msra.mxu0 %v196_v1  ;;  %v173_v8 = vld [vmem:[%s296_s3] ss:$0 sm:$0xff]  ;;  %s201_s0 = scalar_lea.vmem %s154_s5, 512  ;;  %p206_p1 = scmp.lt.s32.totalorder %s154_s5, %s154_s5 }
   0x8   :  { %184 = vmatprep.subr.bf16.mxu0 %v197_v2  ;;  %p202_p0 = scmp.ne.s32.totalorder %s154_s5, %s201_s0  ;;  %p207_p2 = scmp.lt.s32.totalorder %s201_s0, %s201_s0 }
   0xa   :  { %p208_p3 = por %p207_p2, %p206_p1 }
   0xb   :  { %185 = vmatpush3.bf16.msra.mxu0 %v197_v2 }
   0xc   :  { %186 = vmatprep.subr.bf16.mxu0 %v198_v4  ;;  %p209_p4 = pnand %p208_p3, %p202_p0 }
   0xf   :  { %187 = vmatpush3.bf16.msra.mxu0 %v198_v4 }
  0x12   :  { %189 = vmatmul.mubr.msk.bf16.vlgmr.msra.gmra.mrb[0].mxu0 %vm65_vm0, %v200_v5 }
  0xe5   :  { %v190_v7 = vpop.f32.mrb[0].mxu0 }
  0xe6   :  { %v130_v9 = vmul.f32 %v190_v7, %v172_v6  ;;  %v106_v10 = vpop.f32.mrb[1].mxu0 }
  0xe7   :  { %v128_v11 = vmul.f32 %v172_v6, %v106_v10  ;;  %v191_v12 = vpop.f32.mrb[2].mxu0 }
  0xe8   :  { %v141_v13 = vadd.f32 %v173_v8, %v130_v9  ;;  %v131_v14 = vmul.f32 %v191_v12, %v172_v6  ;;  %v109_v15 = vpop.f32.mrb[3].mxu0 }
  0xe9   :  { %v139_v16 = vadd.f32 %v173_v8, %v128_v11  ;;  %v129_v17 = vmul.f32 %v172_v6, %v109_v15 }
  0xea   :  { %146 = vst.msk [vmem:[#allocation2 + $0x10] sm:$0xff] %vm143_vm1, %v141_v13  ;;  %v142_v18 = vadd.f32 %v173_v8, %v131_v14 }
  0xeb   :  { %144 = vst.msk [vmem:[#allocation2] sm:$0xff] %vm143_vm1, %v139_v16  ;;  %v140_v19 = vadd.f32 %v173_v8, %v129_v17 }
  0xec   :  { %147 = vst.msk [vmem:[#allocation2 + $0x18] sm:$0xff] %vm143_vm1, %v142_v18 }
  0xed   :  { %145 = vst.msk [vmem:[#allocation2 + $0x8] sm:$0xff] %vm143_vm1, %v140_v19 }
  0xee   :  { %212 = shalt.err (!%p209_p4)
}
  0xef   :  { %s213_s6 = scalar_lea.hbm %s297_s4, 512 }
  0xf0   :  { %p214_p5 = scmp.ne.s32.totalorder %s297_s4, %s213_s6  ;;  %p217_p6 = scmp.lt.u32.totalorder %s213_s6, %s297_s4 }
  0xf2   :  { %p219_p7 = pnand %p217_p6, %p214_p5 }
  0xf4   :  { %222 = shalt.err (!%p219_p7)
}
  0xf5   :  { %s226_s11 = smov 128   ;;  %s227_s12 = smov 8  }
  0xf6   :  { %159 = dma.vmem_to_hbm [thread:$0]  %s154_s5, 512, %s297_s4, [#allocation3], %s226_s11, %s226_s11, %s227_s12  }
  0xf7   :  { %223 = dma.done.wait [#allocation3], 512  }
  0xf8   :  { %224 = vsyncadd [#allocation3], 4294966784 }
  0xf9   :  { %163 = vsyncpa [#allocation3], 1 }

</bundles_post_ra>
